<compile_context>
chip_gen: v7x
topology: tpu7x:2x2x1
jax: 0.10.0
libtpu: 0.0.40
codegen_flags: <defaults>
</compile_context>

<pallas_src>
import jax
import jax.numpy as jnp
from jax.experimental import pallas as pl
from jax.experimental.pallas import tpu as pltpu


def attn_decoder_kernel(emb_ref, h0_ref, enc_ref,
                        wa_ref, ba_ref, wc_ref, bc_ref,
                        wih_ref, bih_ref, whh_ref, bhh_ref,
                        wout_ref, bout_ref,
                        out_ref, h_state):
    C, BB, H = emb_ref.shape            # time-chunk, stream-block, hidden
    L = ba_ref.shape[1]
    V = bout_ref.shape[1]
    PAD = out_ref.shape[2]
    mm = wa_ref.dtype                   # MXU operand dtype (f32 or bf16)

    # --- carried hidden state: (re)initialize at the start of each stream block ---
    @pl.when(pl.program_id(1) == 0)
    def _():
        h_state[...] = h0_ref[...]

    h = h_state[...]                                            # (BB, H) f32
    pad = PAD - (V + H + L)
    zpad = jnp.zeros((BB, pad), jnp.float32) if pad > 0 else None

    # --- C decode steps per grid iteration (static unroll) ---
    for s in range(C):
        emb = emb_ref[s]                                        # (BB, H) f32 (dropout == identity)

        # attn_weights = softmax(Linear(cat(emb, h))): one K=2H matmul, exact softmax
        eh = jnp.concatenate([emb, h], axis=1)                  # (BB, 2H)
        a_logits = (jnp.dot(eh.astype(mm), wa_ref[...],
                            preferred_element_type=jnp.float32) + ba_ref[...])
        m = jnp.max(a_logits, axis=-1, keepdims=True)
        e = jnp.exp(a_logits - m)
        attn_w = e / jnp.sum(e, axis=-1, keepdims=True)         # (BB, L)

        # attn_applied = attn_w @ encoder_outputs
        applied = jnp.dot(attn_w.astype(mm), enc_ref[...],
                          preferred_element_type=jnp.float32)   # (BB, H)

        # attn_combine + relu: one K=2H matmul
        ea = jnp.concatenate([emb, applied], axis=1)            # (BB, 2H)
        x = jnp.maximum(
            jnp.dot(ea.astype(mm), wc_ref[...],
                    preferred_element_type=jnp.float32) + bc_ref[...], 0.0)

        # GRU cell, gates fused into two (., 3H) matmuls; gate order (r, z, n)
        gi = jnp.dot(x.astype(mm), wih_ref[...],
                     preferred_element_type=jnp.float32) + bih_ref[...]
        gh = jnp.dot(h.astype(mm), whh_ref[...],
                     preferred_element_type=jnp.float32) + bhh_ref[...]
        r = jax.nn.sigmoid(gi[:, 0:H] + gh[:, 0:H])
        z = jax.nn.sigmoid(gi[:, H:2 * H] + gh[:, H:2 * H])
        n = jnp.tanh(gi[:, 2 * H:3 * H] + r * gh[:, 2 * H:3 * H])
        h = (1.0 - z) * n + z * h                               # (BB, H) f32

        # out Linear + log_softmax
        logits = jnp.dot(h.astype(mm), wout_ref[...],
                         preferred_element_type=jnp.float32) + bout_ref[...]
        m2 = jnp.max(logits, axis=-1, keepdims=True)
        lse = m2 + jnp.log(jnp.sum(jnp.exp(logits - m2), axis=-1, keepdims=True))
        logp = logits - lse                                     # (BB, V)

        # pack [log_probs | hidden | attn_w | 0-pad] into one lane-dense slab
        pieces = [logp, h, attn_w] + ([zpad] if pad > 0 else [])
        out_ref[s] = jnp.concatenate(pieces, axis=1)            # dense (BB, PAD) store

    h_state[...] = h


def attn_decoder_forward_seq(tokens, hidden0, encoder_outputs, params,
                             *, chunk=8, matmul_dtype=jnp.float32):
    """Teacher-forced decode of B parallel streams for T steps in one kernel.

    tokens: (B, T) int32; hidden0: (B, H) f32; encoder_outputs: (L, H) shared.
    Returns (log_probs (T, B, V), final_hidden (B, H), attn_weights (T, B, L)).
    """
    B, T = tokens.shape
    H = hidden0.shape[-1]
    L = encoder_outputs.shape[0]
    V = params["b_out"].shape[1]
    PAD = ((V + H + L + 127) // 128) * 128

    # Stream-block (sublane) and time-chunk tiling.
    BB = B if B < 8 else 8
    Bp = B if B < 8 else ((B + 7) // 8) * 8
    C = max(1, min(chunk, T))
    Tp = ((T + C - 1) // C) * C
    nb, nc = Bp // BB, Tp // C

    tok = jnp.zeros((Bp, Tp), jnp.int32).at[:B, :T].set(jnp.asarray(tokens, jnp.int32))
    h0 = jnp.zeros((Bp, H), jnp.float32).at[:B].set(hidden0.astype(jnp.float32))

    # Embedding gather in the wrapper (dropout == eval-mode identity); rows are
    # streamed to VMEM per chunk via a normal BlockSpec (auto double-buffered).
    emb_seq = jnp.take(params["emb"].astype(jnp.float32), tok, axis=0)   # (Bp, Tp, H)
    emb_seq = jnp.transpose(emb_seq, (1, 0, 2))                          # (Tp, Bp, H)

    md = matmul_dtype                                   # bf16 on v6e/v7x, f32 otherwise
    enc = encoder_outputs.astype(md)
    wa, wc = params["w_attn"].astype(md), params["w_comb"].astype(md)
    wih, whh = params["w_ih"].astype(md), params["w_hh"].astype(md)
    wout = params["w_out"].astype(md)
    # biases stay f32 (added after the f32-accumulating matmul)

    # Constant index_map => block DMA'd once, VMEM-resident across the whole decode.
    const = lambda shape: pl.BlockSpec(shape, lambda b, c: (0, 0))

    grid_spec = pltpu.PrefetchScalarGridSpec(
        num_scalar_prefetch=0,
        grid=(nb, nc),                                  # (stream blocks, time chunks)
        in_specs=[
            pl.BlockSpec((C, BB, H), lambda b, c: (c, b, 0)),   # embedded tokens
            pl.BlockSpec((BB, H), lambda b, c: (b, 0)),         # initial hidden
            const((L, H)),                                      # encoder outputs
            const((2 * H, L)), const((1, L)),                   # attn linear
            const((2 * H, H)), const((1, H)),                   # attn_combine linear
            const((H, 3 * H)), const((1, 3 * H)),               # GRU w_ih, b_ih
            const((H, 3 * H)), const((1, 3 * H)),               # GRU w_hh, b_hh
            const((H, V)), const((1, V)),                       # out linear
        ],
        out_specs=pl.BlockSpec((C, BB, PAD), lambda b, c: (c, b, 0)),
        scratch_shapes=[pltpu.VMEM((BB, H), jnp.float32)],      # carried hidden state
    )

    packed = pl.pallas_call(
        attn_decoder_kernel,
        grid_spec=grid_spec,
        out_shape=jax.ShapeDtypeStruct((Tp, Bp, PAD), jnp.float32),
        compiler_params=pltpu.CompilerParams(
            # batch axis parallel (v7x 2nd TensorCore), time axis carries state
            dimension_semantics=("parallel", "arbitrary"),
            vmem_limit_bytes=32 * 1024 * 1024),
    )(emb_seq, h0, enc,
      wa, params["b_attn"], wc, params["b_comb"],
      wih, params["b_ih"], whh, params["b_hh"],
      wout, params["b_out"])

    log_probs = packed[:T, :B, :V]
    hiddens = packed[:T, :B, V:V + H]
    attn_w = packed[:T, :B, V + H:V + H + L]
    return log_probs, hiddens[T - 1], attn_w


def attn_decoder_forward(token, hidden, encoder_outputs, params):
    """Single decode step with the original module's (input, hidden, enc) API."""
    tokens = jnp.asarray(token, jnp.int32).reshape(1, 1)
    h0 = jnp.asarray(hidden, jnp.float32).reshape(1, -1)
    lp, h_fin, aw = attn_decoder_forward_seq(tokens, h0, encoder_outputs, params,
                                             chunk=1)
    return lp[0], h_fin.reshape(1, 1, -1), aw[0]


def init_params(key, hidden_size, output_size, max_length):
    H, V, L = hidden_size, output_size, max_length
    ks = jax.random.split(key, 11)
    s = 0.1
    return {
        "emb":    jax.random.normal(ks[0], (V, H), jnp.float32) * s,
        "w_attn": jax.random.normal(ks[1], (2 * H, L), jnp.float32) * s,
        "b_attn": jax.random.normal(ks[2], (1, L), jnp.float32) * s,
        "w_comb": jax.random.normal(ks[3], (2 * H, H), jnp.float32) * s,
        "b_comb": jax.random.normal(ks[4], (1, H), jnp.float32) * s,
        # fused GRU weights: gate order (r, z, n) along the 3H lane axis,
        # laid out for x @ W (PyTorch stores the transpose).
        "w_ih":   jax.random.normal(ks[5], (H, 3 * H), jnp.float32) * s,
        "b_ih":   jax.random.normal(ks[6], (1, 3 * H), jnp.float32) * s,
        "w_hh":   jax.random.normal(ks[7], (H, 3 * H), jnp.float32) * s,
        "b_hh":   jax.random.normal(ks[8], (1, 3 * H), jnp.float32) * s,
        "w_out":  jax.random.normal(ks[9], (H, V), jnp.float32) * s,
        "b_out":  jax.random.normal(ks[10], (1, V), jnp.float32) * s,
    }


def reference_decode(tokens, h0, enc, p):
    """Pure-JAX batched step-by-step reference (f32, highest matmul precision)."""
    H = h0.shape[1]
    hp = jax.lax.Precision.HIGHEST
    dot = lambda a, b: jnp.dot(a, b, precision=hp)
    h = h0
    lps, aws = [], []
    for t in range(tokens.shape[1]):
        emb = p["emb"][tokens[:, t]]                                    # (B, H)
        aw = jax.nn.softmax(dot(jnp.concatenate([emb, h], 1), p["w_attn"])
                            + p["b_attn"], axis=1)
        applied = dot(aw, enc)
        x = jnp.maximum(dot(jnp.concatenate([emb, applied], 1), p["w_comb"])
                        + p["b_comb"], 0.0)
        gi = dot(x, p["w_ih"]) + p["b_ih"]
        gh = dot(h, p["w_hh"]) + p["b_hh"]
        r = jax.nn.sigmoid(gi[:, :H] + gh[:, :H])
        z = jax.nn.sigmoid(gi[:, H:2 * H] + gh[:, H:2 * H])
        n = jnp.tanh(gi[:, 2 * H:] + r * gh[:, 2 * H:])
        h = (1.0 - z) * n + z * h
        lps.append(jax.nn.log_softmax(dot(h, p["w_out"]) + p["b_out"], axis=1))
        aws.append(aw)
    return jnp.stack(lps), h, jnp.stack(aws)       # (T,B,V), (B,H), (T,B,L)


if __name__ == "__main__":
    # Lane-friendly small shapes (multiples of 128); 16 decode streams sharing one
    # encoder output (beam-search style), 12 steps chunked 8-per-grid-iteration.
    HIDDEN, VOCAB, MAXLEN = 128, 256, 128
    BATCH, STEPS, CHUNK = 16, 12, 8

    key = jax.random.PRNGKey(0)
    kp, kh, ke, kt = jax.random.split(key, 4)

    params = init_params(kp, HIDDEN, VOCAB, MAXLEN)
    tokens = jax.random.randint(kt, (BATCH, STEPS), 0, VOCAB, dtype=jnp.int32)
    hidden0 = jax.random.normal(kh, (BATCH, HIDDEN), jnp.float32)
    enc = jax.random.normal(ke, (MAXLEN, HIDDEN), jnp.float32)

    # --- f32 batched kernel vs. pure-JAX reference ---
    log_probs, h_final, attn_w = attn_decoder_forward_seq(
        tokens, hidden0, enc, params, chunk=CHUNK)
    jax.block_until_ready((log_probs, h_final, attn_w))

    ref_lp, ref_h, ref_aw = reference_decode(tokens, hidden0, enc, params)

    # softmax is exact now; tolerance budgets f32 MXU accumulation-order
    # differences propagated through the 12-step recurrence
    tol = dict(atol=5e-3, rtol=5e-3)
    assert jnp.allclose(log_probs, ref_lp, **tol), "log_softmax output mismatch"
    assert jnp.allclose(attn_w, ref_aw, **tol), "attention weights mismatch"
    assert jnp.allclose(h_final, ref_h, **tol), "hidden mismatch"

    # --- original single-step module API (batch = 1) ---
    lp1, h1, aw1 = attn_decoder_forward(tokens[0, 0],
                                        hidden0[0].reshape(1, 1, HIDDEN), enc, params)
    r_lp1, r_h1, r_aw1 = reference_decode(tokens[:1, :1], hidden0[:1], enc, params)
    assert jnp.allclose(lp1, r_lp1[0], **tol), "single-step log_softmax mismatch"
    assert jnp.allclose(aw1, r_aw1[0], **tol), "single-step attention mismatch"
    assert jnp.allclose(h1.reshape(1, HIDDEN), r_h1, **tol), "single-step hidden mismatch"

    # --- bf16 MXU-operand path (v6e/v7x): f32 accumulation + f32 elementwise ---
    lp_b, hf_b, _ = attn_decoder_forward_seq(
        tokens, hidden0, enc, params, chunk=CHUNK, matmul_dtype=jnp.bfloat16)
    jax.block_until_ready((lp_b, hf_b))
    assert bool(jnp.all(jnp.isfinite(lp_b))), "bf16 path produced non-finite values"
    loose = dict(atol=1e-1, rtol=1e-1)
    assert jnp.allclose(lp_b, ref_lp, **loose), "bf16 log_softmax mismatch"
    assert jnp.allclose(hf_b, ref_h, **loose), "bf16 hidden mismatch"

    print("KERNEL_OK")
</pallas_src>

<mosaic_0001>
module attributes {stable_mosaic.version = 11 : i64} {
  func.func @attn_decoder_kernel(%arg0: i32, %arg1: i32, %arg2: memref<8x8x128xf32, #tpu.memory_space<vmem>>, %arg3: memref<8x128xf32, #tpu.memory_space<vmem>>, %arg4: memref<128x128xf32, #tpu.memory_space<vmem>>, %arg5: memref<256x128xf32, #tpu.memory_space<vmem>>, %arg6: memref<1x128xf32, #tpu.memory_space<vmem>>, %arg7: memref<256x128xf32, #tpu.memory_space<vmem>>, %arg8: memref<1x128xf32, #tpu.memory_space<vmem>>, %arg9: memref<128x384xf32, #tpu.memory_space<vmem>>, %arg10: memref<1x384xf32, #tpu.memory_space<vmem>>, %arg11: memref<128x384xf32, #tpu.memory_space<vmem>>, %arg12: memref<1x384xf32, #tpu.memory_space<vmem>>, %arg13: memref<128x256xf32, #tpu.memory_space<vmem>>, %arg14: memref<1x256xf32, #tpu.memory_space<vmem>>, %arg15: memref<8x8x512xf32, #tpu.memory_space<vmem>>, %arg16: memref<8x128xf32, #tpu.memory_space<vmem>>) attributes {dimension_semantics = [#tpu.dimension_semantics<parallel>, #tpu.dimension_semantics<arbitrary>], iteration_bounds = array<i64: 2, 2>, scalar_prefetch = 0 : i64, scratch_operands = 1 : i64, tpu.core_type = #tpu.core_type<tc>, window_params = [{transform_indices = @transform_0, window_bounds = array<i64: 8, 8, 128>}, {transform_indices = @transform_1, window_bounds = array<i64: 8, 128>}, {pipeline_mode = #tpu.pipeline_mode<synchronous>, transform_indices = @transform_2, window_bounds = array<i64: 128, 128>}, {pipeline_mode = #tpu.pipeline_mode<synchronous>, transform_indices = @transform_3, window_bounds = array<i64: 256, 128>}, {pipeline_mode = #tpu.pipeline_mode<synchronous>, transform_indices = @transform_4, window_bounds = array<i64: 1, 128>}, {pipeline_mode = #tpu.pipeline_mode<synchronous>, transform_indices = @transform_5, window_bounds = array<i64: 256, 128>}, {pipeline_mode = #tpu.pipeline_mode<synchronous>, transform_indices = @transform_6, window_bounds = array<i64: 1, 128>}, {pipeline_mode = #tpu.pipeline_mode<synchronous>, transform_indices = @transform_7, window_bounds = array<i64: 128, 384>}, {pipeline_mode = #tpu.pipeline_mode<synchronous>, transform_indices = @transform_8, window_bounds = array<i64: 1, 384>}, {pipeline_mode = #tpu.pipeline_mode<synchronous>, transform_indices = @transform_9, window_bounds = array<i64: 128, 384>}, {pipeline_mode = #tpu.pipeline_mode<synchronous>, transform_indices = @transform_10, window_bounds = array<i64: 1, 384>}, {pipeline_mode = #tpu.pipeline_mode<synchronous>, transform_indices = @transform_11, window_bounds = array<i64: 128, 256>}, {pipeline_mode = #tpu.pipeline_mode<synchronous>, transform_indices = @transform_12, window_bounds = array<i64: 1, 256>}, {transform_indices = @transform_13, window_bounds = array<i64: 8, 8, 512>}]} {
    %c0_i32 = arith.constant 0 : i32
    %0 = arith.cmpi eq, %arg1, %c0_i32 : i32
    %1 = arith.extui %0 : i1 to i32
    %c0_i32_0 = arith.constant 0 : i32
    %2 = arith.cmpi ne, %1, %c0_i32_0 : i32
    scf.if %2 {
      %c0_332 = arith.constant 0 : index
      %c0_333 = arith.constant 0 : index
      %669 = vector.load %arg3[%c0_332, %c0_333] : memref<8x128xf32, #tpu.memory_space<vmem>>, vector<8x128xf32>
      %c0_334 = arith.constant 0 : index
      %c0_335 = arith.constant 0 : index
      %670 = vector.load %arg16[%c0_334, %c0_335] : memref<8x128xf32, #tpu.memory_space<vmem>>, vector<8x128xf32>
      tpu.vector_store %arg16[%c0_334, %c0_335], %669 {strides = array<i32>} : memref<8x128xf32, #tpu.memory_space<vmem>>, vector<8x128xf32>,
    } else {
    }
    %c0 = arith.constant 0 : index
    %c0_1 = arith.constant 0 : index
    %3 = vector.load %arg16[%c0, %c0_1] : memref<8x128xf32, #tpu.memory_space<vmem>>, vector<8x128xf32>
    %c0_2 = arith.constant 0 : index
    %c0_3 = arith.constant 0 : index
    %c0_4 = arith.constant 0 : index
    %4 = vector.load %arg2[%c0_2, %c0_3, %c0_4] : memref<8x8x128xf32, #tpu.memory_space<vmem>>, vector<1x8x128xf32>
    %5 = vector.shape_cast %4 : vector<1x8x128xf32> to vector<8x128xf32>
    %6 = tpu.concatenate %5, %3 in 1 : vector<8x128xf32>, vector<8x128xf32> -> vector<8x256xf32>
    %c0_5 = arith.constant 0 : index
    %c0_6 = arith.constant 0 : index
    %7 = vector.load %arg5[%c0_5, %c0_6] : memref<256x128xf32, #tpu.memory_space<vmem>>, vector<256x128xf32>
    %cst = arith.constant dense<0.000000e+00> : vector<8x128xf32>
    %8 = tpu.matmul %6, %7, %cst {dimension_numbers = #tpu.dot_dimension_numbers<[1], [0], [0], [1], [0, 0, 1, 1], [], []>} : vector<8x256xf32>, vector<256x128xf32>, vector<8x128xf32> -> vector<8x128xf32>
    %c0_7 = arith.constant 0 : index
    %c0_8 = arith.constant 0 : index
    %9 = vector.load %arg6[%c0_7, %c0_8] : memref<1x128xf32, #tpu.memory_space<vmem>>, vector<1x128xf32>
    %10 = vector.broadcast %9 : vector<1x128xf32> to vector<8x128xf32>
    %11 = arith.addf %8, %10 : vector<8x128xf32>
    %cst_9 = arith.constant dense<0xFF800000> : vector<8xf32>
    %12 = vector.multi_reduction <maximumf>, %11, %cst_9 [1] : vector<8x128xf32> to vector<8xf32>
    %13 = vector.shape_cast %12 : vector<8xf32> to vector<8x1xf32>
    %14 = vector.broadcast %13 : vector<8x1xf32> to vector<8x128xf32>
    %15 = arith.subf %11, %14 : vector<8x128xf32>
    %16 = math.exp %15 : vector<8x128xf32>
    %cst_10 = arith.constant dense<0.000000e+00> : vector<8xf32>
    %17 = vector.multi_reduction <add>, %16, %cst_10 [1] : vector<8x128xf32> to vector<8xf32>
    %18 = vector.shape_cast %17 : vector<8xf32> to vector<8x1xf32>
    %19 = vector.broadcast %18 : vector<8x1xf32> to vector<8x128xf32>
    %20 = arith.divf %16, %19 : vector<8x128xf32>
    %c0_11 = arith.constant 0 : index
    %c0_12 = arith.constant 0 : index
    %21 = vector.load %arg4[%c0_11, %c0_12] : memref<128x128xf32, #tpu.memory_space<vmem>>, vector<128x128xf32>
    %cst_13 = arith.constant dense<0.000000e+00> : vector<8x128xf32>
    %22 = tpu.matmul %20, %21, %cst_13 {dimension_numbers = #tpu.dot_dimension_numbers<[1], [0], [0], [1], [0, 0, 1, 1], [], []>} : vector<8x128xf32>, vector<128x128xf32>, vector<8x128xf32> -> vector<8x128xf32>
    %23 = tpu.concatenate %5, %22 in 1 : vector<8x128xf32>, vector<8x128xf32> -> vector<8x256xf32>
    %c0_14 = arith.constant 0 : index
    %c0_15 = arith.constant 0 : index
    %24 = vector.load %arg7[%c0_14, %c0_15] : memref<256x128xf32, #tpu.memory_space<vmem>>, vector<256x128xf32>
    %cst_16 = arith.constant dense<0.000000e+00> : vector<8x128xf32>
    %25 = tpu.matmul %23, %24, %cst_16 {dimension_numbers = #tpu.dot_dimension_numbers<[1], [0], [0], [1], [0, 0, 1, 1], [], []>} : vector<8x256xf32>, vector<256x128xf32>, vector<8x128xf32> -> vector<8x128xf32>
    %c0_17 = arith.constant 0 : index
    %c0_18 = arith.constant 0 : index
    %26 = vector.load %arg8[%c0_17, %c0_18] : memref<1x128xf32, #tpu.memory_space<vmem>>, vector<1x128xf32>
    %27 = vector.broadcast %26 : vector<1x128xf32> to vector<8x128xf32>
    %28 = arith.addf %25, %27 : vector<8x128xf32>
    %cst_19 = arith.constant 0.000000e+00 : f32
    %29 = vector.broadcast %cst_19 : f32 to vector<8x128xf32>
    %30 = arith.maximumf %28, %29 : vector<8x128xf32>
    %c0_20 = arith.constant 0 : index
    %c0_21 = arith.constant 0 : index
    %31 = vector.load %arg9[%c0_20, %c0_21] : memref<128x384xf32, #tpu.memory_space<vmem>>, vector<128x384xf32>
    %cst_22 = arith.constant dense<0.000000e+00> : vector<8x384xf32>
    %32 = tpu.matmul %30, %31, %cst_22 {dimension_numbers = #tpu.dot_dimension_numbers<[1], [0], [0], [1], [0, 0, 1, 1], [], []>} : vector<8x128xf32>, vector<128x384xf32>, vector<8x384xf32> -> vector<8x384xf32>
    %c0_23 = arith.constant 0 : index
    %c0_24 = arith.constant 0 : index
    %33 = vector.load %arg10[%c0_23, %c0_24] : memref<1x384xf32, #tpu.memory_space<vmem>>, vector<1x384xf32>
    %34 = vector.broadcast %33 : vector<1x384xf32> to vector<8x384xf32>
    %35 = arith.addf %32, %34 : vector<8x384xf32>
    %c0_25 = arith.constant 0 : index
    %c0_26 = arith.constant 0 : index
    %36 = vector.load %arg11[%c0_25, %c0_26] : memref<128x384xf32, #tpu.memory_space<vmem>>, vector<128x384xf32>
    %cst_27 = arith.constant dense<0.000000e+00> : vector<8x384xf32>
    %37 = tpu.matmul %3, %36, %cst_27 {dimension_numbers = #tpu.dot_dimension_numbers<[1], [0], [0], [1], [0, 0, 1, 1], [], []>} : vector<8x128xf32>, vector<128x384xf32>, vector<8x384xf32> -> vector<8x384xf32>
    %c0_28 = arith.constant 0 : index
    %c0_29 = arith.constant 0 : index
    %38 = vector.load %arg12[%c0_28, %c0_29] : memref<1x384xf32, #tpu.memory_space<vmem>>, vector<1x384xf32>
    %39 = vector.broadcast %38 : vector<1x384xf32> to vector<8x384xf32>
    %40 = arith.addf %37, %39 : vector<8x384xf32>
    %41 = vector.extract_strided_slice %35 {offsets = [0, 0], sizes = [8, 128], strides = [1, 1]} : vector<8x384xf32> to vector<8x128xf32>
    %42 = vector.extract_strided_slice %40 {offsets = [0, 0], sizes = [8, 128], strides = [1, 1]} : vector<8x384xf32> to vector<8x128xf32>
    %43 = arith.addf %41, %42 : vector<8x128xf32>
    %44 = arith.negf %43 : vector<8x128xf32>
    %45 = math.exp %44 : vector<8x128xf32>
    %cst_30 = arith.constant 1.000000e+00 : f32
    %46 = vector.broadcast %cst_30 : f32 to vector<8x128xf32>
    %47 = arith.addf %46, %45 : vector<8x128xf32>
    %48 = arith.divf %46, %47 : vector<8x128xf32>
    %49 = vector.extract_strided_slice %35 {offsets = [0, 128], sizes = [8, 128], strides = [1, 1]} : vector<8x384xf32> to vector<8x128xf32>
    %50 = vector.extract_strided_slice %40 {offsets = [0, 128], sizes = [8, 128], strides = [1, 1]} : vector<8x384xf32> to vector<8x128xf32>
    %51 = arith.addf %49, %50 : vector<8x128xf32>
    %52 = arith.negf %51 : vector<8x128xf32>
    %53 = math.exp %52 : vector<8x128xf32>
    %cst_31 = arith.constant 1.000000e+00 : f32
    %54 = vector.broadcast %cst_31 : f32 to vector<8x128xf32>
    %55 = arith.addf %54, %53 : vector<8x128xf32>
    %56 = arith.divf %54, %55 : vector<8x128xf32>
    %57 = vector.extract_strided_slice %35 {offsets = [0, 256], sizes = [8, 128], strides = [1, 1]} : vector<8x384xf32> to vector<8x128xf32>
    %58 = vector.extract_strided_slice %40 {offsets = [0, 256], sizes = [8, 128], strides = [1, 1]} : vector<8x384xf32> to vector<8x128xf32>
    %59 = arith.mulf %48, %58 : vector<8x128xf32>
    %60 = arith.addf %57, %59 : vector<8x128xf32>
    %61 = math.tanh %60 : vector<8x128xf32>
    %cst_32 = arith.constant 1.000000e+00 : f32
    %62 = vector.broadcast %cst_32 : f32 to vector<8x128xf32>
    %63 = arith.subf %62, %56 : vector<8x128xf32>
    %64 = arith.mulf %63, %61 : vector<8x128xf32>
    %65 = arith.mulf %56, %3 : vector<8x128xf32>
    %66 = arith.addf %64, %65 : vector<8x128xf32>
    %c0_33 = arith.constant 0 : index
    %c0_34 = arith.constant 0 : index
    %67 = vector.load %arg13[%c0_33, %c0_34] : memref<128x256xf32, #tpu.memory_space<vmem>>, vector<128x256xf32>
    %cst_35 = arith.constant dense<0.000000e+00> : vector<8x256xf32>
    %68 = tpu.matmul %66, %67, %cst_35 {dimension_numbers = #tpu.dot_dimension_numbers<[1], [0], [0], [1], [0, 0, 1, 1], [], []>} : vector<8x128xf32>, vector<128x256xf32>, vector<8x256xf32> -> vector<8x256xf32>
    %c0_36 = arith.constant 0 : index
    %c0_37 = arith.constant 0 : index
    %69 = vector.load %arg14[%c0_36, %c0_37] : memref<1x256xf32, #tpu.memory_space<vmem>>, vector<1x256xf32>
    %70 = vector.broadcast %69 : vector<1x256xf32> to vector<8x256xf32>
    %71 = arith.addf %68, %70 : vector<8x256xf32>
    %cst_38 = arith.constant dense<0xFF800000> : vector<8xf32>
    %72 = vector.multi_reduction <maximumf>, %71, %cst_38 [1] : vector<8x256xf32> to vector<8xf32>
    %73 = vector.shape_cast %72 : vector<8xf32> to vector<8x1xf32>
    %74 = vector.broadcast %73 : vector<8x1xf32> to vector<8x256xf32>
    %75 = arith.subf %71, %74 : vector<8x256xf32>
    %76 = math.exp %75 : vector<8x256xf32>
    %cst_39 = arith.constant dense<0.000000e+00> : vector<8xf32>
    %77 = vector.multi_reduction <add>, %76, %cst_39 [1] : vector<8x256xf32> to vector<8xf32>
    %78 = vector.shape_cast %77 : vector<8xf32> to vector<8x1xf32>
    %79 = math.log %78 : vector<8x1xf32>
    %80 = arith.addf %73, %79 : vector<8x1xf32>
    %81 = vector.broadcast %80 : vector<8x1xf32> to vector<8x256xf32>
    %82 = arith.subf %71, %81 : vector<8x256xf32>
    %83 = tpu.concatenate %82, %66, %20 in 1 : vector<8x256xf32>, vector<8x128xf32>, vector<8x128xf32> -> vector<8x512xf32>
    %c0_40 = arith.constant 0 : index
    %c0_41 = arith.constant 0 : index
    %c0_42 = arith.constant 0 : index
    %84 = vector.load %arg15[%c0_40, %c0_41, %c0_42] : memref<8x8x512xf32, #tpu.memory_space<vmem>>, vector<1x8x512xf32>
    %85 = vector.shape_cast %84 : vector<1x8x512xf32> to vector<8x512xf32>
    %86 = vector.shape_cast %83 : vector<8x512xf32> to vector<1x8x512xf32>
    tpu.vector_store %arg15[%c0_40, %c0_41, %c0_42], %86 {strides = array<i32>} : memref<8x8x512xf32, #tpu.memory_space<vmem>>, vector<1x8x512xf32>,
    %c1 = arith.constant 1 : index
    %c0_43 = arith.constant 0 : index
    %c0_44 = arith.constant 0 : index
    %87 = vector.load %arg2[%c1, %c0_43, %c0_44] : memref<8x8x128xf32, #tpu.memory_space<vmem>>, vector<1x8x128xf32>
    %88 = vector.shape_cast %87 : vector<1x8x128xf32> to vector<8x128xf32>
    %89 = tpu.concatenate %88, %66 in 1 : vector<8x128xf32>, vector<8x128xf32> -> vector<8x256xf32>
    %c0_45 = arith.constant 0 : index
    %c0_46 = arith.constant 0 : index
    %90 = vector.load %arg5[%c0_45, %c0_46] : memref<256x128xf32, #tpu.memory_space<vmem>>, vector<256x128xf32>
    %cst_47 = arith.constant dense<0.000000e+00> : vector<8x128xf32>
    %91 = tpu.matmul %89, %90, %cst_47 {dimension_numbers = #tpu.dot_dimension_numbers<[1], [0], [0], [1], [0, 0, 1, 1], [], []>} : vector<8x256xf32>, vector<256x128xf32>, vector<8x128xf32> -> vector<8x128xf32>
    %c0_48 = arith.constant 0 : index
    %c0_49 = arith.constant 0 : index
    %92 = vector.load %arg6[%c0_48, %c0_49] : memref<1x128xf32, #tpu.memory_space<vmem>>, vector<1x128xf32>
    %93 = vector.broadcast %92 : vector<1x128xf32> to vector<8x128xf32>
    %94 = arith.addf %91, %93 : vector<8x128xf32>
    %cst_50 = arith.constant dense<0xFF800000> : vector<8xf32>
    %95 = vector.multi_reduction <maximumf>, %94, %cst_50 [1] : vector<8x128xf32> to vector<8xf32>
    %96 = vector.shape_cast %95 : vector<8xf32> to vector<8x1xf32>
    %97 = vector.broadcast %96 : vector<8x1xf32> to vector<8x128xf32>
    %98 = arith.subf %94, %97 : vector<8x128xf32>
    %99 = math.exp %98 : vector<8x128xf32>
    %cst_51 = arith.constant dense<0.000000e+00> : vector<8xf32>
    %100 = vector.multi_reduction <add>, %99, %cst_51 [1] : vector<8x128xf32> to vector<8xf32>
    %101 = vector.shape_cast %100 : vector<8xf32> to vector<8x1xf32>
    %102 = vector.broadcast %101 : vector<8x1xf32> to vector<8x128xf32>
    %103 = arith.divf %99, %102 : vector<8x128xf32>
    %c0_52 = arith.constant 0 : index
    %c0_53 = arith.constant 0 : index
    %104 = vector.load %arg4[%c0_52, %c0_53] : memref<128x128xf32, #tpu.memory_space<vmem>>, vector<128x128xf32>
    %cst_54 = arith.constant dense<0.000000e+00> : vector<8x128xf32>
    %105 = tpu.matmul %103, %104, %cst_54 {dimension_numbers = #tpu.dot_dimension_numbers<[1], [0], [0], [1], [0, 0, 1, 1], [], []>} : vector<8x128xf32>, vector<128x128xf32>, vector<8x128xf32> -> vector<8x128xf32>
    %106 = tpu.concatenate %88, %105 in 1 : vector<8x128xf32>, vector<8x128xf32> -> vector<8x256xf32>
    %c0_55 = arith.constant 0 : index
    %c0_56 = arith.constant 0 : index
    %107 = vector.load %arg7[%c0_55, %c0_56] : memref<256x128xf32, #tpu.memory_space<vmem>>, vector<256x128xf32>
    %cst_57 = arith.constant dense<0.000000e+00> : vector<8x128xf32>
    %108 = tpu.matmul %106, %107, %cst_57 {dimension_numbers = #tpu.dot_dimension_numbers<[1], [0], [0], [1], [0, 0, 1, 1], [], []>} : vector<8x256xf32>, vector<256x128xf32>, vector<8x128xf32> -> vector<8x128xf32>
    %c0_58 = arith.constant 0 : index
    %c0_59 = arith.constant 0 : index
    %109 = vector.load %arg8[%c0_58, %c0_59] : memref<1x128xf32, #tpu.memory_space<vmem>>, vector<1x128xf32>
    %110 = vector.broadcast %109 : vector<1x128xf32> to vector<8x128xf32>
    %111 = arith.addf %108, %110 : vector<8x128xf32>
    %cst_60 = arith.constant 0.000000e+00 : f32
    %112 = vector.broadcast %cst_60 : f32 to vector<8x128xf32>
    %113 = arith.maximumf %111, %112 : vector<8x128xf32>
    %c0_61 = arith.constant 0 : index
    %c0_62 = arith.constant 0 : index
    %114 = vector.load %arg9[%c0_61, %c0_62] : memref<128x384xf32, #tpu.memory_space<vmem>>, vector<128x384xf32>
    %cst_63 = arith.constant dense<0.000000e+00> : vector<8x384xf32>
    %115 = tpu.matmul %113, %114, %cst_63 {dimension_numbers = #tpu.dot_dimension_numbers<[1], [0], [0], [1], [0, 0, 1, 1], [], []>} : vector<8x128xf32>, vector<128x384xf32>, vector<8x384xf32> -> vector<8x384xf32>
    %c0_64 = arith.constant 0 : index
    %c0_65 = arith.constant 0 : index
    %116 = vector.load %arg10[%c0_64, %c0_65] : memref<1x384xf32, #tpu.memory_space<vmem>>, vector<1x384xf32>
    %117 = vector.broadcast %116 : vector<1x384xf32> to vector<8x384xf32>
    %118 = arith.addf %115, %117 : vector<8x384xf32>
    %c0_66 = arith.constant 0 : index
    %c0_67 = arith.constant 0 : index
    %119 = vector.load %arg11[%c0_66, %c0_67] : memref<128x384xf32, #tpu.memory_space<vmem>>, vector<128x384xf32>
    %cst_68 = arith.constant dense<0.000000e+00> : vector<8x384xf32>
    %120 = tpu.matmul %66, %119, %cst_68 {dimension_numbers = #tpu.dot_dimension_numbers<[1], [0], [0], [1], [0, 0, 1, 1], [], []>} : vector<8x128xf32>, vector<128x384xf32>, vector<8x384xf32> -> vector<8x384xf32>
    %c0_69 = arith.constant 0 : index
    %c0_70 = arith.constant 0 : index
    %121 = vector.load %arg12[%c0_69, %c0_70] : memref<1x384xf32, #tpu.memory_space<vmem>>, vector<1x384xf32>
    %122 = vector.broadcast %121 : vector<1x384xf32> to vector<8x384xf32>
    %123 = arith.addf %120, %122 : vector<8x384xf32>
    %124 = vector.extract_strided_slice %118 {offsets = [0, 0], sizes = [8, 128], strides = [1, 1]} : vector<8x384xf32> to vector<8x128xf32>
    %125 = vector.extract_strided_slice %123 {offsets = [0, 0], sizes = [8, 128], strides = [1, 1]} : vector<8x384xf32> to vector<8x128xf32>
    %126 = arith.addf %124, %125 : vector<8x128xf32>
    %127 = arith.negf %126 : vector<8x128xf32>
    %128 = math.exp %127 : vector<8x128xf32>
    %cst_71 = arith.constant 1.000000e+00 : f32
    %129 = vector.broadcast %cst_71 : f32 to vector<8x128xf32>
    %130 = arith.addf %129, %128 : vector<8x128xf32>
    %131 = arith.divf %129, %130 : vector<8x128xf32>
    %132 = vector.extract_strided_slice %118 {offsets = [0, 128], sizes = [8, 128], strides = [1, 1]} : vector<8x384xf32> to vector<8x128xf32>
    %133 = vector.extract_strided_slice %123 {offsets = [0, 128], sizes = [8, 128], strides = [1, 1]} : vector<8x384xf32> to vector<8x128xf32>
    %134 = arith.addf %132, %133 : vector<8x128xf32>
    %135 = arith.negf %134 : vector<8x128xf32>
    %136 = math.exp %135 : vector<8x128xf32>
    %cst_72 = arith.constant 1.000000e+00 : f32
    %137 = vector.broadcast %cst_72 : f32 to vector<8x128xf32>
    %138 = arith.addf %137, %136 : vector<8x128xf32>
    %139 = arith.divf %137, %138 : vector<8x128xf32>
    %140 = vector.extract_strided_slice %118 {offsets = [0, 256], sizes = [8, 128], strides = [1, 1]} : vector<8x384xf32> to vector<8x128xf32>
    %141 = vector.extract_strided_slice %123 {offsets = [0, 256], sizes = [8, 128], strides = [1, 1]} : vector<8x384xf32> to vector<8x128xf32>
    %142 = arith.mulf %131, %141 : vector<8x128xf32>
    %143 = arith.addf %140, %142 : vector<8x128xf32>
    %144 = math.tanh %143 : vector<8x128xf32>
    %cst_73 = arith.constant 1.000000e+00 : f32
    %145 = vector.broadcast %cst_73 : f32 to vector<8x128xf32>
    %146 = arith.subf %145, %139 : vector<8x128xf32>
    %147 = arith.mulf %146, %144 : vector<8x128xf32>
    %148 = arith.mulf %139, %66 : vector<8x128xf32>
    %149 = arith.addf %147, %148 : vector<8x128xf32>
    %c0_74 = arith.constant 0 : index
    %c0_75 = arith.constant 0 : index
    %150 = vector.load %arg13[%c0_74, %c0_75] : memref<128x256xf32, #tpu.memory_space<vmem>>, vector<128x256xf32>
    %cst_76 = arith.constant dense<0.000000e+00> : vector<8x256xf32>
    %151 = tpu.matmul %149, %150, %cst_76 {dimension_numbers = #tpu.dot_dimension_numbers<[1], [0], [0], [1], [0, 0, 1, 1], [], []>} : vector<8x128xf32>, vector<128x256xf32>, vector<8x256xf32> -> vector<8x256xf32>
    %c0_77 = arith.constant 0 : index
    %c0_78 = arith.constant 0 : index
    %152 = vector.load %arg14[%c0_77, %c0_78] : memref<1x256xf32, #tpu.memory_space<vmem>>, vector<1x256xf32>
    %153 = vector.broadcast %152 : vector<1x256xf32> to vector<8x256xf32>
    %154 = arith.addf %151, %153 : vector<8x256xf32>
    %cst_79 = arith.constant dense<0xFF800000> : vector<8xf32>
    %155 = vector.multi_reduction <maximumf>, %154, %cst_79 [1] : vector<8x256xf32> to vector<8xf32>
    %156 = vector.shape_cast %155 : vector<8xf32> to vector<8x1xf32>
    %157 = vector.broadcast %156 : vector<8x1xf32> to vector<8x256xf32>
    %158 = arith.subf %154, %157 : vector<8x256xf32>
    %159 = math.exp %158 : vector<8x256xf32>
    %cst_80 = arith.constant dense<0.000000e+00> : vector<8xf32>
    %160 = vector.multi_reduction <add>, %159, %cst_80 [1] : vector<8x256xf32> to vector<8xf32>
    %161 = vector.shape_cast %160 : vector<8xf32> to vector<8x1xf32>
    %162 = math.log %161 : vector<8x1xf32>
    %163 = arith.addf %156, %162 : vector<8x1xf32>
    %164 = vector.broadcast %163 : vector<8x1xf32> to vector<8x256xf32>
    %165 = arith.subf %154, %164 : vector<8x256xf32>
    %166 = tpu.concatenate %165, %149, %103 in 1 : vector<8x256xf32>, vector<8x128xf32>, vector<8x128xf32> -> vector<8x512xf32>
    %c1_81 = arith.constant 1 : index
    %c0_82 = arith.constant 0 : index
    %c0_83 = arith.constant 0 : index
    %167 = vector.load %arg15[%c1_81, %c0_82, %c0_83] : memref<8x8x512xf32, #tpu.memory_space<vmem>>, vector<1x8x512xf32>
    %168 = vector.shape_cast %167 : vector<1x8x512xf32> to vector<8x512xf32>
    %169 = vector.shape_cast %166 : vector<8x512xf32> to vector<1x8x512xf32>
    tpu.vector_store %arg15[%c1_81, %c0_82, %c0_83], %169 {strides = array<i32>} : memref<8x8x512xf32, #tpu.memory_space<vmem>>, vector<1x8x512xf32>,
    %c2 = arith.constant 2 : index
    %c0_84 = arith.constant 0 : index
    %c0_85 = arith.constant 0 : index
    %170 = vector.load %arg2[%c2, %c0_84, %c0_85] : memref<8x8x128xf32, #tpu.memory_space<vmem>>, vector<1x8x128xf32>
    %171 = vector.shape_cast %170 : vector<1x8x128xf32> to vector<8x128xf32>
    %172 = tpu.concatenate %171, %149 in 1 : vector<8x128xf32>, vector<8x128xf32> -> vector<8x256xf32>
    %c0_86 = arith.constant 0 : index
    %c0_87 = arith.constant 0 : index
    %173 = vector.load %arg5[%c0_86, %c0_87] : memref<256x128xf32, #tpu.memory_space<vmem>>, vector<256x128xf32>
    %cst_88 = arith.constant dense<0.000000e+00> : vector<8x128xf32>
    %174 = tpu.matmul %172, %173, %cst_88 {dimension_numbers = #tpu.dot_dimension_numbers<[1], [0], [0], [1], [0, 0, 1, 1], [], []>} : vector<8x256xf32>, vector<256x128xf32>, vector<8x128xf32> -> vector<8x128xf32>
    %c0_89 = arith.constant 0 : index
    %c0_90 = arith.constant 0 : index
    %175 = vector.load %arg6[%c0_89, %c0_90] : memref<1x128xf32, #tpu.memory_space<vmem>>, vector<1x128xf32>
    %176 = vector.broadcast %175 : vector<1x128xf32> to vector<8x128xf32>
    %177 = arith.addf %174, %176 : vector<8x128xf32>
    %cst_91 = arith.constant dense<0xFF800000> : vector<8xf32>
    %178 = vector.multi_reduction <maximumf>, %177, %cst_91 [1] : vector<8x128xf32> to vector<8xf32>
    %179 = vector.shape_cast %178 : vector<8xf32> to vector<8x1xf32>
    %180 = vector.broadcast %179 : vector<8x1xf32> to vector<8x128xf32>
    %181 = arith.subf %177, %180 : vector<8x128xf32>
    %182 = math.exp %181 : vector<8x128xf32>
    %cst_92 = arith.constant dense<0.000000e+00> : vector<8xf32>
    %183 = vector.multi_reduction <add>, %182, %cst_92 [1] : vector<8x128xf32> to vector<8xf32>
    %184 = vector.shape_cast %183 : vector<8xf32> to vector<8x1xf32>
    %185 = vector.broadcast %184 : vector<8x1xf32> to vector<8x128xf32>
    %186 = arith.divf %182, %185 : vector<8x128xf32>
    %c0_93 = arith.constant 0 : index
    %c0_94 = arith.constant 0 : index
    %187 = vector.load %arg4[%c0_93, %c0_94] : memref<128x128xf32, #tpu.memory_space<vmem>>, vector<128x128xf32>
    %cst_95 = arith.constant dense<0.000000e+00> : vector<8x128xf32>
    %188 = tpu.matmul %186, %187, %cst_95 {dimension_numbers = #tpu.dot_dimension_numbers<[1], [0], [0], [1], [0, 0, 1, 1], [], []>} : vector<8x128xf32>, vector<128x128xf32>, vector<8x128xf32> -> vector<8x128xf32>
    %189 = tpu.concatenate %171, %188 in 1 : vector<8x128xf32>, vector<8x128xf32> -> vector<8x256xf32>
    %c0_96 = arith.constant 0 : index
    %c0_97 = arith.constant 0 : index
    %190 = vector.load %arg7[%c0_96, %c0_97] : memref<256x128xf32, #tpu.memory_space<vmem>>, vector<256x128xf32>
    %cst_98 = arith.constant dense<0.000000e+00> : vector<8x128xf32>
    %191 = tpu.matmul %189, %190, %cst_98 {dimension_numbers = #tpu.dot_dimension_numbers<[1], [0], [0], [1], [0, 0, 1, 1], [], []>} : vector<8x256xf32>, vector<256x128xf32>, vector<8x128xf32> -> vector<8x128xf32>
    %c0_99 = arith.constant 0 : index
    %c0_100 = arith.constant 0 : index
    %192 = vector.load %arg8[%c0_99, %c0_100] : memref<1x128xf32, #tpu.memory_space<vmem>>, vector<1x128xf32>
    %193 = vector.broadcast %192 : vector<1x128xf32> to vector<8x128xf32>
    %194 = arith.addf %191, %193 : vector<8x128xf32>
    %cst_101 = arith.constant 0.000000e+00 : f32
    %195 = vector.broadcast %cst_101 : f32 to vector<8x128xf32>
    %196 = arith.maximumf %194, %195 : vector<8x128xf32>
    %c0_102 = arith.constant 0 : index
    %c0_103 = arith.constant 0 : index
    %197 = vector.load %arg9[%c0_102, %c0_103] : memref<128x384xf32, #tpu.memory_space<vmem>>, vector<128x384xf32>
    %cst_104 = arith.constant dense<0.000000e+00> : vector<8x384xf32>
    %198 = tpu.matmul %196, %197, %cst_104 {dimension_numbers = #tpu.dot_dimension_numbers<[1], [0], [0], [1], [0, 0, 1, 1], [], []>} : vector<8x128xf32>, vector<128x384xf32>, vector<8x384xf32> -> vector<8x384xf32>
    %c0_105 = arith.constant 0 : index
    %c0_106 = arith.constant 0 : index
    %199 = vector.load %arg10[%c0_105, %c0_106] : memref<1x384xf32, #tpu.memory_space<vmem>>, vector<1x384xf32>
    %200 = vector.broadcast %199 : vector<1x384xf32> to vector<8x384xf32>
    %201 = arith.addf %198, %200 : vector<8x384xf32>
    %c0_107 = arith.constant 0 : index
    %c0_108 = arith.constant 0 : index
    %202 = vector.load %arg11[%c0_107, %c0_108] : memref<128x384xf32, #tpu.memory_space<vmem>>, vector<128x384xf32>
    %cst_109 = arith.constant dense<0.000000e+00> : vector<8x384xf32>
    %203 = tpu.matmul %149, %202, %cst_109 {dimension_numbers = #tpu.dot_dimension_numbers<[1], [0], [0], [1], [0, 0, 1, 1], [], []>} : vector<8x128xf32>, vector<128x384xf32>, vector<8x384xf32> -> vector<8x384xf32>
    %c0_110 = arith.constant 0 : index
    %c0_111 = arith.constant 0 : index
    %204 = vector.load %arg12[%c0_110, %c0_111] : memref<1x384xf32, #tpu.memory_space<vmem>>, vector<1x384xf32>
    %205 = vector.broadcast %204 : vector<1x384xf32> to vector<8x384xf32>
    %206 = arith.addf %203, %205 : vector<8x384xf32>
    %207 = vector.extract_strided_slice %201 {offsets = [0, 0], sizes = [8, 128], strides = [1, 1]} : vector<8x384xf32> to vector<8x128xf32>
    %208 = vector.extract_strided_slice %206 {offsets = [0, 0], sizes = [8, 128], strides = [1, 1]} : vector<8x384xf32> to vector<8x128xf32>
    %209 = arith.addf %207, %208 : vector<8x128xf32>
    %210 = arith.negf %209 : vector<8x128xf32>
    %211 = math.exp %210 : vector<8x128xf32>
    %cst_112 = arith.constant 1.000000e+00 : f32
    %212 = vector.broadcast %cst_112 : f32 to vector<8x128xf32>
    %213 = arith.addf %212, %211 : vector<8x128xf32>
    %214 = arith.divf %212, %213 : vector<8x128xf32>
    %215 = vector.extract_strided_slice %201 {offsets = [0, 128], sizes = [8, 128], strides = [1, 1]} : vector<8x384xf32> to vector<8x128xf32>
    %216 = vector.extract_strided_slice %206 {offsets = [0, 128], sizes = [8, 128], strides = [1, 1]} : vector<8x384xf32> to vector<8x128xf32>
    %217 = arith.addf %215, %216 : vector<8x128xf32>
    %218 = arith.negf %217 : vector<8x128xf32>
    %219 = math.exp %218 : vector<8x128xf32>
    %cst_113 = arith.constant 1.000000e+00 : f32
    %220 = vector.broadcast %cst_113 : f32 to vector<8x128xf32>
    %221 = arith.addf %220, %219 : vector<8x128xf32>
    %222 = arith.divf %220, %221 : vector<8x128xf32>
    %223 = vector.extract_strided_slice %201 {offsets = [0, 256], sizes = [8, 128], strides = [1, 1]} : vector<8x384xf32> to vector<8x128xf32>
    %224 = vector.extract_strided_slice %206 {offsets = [0, 256], sizes = [8, 128], strides = [1, 1]} : vector<8x384xf32> to vector<8x128xf32>
    %225 = arith.mulf %214, %224 : vector<8x128xf32>
    %226 = arith.addf %223, %225 : vector<8x128xf32>
    %227 = math.tanh %226 : vector<8x128xf32>
    %cst_114 = arith.constant 1.000000e+00 : f32
    %228 = vector.broadcast %cst_114 : f32 to vector<8x128xf32>
    %229 = arith.subf %228, %222 : vector<8x128xf32>
    %230 = arith.mulf %229, %227 : vector<8x128xf32>
    %231 = arith.mulf %222, %149 : vector<8x128xf32>
    %232 = arith.addf %230, %231 : vector<8x128xf32>
    %c0_115 = arith.constant 0 : index
    %c0_116 = arith.constant 0 : index
    %233 = vector.load %arg13[%c0_115, %c0_116] : memref<128x256xf32, #tpu.memory_space<vmem>>, vector<128x256xf32>
    %cst_117 = arith.constant dense<0.000000e+00> : vector<8x256xf32>
    %234 = tpu.matmul %232, %233, %cst_117 {dimension_numbers = #tpu.dot_dimension_numbers<[1], [0], [0], [1], [0, 0, 1, 1], [], []>} : vector<8x128xf32>, vector<128x256xf32>, vector<8x256xf32> -> vector<8x256xf32>
    %c0_118 = arith.constant 0 : index
    %c0_119 = arith.constant 0 : index
    %235 = vector.load %arg14[%c0_118, %c0_119] : memref<1x256xf32, #tpu.memory_space<vmem>>, vector<1x256xf32>
    %236 = vector.broadcast %235 : vector<1x256xf32> to vector<8x256xf32>
    %237 = arith.addf %234, %236 : vector<8x256xf32>
    %cst_120 = arith.constant dense<0xFF800000> : vector<8xf32>
    %238 = vector.multi_reduction <maximumf>, %237, %cst_120 [1] : vector<8x256xf32> to vector<8xf32>
    %239 = vector.shape_cast %238 : vector<8xf32> to vector<8x1xf32>
    %240 = vector.broadcast %239 : vector<8x1xf32> to vector<8x256xf32>
    %241 = arith.subf %237, %240 : vector<8x256xf32>
    %242 = math.exp %241 : vector<8x256xf32>
    %cst_121 = arith.constant dense<0.000000e+00> : vector<8xf32>
    %243 = vector.multi_reduction <add>, %242, %cst_121 [1] : vector<8x256xf32> to vector<8xf32>
    %244 = vector.shape_cast %243 : vector<8xf32> to vector<8x1xf32>
    %245 = math.log %244 : vector<8x1xf32>
    %246 = arith.addf %239, %245 : vector<8x1xf32>
    %247 = vector.broadcast %246 : vector<8x1xf32> to vector<8x256xf32>
    %248 = arith.subf %237, %247 : vector<8x256xf32>
    %249 = tpu.concatenate %248, %232, %186 in 1 : vector<8x256xf32>, vector<8x128xf32>, vector<8x128xf32> -> vector<8x512xf32>
    %c2_122 = arith.constant 2 : index
    %c0_123 = arith.constant 0 : index
    %c0_124 = arith.constant 0 : index
    %250 = vector.load %arg15[%c2_122, %c0_123, %c0_124] : memref<8x8x512xf32, #tpu.memory_space<vmem>>, vector<1x8x512xf32>
    %251 = vector.shape_cast %250 : vector<1x8x512xf32> to vector<8x512xf32>
    %252 = vector.shape_cast %249 : vector<8x512xf32> to vector<1x8x512xf32>
    tpu.vector_store %arg15[%c2_122, %c0_123, %c0_124], %252 {strides = array<i32>} : memref<8x8x512xf32, #tpu.memory_space<vmem>>, vector<1x8x512xf32>,
    %c3 = arith.constant 3 : index
    %c0_125 = arith.constant 0 : index
    %c0_126 = arith.constant 0 : index
    %253 = vector.load %arg2[%c3, %c0_125, %c0_126] : memref<8x8x128xf32, #tpu.memory_space<vmem>>, vector<1x8x128xf32>
    %254 = vector.shape_cast %253 : vector<1x8x128xf32> to vector<8x128xf32>
    %255 = tpu.concatenate %254, %232 in 1 : vector<8x128xf32>, vector<8x128xf32> -> vector<8x256xf32>
    %c0_127 = arith.constant 0 : index
    %c0_128 = arith.constant 0 : index
    %256 = vector.load %arg5[%c0_127, %c0_128] : memref<256x128xf32, #tpu.memory_space<vmem>>, vector<256x128xf32>
    %cst_129 = arith.constant dense<0.000000e+00> : vector<8x128xf32>
    %257 = tpu.matmul %255, %256, %cst_129 {dimension_numbers = #tpu.dot_dimension_numbers<[1], [0], [0], [1], [0, 0, 1, 1], [], []>} : vector<8x256xf32>, vector<256x128xf32>, vector<8x128xf32> -> vector<8x128xf32>
    %c0_130 = arith.constant 0 : index
    %c0_131 = arith.constant 0 : index
    %258 = vector.load %arg6[%c0_130, %c0_131] : memref<1x128xf32, #tpu.memory_space<vmem>>, vector<1x128xf32>
    %259 = vector.broadcast %258 : vector<1x128xf32> to vector<8x128xf32>
    %260 = arith.addf %257, %259 : vector<8x128xf32>
    %cst_132 = arith.constant dense<0xFF800000> : vector<8xf32>
    %261 = vector.multi_reduction <maximumf>, %260, %cst_132 [1] : vector<8x128xf32> to vector<8xf32>
    %262 = vector.shape_cast %261 : vector<8xf32> to vector<8x1xf32>
    %263 = vector.broadcast %262 : vector<8x1xf32> to vector<8x128xf32>
    %264 = arith.subf %260, %263 : vector<8x128xf32>
    %265 = math.exp %264 : vector<8x128xf32>
    %cst_133 = arith.constant dense<0.000000e+00> : vector<8xf32>
    %266 = vector.multi_reduction <add>, %265, %cst_133 [1] : vector<8x128xf32> to vector<8xf32>
    %267 = vector.shape_cast %266 : vector<8xf32> to vector<8x1xf32>
    %268 = vector.broadcast %267 : vector<8x1xf32> to vector<8x128xf32>
    %269 = arith.divf %265, %268 : vector<8x128xf32>
    %c0_134 = arith.constant 0 : index
    %c0_135 = arith.constant 0 : index
    %270 = vector.load %arg4[%c0_134, %c0_135] : memref<128x128xf32, #tpu.memory_space<vmem>>, vector<128x128xf32>
    %cst_136 = arith.constant dense<0.000000e+00> : vector<8x128xf32>
    %271 = tpu.matmul %269, %270, %cst_136 {dimension_numbers = #tpu.dot_dimension_numbers<[1], [0], [0], [1], [0, 0, 1, 1], [], []>} : vector<8x128xf32>, vector<128x128xf32>, vector<8x128xf32> -> vector<8x128xf32>
    %272 = tpu.concatenate %254, %271 in 1 : vector<8x128xf32>, vector<8x128xf32> -> vector<8x256xf32>
    %c0_137 = arith.constant 0 : index
    %c0_138 = arith.constant 0 : index
    %273 = vector.load %arg7[%c0_137, %c0_138] : memref<256x128xf32, #tpu.memory_space<vmem>>, vector<256x128xf32>
    %cst_139 = arith.constant dense<0.000000e+00> : vector<8x128xf32>
    %274 = tpu.matmul %272, %273, %cst_139 {dimension_numbers = #tpu.dot_dimension_numbers<[1], [0], [0], [1], [0, 0, 1, 1], [], []>} : vector<8x256xf32>, vector<256x128xf32>, vector<8x128xf32> -> vector<8x128xf32>
    %c0_140 = arith.constant 0 : index
    %c0_141 = arith.constant 0 : index
    %275 = vector.load %arg8[%c0_140, %c0_141] : memref<1x128xf32, #tpu.memory_space<vmem>>, vector<1x128xf32>
    %276 = vector.broadcast %275 : vector<1x128xf32> to vector<8x128xf32>
    %277 = arith.addf %274, %276 : vector<8x128xf32>
    %cst_142 = arith.constant 0.000000e+00 : f32
    %278 = vector.broadcast %cst_142 : f32 to vector<8x128xf32>
    %279 = arith.maximumf %277, %278 : vector<8x128xf32>
    %c0_143 = arith.constant 0 : index
    %c0_144 = arith.constant 0 : index
    %280 = vector.load %arg9[%c0_143, %c0_144] : memref<128x384xf32, #tpu.memory_space<vmem>>, vector<128x384xf32>
    %cst_145 = arith.constant dense<0.000000e+00> : vector<8x384xf32>
    %281 = tpu.matmul %279, %280, %cst_145 {dimension_numbers = #tpu.dot_dimension_numbers<[1], [0], [0], [1], [0, 0, 1, 1], [], []>} : vector<8x128xf32>, vector<128x384xf32>, vector<8x384xf32> -> vector<8x384xf32>
    %c0_146 = arith.constant 0 : index
    %c0_147 = arith.constant 0 : index
    %282 = vector.load %arg10[%c0_146, %c0_147] : memref<1x384xf32, #tpu.memory_space<vmem>>, vector<1x384xf32>
    %283 = vector.broadcast %282 : vector<1x384xf32> to vector<8x384xf32>
    %284 = arith.addf %281, %283 : vector<8x384xf32>
    %c0_148 = arith.constant 0 : index
    %c0_149 = arith.constant 0 : index
    %285 = vector.load %arg11[%c0_148, %c0_149] : memref<128x384xf32, #tpu.memory_space<vmem>>, vector<128x384xf32>
    %cst_150 = arith.constant dense<0.000000e+00> : vector<8x384xf32>
    %286 = tpu.matmul %232, %285, %cst_150 {dimension_numbers = #tpu.dot_dimension_numbers<[1], [0], [0], [1], [0, 0, 1, 1], [], []>} : vector<8x128xf32>, vector<128x384xf32>, vector<8x384xf32> -> vector<8x384xf32>
    %c0_151 = arith.constant 0 : index
    %c0_152 = arith.constant 0 : index
    %287 = vector.load %arg12[%c0_151, %c0_152] : memref<1x384xf32, #tpu.memory_space<vmem>>, vector<1x384xf32>
    %288 = vector.broadcast %287 : vector<1x384xf32> to vector<8x384xf32>
    %289 = arith.addf %286, %288 : vector<8x384xf32>
    %290 = vector.extract_strided_slice %284 {offsets = [0, 0], sizes = [8, 128], strides = [1, 1]} : vector<8x384xf32> to vector<8x128xf32>
    %291 = vector.extract_strided_slice %289 {offsets = [0, 0], sizes = [8, 128], strides = [1, 1]} : vector<8x384xf32> to vector<8x128xf32>
    %292 = arith.addf %290, %291 : vector<8x128xf32>
    %293 = arith.negf %292 : vector<8x128xf32>
    %294 = math.exp %293 : vector<8x128xf32>
    %cst_153 = arith.constant 1.000000e+00 : f32
    %295 = vector.broadcast %cst_153 : f32 to vector<8x128xf32>
    %296 = arith.addf %295, %294 : vector<8x128xf32>
    %297 = arith.divf %295, %296 : vector<8x128xf32>
    %298 = vector.extract_strided_slice %284 {offsets = [0, 128], sizes = [8, 128], strides = [1, 1]} : vector<8x384xf32> to vector<8x128xf32>
    %299 = vector.extract_strided_slice %289 {offsets = [0, 128], sizes = [8, 128], strides = [1, 1]} : vector<8x384xf32> to vector<8x128xf32>
    %300 = arith.addf %298, %299 : vector<8x128xf32>
    %301 = arith.negf %300 : vector<8x128xf32>
    %302 = math.exp %301 : vector<8x128xf32>
    %cst_154 = arith.constant 1.000000e+00 : f32
    %303 = vector.broadcast %cst_154 : f32 to vector<8x128xf32>
    %304 = arith.addf %303, %302 : vector<8x128xf32>
    %305 = arith.divf %303, %304 : vector<8x128xf32>
    %306 = vector.extract_strided_slice %284 {offsets = [0, 256], sizes = [8, 128], strides = [1, 1]} : vector<8x384xf32> to vector<8x128xf32>
    %307 = vector.extract_strided_slice %289 {offsets = [0, 256], sizes = [8, 128], strides = [1, 1]} : vector<8x384xf32> to vector<8x128xf32>
    %308 = arith.mulf %297, %307 : vector<8x128xf32>
    %309 = arith.addf %306, %308 : vector<8x128xf32>
    %310 = math.tanh %309 : vector<8x128xf32>
    %cst_155 = arith.constant 1.000000e+00 : f32
    %311 = vector.broadcast %cst_155 : f32 to vector<8x128xf32>
    %312 = arith.subf %311, %305 : vector<8x128xf32>
    %313 = arith.mulf %312, %310 : vector<8x128xf32>
    %314 = arith.mulf %305, %232 : vector<8x128xf32>
    %315 = arith.addf %313, %314 : vector<8x128xf32>
    %c0_156 = arith.constant 0 : index
    %c0_157 = arith.constant 0 : index
    %316 = vector.load %arg13[%c0_156, %c0_157] : memref<128x256xf32, #tpu.memory_space<vmem>>, vector<128x256xf32>
    %cst_158 = arith.constant dense<0.000000e+00> : vector<8x256xf32>
    %317 = tpu.matmul %315, %316, %cst_158 {dimension_numbers = #tpu.dot_dimension_numbers<[1], [0], [0], [1], [0, 0, 1, 1], [], []>} : vector<8x128xf32>, vector<128x256xf32>, vector<8x256xf32> -> vector<8x256xf32>
    %c0_159 = arith.constant 0 : index
    %c0_160 = arith.constant 0 : index
    %318 = vector.load %arg14[%c0_159, %c0_160] : memref<1x256xf32, #tpu.memory_space<vmem>>, vector<1x256xf32>
    %319 = vector.broadcast %318 : vector<1x256xf32> to vector<8x256xf32>
    %320 = arith.addf %317, %319 : vector<8x256xf32>
    %cst_161 = arith.constant dense<0xFF800000> : vector<8xf32>
    %321 = vector.multi_reduction <maximumf>, %320, %cst_161 [1] : vector<8x256xf32> to vector<8xf32>
    %322 = vector.shape_cast %321 : vector<8xf32> to vector<8x1xf32>
    %323 = vector.broadcast %322 : vector<8x1xf32> to vector<8x256xf32>
    %324 = arith.subf %320, %323 : vector<8x256xf32>
    %325 = math.exp %324 : vector<8x256xf32>
    %cst_162 = arith.constant dense<0.000000e+00> : vector<8xf32>
    %326 = vector.multi_reduction <add>, %325, %cst_162 [1] : vector<8x256xf32> to vector<8xf32>
    %327 = vector.shape_cast %326 : vector<8xf32> to vector<8x1xf32>
    %328 = math.log %327 : vector<8x1xf32>
    %329 = arith.addf %322, %328 : vector<8x1xf32>
    %330 = vector.broadcast %329 : vector<8x1xf32> to vector<8x256xf32>
    %331 = arith.subf %320, %330 : vector<8x256xf32>
    %332 = tpu.concatenate %331, %315, %269 in 1 : vector<8x256xf32>, vector<8x128xf32>, vector<8x128xf32> -> vector<8x512xf32>
    %c3_163 = arith.constant 3 : index
    %c0_164 = arith.constant 0 : index
    %c0_165 = arith.constant 0 : index
    %333 = vector.load %arg15[%c3_163, %c0_164, %c0_165] : memref<8x8x512xf32, #tpu.memory_space<vmem>>, vector<1x8x512xf32>
    %334 = vector.shape_cast %333 : vector<1x8x512xf32> to vector<8x512xf32>
    %335 = vector.shape_cast %332 : vector<8x512xf32> to vector<1x8x512xf32>
    tpu.vector_store %arg15[%c3_163, %c0_164, %c0_165], %335 {strides = array<i32>} : memref<8x8x512xf32, #tpu.memory_space<vmem>>, vector<1x8x512xf32>,
    %c4 = arith.constant 4 : index
    %c0_166 = arith.constant 0 : index
    %c0_167 = arith.constant 0 : index
    %336 = vector.load %arg2[%c4, %c0_166, %c0_167] : memref<8x8x128xf32, #tpu.memory_space<vmem>>, vector<1x8x128xf32>
    %337 = vector.shape_cast %336 : vector<1x8x128xf32> to vector<8x128xf32>
    %338 = tpu.concatenate %337, %315 in 1 : vector<8x128xf32>, vector<8x128xf32> -> vector<8x256xf32>
    %c0_168 = arith.constant 0 : index
    %c0_169 = arith.constant 0 : index
    %339 = vector.load %arg5[%c0_168, %c0_169] : memref<256x128xf32, #tpu.memory_space<vmem>>, vector<256x128xf32>
    %cst_170 = arith.constant dense<0.000000e+00> : vector<8x128xf32>
    %340 = tpu.matmul %338, %339, %cst_170 {dimension_numbers = #tpu.dot_dimension_numbers<[1], [0], [0], [1], [0, 0, 1, 1], [], []>} : vector<8x256xf32>, vector<256x128xf32>, vector<8x128xf32> -> vector<8x128xf32>
    %c0_171 = arith.constant 0 : index
    %c0_172 = arith.constant 0 : index
    %341 = vector.load %arg6[%c0_171, %c0_172] : memref<1x128xf32, #tpu.memory_space<vmem>>, vector<1x128xf32>
    %342 = vector.broadcast %341 : vector<1x128xf32> to vector<8x128xf32>
    %343 = arith.addf %340, %342 : vector<8x128xf32>
    %cst_173 = arith.constant dense<0xFF800000> : vector<8xf32>
    %344 = vector.multi_reduction <maximumf>, %343, %cst_173 [1] : vector<8x128xf32> to vector<8xf32>
    %345 = vector.shape_cast %344 : vector<8xf32> to vector<8x1xf32>
    %346 = vector.broadcast %345 : vector<8x1xf32> to vector<8x128xf32>
    %347 = arith.subf %343, %346 : vector<8x128xf32>
    %348 = math.exp %347 : vector<8x128xf32>
    %cst_174 = arith.constant dense<0.000000e+00> : vector<8xf32>
    %349 = vector.multi_reduction <add>, %348, %cst_174 [1] : vector<8x128xf32> to vector<8xf32>
    %350 = vector.shape_cast %349 : vector<8xf32> to vector<8x1xf32>
    %351 = vector.broadcast %350 : vector<8x1xf32> to vector<8x128xf32>
    %352 = arith.divf %348, %351 : vector<8x128xf32>
    %c0_175 = arith.constant 0 : index
    %c0_176 = arith.constant 0 : index
    %353 = vector.load %arg4[%c0_175, %c0_176] : memref<128x128xf32, #tpu.memory_space<vmem>>, vector<128x128xf32>
    %cst_177 = arith.constant dense<0.000000e+00> : vector<8x128xf32>
    %354 = tpu.matmul %352, %353, %cst_177 {dimension_numbers = #tpu.dot_dimension_numbers<[1], [0], [0], [1], [0, 0, 1, 1], [], []>} : vector<8x128xf32>, vector<128x128xf32>, vector<8x128xf32> -> vector<8x128xf32>
    %355 = tpu.concatenate %337, %354 in 1 : vector<8x128xf32>, vector<8x128xf32> -> vector<8x256xf32>
    %c0_178 = arith.constant 0 : index
    %c0_179 = arith.constant 0 : index
    %356 = vector.load %arg7[%c0_178, %c0_179] : memref<256x128xf32, #tpu.memory_space<vmem>>, vector<256x128xf32>
    %cst_180 = arith.constant dense<0.000000e+00> : vector<8x128xf32>
    %357 = tpu.matmul %355, %356, %cst_180 {dimension_numbers = #tpu.dot_dimension_numbers<[1], [0], [0], [1], [0, 0, 1, 1], [], []>} : vector<8x256xf32>, vector<256x128xf32>, vector<8x128xf32> -> vector<8x128xf32>
    %c0_181 = arith.constant 0 : index
    %c0_182 = arith.constant 0 : index
    %358 = vector.load %arg8[%c0_181, %c0_182] : memref<1x128xf32, #tpu.memory_space<vmem>>, vector<1x128xf32>
    %359 = vector.broadcast %358 : vector<1x128xf32> to vector<8x128xf32>
    %360 = arith.addf %357, %359 : vector<8x128xf32>
    %cst_183 = arith.constant 0.000000e+00 : f32
    %361 = vector.broadcast %cst_183 : f32 to vector<8x128xf32>
    %362 = arith.maximumf %360, %361 : vector<8x128xf32>
    %c0_184 = arith.constant 0 : index
    %c0_185 = arith.constant 0 : index
    %363 = vector.load %arg9[%c0_184, %c0_185] : memref<128x384xf32, #tpu.memory_space<vmem>>, vector<128x384xf32>
    %cst_186 = arith.constant dense<0.000000e+00> : vector<8x384xf32>
    %364 = tpu.matmul %362, %363, %cst_186 {dimension_numbers = #tpu.dot_dimension_numbers<[1], [0], [0], [1], [0, 0, 1, 1], [], []>} : vector<8x128xf32>, vector<128x384xf32>, vector<8x384xf32> -> vector<8x384xf32>
    %c0_187 = arith.constant 0 : index
    %c0_188 = arith.constant 0 : index
    %365 = vector.load %arg10[%c0_187, %c0_188] : memref<1x384xf32, #tpu.memory_space<vmem>>, vector<1x384xf32>
    %366 = vector.broadcast %365 : vector<1x384xf32> to vector<8x384xf32>
    %367 = arith.addf %364, %366 : vector<8x384xf32>
    %c0_189 = arith.constant 0 : index
    %c0_190 = arith.constant 0 : index
    %368 = vector.load %arg11[%c0_189, %c0_190] : memref<128x384xf32, #tpu.memory_space<vmem>>, vector<128x384xf32>
    %cst_191 = arith.constant dense<0.000000e+00> : vector<8x384xf32>
    %369 = tpu.matmul %315, %368, %cst_191 {dimension_numbers = #tpu.dot_dimension_numbers<[1], [0], [0], [1], [0, 0, 1, 1], [], []>} : vector<8x128xf32>, vector<128x384xf32>, vector<8x384xf32> -> vector<8x384xf32>
    %c0_192 = arith.constant 0 : index
    %c0_193 = arith.constant 0 : index
    %370 = vector.load %arg12[%c0_192, %c0_193] : memref<1x384xf32, #tpu.memory_space<vmem>>, vector<1x384xf32>
    %371 = vector.broadcast %370 : vector<1x384xf32> to vector<8x384xf32>
    %372 = arith.addf %369, %371 : vector<8x384xf32>
    %373 = vector.extract_strided_slice %367 {offsets = [0, 0], sizes = [8, 128], strides = [1, 1]} : vector<8x384xf32> to vector<8x128xf32>
    %374 = vector.extract_strided_slice %372 {offsets = [0, 0], sizes = [8, 128], strides = [1, 1]} : vector<8x384xf32> to vector<8x128xf32>
    %375 = arith.addf %373, %374 : vector<8x128xf32>
    %376 = arith.negf %375 : vector<8x128xf32>
    %377 = math.exp %376 : vector<8x128xf32>
    %cst_194 = arith.constant 1.000000e+00 : f32
    %378 = vector.broadcast %cst_194 : f32 to vector<8x128xf32>
    %379 = arith.addf %378, %377 : vector<8x128xf32>
    %380 = arith.divf %378, %379 : vector<8x128xf32>
    %381 = vector.extract_strided_slice %367 {offsets = [0, 128], sizes = [8, 128], strides = [1, 1]} : vector<8x384xf32> to vector<8x128xf32>
    %382 = vector.extract_strided_slice %372 {offsets = [0, 128], sizes = [8, 128], strides = [1, 1]} : vector<8x384xf32> to vector<8x128xf32>
    %383 = arith.addf %381, %382 : vector<8x128xf32>
    %384 = arith.negf %383 : vector<8x128xf32>
    %385 = math.exp %384 : vector<8x128xf32>
    %cst_195 = arith.constant 1.000000e+00 : f32
    %386 = vector.broadcast %cst_195 : f32 to vector<8x128xf32>
    %387 = arith.addf %386, %385 : vector<8x128xf32>
    %388 = arith.divf %386, %387 : vector<8x128xf32>
    %389 = vector.extract_strided_slice %367 {offsets = [0, 256], sizes = [8, 128], strides = [1, 1]} : vector<8x384xf32> to vector<8x128xf32>
    %390 = vector.extract_strided_slice %372 {offsets = [0, 256], sizes = [8, 128], strides = [1, 1]} : vector<8x384xf32> to vector<8x128xf32>
    %391 = arith.mulf %380, %390 : vector<8x128xf32>
    %392 = arith.addf %389, %391 : vector<8x128xf32>
    %393 = math.tanh %392 : vector<8x128xf32>
    %cst_196 = arith.constant 1.000000e+00 : f32
    %394 = vector.broadcast %cst_196 : f32 to vector<8x128xf32>
    %395 = arith.subf %394, %388 : vector<8x128xf32>
    %396 = arith.mulf %395, %393 : vector<8x128xf32>
    %397 = arith.mulf %388, %315 : vector<8x128xf32>
    %398 = arith.addf %396, %397 : vector<8x128xf32>
    %c0_197 = arith.constant 0 : index
    %c0_198 = arith.constant 0 : index
    %399 = vector.load %arg13[%c0_197, %c0_198] : memref<128x256xf32, #tpu.memory_space<vmem>>, vector<128x256xf32>
    %cst_199 = arith.constant dense<0.000000e+00> : vector<8x256xf32>
    %400 = tpu.matmul %398, %399, %cst_199 {dimension_numbers = #tpu.dot_dimension_numbers<[1], [0], [0], [1], [0, 0, 1, 1], [], []>} : vector<8x128xf32>, vector<128x256xf32>, vector<8x256xf32> -> vector<8x256xf32>
    %c0_200 = arith.constant 0 : index
    %c0_201 = arith.constant 0 : index
    %401 = vector.load %arg14[%c0_200, %c0_201] : memref<1x256xf32, #tpu.memory_space<vmem>>, vector<1x256xf32>
    %402 = vector.broadcast %401 : vector<1x256xf32> to vector<8x256xf32>
    %403 = arith.addf %400, %402 : vector<8x256xf32>
    %cst_202 = arith.constant dense<0xFF800000> : vector<8xf32>
    %404 = vector.multi_reduction <maximumf>, %403, %cst_202 [1] : vector<8x256xf32> to vector<8xf32>
    %405 = vector.shape_cast %404 : vector<8xf32> to vector<8x1xf32>
    %406 = vector.broadcast %405 : vector<8x1xf32> to vector<8x256xf32>
    %407 = arith.subf %403, %406 : vector<8x256xf32>
    %408 = math.exp %407 : vector<8x256xf32>
    %cst_203 = arith.constant dense<0.000000e+00> : vector<8xf32>
    %409 = vector.multi_reduction <add>, %408, %cst_203 [1] : vector<8x256xf32> to vector<8xf32>
    %410 = vector.shape_cast %409 : vector<8xf32> to vector<8x1xf32>
    %411 = math.log %410 : vector<8x1xf32>
    %412 = arith.addf %405, %411 : vector<8x1xf32>
    %413 = vector.broadcast %412 : vector<8x1xf32> to vector<8x256xf32>
    %414 = arith.subf %403, %413 : vector<8x256xf32>
    %415 = tpu.concatenate %414, %398, %352 in 1 : vector<8x256xf32>, vector<8x128xf32>, vector<8x128xf32> -> vector<8x512xf32>
    %c4_204 = arith.constant 4 : index
    %c0_205 = arith.constant 0 : index
    %c0_206 = arith.constant 0 : index
    %416 = vector.load %arg15[%c4_204, %c0_205, %c0_206] : memref<8x8x512xf32, #tpu.memory_space<vmem>>, vector<1x8x512xf32>
    %417 = vector.shape_cast %416 : vector<1x8x512xf32> to vector<8x512xf32>
    %418 = vector.shape_cast %415 : vector<8x512xf32> to vector<1x8x512xf32>
    tpu.vector_store %arg15[%c4_204, %c0_205, %c0_206], %418 {strides = array<i32>} : memref<8x8x512xf32, #tpu.memory_space<vmem>>, vector<1x8x512xf32>,
    %c5 = arith.constant 5 : index
    %c0_207 = arith.constant 0 : index
    %c0_208 = arith.constant 0 : index
    %419 = vector.load %arg2[%c5, %c0_207, %c0_208] : memref<8x8x128xf32, #tpu.memory_space<vmem>>, vector<1x8x128xf32>
    %420 = vector.shape_cast %419 : vector<1x8x128xf32> to vector<8x128xf32>
    %421 = tpu.concatenate %420, %398 in 1 : vector<8x128xf32>, vector<8x128xf32> -> vector<8x256xf32>
    %c0_209 = arith.constant 0 : index
    %c0_210 = arith.constant 0 : index
    %422 = vector.load %arg5[%c0_209, %c0_210] : memref<256x128xf32, #tpu.memory_space<vmem>>, vector<256x128xf32>
    %cst_211 = arith.constant dense<0.000000e+00> : vector<8x128xf32>
    %423 = tpu.matmul %421, %422, %cst_211 {dimension_numbers = #tpu.dot_dimension_numbers<[1], [0], [0], [1], [0, 0, 1, 1], [], []>} : vector<8x256xf32>, vector<256x128xf32>, vector<8x128xf32> -> vector<8x128xf32>
    %c0_212 = arith.constant 0 : index
    %c0_213 = arith.constant 0 : index
    %424 = vector.load %arg6[%c0_212, %c0_213] : memref<1x128xf32, #tpu.memory_space<vmem>>, vector<1x128xf32>
    %425 = vector.broadcast %424 : vector<1x128xf32> to vector<8x128xf32>
    %426 = arith.addf %423, %425 : vector<8x128xf32>
    %cst_214 = arith.constant dense<0xFF800000> : vector<8xf32>
    %427 = vector.multi_reduction <maximumf>, %426, %cst_214 [1] : vector<8x128xf32> to vector<8xf32>
    %428 = vector.shape_cast %427 : vector<8xf32> to vector<8x1xf32>
    %429 = vector.broadcast %428 : vector<8x1xf32> to vector<8x128xf32>
    %430 = arith.subf %426, %429 : vector<8x128xf32>
    %431 = math.exp %430 : vector<8x128xf32>
    %cst_215 = arith.constant dense<0.000000e+00> : vector<8xf32>
    %432 = vector.multi_reduction <add>, %431, %cst_215 [1] : vector<8x128xf32> to vector<8xf32>
    %433 = vector.shape_cast %432 : vector<8xf32> to vector<8x1xf32>
    %434 = vector.broadcast %433 : vector<8x1xf32> to vector<8x128xf32>
    %435 = arith.divf %431, %434 : vector<8x128xf32>
    %c0_216 = arith.constant 0 : index
    %c0_217 = arith.constant 0 : index
    %436 = vector.load %arg4[%c0_216, %c0_217] : memref<128x128xf32, #tpu.memory_space<vmem>>, vector<128x128xf32>
    %cst_218 = arith.constant dense<0.000000e+00> : vector<8x128xf32>
    %437 = tpu.matmul %435, %436, %cst_218 {dimension_numbers = #tpu.dot_dimension_numbers<[1], [0], [0], [1], [0, 0, 1, 1], [], []>} : vector<8x128xf32>, vector<128x128xf32>, vector<8x128xf32> -> vector<8x128xf32>
    %438 = tpu.concatenate %420, %437 in 1 : vector<8x128xf32>, vector<8x128xf32> -> vector<8x256xf32>
    %c0_219 = arith.constant 0 : index
    %c0_220 = arith.constant 0 : index
    %439 = vector.load %arg7[%c0_219, %c0_220] : memref<256x128xf32, #tpu.memory_space<vmem>>, vector<256x128xf32>
    %cst_221 = arith.constant dense<0.000000e+00> : vector<8x128xf32>
    %440 = tpu.matmul %438, %439, %cst_221 {dimension_numbers = #tpu.dot_dimension_numbers<[1], [0], [0], [1], [0, 0, 1, 1], [], []>} : vector<8x256xf32>, vector<256x128xf32>, vector<8x128xf32> -> vector<8x128xf32>
    %c0_222 = arith.constant 0 : index
    %c0_223 = arith.constant 0 : index
    %441 = vector.load %arg8[%c0_222, %c0_223] : memref<1x128xf32, #tpu.memory_space<vmem>>, vector<1x128xf32>
    %442 = vector.broadcast %441 : vector<1x128xf32> to vector<8x128xf32>
    %443 = arith.addf %440, %442 : vector<8x128xf32>
    %cst_224 = arith.constant 0.000000e+00 : f32
    %444 = vector.broadcast %cst_224 : f32 to vector<8x128xf32>
    %445 = arith.maximumf %443, %444 : vector<8x128xf32>
    %c0_225 = arith.constant 0 : index
    %c0_226 = arith.constant 0 : index
    %446 = vector.load %arg9[%c0_225, %c0_226] : memref<128x384xf32, #tpu.memory_space<vmem>>, vector<128x384xf32>
    %cst_227 = arith.constant dense<0.000000e+00> : vector<8x384xf32>
    %447 = tpu.matmul %445, %446, %cst_227 {dimension_numbers = #tpu.dot_dimension_numbers<[1], [0], [0], [1], [0, 0, 1, 1], [], []>} : vector<8x128xf32>, vector<128x384xf32>, vector<8x384xf32> -> vector<8x384xf32>
    %c0_228 = arith.constant 0 : index
    %c0_229 = arith.constant 0 : index
    %448 = vector.load %arg10[%c0_228, %c0_229] : memref<1x384xf32, #tpu.memory_space<vmem>>, vector<1x384xf32>
    %449 = vector.broadcast %448 : vector<1x384xf32> to vector<8x384xf32>
    %450 = arith.addf %447, %449 : vector<8x384xf32>
    %c0_230 = arith.constant 0 : index
    %c0_231 = arith.constant 0 : index
    %451 = vector.load %arg11[%c0_230, %c0_231] : memref<128x384xf32, #tpu.memory_space<vmem>>, vector<128x384xf32>
    %cst_232 = arith.constant dense<0.000000e+00> : vector<8x384xf32>
    %452 = tpu.matmul %398, %451, %cst_232 {dimension_numbers = #tpu.dot_dimension_numbers<[1], [0], [0], [1], [0, 0, 1, 1], [], []>} : vector<8x128xf32>, vector<128x384xf32>, vector<8x384xf32> -> vector<8x384xf32>
    %c0_233 = arith.constant 0 : index
    %c0_234 = arith.constant 0 : index
    %453 = vector.load %arg12[%c0_233, %c0_234] : memref<1x384xf32, #tpu.memory_space<vmem>>, vector<1x384xf32>
    %454 = vector.broadcast %453 : vector<1x384xf32> to vector<8x384xf32>
    %455 = arith.addf %452, %454 : vector<8x384xf32>
    %456 = vector.extract_strided_slice %450 {offsets = [0, 0], sizes = [8, 128], strides = [1, 1]} : vector<8x384xf32> to vector<8x128xf32>
    %457 = vector.extract_strided_slice %455 {offsets = [0, 0], sizes = [8, 128], strides = [1, 1]} : vector<8x384xf32> to vector<8x128xf32>
    %458 = arith.addf %456, %457 : vector<8x128xf32>
    %459 = arith.negf %458 : vector<8x128xf32>
    %460 = math.exp %459 : vector<8x128xf32>
    %cst_235 = arith.constant 1.000000e+00 : f32
    %461 = vector.broadcast %cst_235 : f32 to vector<8x128xf32>
    %462 = arith.addf %461, %460 : vector<8x128xf32>
    %463 = arith.divf %461, %462 : vector<8x128xf32>
    %464 = vector.extract_strided_slice %450 {offsets = [0, 128], sizes = [8, 128], strides = [1, 1]} : vector<8x384xf32> to vector<8x128xf32>
    %465 = vector.extract_strided_slice %455 {offsets = [0, 128], sizes = [8, 128], strides = [1, 1]} : vector<8x384xf32> to vector<8x128xf32>
    %466 = arith.addf %464, %465 : vector<8x128xf32>
    %467 = arith.negf %466 : vector<8x128xf32>
    %468 = math.exp %467 : vector<8x128xf32>
    %cst_236 = arith.constant 1.000000e+00 : f32
    %469 = vector.broadcast %cst_236 : f32 to vector<8x128xf32>
    %470 = arith.addf %469, %468 : vector<8x128xf32>
    %471 = arith.divf %469, %470 : vector<8x128xf32>
    %472 = vector.extract_strided_slice %450 {offsets = [0, 256], sizes = [8, 128], strides = [1, 1]} : vector<8x384xf32> to vector<8x128xf32>
    %473 = vector.extract_strided_slice %455 {offsets = [0, 256], sizes = [8, 128], strides = [1, 1]} : vector<8x384xf32> to vector<8x128xf32>
    %474 = arith.mulf %463, %473 : vector<8x128xf32>
    %475 = arith.addf %472, %474 : vector<8x128xf32>
    %476 = math.tanh %475 : vector<8x128xf32>
    %cst_237 = arith.constant 1.000000e+00 : f32
    %477 = vector.broadcast %cst_237 : f32 to vector<8x128xf32>
    %478 = arith.subf %477, %471 : vector<8x128xf32>
    %479 = arith.mulf %478, %476 : vector<8x128xf32>
    %480 = arith.mulf %471, %398 : vector<8x128xf32>
    %481 = arith.addf %479, %480 : vector<8x128xf32>
    %c0_238 = arith.constant 0 : index
    %c0_239 = arith.constant 0 : index
    %482 = vector.load %arg13[%c0_238, %c0_239] : memref<128x256xf32, #tpu.memory_space<vmem>>, vector<128x256xf32>
    %cst_240 = arith.constant dense<0.000000e+00> : vector<8x256xf32>
    %483 = tpu.matmul %481, %482, %cst_240 {dimension_numbers = #tpu.dot_dimension_numbers<[1], [0], [0], [1], [0, 0, 1, 1], [], []>} : vector<8x128xf32>, vector<128x256xf32>, vector<8x256xf32> -> vector<8x256xf32>
    %c0_241 = arith.constant 0 : index
    %c0_242 = arith.constant 0 : index
    %484 = vector.load %arg14[%c0_241, %c0_242] : memref<1x256xf32, #tpu.memory_space<vmem>>, vector<1x256xf32>
    %485 = vector.broadcast %484 : vector<1x256xf32> to vector<8x256xf32>
    %486 = arith.addf %483, %485 : vector<8x256xf32>
    %cst_243 = arith.constant dense<0xFF800000> : vector<8xf32>
    %487 = vector.multi_reduction <maximumf>, %486, %cst_243 [1] : vector<8x256xf32> to vector<8xf32>
    %488 = vector.shape_cast %487 : vector<8xf32> to vector<8x1xf32>
    %489 = vector.broadcast %488 : vector<8x1xf32> to vector<8x256xf32>
    %490 = arith.subf %486, %489 : vector<8x256xf32>
    %491 = math.exp %490 : vector<8x256xf32>
    %cst_244 = arith.constant dense<0.000000e+00> : vector<8xf32>
    %492 = vector.multi_reduction <add>, %491, %cst_244 [1] : vector<8x256xf32> to vector<8xf32>
    %493 = vector.shape_cast %492 : vector<8xf32> to vector<8x1xf32>
    %494 = math.log %493 : vector<8x1xf32>
    %495 = arith.addf %488, %494 : vector<8x1xf32>
    %496 = vector.broadcast %495 : vector<8x1xf32> to vector<8x256xf32>
    %497 = arith.subf %486, %496 : vector<8x256xf32>
    %498 = tpu.concatenate %497, %481, %435 in 1 : vector<8x256xf32>, vector<8x128xf32>, vector<8x128xf32> -> vector<8x512xf32>
    %c5_245 = arith.constant 5 : index
    %c0_246 = arith.constant 0 : index
    %c0_247 = arith.constant 0 : index
    %499 = vector.load %arg15[%c5_245, %c0_246, %c0_247] : memref<8x8x512xf32, #tpu.memory_space<vmem>>, vector<1x8x512xf32>
    %500 = vector.shape_cast %499 : vector<1x8x512xf32> to vector<8x512xf32>
    %501 = vector.shape_cast %498 : vector<8x512xf32> to vector<1x8x512xf32>
    tpu.vector_store %arg15[%c5_245, %c0_246, %c0_247], %501 {strides = array<i32>} : memref<8x8x512xf32, #tpu.memory_space<vmem>>, vector<1x8x512xf32>,
    %c6 = arith.constant 6 : index
    %c0_248 = arith.constant 0 : index
    %c0_249 = arith.constant 0 : index
    %502 = vector.load %arg2[%c6, %c0_248, %c0_249] : memref<8x8x128xf32, #tpu.memory_space<vmem>>, vector<1x8x128xf32>
    %503 = vector.shape_cast %502 : vector<1x8x128xf32> to vector<8x128xf32>
    %504 = tpu.concatenate %503, %481 in 1 : vector<8x128xf32>, vector<8x128xf32> -> vector<8x256xf32>
    %c0_250 = arith.constant 0 : index
    %c0_251 = arith.constant 0 : index
    %505 = vector.load %arg5[%c0_250, %c0_251] : memref<256x128xf32, #tpu.memory_space<vmem>>, vector<256x128xf32>
    %cst_252 = arith.constant dense<0.000000e+00> : vector<8x128xf32>
    %506 = tpu.matmul %504, %505, %cst_252 {dimension_numbers = #tpu.dot_dimension_numbers<[1], [0], [0], [1], [0, 0, 1, 1], [], []>} : vector<8x256xf32>, vector<256x128xf32>, vector<8x128xf32> -> vector<8x128xf32>
    %c0_253 = arith.constant 0 : index
    %c0_254 = arith.constant 0 : index
    %507 = vector.load %arg6[%c0_253, %c0_254] : memref<1x128xf32, #tpu.memory_space<vmem>>, vector<1x128xf32>
    %508 = vector.broadcast %507 : vector<1x128xf32> to vector<8x128xf32>
    %509 = arith.addf %506, %508 : vector<8x128xf32>
    %cst_255 = arith.constant dense<0xFF800000> : vector<8xf32>
    %510 = vector.multi_reduction <maximumf>, %509, %cst_255 [1] : vector<8x128xf32> to vector<8xf32>
    %511 = vector.shape_cast %510 : vector<8xf32> to vector<8x1xf32>
    %512 = vector.broadcast %511 : vector<8x1xf32> to vector<8x128xf32>
    %513 = arith.subf %509, %512 : vector<8x128xf32>
    %514 = math.exp %513 : vector<8x128xf32>
    %cst_256 = arith.constant dense<0.000000e+00> : vector<8xf32>
    %515 = vector.multi_reduction <add>, %514, %cst_256 [1] : vector<8x128xf32> to vector<8xf32>
    %516 = vector.shape_cast %515 : vector<8xf32> to vector<8x1xf32>
    %517 = vector.broadcast %516 : vector<8x1xf32> to vector<8x128xf32>
    %518 = arith.divf %514, %517 : vector<8x128xf32>
    %c0_257 = arith.constant 0 : index
    %c0_258 = arith.constant 0 : index
    %519 = vector.load %arg4[%c0_257, %c0_258] : memref<128x128xf32, #tpu.memory_space<vmem>>, vector<128x128xf32>
    %cst_259 = arith.constant dense<0.000000e+00> : vector<8x128xf32>
    %520 = tpu.matmul %518, %519, %cst_259 {dimension_numbers = #tpu.dot_dimension_numbers<[1], [0], [0], [1], [0, 0, 1, 1], [], []>} : vector<8x128xf32>, vector<128x128xf32>, vector<8x128xf32> -> vector<8x128xf32>
    %521 = tpu.concatenate %503, %520 in 1 : vector<8x128xf32>, vector<8x128xf32> -> vector<8x256xf32>
    %c0_260 = arith.constant 0 : index
    %c0_261 = arith.constant 0 : index
    %522 = vector.load %arg7[%c0_260, %c0_261] : memref<256x128xf32, #tpu.memory_space<vmem>>, vector<256x128xf32>
    %cst_262 = arith.constant dense<0.000000e+00> : vector<8x128xf32>
    %523 = tpu.matmul %521, %522, %cst_262 {dimension_numbers = #tpu.dot_dimension_numbers<[1], [0], [0], [1], [0, 0, 1, 1], [], []>} : vector<8x256xf32>, vector<256x128xf32>, vector<8x128xf32> -> vector<8x128xf32>
    %c0_263 = arith.constant 0 : index
    %c0_264 = arith.constant 0 : index
    %524 = vector.load %arg8[%c0_263, %c0_264] : memref<1x128xf32, #tpu.memory_space<vmem>>, vector<1x128xf32>
    %525 = vector.broadcast %524 : vector<1x128xf32> to vector<8x128xf32>
    %526 = arith.addf %523, %525 : vector<8x128xf32>
    %cst_265 = arith.constant 0.000000e+00 : f32
    %527 = vector.broadcast %cst_265 : f32 to vector<8x128xf32>
    %528 = arith.maximumf %526, %527 : vector<8x128xf32>
    %c0_266 = arith.constant 0 : index
    %c0_267 = arith.constant 0 : index
    %529 = vector.load %arg9[%c0_266, %c0_267] : memref<128x384xf32, #tpu.memory_space<vmem>>, vector<128x384xf32>
    %cst_268 = arith.constant dense<0.000000e+00> : vector<8x384xf32>
    %530 = tpu.matmul %528, %529, %cst_268 {dimension_numbers = #tpu.dot_dimension_numbers<[1], [0], [0], [1], [0, 0, 1, 1], [], []>} : vector<8x128xf32>, vector<128x384xf32>, vector<8x384xf32> -> vector<8x384xf32>
    %c0_269 = arith.constant 0 : index
    %c0_270 = arith.constant 0 : index
    %531 = vector.load %arg10[%c0_269, %c0_270] : memref<1x384xf32, #tpu.memory_space<vmem>>, vector<1x384xf32>
    %532 = vector.broadcast %531 : vector<1x384xf32> to vector<8x384xf32>
    %533 = arith.addf %530, %532 : vector<8x384xf32>
    %c0_271 = arith.constant 0 : index
    %c0_272 = arith.constant 0 : index
    %534 = vector.load %arg11[%c0_271, %c0_272] : memref<128x384xf32, #tpu.memory_space<vmem>>, vector<128x384xf32>
    %cst_273 = arith.constant dense<0.000000e+00> : vector<8x384xf32>
    %535 = tpu.matmul %481, %534, %cst_273 {dimension_numbers = #tpu.dot_dimension_numbers<[1], [0], [0], [1], [0, 0, 1, 1], [], []>} : vector<8x128xf32>, vector<128x384xf32>, vector<8x384xf32> -> vector<8x384xf32>
    %c0_274 = arith.constant 0 : index
    %c0_275 = arith.constant 0 : index
    %536 = vector.load %arg12[%c0_274, %c0_275] : memref<1x384xf32, #tpu.memory_space<vmem>>, vector<1x384xf32>
    %537 = vector.broadcast %536 : vector<1x384xf32> to vector<8x384xf32>
    %538 = arith.addf %535, %537 : vector<8x384xf32>
    %539 = vector.extract_strided_slice %533 {offsets = [0, 0], sizes = [8, 128], strides = [1, 1]} : vector<8x384xf32> to vector<8x128xf32>
    %540 = vector.extract_strided_slice %538 {offsets = [0, 0], sizes = [8, 128], strides = [1, 1]} : vector<8x384xf32> to vector<8x128xf32>
    %541 = arith.addf %539, %540 : vector<8x128xf32>
    %542 = arith.negf %541 : vector<8x128xf32>
    %543 = math.exp %542 : vector<8x128xf32>
    %cst_276 = arith.constant 1.000000e+00 : f32
    %544 = vector.broadcast %cst_276 : f32 to vector<8x128xf32>
    %545 = arith.addf %544, %543 : vector<8x128xf32>
    %546 = arith.divf %544, %545 : vector<8x128xf32>
    %547 = vector.extract_strided_slice %533 {offsets = [0, 128], sizes = [8, 128], strides = [1, 1]} : vector<8x384xf32> to vector<8x128xf32>
    %548 = vector.extract_strided_slice %538 {offsets = [0, 128], sizes = [8, 128], strides = [1, 1]} : vector<8x384xf32> to vector<8x128xf32>
    %549 = arith.addf %547, %548 : vector<8x128xf32>
    %550 = arith.negf %549 : vector<8x128xf32>
    %551 = math.exp %550 : vector<8x128xf32>
    %cst_277 = arith.constant 1.000000e+00 : f32
    %552 = vector.broadcast %cst_277 : f32 to vector<8x128xf32>
    %553 = arith.addf %552, %551 : vector<8x128xf32>
    %554 = arith.divf %552, %553 : vector<8x128xf32>
    %555 = vector.extract_strided_slice %533 {offsets = [0, 256], sizes = [8, 128], strides = [1, 1]} : vector<8x384xf32> to vector<8x128xf32>
    %556 = vector.extract_strided_slice %538 {offsets = [0, 256], sizes = [8, 128], strides = [1, 1]} : vector<8x384xf32> to vector<8x128xf32>
    %557 = arith.mulf %546, %556 : vector<8x128xf32>
    %558 = arith.addf %555, %557 : vector<8x128xf32>
    %559 = math.tanh %558 : vector<8x128xf32>
    %cst_278 = arith.constant 1.000000e+00 : f32
    %560 = vector.broadcast %cst_278 : f32 to vector<8x128xf32>
    %561 = arith.subf %560, %554 : vector<8x128xf32>
    %562 = arith.mulf %561, %559 : vector<8x128xf32>
    %563 = arith.mulf %554, %481 : vector<8x128xf32>
    %564 = arith.addf %562, %563 : vector<8x128xf32>
    %c0_279 = arith.constant 0 : index
    %c0_280 = arith.constant 0 : index
    %565 = vector.load %arg13[%c0_279, %c0_280] : memref<128x256xf32, #tpu.memory_space<vmem>>, vector<128x256xf32>
    %cst_281 = arith.constant dense<0.000000e+00> : vector<8x256xf32>
    %566 = tpu.matmul %564, %565, %cst_281 {dimension_numbers = #tpu.dot_dimension_numbers<[1], [0], [0], [1], [0, 0, 1, 1], [], []>} : vector<8x128xf32>, vector<128x256xf32>, vector<8x256xf32> -> vector<8x256xf32>
    %c0_282 = arith.constant 0 : index
    %c0_283 = arith.constant 0 : index
    %567 = vector.load %arg14[%c0_282, %c0_283] : memref<1x256xf32, #tpu.memory_space<vmem>>, vector<1x256xf32>
    %568 = vector.broadcast %567 : vector<1x256xf32> to vector<8x256xf32>
    %569 = arith.addf %566, %568 : vector<8x256xf32>
    %cst_284 = arith.constant dense<0xFF800000> : vector<8xf32>
    %570 = vector.multi_reduction <maximumf>, %569, %cst_284 [1] : vector<8x256xf32> to vector<8xf32>
    %571 = vector.shape_cast %570 : vector<8xf32> to vector<8x1xf32>
    %572 = vector.broadcast %571 : vector<8x1xf32> to vector<8x256xf32>
    %573 = arith.subf %569, %572 : vector<8x256xf32>
    %574 = math.exp %573 : vector<8x256xf32>
    %cst_285 = arith.constant dense<0.000000e+00> : vector<8xf32>
    %575 = vector.multi_reduction <add>, %574, %cst_285 [1] : vector<8x256xf32> to vector<8xf32>
    %576 = vector.shape_cast %575 : vector<8xf32> to vector<8x1xf32>
    %577 = math.log %576 : vector<8x1xf32>
    %578 = arith.addf %571, %577 : vector<8x1xf32>
    %579 = vector.broadcast %578 : vector<8x1xf32> to vector<8x256xf32>
    %580 = arith.subf %569, %579 : vector<8x256xf32>
    %581 = tpu.concatenate %580, %564, %518 in 1 : vector<8x256xf32>, vector<8x128xf32>, vector<8x128xf32> -> vector<8x512xf32>
    %c6_286 = arith.constant 6 : index
    %c0_287 = arith.constant 0 : index
    %c0_288 = arith.constant 0 : index
    %582 = vector.load %arg15[%c6_286, %c0_287, %c0_288] : memref<8x8x512xf32, #tpu.memory_space<vmem>>, vector<1x8x512xf32>
    %583 = vector.shape_cast %582 : vector<1x8x512xf32> to vector<8x512xf32>
    %584 = vector.shape_cast %581 : vector<8x512xf32> to vector<1x8x512xf32>
    tpu.vector_store %arg15[%c6_286, %c0_287, %c0_288], %584 {strides = array<i32>} : memref<8x8x512xf32, #tpu.memory_space<vmem>>, vector<1x8x512xf32>,
    %c7 = arith.constant 7 : index
    %c0_289 = arith.constant 0 : index
    %c0_290 = arith.constant 0 : index
    %585 = vector.load %arg2[%c7, %c0_289, %c0_290] : memref<8x8x128xf32, #tpu.memory_space<vmem>>, vector<1x8x128xf32>
    %586 = vector.shape_cast %585 : vector<1x8x128xf32> to vector<8x128xf32>
    %587 = tpu.concatenate %586, %564 in 1 : vector<8x128xf32>, vector<8x128xf32> -> vector<8x256xf32>
    %c0_291 = arith.constant 0 : index
    %c0_292 = arith.constant 0 : index
    %588 = vector.load %arg5[%c0_291, %c0_292] : memref<256x128xf32, #tpu.memory_space<vmem>>, vector<256x128xf32>
    %cst_293 = arith.constant dense<0.000000e+00> : vector<8x128xf32>
    %589 = tpu.matmul %587, %588, %cst_293 {dimension_numbers = #tpu.dot_dimension_numbers<[1], [0], [0], [1], [0, 0, 1, 1], [], []>} : vector<8x256xf32>, vector<256x128xf32>, vector<8x128xf32> -> vector<8x128xf32>
    %c0_294 = arith.constant 0 : index
    %c0_295 = arith.constant 0 : index
    %590 = vector.load %arg6[%c0_294, %c0_295] : memref<1x128xf32, #tpu.memory_space<vmem>>, vector<1x128xf32>
    %591 = vector.broadcast %590 : vector<1x128xf32> to vector<8x128xf32>
    %592 = arith.addf %589, %591 : vector<8x128xf32>
    %cst_296 = arith.constant dense<0xFF800000> : vector<8xf32>
    %593 = vector.multi_reduction <maximumf>, %592, %cst_296 [1] : vector<8x128xf32> to vector<8xf32>
    %594 = vector.shape_cast %593 : vector<8xf32> to vector<8x1xf32>
    %595 = vector.broadcast %594 : vector<8x1xf32> to vector<8x128xf32>
    %596 = arith.subf %592, %595 : vector<8x128xf32>
    %597 = math.exp %596 : vector<8x128xf32>
    %cst_297 = arith.constant dense<0.000000e+00> : vector<8xf32>
    %598 = vector.multi_reduction <add>, %597, %cst_297 [1] : vector<8x128xf32> to vector<8xf32>
    %599 = vector.shape_cast %598 : vector<8xf32> to vector<8x1xf32>
    %600 = vector.broadcast %599 : vector<8x1xf32> to vector<8x128xf32>
    %601 = arith.divf %597, %600 : vector<8x128xf32>
    %c0_298 = arith.constant 0 : index
    %c0_299 = arith.constant 0 : index
    %602 = vector.load %arg4[%c0_298, %c0_299] : memref<128x128xf32, #tpu.memory_space<vmem>>, vector<128x128xf32>
    %cst_300 = arith.constant dense<0.000000e+00> : vector<8x128xf32>
    %603 = tpu.matmul %601, %602, %cst_300 {dimension_numbers = #tpu.dot_dimension_numbers<[1], [0], [0], [1], [0, 0, 1, 1], [], []>} : vector<8x128xf32>, vector<128x128xf32>, vector<8x128xf32> -> vector<8x128xf32>
    %604 = tpu.concatenate %586, %603 in 1 : vector<8x128xf32>, vector<8x128xf32> -> vector<8x256xf32>
    %c0_301 = arith.constant 0 : index
    %c0_302 = arith.constant 0 : index
    %605 = vector.load %arg7[%c0_301, %c0_302] : memref<256x128xf32, #tpu.memory_space<vmem>>, vector<256x128xf32>
    %cst_303 = arith.constant dense<0.000000e+00> : vector<8x128xf32>
    %606 = tpu.matmul %604, %605, %cst_303 {dimension_numbers = #tpu.dot_dimension_numbers<[1], [0], [0], [1], [0, 0, 1, 1], [], []>} : vector<8x256xf32>, vector<256x128xf32>, vector<8x128xf32> -> vector<8x128xf32>
    %c0_304 = arith.constant 0 : index
    %c0_305 = arith.constant 0 : index
    %607 = vector.load %arg8[%c0_304, %c0_305] : memref<1x128xf32, #tpu.memory_space<vmem>>, vector<1x128xf32>
    %608 = vector.broadcast %607 : vector<1x128xf32> to vector<8x128xf32>
    %609 = arith.addf %606, %608 : vector<8x128xf32>
    %cst_306 = arith.constant 0.000000e+00 : f32
    %610 = vector.broadcast %cst_306 : f32 to vector<8x128xf32>
    %611 = arith.maximumf %609, %610 : vector<8x128xf32>
    %c0_307 = arith.constant 0 : index
    %c0_308 = arith.constant 0 : index
    %612 = vector.load %arg9[%c0_307, %c0_308] : memref<128x384xf32, #tpu.memory_space<vmem>>, vector<128x384xf32>
    %cst_309 = arith.constant dense<0.000000e+00> : vector<8x384xf32>
    %613 = tpu.matmul %611, %612, %cst_309 {dimension_numbers = #tpu.dot_dimension_numbers<[1], [0], [0], [1], [0, 0, 1, 1], [], []>} : vector<8x128xf32>, vector<128x384xf32>, vector<8x384xf32> -> vector<8x384xf32>
    %c0_310 = arith.constant 0 : index
    %c0_311 = arith.constant 0 : index
    %614 = vector.load %arg10[%c0_310, %c0_311] : memref<1x384xf32, #tpu.memory_space<vmem>>, vector<1x384xf32>
    %615 = vector.broadcast %614 : vector<1x384xf32> to vector<8x384xf32>
    %616 = arith.addf %613, %615 : vector<8x384xf32>
    %c0_312 = arith.constant 0 : index
    %c0_313 = arith.constant 0 : index
    %617 = vector.load %arg11[%c0_312, %c0_313] : memref<128x384xf32, #tpu.memory_space<vmem>>, vector<128x384xf32>
    %cst_314 = arith.constant dense<0.000000e+00> : vector<8x384xf32>
    %618 = tpu.matmul %564, %617, %cst_314 {dimension_numbers = #tpu.dot_dimension_numbers<[1], [0], [0], [1], [0, 0, 1, 1], [], []>} : vector<8x128xf32>, vector<128x384xf32>, vector<8x384xf32> -> vector<8x384xf32>
    %c0_315 = arith.constant 0 : index
    %c0_316 = arith.constant 0 : index
    %619 = vector.load %arg12[%c0_315, %c0_316] : memref<1x384xf32, #tpu.memory_space<vmem>>, vector<1x384xf32>
    %620 = vector.broadcast %619 : vector<1x384xf32> to vector<8x384xf32>
    %621 = arith.addf %618, %620 : vector<8x384xf32>
    %622 = vector.extract_strided_slice %616 {offsets = [0, 0], sizes = [8, 128], strides = [1, 1]} : vector<8x384xf32> to vector<8x128xf32>
    %623 = vector.extract_strided_slice %621 {offsets = [0, 0], sizes = [8, 128], strides = [1, 1]} : vector<8x384xf32> to vector<8x128xf32>
    %624 = arith.addf %622, %623 : vector<8x128xf32>
    %625 = arith.negf %624 : vector<8x128xf32>
    %626 = math.exp %625 : vector<8x128xf32>
    %cst_317 = arith.constant 1.000000e+00 : f32
    %627 = vector.broadcast %cst_317 : f32 to vector<8x128xf32>
    %628 = arith.addf %627, %626 : vector<8x128xf32>
    %629 = arith.divf %627, %628 : vector<8x128xf32>
    %630 = vector.extract_strided_slice %616 {offsets = [0, 128], sizes = [8, 128], strides = [1, 1]} : vector<8x384xf32> to vector<8x128xf32>
    %631 = vector.extract_strided_slice %621 {offsets = [0, 128], sizes = [8, 128], strides = [1, 1]} : vector<8x384xf32> to vector<8x128xf32>
    %632 = arith.addf %630, %631 : vector<8x128xf32>
    %633 = arith.negf %632 : vector<8x128xf32>
    %634 = math.exp %633 : vector<8x128xf32>
    %cst_318 = arith.constant 1.000000e+00 : f32
    %635 = vector.broadcast %cst_318 : f32 to vector<8x128xf32>
    %636 = arith.addf %635, %634 : vector<8x128xf32>
    %637 = arith.divf %635, %636 : vector<8x128xf32>
    %638 = vector.extract_strided_slice %616 {offsets = [0, 256], sizes = [8, 128], strides = [1, 1]} : vector<8x384xf32> to vector<8x128xf32>
    %639 = vector.extract_strided_slice %621 {offsets = [0, 256], sizes = [8, 128], strides = [1, 1]} : vector<8x384xf32> to vector<8x128xf32>
    %640 = arith.mulf %629, %639 : vector<8x128xf32>
    %641 = arith.addf %638, %640 : vector<8x128xf32>
    %642 = math.tanh %641 : vector<8x128xf32>
    %cst_319 = arith.constant 1.000000e+00 : f32
    %643 = vector.broadcast %cst_319 : f32 to vector<8x128xf32>
    %644 = arith.subf %643, %637 : vector<8x128xf32>
    %645 = arith.mulf %644, %642 : vector<8x128xf32>
    %646 = arith.mulf %637, %564 : vector<8x128xf32>
    %647 = arith.addf %645, %646 : vector<8x128xf32>
    %c0_320 = arith.constant 0 : index
    %c0_321 = arith.constant 0 : index
    %648 = vector.load %arg13[%c0_320, %c0_321] : memref<128x256xf32, #tpu.memory_space<vmem>>, vector<128x256xf32>
    %cst_322 = arith.constant dense<0.000000e+00> : vector<8x256xf32>
    %649 = tpu.matmul %647, %648, %cst_322 {dimension_numbers = #tpu.dot_dimension_numbers<[1], [0], [0], [1], [0, 0, 1, 1], [], []>} : vector<8x128xf32>, vector<128x256xf32>, vector<8x256xf32> -> vector<8x256xf32>
    %c0_323 = arith.constant 0 : index
    %c0_324 = arith.constant 0 : index
    %650 = vector.load %arg14[%c0_323, %c0_324] : memref<1x256xf32, #tpu.memory_space<vmem>>, vector<1x256xf32>
    %651 = vector.broadcast %650 : vector<1x256xf32> to vector<8x256xf32>
    %652 = arith.addf %649, %651 : vector<8x256xf32>
    %cst_325 = arith.constant dense<0xFF800000> : vector<8xf32>
    %653 = vector.multi_reduction <maximumf>, %652, %cst_325 [1] : vector<8x256xf32> to vector<8xf32>
    %654 = vector.shape_cast %653 : vector<8xf32> to vector<8x1xf32>
    %655 = vector.broadcast %654 : vector<8x1xf32> to vector<8x256xf32>
    %656 = arith.subf %652, %655 : vector<8x256xf32>
    %657 = math.exp %656 : vector<8x256xf32>
    %cst_326 = arith.constant dense<0.000000e+00> : vector<8xf32>
    %658 = vector.multi_reduction <add>, %657, %cst_326 [1] : vector<8x256xf32> to vector<8xf32>
    %659 = vector.shape_cast %658 : vector<8xf32> to vector<8x1xf32>
    %660 = math.log %659 : vector<8x1xf32>
    %661 = arith.addf %654, %660 : vector<8x1xf32>
    %662 = vector.broadcast %661 : vector<8x1xf32> to vector<8x256xf32>
    %663 = arith.subf %652, %662 : vector<8x256xf32>
    %664 = tpu.concatenate %663, %647, %601 in 1 : vector<8x256xf32>, vector<8x128xf32>, vector<8x128xf32> -> vector<8x512xf32>
    %c7_327 = arith.constant 7 : index
    %c0_328 = arith.constant 0 : index
    %c0_329 = arith.constant 0 : index
    %665 = vector.load %arg15[%c7_327, %c0_328, %c0_329] : memref<8x8x512xf32, #tpu.memory_space<vmem>>, vector<1x8x512xf32>
    %666 = vector.shape_cast %665 : vector<1x8x512xf32> to vector<8x512xf32>
    %667 = vector.shape_cast %664 : vector<8x512xf32> to vector<1x8x512xf32>
    tpu.vector_store %arg15[%c7_327, %c0_328, %c0_329], %667 {strides = array<i32>} : memref<8x8x512xf32, #tpu.memory_space<vmem>>, vector<1x8x512xf32>,
    %c0_330 = arith.constant 0 : index
    %c0_331 = arith.constant 0 : index
    %668 = vector.load %arg16[%c0_330, %c0_331] : memref<8x128xf32, #tpu.memory_space<vmem>>, vector<8x128xf32>
    tpu.vector_store %arg16[%c0_330, %c0_331], %647 {strides = array<i32>} : memref<8x128xf32, #tpu.memory_space<vmem>>, vector<8x128xf32>,
    return
  }
  func.func @transform_0(%arg0: i32, %arg1: i32) -> (i32, i32, i32) {
    %c0_i32 = arith.constant 0 : i32
    %c0_i32_0 = arith.constant 0 : i32
    return %arg1, %arg0, %c0_i32 : i32, i32, i32
  }
  func.func @transform_1(%arg0: i32, %arg1: i32) -> (i32, i32) {
    %c0_i32 = arith.constant 0 : i32
    %c0_i32_0 = arith.constant 0 : i32
    return %arg0, %c0_i32 : i32, i32
  }
  func.func @transform_2(%arg0: i32, %arg1: i32) -> (i32, i32) {
    %c0_i32 = arith.constant 0 : i32
    %c0_i32_0 = arith.constant 0 : i32
    %c0_i32_1 = arith.constant 0 : i32
    return %c0_i32, %c0_i32_0 : i32, i32
  }
  func.func @transform_3(%arg0: i32, %arg1: i32) -> (i32, i32) {
    %c0_i32 = arith.constant 0 : i32
    %c0_i32_0 = arith.constant 0 : i32
    %c0_i32_1 = arith.constant 0 : i32
    return %c0_i32, %c0_i32_0 : i32, i32
  }
  func.func @transform_4(%arg0: i32, %arg1: i32) -> (i32, i32) {
    %c0_i32 = arith.constant 0 : i32
    %c0_i32_0 = arith.constant 0 : i32
    %c0_i32_1 = arith.constant 0 : i32
    return %c0_i32, %c0_i32_0 : i32, i32
  }
  func.func @transform_5(%arg0: i32, %arg1: i32) -> (i32, i32) {
    %c0_i32 = arith.constant 0 : i32
    %c0_i32_0 = arith.constant 0 : i32
    %c0_i32_1 = arith.constant 0 : i32
    return %c0_i32, %c0_i32_0 : i32, i32
  }
  func.func @transform_6(%arg0: i32, %arg1: i32) -> (i32, i32) {
    %c0_i32 = arith.constant 0 : i32
    %c0_i32_0 = arith.constant 0 : i32
    %c0_i32_1 = arith.constant 0 : i32
    return %c0_i32, %c0_i32_0 : i32, i32
  }
  func.func @transform_7(%arg0: i32, %arg1: i32) -> (i32, i32) {
    %c0_i32 = arith.constant 0 : i32
    %c0_i32_0 = arith.constant 0 : i32
    %c0_i32_1 = arith.constant 0 : i32
    return %c0_i32, %c0_i32_0 : i32, i32
  }
  func.func @transform_8(%arg0: i32, %arg1: i32) -> (i32, i32) {
    %c0_i32 = arith.constant 0 : i32
    %c0_i32_0 = arith.constant 0 : i32
    %c0_i32_1 = arith.constant 0 : i32
    return %c0_i32, %c0_i32_0 : i32, i32
  }
  func.func @transform_9(%arg0: i32, %arg1: i32) -> (i32, i32) {
    %c0_i32 = arith.constant 0 : i32
    %c0_i32_0 = arith.constant 0 : i32
    %c0_i32_1 = arith.constant 0 : i32
    return %c0_i32, %c0_i32_0 : i32, i32
  }
  func.func @transform_10(%arg0: i32, %arg1: i32) -> (i32, i32) {
    %c0_i32 = arith.constant 0 : i32
    %c0_i32_0 = arith.constant 0 : i32
    %c0_i32_1 = arith.constant 0 : i32
    return %c0_i32, %c0_i32_0 : i32, i32
  }
  func.func @transform_11(%arg0: i32, %arg1: i32) -> (i32, i32) {
    %c0_i32 = arith.constant 0 : i32
    %c0_i32_0 = arith.constant 0 : i32
    %c0_i32_1 = arith.constant 0 : i32
    return %c0_i32, %c0_i32_0 : i32, i32
  }
  func.func @transform_12(%arg0: i32, %arg1: i32) -> (i32, i32) {
    %c0_i32 = arith.constant 0 : i32
    %c0_i32_0 = arith.constant 0 : i32
    %c0_i32_1 = arith.constant 0 : i32
    return %c0_i32, %c0_i32_0 : i32, i32
  }
  func.func @transform_13(%arg0: i32, %arg1: i32) -> (i32, i32, i32) {
    %c0_i32 = arith.constant 0 : i32
    %c0_i32_0 = arith.constant 0 : i32
    return %arg1, %arg0, %c0_i32 : i32, i32, i32
  }
}

</mosaic_0001>

<bundles_post_ra>
// kernel: tpu_custom_call.1
= control target key start
LH: loop header
LB: loop body
LE: loop exit
PB: predicated region body
PF: predicated region fallthrough
CT: control target
= control target key end

     0   :  { %s13829_s0 = inlined_call_operand.hbm [shape: f32[16,16,128], index: 0, kind: input, shape index: {}]   ;;  %s13830_s1 = inlined_call_operand.hbm [shape: f32[16,128], index: 1, kind: input, shape index: {}]   ;;  %s13831_s2 = inlined_call_operand.hbm [shape: f32[128,128], index: 2, kind: input, shape index: {}]   ;;  %s13832_s3 = inlined_call_operand.hbm [shape: f32[256,128], index: 3, kind: input, shape index: {}]   ;;  %s13833_s4 = inlined_call_operand.vmem [shape: f32[1,128], index: 4, kind: input, shape index: {}]   ;;  %s13834_s5 = inlined_call_operand.hbm [shape: f32[256,128], index: 5, kind: input, shape index: {}]   ;;  %s13835_s6 = inlined_call_operand.vmem [shape: f32[1,128], index: 6, kind: input, shape index: {}]   ;;  %s13836_s7 = inlined_call_operand.hbm [shape: f32[128,384], index: 7, kind: input, shape index: {}]   ;;  %s13837_s8 = inlined_call_operand.vmem [shape: f32[1,384], index: 8, kind: input, shape index: {}]   ;;  %s13838_s9 = inlined_call_operand.hbm [shape: f32[128,384], index: 9, kind: input, shape index: {}]   ;;  %s13839_s10 = inlined_call_operand.vmem [shape: f32[1,384], index: 10, kind: input, shape index: {}]   ;;  %s13840_s11 = inlined_call_operand.hbm [shape: f32[128,256], index: 11, kind: input, shape index: {}]   ;;  %s13841_s12 = inlined_call_operand.vmem [shape: f32[1,256], index: 12, kind: input, shape index: {}]   ;;  %s13842_s13 = inlined_call_operand.hbm [shape: f32[16,16,512], index: 13, kind: output, shape index: {}]  }
   0x1   :  { %13864 = sst [smem:[#allocation31_spill]] %s13829_s0 }
   0x2   :  { %13865 = sst [smem:[#allocation32_spill]] %s13830_s1 }
   0x3   :  { %13866 = sst [smem:[#allocation33_spill]] %s13831_s2 }
   0x4   :  { %13867 = sst [smem:[#allocation34_spill]] %s13832_s3 }
   0x5   :  { %13868 = sst [smem:[#allocation35_spill]] %s13833_s4 }
   0x6   :  { %13869 = sst [smem:[#allocation36_spill]] %s13834_s5 }
   0x7   :  { %13870 = sst [smem:[#allocation37_spill]] %s13835_s6 }
   0x8   :  { %13871 = sst [smem:[#allocation38_spill]] %s13836_s7 }
   0x9   :  { %13872 = sst [smem:[#allocation39_spill]] %s13837_s8 }
   0xa   :  { %13873 = sst [smem:[#allocation40_spill]] %s13838_s9 }
   0xb   :  { %13874 = sst [smem:[#allocation41_spill]] %s13839_s10 }
   0xc   :  { %13875 = sst [smem:[#allocation42_spill]] %s13840_s11 }
   0xd   :  { %13876 = sst [smem:[#allocation43_spill]] %s13841_s12 }
   0xe   :  { %13877 = sst [smem:[#allocation44_spill]] %s13842_s13 }
   0xf   :  { %18 = vsyncpa [#allocation4], 0 }
  0x10   :  { %20 = vsyncpa [#allocation4 + $0x1], 0 }
  0x11   :  { %21 = vsyncpa [#allocation7], 0 }
  0x12   :  { %23 = vsyncpa [#allocation7 + $0x1], 0 }
  0x13   :  { %24 = vsyncpa [#allocation10], 0 }
  0x14   :  { %25 = vsyncpa [#allocation13], 0 }
  0x15   :  { %26 = vsyncpa [#allocation16], 0 }
  0x16   :  { %27 = vsyncpa [#allocation5], 0 }
  0x17   :  { %29 = vsyncpa [#allocation5 + $0x1], 0  ;;  %s12508_s25 = smov 0   ;;  %s12510_s26 = smov 0  }
  0x18   :  { %s12512_s27 = smov 0   ;;  %s12514_s28 = smov 0  }
  0x19   :  { %s12516_s29 = smov 0   ;;  %s12518_s30 = smov 0  }
  0x1a   :  { %s12520_s14 = smov 0   ;;  %s12522_s15 = smov 0  }
  0x1b   :  { %s12524_s16 = smov 0   ;;  %s12526_s17 = smov 0  }
  0x1c   :  { %s12528_s18 = smov 0  }
  0x1d LB: > { %13878 = sst [smem:[#allocation25_spill]] %s12375_s25  ;;  %s12564_s19 = sadd.s32 4294967295, %s12415_s18   ;;  %s12415_s18 = sphi %s12528_s18, %s35_s18   ;;  %s12411_s17 = sphi %s12526_s17, %s13947_s17   ;;  %s12407_s16 = sphi %s12524_s16, %s13946_s16   ;;  %s12403_s15 = sphi %s12522_s15, %s13945_s15   ;;  %s12399_s14 = sphi %s12520_s14, %s13944_s14   ;;  %s12395_s30 = sphi %s12518_s30, %s13943_s30   ;;  %s12391_s29 = sphi %s12516_s29, %s13942_s29   ;;  %s12387_s28 = sphi %s12514_s28, %s13941_s28   ;;  %s12383_s27 = sphi %s12512_s27, %s13940_s27   ;;  %s12379_s26 = sphi %s12510_s26, %s13939_s26   ;;  %s12375_s25 = sphi %s12508_s25, %s13936_s25  }
  0x1e   : > { %13879 = sst [smem:[#allocation26_spill]] %s12379_s26  ;;  %p7885_p0 = scmp.ge.s32.totalorder %s12415_s18, 1 }
  0x1f   : > { %13880 = sst [smem:[#allocation27_spill]] %s12399_s14  ;;  %p13852_p1 = scmp.eq.s32.totalorder %s12564_s19, 0 }
  0x20   : > { %13881 = sst [smem:[#allocation28_spill]] %s12403_s15  ;;  %p365_p2 = scmp.lt.s32.totalorder %s12415_s18, 5 }
  0x21   : > { %s12417_s21 = smov [#allocation8]   ;;  %s12418_s24 = smov [#allocation9]  }
  0x22   : > { %p12569_p3 = pnand %p7885_p0, %p365_p2  ;;  %s377_s22 = sshll.u32 %s12417_s21, 4  ;;  %s12573_s22 = int_to_ptr.vmem [resolvable:$true] %s377_s22 }
  0x23   : > { %s390_s13 = sshll.u32 %s12418_s24, 4  ;;  %s12419_s15 = smov [#allocation12]   ;;  %s12583_s13 = int_to_ptr.vmem [resolvable:$true] %s390_s13 }
  0x24   : > { %s13882_s20 = scalar_select %p12569_p3, 1, 0 }
  0x25   : > { %p11728_p4 = pneg %p12569_p3  ;;  %s12585_s12 = sshll.u32 %s12419_s15, 4  ;;  %s423_s12 = int_to_ptr.vmem [resolvable:$true] %s12585_s12 }
  0x26   : > { %13883 = sst [smem:[#allocation29_spill]] %s13882_s20  ;;  %s13885_s2 = sld [smem:[#allocation33_spill]] }
  0x27   : > { %p12579_p5 = pnand %p11728_p4, %p13852_p1 }
  0x29   : > { %p12595_p7 = pneg %p12579_p5 }
  0x2c   : > { %s12045_s21 = scalar_lea.hbm %s13885_s2, 2048 }
  0x2d   : > { %p12046_p6 = scmp.ne.s32.totalorder %s13885_s2, %s12045_s21  ;;  %p12052_p10 = scmp.lt.u32.totalorder %s12045_s21, %s13885_s2 }
  0x2f   : > { %p12048_p8 = pnand %p12595_p7, %p12046_p6 }
  0x31   : > { %p12049_p9 = pneg %p12048_p8 }
  0x33   : > { %p12054_p11 = pnand %p12052_p10, %p12049_p9 }
  0x35   : > { %12057 = shalt.err (!%p12054_p11)
}
  0x36   : > { %s12058_s4 = scalar_lea.vmem %s12573_s22, 2048  ;;  %p12066_p2 = scmp.lt.s32.totalorder %s12573_s22, %s12573_s22 }
  0x37   : > { %p12059_p12 = scmp.ne.s32.totalorder %s12573_s22, %s12058_s4  ;;  %p12067_p4 = scmp.lt.s32.totalorder %s12058_s4, %s12058_s4 }
  0x39   : > { %p12061_p13 = pnand %p12059_p12, %p12595_p7  ;;  %p12068_p6 = por %p12067_p4, %p12066_p2 }
  0x3b   : > { %p12062_p0 = pneg %p12061_p13 }
  0x3d   : > { %p12069_p8 = pnand %p12068_p6, %p12062_p0 }
  0x3f   : > { %12072 = shalt.err (!%p12069_p8)
}
  0x40   : > { %s13854_s6 = smov 128   ;;  %s13856_s8 = smov 8  }
  0x41   : > { %11731 = dma.hbm_to_vmem [thread:$0]  (!%p12579_p5), %s13885_s2, 2048, %s12573_s22, [#allocation7], %s13854_s6, %s13854_s6, %s13856_s8  }
  0x42   : > { %s13887_s3 = sld [smem:[#allocation34_spill]] }
  0x48   : > { %s12073_s4 = scalar_lea.hbm %s13887_s3, 4096 }
  0x49   : > { %p12074_p9 = scmp.ne.s32.totalorder %s13887_s3, %s12073_s4  ;;  %p12080_p12 = scmp.lt.u32.totalorder %s12073_s4, %s13887_s3 }
  0x4b   : > { %p12076_p10 = pnand %p12074_p9, %p12595_p7 }
  0x4d   : > { %p12077_p11 = pneg %p12076_p10 }
  0x4f   : > { %p12082_p13 = pnand %p12080_p12, %p12077_p11 }
  0x51   : > { %12085 = shalt.err (!%p12082_p13)
}
  0x52   : > { %s12086_s22 = scalar_lea.vmem %s12583_s13, 4096  ;;  %p12094_p6 = scmp.lt.s32.totalorder %s12583_s13, %s12583_s13 }
  0x53   : > { %p12087_p0 = scmp.ne.s32.totalorder %s12583_s13, %s12086_s22  ;;  %p12095_p8 = scmp.lt.s32.totalorder %s12086_s22, %s12086_s22 }
  0x55   : > { %p12089_p2 = pnand %p12087_p0, %p12595_p7  ;;  %p12096_p9 = por %p12095_p8, %p12094_p6 }
  0x57   : > { %p12090_p4 = pneg %p12089_p2 }
  0x59   : > { %p12097_p10 = pnand %p12096_p9, %p12090_p4 }
  0x5b   : > { %12100 = shalt.err (!%p12097_p10)
}
  0x5c   : > { %11734 = dma.hbm_to_vmem [thread:$0]  (!%p12579_p5), %s13887_s3, 4096, %s12583_s13, [#allocation10], %s13854_s6, %s13854_s6, %s13856_s8  }
  0x5d   : > { %s13888_s7 = sld [smem:[#allocation38_spill]] }
  0x63   : > { %s12101_s10 = scalar_lea.hbm %s13888_s7, 6144 }
  0x64   : > { %p12102_p11 = scmp.ne.s32.totalorder %s13888_s7, %s12101_s10  ;;  %p12108_p0 = scmp.lt.u32.totalorder %s12101_s10, %s13888_s7 }
  0x66   : > { %p12104_p12 = pnand %p12102_p11, %p12595_p7 }
  0x68   : > { %p12105_p13 = pneg %p12104_p12 }
  0x6a   : > { %p12110_p2 = pnand %p12108_p0, %p12105_p13 }
  0x6c   : > { %12113 = shalt.err (!%p12110_p2)
}
  0x6d   : > { %s12114_s22 = scalar_lea.vmem %s423_s12, 6144  ;;  %p12122_p9 = scmp.lt.s32.totalorder %s423_s12, %s423_s12 }
  0x6e   : > { %p12115_p4 = scmp.ne.s32.totalorder %s423_s12, %s12114_s22  ;;  %p12123_p10 = scmp.lt.s32.totalorder %s12114_s22, %s12114_s22 }
  0x70   : > { %p12117_p6 = pnand %p12115_p4, %p12595_p7  ;;  %p12124_p1 = por %p12123_p10, %p12122_p9 }
  0x72   : > { %p12118_p8 = pneg %p12117_p6 }
  0x74   : > { %p12125_p3 = pnand %p12124_p1, %p12118_p8 }
  0x76   : > { %12128 = shalt.err (!%p12125_p3)
}
  0x77   : > { %s12422_s13 = smov 384   ;;  %s12423_s1 = smov 24  }
  0x78   : > { %11740 = dma.hbm_to_vmem [thread:$0]  (!%p12579_p5), %s13888_s7, 6144, %s423_s12, [#allocation13], %s12422_s13, %s12422_s13, %s12423_s1  }
  0x79   : > { %s12424_s20 = smov [#allocation11]   ;;  %s12425_s21 = smov [#allocation14]  }
  0x7a   : > { %s406_s10 = sshll.u32 %s12424_s20, 4  ;;  %s438_s24 = sshll.u32 %s12425_s21, 4  ;;  %s407_s10 = int_to_ptr.vmem [resolvable:$true] %s406_s10  ;;  %s439_s24 = int_to_ptr.vmem [resolvable:$true] %s438_s24 }
  0x7b   : > { %s13889_s5 = sld [smem:[#allocation36_spill]] }
  0x81   : > { %s12129_s22 = scalar_lea.hbm %s13889_s5, 4096 }
  0x82   : > { %p12130_p1 = scmp.ne.s32.totalorder %s13889_s5, %s12129_s22  ;;  %p12136_p12 = scmp.lt.u32.totalorder %s12129_s22, %s13889_s5 }
  0x84   : > { %p12132_p3 = pnand %p12130_p1, %p12595_p7 }
  0x86   : > { %p12133_p11 = pneg %p12132_p3 }
  0x88   : > { %p12138_p13 = pnand %p12136_p12, %p12133_p11 }
  0x8a   : > { %12141 = shalt.err (!%p12138_p13)
}
  0x8b   : > { %s12142_s12 = scalar_lea.vmem %s407_s10, 4096  ;;  %p12150_p6 = scmp.lt.s32.totalorder %s407_s10, %s407_s10 }
  0x8c   : > { %p12143_p0 = scmp.ne.s32.totalorder %s407_s10, %s12142_s12  ;;  %p12151_p8 = scmp.lt.s32.totalorder %s12142_s12, %s12142_s12 }
  0x8e   : > { %p12145_p2 = pnand %p12143_p0, %p12595_p7  ;;  %p12152_p9 = por %p12151_p8, %p12150_p6 }
  0x90   : > { %p12146_p4 = pneg %p12145_p2 }
  0x92   : > { %p12153_p10 = pnand %p12152_p9, %p12146_p4 }
  0x94   : > { %12156 = shalt.err (!%p12153_p10)
}
  0x95   : > { %s13890_s6 = smov 8   ;;  %s13891_s8 = smov 128  }
  0x96   : > { %11737 = dma.hbm_to_vmem [thread:$0]  (!%p12579_p5), %s13889_s5, 4096, %s407_s10, [#allocation10], %s13891_s8, %s13891_s8, %s13890_s6  }
  0x97   : > { %s13892_s9 = sld [smem:[#allocation40_spill]] }
  0x9d   : > { %s12157_s20 = scalar_lea.hbm %s13892_s9, 6144 }
  0x9e   : > { %p12158_p1 = scmp.ne.s32.totalorder %s13892_s9, %s12157_s20  ;;  %p12164_p12 = scmp.lt.u32.totalorder %s12157_s20, %s13892_s9 }
  0xa0   : > { %p12160_p3 = pnand %p12158_p1, %p12595_p7 }
  0xa2   : > { %p12161_p11 = pneg %p12160_p3 }
  0xa4   : > { %p12166_p13 = pnand %p12164_p12, %p12161_p11 }
  0xa6   : > { %12169 = shalt.err (!%p12166_p13)
}
  0xa7   : > { %s12170_s12 = scalar_lea.vmem %s439_s24, 6144  ;;  %p12178_p6 = scmp.lt.s32.totalorder %s439_s24, %s439_s24 }
  0xa8   : > { %p12171_p0 = scmp.ne.s32.totalorder %s439_s24, %s12170_s12  ;;  %p12179_p8 = scmp.lt.s32.totalorder %s12170_s12, %s12170_s12 }
  0xaa   : > { %p12173_p2 = pnand %p12171_p0, %p12595_p7  ;;  %p12180_p9 = por %p12179_p8, %p12178_p6 }
  0xac   : > { %p12174_p4 = pneg %p12173_p2 }
  0xae   : > { %p12181_p10 = pnand %p12180_p9, %p12174_p4 }
  0xb0   : > { %12184 = shalt.err (!%p12181_p10)
}
  0xb1   : > { %11743 = dma.hbm_to_vmem [thread:$0]  (!%p12579_p5), %s13892_s9, 6144, %s439_s24, [#allocation13], %s12422_s13, %s12422_s13, %s12423_s1  }
  0xb2   : > { %s12426_s3 = smov [#allocation15]   ;;  %s13893_s11 = sld [smem:[#allocation42_spill]] }
  0xb3   : > { %s454_s25 = sshll.u32 %s12426_s3, 4  ;;  %s455_s25 = int_to_ptr.vmem [resolvable:$true] %s454_s25 }
  0xb8   : > { %s12185_s21 = scalar_lea.hbm %s13893_s11, 4096 }
  0xb9   : > { %p12186_p1 = scmp.ne.s32.totalorder %s13893_s11, %s12185_s21  ;;  %p12192_p12 = scmp.lt.u32.totalorder %s12185_s21, %s13893_s11 }
  0xbb   : > { %p12188_p3 = pnand %p12186_p1, %p12595_p7 }
  0xbd   : > { %p12189_p11 = pneg %p12188_p3 }
  0xbf   : > { %p12194_p13 = pnand %p12192_p12, %p12189_p11 }
  0xc1   : > { %12197 = shalt.err (!%p12194_p13)
}
  0xc2   : > { %s12198_s13 = scalar_lea.vmem %s455_s25, 4096  ;;  %p12206_p6 = scmp.lt.s32.totalorder %s455_s25, %s455_s25 }
  0xc3   : > { %p12199_p0 = scmp.ne.s32.totalorder %s455_s25, %s12198_s13  ;;  %p12207_p8 = scmp.lt.s32.totalorder %s12198_s13, %s12198_s13 }
  0xc5   : > { %p12201_p2 = pnand %p12199_p0, %p12595_p7  ;;  %p12208_p9 = por %p12207_p8, %p12206_p6 }
  0xc7   : > { %p12202_p4 = pneg %p12201_p2 }
  0xc9   : > { %p12209_p10 = pnand %p12208_p9, %p12202_p4 }
  0xcb   : > { %12212 = shalt.err (!%p12209_p10)
}
  0xcc   : > { %s13858_s1 = smov 256   ;;  %s12428_s14 = smov 16  }
  0xcd   : > { %11746 = dma.hbm_to_vmem [thread:$0]  (!%p12579_p5), %s13893_s11, 4096, %s455_s25, [#allocation16], %s13858_s1, %s13858_s1, %s12428_s14  }
  0xce   : > { %s7884_s2 = sadd.s32 4294967294, %s12415_s18   ;;  %s44_s3 = sadd.s32 1, %s12407_s16 }
  0xcf   : > { %p45_p7 = scmp.ge.s32.totalorder %s44_s3, 2  ;;  %s47_s26 = sadd.s32 1, %s12411_s17 }
  0xd0   : > { %s56_s20 = sadd.s32 1, %s12395_s30  ;;  %p63_p1 = scmp.ne.s32.totalorder %s12395_s30, %s12391_s29 }
  0xd1   : > { %s13949_s3 = smov (%p45_p7, %s44_s3), 0  ;;  %s13951_s26 = smov (!%p45_p7, %s47_s26), %s12411_s17 }
  0xd2   : > { %s51_s23 = ssub.s32 %s12407_s16, %s13949_s3  ;;  %p13861_p3 = scmp.eq.s32.totalorder %s12415_s18, 0 }
  0xd3   : > { %p49_p11 = scmp.ge.s32.totalorder %s13951_s26, 2  ;;  %p69_p5 = scmp.ne.s32.totalorder %s12391_s29, %s12387_s28 }
  0xd4   : > { %p12745_p12 = por %p13861_p3, %p63_p1  ;;  %p352_p13 = scmp.eq.s32.totalorder %s12564_s19, 3 }
  0xd5   : > { %s13953_s26 = smov (%p49_p11, %s13951_s26), 0  ;;  %p13896_p0 = scmp.eq.s32.totalorder %s12564_s19, 0 }
  0xd6   : > { %13895 = sst [smem:[#allocation30_spill]] %s13953_s26  ;;  %p12758_p4 = por %p352_p13, %p63_p1 }
  0xd7   : > { %p12754_p2 = por %p13896_p0, %p69_p5  ;;  %s12764_s4 = ssub.s32 %s12411_s17, %s13953_s26 }
  0xd8   : > { %s13898_s15 = scalar_select %p12758_p4, 1, 0 }
  0xd9   : > { %p358_p6 = scmp.eq.s32.totalorder %s7884_s2, 3  ;;  %s53_s22 = sor.u32 %s12764_s4, %s51_s23 }
  0xda   : > { %p13860_p8 = scmp.lt.s32.totalorder %s12415_s18, 4  ;;  %p54_p9 = scmp.eq.s32.totalorder %s53_s22, 0 }
  0xdb   : > { %p12768_p10 = por %p358_p6, %p69_p5  ;;  %s471_s13 = sand.u32 1, %s12395_s30  }
  0xdc   : > { %s7984_s14 = sshll.u32 %s12407_s16, 4  ;;  %s7893_s10 = sshll.u32 %s471_s13, 6 }
  0xdd   : > { %s13899_s12 = scalar_select %p12768_p10, 1, 0 }
  0xde   : > { %s12775_s24 = scalar_select %p54_p9, %s12395_s30, %s56_s20  }
  0xdf   : > { %s481_s1 = sadd.s32 %s12411_s17, %s7984_s14  ;;  %s475_s7 = scalar_lea.vmem [#allocation3], %s7893_s10 }
  0xe0   : > { %s7896_s5 = sshll.u32 %s481_s1, 7  ;;  %s484_s9 = sshll.u32 %s475_s7, 4  ;;  %s12783_s9 = int_to_ptr.vmem [resolvable:$true] %s484_s9 }
  0xe1   : > { %s13900_s0 = sld [smem:[#allocation31_spill]]  ;;  %p12789_p7 = pnand %p13860_p8, %p12745_p12 }
  0xe2   : > { %s12793_s7 = scalar_lea.sflag [#allocation4], %s471_s13 }
  0xe3   : > { %p12215_p11 = pneg %p12789_p7 }
  0xe7   : > { %s12781_s2 = scalar_lea.hbm %s13900_s0, %s7896_s5  ;;  %s12218_s26 = scalar_lea.hbm %s13900_s0, 4096 }
  0xe8   : > { %s12213_s1 = scalar_lea.hbm %s12781_s2, 1024  ;;  %p12219_p12 = scmp.lt.u32.totalorder %s12781_s2, %s13900_s0 }
  0xe9   : > { %p12214_p1 = scmp.ne.s32.totalorder %s12781_s2, %s12213_s1  ;;  %p12220_p0 = scmp.lt.u32.totalorder %s12218_s26, %s12213_s1 }
  0xea   : > { %p12222_p9 = scmp.lt.u32.totalorder %s12213_s1, %s12781_s2 }
  0xeb   : > { %p12216_p5 = pnand %p12215_p11, %p12214_p1  ;;  %p12221_p6 = por %p12220_p0, %p12219_p12 }
  0xed   : > { %p12217_p13 = pneg %p12216_p5  ;;  %p12223_p8 = por %p12222_p9, %p12221_p6 }
  0xef   : > { %p12224_p3 = pnand %p12223_p8, %p12217_p13 }
  0xf1   : > { %12227 = shalt.err (!%p12224_p3)
}
  0xf2   : > { %s12228_s22 = scalar_lea.vmem %s12783_s9, 1024  ;;  %s12429_s13 = smov [#allocation3]  }
  0xf3   : > { %p12229_p1 = scmp.ne.s32.totalorder %s12783_s9, %s12228_s22  ;;  %s12233_s14 = sshll.u32 %s12429_s13, 4  ;;  %s12234_s14 = int_to_ptr.vmem [resolvable:$false] %s12233_s14 }
  0xf4   : > { %s12235_s10 = scalar_lea.vmem %s12234_s14, 2048  ;;  %p12236_p4 = scmp.lt.s32.totalorder %s12783_s9, %s12234_s14 }
  0xf5   : > { %p12231_p5 = pnand %p12229_p1, %p12215_p11  ;;  %p12237_p12 = scmp.lt.s32.totalorder %s12235_s10, %s12228_s22 }
  0xf7   : > { %p12232_p10 = pneg %p12231_p5  ;;  %p12238_p0 = por %p12237_p12, %p12236_p4 }
  0xf9   : > { %p12239_p6 = pnand %p12238_p0, %p12232_p10 }
  0xfb   : > { %12242 = shalt.err (!%p12239_p6)
}
  0xfc   : > { %s13902_s1 = smov 256   ;;  %s13903_s5 = sld [smem:[#allocation26_spill]] }
  0xfd   : > { %s13904_s11 = sld [smem:[#allocation25_spill]]  ;;  %p80_p3 = scmp.eq.s32.totalorder %s12764_s4, 0 }
  0xfe   : > { %11750 = dma.hbm_to_vmem [thread:$0]  (!%p12789_p7), %s12781_s2, 1024, %s12783_s9, %s12793_s7, %s13902_s1, %s13891_s8, %s13890_s6  }
  0xff   : > { %s82_s20 = sadd.s32 1, %s12383_s27  ;;  %p13905_p10 = scmp.eq.s32.totalorder %s12415_s18, 0 }
 0x100   : > { %s12831_s26 = scalar_select %p80_p3, %s12383_s27, %s82_s20  }
 0x101   : > { %p13906_p13 = scmp.eq.s32.totalorder %s12564_s19, 0  ;;  %s494_s25 = sand.u32 1, %s12415_s18  }
 0x102   : > { %p89_p4 = scmp.ne.s32.totalorder %s12383_s27, %s13903_s5  ;;  %s496_s22 = sand.u32 1, %s12383_s27  }
 0x103   : > { %p95_p8 = scmp.ne.s32.totalorder %s13903_s5, %s13904_s11  ;;  %s7897_s13 = sshll.u32 %s496_s22, 3 }
 0x104   : > { %p91_p11 = por %p89_p4, %p13905_p10  ;;  %s7898_s14 = sshll.u32 %s12411_s17, 7 }
 0x105   : > { %p12837_p9 = por %p95_p8, %p13906_p13  ;;  %s13908_s6 = sld [smem:[#allocation32_spill]] }
 0x106   : > { %s498_s4 = scalar_lea.vmem [#allocation6], %s7897_s13  ;;  %p13909_p7 = scmp.lt.s32.totalorder %s12415_s18, 4 }
 0x107   : > { %s13907_s23 = scalar_select %p12837_p9, 1, 0 }
 0x108   : > { %s505_s2 = sshll.u32 %s498_s4, 4  ;;  %p12853_p1 = pnand %p13909_p7, %p91_p11  ;;  %s12849_s2 = int_to_ptr.vmem [resolvable:$true] %s505_s2 }
 0x109   : > { %s495_s1 = scalar_lea.sflag [#allocation7], %s494_s25 }
 0x10a   : > { %p12245_p12 = pneg %p12853_p1 }
 0x10b   : > { %s12847_s8 = scalar_lea.hbm %s13908_s6, %s7898_s14  ;;  %s12248_s22 = scalar_lea.hbm %s13908_s6, 256 }
 0x10c   : > { %s12243_s5 = scalar_lea.hbm %s12847_s8, 128  ;;  %p12249_p3 = scmp.lt.u32.totalorder %s12847_s8, %s13908_s6 }
 0x10d   : > { %p12244_p5 = scmp.ne.s32.totalorder %s12847_s8, %s12243_s5  ;;  %p12250_p4 = scmp.lt.u32.totalorder %s12248_s22, %s12243_s5 }
 0x10e   : > { %p12252_p10 = scmp.lt.u32.totalorder %s12243_s5, %s12847_s8 }
 0x10f   : > { %p12246_p0 = pnand %p12245_p12, %p12244_p5  ;;  %p12251_p8 = por %p12250_p4, %p12249_p3 }
 0x111   : > { %p12247_p6 = pneg %p12246_p0  ;;  %p12253_p11 = por %p12252_p10, %p12251_p8 }
 0x113   : > { %p12254_p13 = pnand %p12253_p11, %p12247_p6 }
 0x115   : > { %12257 = shalt.err (!%p12254_p13)
}
 0x116   : > { %s12258_s25 = scalar_lea.vmem %s12849_s2, 128  ;;  %s12430_s10 = smov [#allocation6]  }
 0x117   : > { %p12259_p7 = scmp.ne.s32.totalorder %s12849_s2, %s12258_s25  ;;  %s12263_s9 = sshll.u32 %s12430_s10, 4  ;;  %s12264_s9 = int_to_ptr.vmem [resolvable:$false] %s12263_s9 }
 0x118   : > { %s12265_s4 = scalar_lea.vmem %s12264_s9, 256  ;;  %p12266_p9 = scmp.lt.s32.totalorder %s12849_s2, %s12264_s9 }
 0x119   : > { %p12261_p5 = pnand %p12259_p7, %p12245_p12  ;;  %p12267_p3 = scmp.lt.s32.totalorder %s12265_s4, %s12258_s25 }
 0x11b   : > { %p12262_p0 = pneg %p12261_p5  ;;  %p12268_p4 = por %p12267_p3, %p12266_p9 }
 0x11d   : > { %p12269_p8 = pnand %p12268_p4, %p12262_p0 }
 0x11f   : > { %12272 = shalt.err (!%p12269_p8)
}
 0x120   : > { %11753 = dma.hbm_to_vmem [thread:$0]  (!%p12853_p1), %s12847_s8, 128, %s12849_s2, %s495_s1  }
 0x121   : > { %s13911_s5 = sld [smem:[#allocation29_spill]] }
 0x127   : > { %p13912_p6 = scmp.ne.s32.totalorder %s13911_s5, 0 }
 0x128   : > { %s12885_s11 = sand.u32 (!%p13912_p6), 1, %s12391_s29  }
 0x129   : > { %514 = sbr.rel (%p13912_p6) target bundleno = 10952 (0x2ac8), region = 72  ;;  %s7900_s20 = sshll.u32 (!%p13912_p6), %s12885_s11, 6 }
 0x12a   : > { %s517_s22 = scalar_lea.sflag (!%p13912_p6), [#allocation4], %s12885_s11  ;;  %s12889_s13 = scalar_lea.vmem (!%p13912_p6), [#allocation3], %s7900_s20 }
 0x130   : > { %12346 = dma.done.wait (%p12754_p2), %s517_s22, 1024  }
 0x131   : > { %12348 = vsyncadd (%p12754_p2), %s517_s22, 4294966272  ;;  %s13913_s8 = sld [smem:[#allocation26_spill]]  ;;  %s525_s2 = sand.u32 1, %s12564_s19  }
 0x132   : > { %s526_s14 = scalar_lea.sflag [#allocation7], %s525_s2  ;;  %p13914_p9 = scmp.ne.s32.totalorder %s13907_s23, 0 }
 0x137   : > { %s527_s7 = sand.u32 1, %s13913_s8  }
 0x138   : > { %s7901_s1 = sshll.u32 %s527_s7, 3 }
 0x139   : > { %s529_s25 = scalar_lea.vmem [#allocation6], %s7901_s1 }
 0x13a   : > { %12350 = dma.done.wait (%p13914_p9), %s526_s14, 128  }
 0x13b   : > { %12352 = vsyncadd (%p13914_p9), %s526_s14, 4294967168  ;;  %p13915_p1 = scmp.eq.s32.totalorder %s12564_s19, 0 }
 0x13d   : > { %12354 = dma.done.wait (%p13915_p1), [#allocation7], 2048   ;;  %p13916_p12 = pmov %p13915_p1 }
 0x13e   : > { %p13917_p2 = pmov %p13915_p1 }
 0x13f   : > { %12356 = vsyncadd (%p13916_p12), [#allocation7], 4294965248 }
 0x140   : > { %12358 = dma.done.wait (%p13917_p2), [#allocation10], 8192   ;;  %p13918_p10 = pmov %p13915_p1 }
 0x141   : > { %p13919_p11 = pmov %p13915_p1 }
 0x142   : > { %12360 = vsyncadd (%p13918_p10), [#allocation10], 4294959104 }
 0x143   : > { %12362 = dma.done.wait (%p13919_p11), [#allocation13], 12288   ;;  %p13920_p13 = pmov %p13915_p1 }
 0x144   : > { %p13921_p7 = pmov %p13915_p1 }
 0x145   : > { %12364 = vsyncadd (%p13920_p13), [#allocation13], 4294955008 }
 0x146   : > { %12366 = dma.done.wait (%p13921_p7), [#allocation16], 4096   ;;  %p13922_p5 = pmov %p13915_p1 }
 0x147   : > { %s7908_s21 = sshll.u32 %s12885_s11, 8  ;;  %s13923_s10 = sld [smem:[#allocation27_spill]] }
 0x148   : > { %12368 = vsyncadd (%p13922_p5), [#allocation16], 4294963200  ;;  %s12918_s23 = scalar_lea.vmem [#allocation17], %s7908_s21 }
 0x14d   : > { %p7909_p0 = scmp.ne.s32.totalorder %s13923_s10, 0 }
 0x14e   : > { %v607_v0 = vld [vmem:[%s529_s25] sm:$0xff] (!%p7909_p0) }
 0x14f   : > { %606 = sbr.rel (%p7909_p0) target bundleno = 342 (0x156), region = 108  ;;  %608 = vst [vmem:[#allocation2] sm:$0xff] (!%p7909_p0), %v607_v0 }
 0x156 PF: > { %v627_v1 = vld [vmem:[#allocation9 + $0x80] sm:$0xff]  ;;  %v628_v2 = vld [vmem:[#allocation9 + $0x88] sm:$0xff]  ;;  %v629_v6 = vld [vmem:[#allocation9 + $0x90] sm:$0xff]  ;;  %s13924_s4 = sld [smem:[#allocation35_spill]]  ;;  %v12431_v59 = vmov 0.0|0.0   ;;  %vm12432_vm0 = vmmov 0  }
 0x157   : > { %v611_v3 = vld [vmem:[#allocation9] sm:$0xff]  ;;  %v12921_v4 = vpack.c.bf16 %v628_v2, %v627_v1  ;;  %v612_v5 = vld [vmem:[#allocation9 + $0x8] sm:$0xff]  ;;  %v630_v7 = vld [vmem:[#allocation9 + $0x98] sm:$0xff]  ;;  %9826 = vmatprep.subr.bf16.mxu1 %v12431_v59  ;;  %s13925_s22 = sld [smem:[#allocation37_spill]]  ;;  %s13926_s7 = sld [smem:[#allocation41_spill]] }
 0x158   : > { %v12923_v8 = vpack.c.bf16 %v612_v5, %v611_v3  ;;  %v12925_v9 = vpack.c.bf16 %v630_v7, %v629_v6  ;;  %v613_v10 = vld [vmem:[#allocation9 + $0x10] sm:$0xff]  ;;  %v614_v11 = vld [vmem:[#allocation9 + $0x18] sm:$0xff]  ;;  %v631_v12 = vld [vmem:[#allocation9 + $0xa0] sm:$0xff]  ;;  %s13927_s25 = sld [smem:[#allocation39_spill]]  ;;  %s13929_s10 = sld [smem:[#allocation43_spill]] }
 0x159   : > { %9795 = vmatprep.subr.bf16.mxu0 %v12921_v4  ;;  %v632_v13 = vld [vmem:[#allocation9 + $0xa8] sm:$0xff]  ;;  %v12929_v14 = vpack.c.bf16 %v614_v11, %v613_v10  ;;  %v615_v16 = vld [vmem:[#allocation9 + $0x20] sm:$0xff]  ;;  %v633_v18 = vld [vmem:[#allocation9 + $0xb0] sm:$0xff]  ;;  %s13930_s9 = sld [smem:[#allocation28_spill]]  ;;  %s13931_s5 = sld [smem:[#allocation27_spill]] }
 0x15a   : > { %9797 = vmatpush3.bf16.msra.mxu0 %v12923_v8  ;;  %v12932_v15 = vpack.c.bf16 %v632_v13, %v631_v12  ;;  %v616_v17 = vld [vmem:[#allocation9 + $0x28] sm:$0xff]  ;;  %v634_v19 = vld [vmem:[#allocation9 + $0xb8] sm:$0xff]  ;;  %v617_v22 = vld [vmem:[#allocation9 + $0x30] sm:$0xff]  ;;  %s7714_s14 = sshll.u32 %s12918_s23, 4  ;;  %s13932_s19 = sld [smem:[#allocation44_spill]]  ;;  %s13762_s14 = int_to_ptr.vmem [resolvable:$true] %s7714_s14 }
 0x15b   : > { %9799 = vmatprep.subr.bf16.mxu0 %v12925_v9  ;;  %v12935_v20 = vpack.c.bf16 %v616_v17, %v615_v16  ;;  %v12938_v21 = vpack.c.bf16 %v634_v19, %v633_v18  ;;  %v618_v23 = vld [vmem:[#allocation9 + $0x38] sm:$0xff]  ;;  %v635_v24 = vld [vmem:[#allocation9 + $0xc0] sm:$0xff]  ;;  %v636_v25 = vld [vmem:[#allocation9 + $0xc8] sm:$0xff]  ;;  %p13933_p4 = scmp.ne.s32.totalorder %s13898_s15, 0 }
 0x15c   : > { %v12940_v26 = vld [vmem:[#allocation2] sm:$0xff]  ;;  %v12944_v27 = vpack.c.bf16 %v618_v23, %v617_v22  ;;  %v12947_v28 = vpack.c.bf16 %v636_v25, %v635_v24  ;;  %v619_v29 = vld [vmem:[#allocation9 + $0x40] sm:$0xff]  ;;  %v637_v31 = vld [vmem:[#allocation9 + $0xd0] sm:$0xff]  ;;  %v12433_v24 = vmov 0.0  }
 0x15d   : > { %714 = vmatprep.mubr.f32.mxu0 %v12940_v26  ;;  %v620_v30 = vld [vmem:[#allocation9 + $0x48] sm:$0xff]  ;;  %v638_v32 = vld [vmem:[#allocation9 + $0xd8] sm:$0xff]  ;;  %v621_v35 = vld [vmem:[#allocation9 + $0x50] sm:$0xff]  ;;  %8986 = vmatprep.mubr.msk.f32.mxu1 %vm12432_vm0, %v12433_v24 }
 0x15e   : > { %9801 = vmatpush3.bf16.msra.mxu0 %v12929_v14  ;;  %v12950_v33 = vpack.c.bf16 %v620_v30, %v619_v29  ;;  %v12953_v34 = vpack.c.bf16 %v638_v32, %v637_v31  ;;  %v622_v36 = vld [vmem:[#allocation9 + $0x58] sm:$0xff]  ;;  %v639_v37 = vld [vmem:[#allocation9 + $0xe0] sm:$0xff]  ;;  %v640_v38 = vld [vmem:[#allocation9 + $0xe8] sm:$0xff]  ;;  %s13928_s21 = smov %s13927_s25 }
 0x15f   : > { %9803 = vmatprep.subr.bf16.mxu0 %v12932_v15  ;;  %v12956_v39 = vpack.c.bf16 %v622_v36, %v621_v35  ;;  %v9818_v40 = vpack.c.bf16 %v640_v38, %v639_v37  ;;  %v623_v41 = vld [vmem:[#allocation9 + $0x60] sm:$0xff]  ;;  %v624_v42 = vld [vmem:[#allocation9 + $0x68] sm:$0xff]  ;;  %v641_v43 = vld [vmem:[#allocation9 + $0xf0] sm:$0xff]  ;;  %s7979_s20 = sshll.u32 %s13930_s9, 2  ;;  %s7985_s8 = sshll.u32 %s13931_s5, 6 }
 0x160   : > { %v642_v44 = vld [vmem:[#allocation9 + $0xf8] sm:$0xff]  ;;  %v9820_v45 = vpack.c.bf16 %v624_v42, %v623_v41  ;;  %v625_v47 = vld [vmem:[#allocation9 + $0x70] sm:$0xff]  ;;  %v7910_v53 = vld [vmem:[%s13924_s4] ss:$0 sm:$0xff]  ;;  %s7711_s2 = sadd.s32 %s7985_s8, %s7979_s20  ;;  %s12273_s5 = scalar_lea.vmem %s13762_s14, 4096 }
 0x161   : > { %v9822_v46 = vpack.c.bf16 %v642_v44, %v641_v43  ;;  %v626_v48 = vld [vmem:[#allocation9 + $0x78] sm:$0xff]  ;;  %v12961_v50 = vld [vmem:[%s12889_s13] sm:$0xff]  ;;  %v729_v56 = vld [vmem:[#allocation8] sm:$0xff]  ;;  %s7981_s1 = sshll.u32 %s7711_s2, 7  ;;  %p12274_p3 = scmp.ne.s32.totalorder %s13762_s14, %s12273_s5 }
 0x162   : > { %9805 = vmatpush3.bf16.msra.mxu0 %v12935_v20  ;;  %v9824_v49 = vpack.c.bf16 %v626_v48, %v625_v47  ;;  %v730_v57 = vld [vmem:[#allocation8 + $0x8] sm:$0xff]  ;;  %v731_v58 = vld [vmem:[#allocation8 + $0x10] sm:$0xff]  ;;  %v732_v61 = vld [vmem:[#allocation8 + $0x18] sm:$0xff]  ;;  %s13760_s0 = scalar_lea.hbm %s13932_s19, %s7981_s1  ;;  %s12434_s20 = smov [#allocation17]  }
 0x163   : > { %9807 = vmatprep.subr.bf16.mxu0 %v12938_v21  ;;  %v9827_v60 = vpack.c.bf16 %v730_v57, %v729_v56  ;;  %v9830_v62 = vpack.c.bf16 %v732_v61, %v731_v58  ;;  %v733_v63 = vld [vmem:[#allocation8 + $0x20] sm:$0xff]  ;;  %v734_v0 = vld [vmem:[#allocation8 + $0x28] sm:$0xff]  ;;  %v735_v2 = vld [vmem:[#allocation8 + $0x30] sm:$0xff]  ;;  %p12275_p8 = pnand %p12274_p3, %p13933_p4  ;;  %s12277_s8 = sshll.u32 %s12434_s20, 4  ;;  %s12278_s8 = int_to_ptr.vmem [resolvable:$false] %s12277_s8 }
 0x164   : > { %v9833_v1 = vpack.c.bf16 %v734_v0, %v733_v63  ;;  %v736_v3 = vld [vmem:[#allocation8 + $0x38] sm:$0xff]  ;;  %v737_v6 = vld [vmem:[#allocation8 + $0x40] sm:$0xff]  ;;  %v738_v7 = vld [vmem:[#allocation8 + $0x48] sm:$0xff]  ;;  %s12279_s2 = scalar_lea.vmem %s12278_s8, 8192  ;;  %p12280_p9 = scmp.lt.s32.totalorder %s13762_s14, %s12278_s8 }
 0x165   : > { %9828 = vmatpush3.bf16.msra.mxu1 %v9827_v60  ;;  %v9836_v5 = vpack.c.bf16 %v736_v3, %v735_v2  ;;  %v9839_v10 = vpack.c.bf16 %v738_v7, %v737_v6  ;;  %v739_v17 = vld [vmem:[#allocation8 + $0x50] sm:$0xff]  ;;  %v740_v18 = vld [vmem:[#allocation8 + $0x58] sm:$0xff]  ;;  %v741_v22 = vld [vmem:[#allocation8 + $0x60] sm:$0xff]  ;;  %p12276_p6 = pneg %p12275_p8  ;;  %p12281_p1 = scmp.lt.s32.totalorder %s12279_s2, %s12273_s5 }
 0x166   : > { %9809 = vmatpush3.bf16.msra.mxu0 %v12944_v27  ;;  %9829 = vmatprep.subr.bf16.mxu1 %v12431_v59  ;;  %v9842_v19 = vpack.c.bf16 %v740_v18, %v739_v17  ;;  %v742_v23 = vld [vmem:[#allocation8 + $0x68] sm:$0xff]  ;;  %v743_v29 = vld [vmem:[#allocation8 + $0x70] sm:$0xff]  ;;  %v744_v30 = vld [vmem:[#allocation8 + $0x78] sm:$0xff] }
 0x167   : > { %9811 = vmatprep.subr.bf16.mxu0 %v12947_v28  ;;  %v9845_v25 = vpack.c.bf16 %v742_v23, %v741_v22  ;;  %v9848_v31 = vpack.c.bf16 %v744_v30, %v743_v29  ;;  %v831_v32 = vld [vmem:[#allocation11 + $0x80] sm:$0xff]  ;;  %v832_v35 = vld [vmem:[#allocation11 + $0x88] sm:$0xff]  ;;  %v834_v41 = vld [vmem:[#allocation11 + $0x98] sm:$0xff]  ;;  %p12282_p12 = por %p12281_p1, %p12280_p9 }
 0x168   : > { %v815_v36 = vld [vmem:[#allocation11] sm:$0xff]  ;;  %v9850_v37 = vpack.c.bf16 %v832_v35, %v831_v32  ;;  %v816_v38 = vld [vmem:[#allocation11 + $0x8] sm:$0xff]  ;;  %v817_v44 = vld [vmem:[#allocation11 + $0x10] sm:$0xff] }
 0x169   : > { %9831 = vmatpush3.bf16.msra.mxu1 %v9830_v62  ;;  %v9852_v42 = vpack.c.bf16 %v816_v38, %v815_v36  ;;  %v836_v47 = vld [vmem:[#allocation11 + $0xa8] sm:$0xff]  ;;  %v821_v57 = vld [vmem:[#allocation11 + $0x30] sm:$0xff]  ;;  %v822_v58 = vld [vmem:[#allocation11 + $0x38] sm:$0xff]  ;;  %p12283_p2 = pnand %p12282_p12, %p12276_p6 }
 0x16a   : > { %9813 = vmatpush3.bf16.msra.mxu0 %v12950_v33  ;;  %9832 = vmatprep.subr.bf16.mxu1 %v12431_v59  ;;  %v839_v60 = vld [vmem:[#allocation11 + $0xc0] sm:$0xff]  ;;  %v840_v61 = vld [vmem:[#allocation11 + $0xc8] sm:$0xff]  ;;  %v9864_v62 = vpack.c.bf16 %v822_v58, %v821_v57  ;;  %v841_v2 = vld [vmem:[#allocation11 + $0xd0] sm:$0xff] }
 0x16b   : > { %9815 = vmatprep.subr.bf16.mxu0 %v12953_v34  ;;  %v9866_v63 = vpack.c.bf16 %v840_v61, %v839_v60  ;;  %v823_v0 = vld [vmem:[#allocation11 + $0x40] sm:$0xff]  ;;  %v842_v3 = vld [vmem:[#allocation11 + $0xd8] sm:$0xff]  ;;  %v825_v7 = vld [vmem:[#allocation11 + $0x50] sm:$0xff] }
 0x16c   : > { %v9870_v6 = vpack.c.bf16 %v842_v3, %v841_v2  ;;  %v827_v18 = vld [vmem:[#allocation11 + $0x60] sm:$0xff]  ;;  %v845_v22 = vld [vmem:[#allocation11 + $0xf0] sm:$0xff]  ;;  %v846_v23 = vld [vmem:[#allocation11 + $0xf8] sm:$0xff] }
 0x16d   : > { %9834 = vmatpush3.bf16.msra.mxu1 %v9833_v1  ;;  %v824_v1 = vld [vmem:[#allocation11 + $0x48] sm:$0xff]  ;;  %v9878_v29 = vpack.c.bf16 %v846_v23, %v845_v22  ;;  %v829_v30 = vld [vmem:[#allocation11 + $0x70] sm:$0xff]  ;;  %v944_v57 = vld [vmem:[#allocation12 + $0x98] sm:$0xff] }
 0x16e   : > { %9817 = vmatpush3.bf16.msra.mxu0 %v12956_v39  ;;  %9835 = vmatprep.subr.bf16.mxu1 %v12431_v59  ;;  %v926_v38 = vld [vmem:[#allocation12 + $0x8] sm:$0xff]  ;;  %v947_v58 = vld [vmem:[#allocation12 + $0xb0] sm:$0xff]  ;;  %v949_v2 = vld [vmem:[#allocation12 + $0xc0] sm:$0xff] }
 0x16f   : > { %9819 = vmatprep.subr.bf16.mxu0 %v9818_v40  ;;  %v833_v40 = vld [vmem:[#allocation11 + $0x90] sm:$0xff]  ;;  %v9894_v61 = vpack.c.bf16 %v947_v58, %v944_v57 }
 0x170   : > { %v9854_v43 = vpack.c.bf16 %v834_v41, %v833_v40  ;;  %v929_v40 = vld [vmem:[#allocation12 + $0x20] sm:$0xff]  ;;  %v943_v60 = vld [vmem:[#allocation12 + $0x90] sm:$0xff] }
 0x171   : > { %9837 = vmatpush3.bf16.msra.mxu1 %v9836_v5  ;;  %v9868_v5 = vpack.c.bf16 %v824_v1, %v823_v0  ;;  %v925_v41 = vld [vmem:[#allocation12] sm:$0xff]  ;;  %v950_v0 = vld [vmem:[#allocation12 + $0xc8] sm:$0xff]  ;;  %v927_v23 = vld [vmem:[#allocation12 + $0x10] sm:$0xff] }
 0x172   : > { %9821 = vmatpush3.bf16.msra.mxu0 %v9820_v45  ;;  %9838 = vmatprep.subr.bf16.mxu1 %v12431_v59  ;;  %v818_v45 = vld [vmem:[#allocation11 + $0x18] sm:$0xff]  ;;  %v953_v1 = vld [vmem:[#allocation12 + $0xe0] sm:$0xff]  ;;  %v967_v58 = vld [vmem:[#allocation12 + $0x150] sm:$0xff] }
 0x173   : > { %9823 = vmatprep.subr.bf16.mxu0 %v9822_v46  ;;  %v835_v46 = vld [vmem:[#allocation11 + $0xa0] sm:$0xff]  ;;  %v9856_v48 = vpack.c.bf16 %v818_v45, %v817_v44  ;;  %v932_v45 = vld [vmem:[#allocation12 + $0x38] sm:$0xff]  ;;  %v9898_v3 = vpack.c.bf16 %v953_v1, %v950_v0  ;;  %v1132_v1 = vld [vmem:[#allocation14 + $0x8] sm:$0xff] }
 0x175   : > { %9840 = vmatpush3.bf16.msra.mxu1 %v9839_v10  ;;  %v826_v10 = vld [vmem:[#allocation11 + $0x58] sm:$0xff] }
 0x176   : > { %9825 = vmatpush3.bf16.msra.mxu0 %v9824_v49  ;;  %9841 = vmatprep.subr.bf16.mxu1 %v12431_v59  ;;  %v9858_v49 = vpack.c.bf16 %v836_v47, %v835_v46  ;;  %v935_v46 = vld [vmem:[#allocation12 + $0x50] sm:$0xff] }
 0x177   : > { %9851 = vmatprep.subr.bf16.mxu0 %v9850_v37  ;;  %v931_v47 = vld [vmem:[#allocation12 + $0x30] sm:$0xff] }
 0x179   : > { %715 = vmatmul.mubr.f32.vlgmr.msra.gmra.mrb[0].mxu0 %v12961_v50  ;;  %9843 = vmatpush3.bf16.msra.mxu1 %v9842_v19  ;;  %v828_v19 = vld [vmem:[#allocation11 + $0x68] sm:$0xff] }
 0x17a   : > { %9844 = vmatprep.subr.bf16.mxu1 %v12431_v59  ;;  %9853 = vmatpush3.bf16.msra.mxu0 %v9852_v42  ;;  %v9882_v42 = vpack.c.bf16 %v929_v40, %v926_v38  ;;  %v942_v38 = vld [vmem:[#allocation12 + $0x88] sm:$0xff] }
 0x17b   : > { %9855 = vmatprep.subr.bf16.mxu0 %v9854_v43  ;;  %v928_v43 = vld [vmem:[#allocation12 + $0x18] sm:$0xff] }
 0x17c   : > { %v9884_v44 = vpack.c.bf16 %v928_v43, %v925_v41  ;;  %v945_v41 = vld [vmem:[#allocation12 + $0xa0] sm:$0xff] }
 0x17d   : > { %9846 = vmatpush3.bf16.msra.mxu1 %v9845_v25  ;;  %v9876_v25 = vpack.c.bf16 %v828_v19, %v827_v18  ;;  %v962_v18 = vld [vmem:[#allocation12 + $0x128] sm:$0xff]  ;;  %v965_v19 = vld [vmem:[#allocation12 + $0x140] sm:$0xff] }
 0x17e   : > { %9847 = vmatprep.subr.bf16.mxu1 %v12431_v59  ;;  %9857 = vmatpush3.bf16.msra.mxu0 %v9856_v48  ;;  %v9886_v48 = vpack.c.bf16 %v935_v46, %v932_v45  ;;  %v9906_v22 = vpack.c.bf16 %v965_v19, %v962_v18  ;;  %v957_v46 = vld [vmem:[#allocation12 + $0x100] sm:$0xff]  ;;  %v1138_v18 = vld [vmem:[#allocation14 + $0x38] sm:$0xff]  ;;  %v1141_v19 = vld [vmem:[#allocation14 + $0x50] sm:$0xff] }
 0x17f   : > { %9859 = vmatprep.subr.bf16.mxu0 %v9858_v49  ;;  %v934_v49 = vld [vmem:[#allocation12 + $0x48] sm:$0xff] }
 0x181   : > { %9849 = vmatpush3.bf16.msra.mxu1 %v9848_v31  ;;  %v830_v31 = vld [vmem:[#allocation11 + $0x78] sm:$0xff] }
 0x182   : > { %v9880_v32 = vpack.c.bf16 %v830_v31, %v829_v30  ;;  %9883 = vmatprep.subr.bf16.mxu1 %v9882_v42  ;;  %v933_v31 = vld [vmem:[#allocation12 + $0x40] sm:$0xff]  ;;  %v948_v42 = vld [vmem:[#allocation12 + $0xb8] sm:$0xff] }
 0x183   : > { %v9924_v43 = vpack.c.bf16 %v948_v42, %v945_v41  ;;  %v1143_v41 = vld [vmem:[#allocation14 + $0x60] sm:$0xff] }
 0x24c   : > { %v8018_v51 = vpop.f32.mrb[0].mxu0 }
 0x24d   : > { %v8019_v52 = vpop.f32.mrb[1].mxu0 }
 0x24e   : > { %v8020_v54 = vadd.f32 %v8019_v52, %v8018_v51  ;;  %v819_v51 = vld [vmem:[#allocation11 + $0x20] sm:$0xff]  ;;  %v820_v52 = vld [vmem:[#allocation11 + $0x28] sm:$0xff] }
 0x250   : > { %v717_v55 = vadd.f32 %v8020_v54, %v7910_v53  ;;  %v837_v53 = vld [vmem:[#allocation11 + $0xb0] sm:$0xff]  ;;  %v838_v54 = vld [vmem:[#allocation11 + $0xb8] sm:$0xff] }
 0x251   : > { %v9862_v56 = vpack.c.bf16 %v838_v54, %v837_v53  ;;  %v937_v53 = vld [vmem:[#allocation12 + $0x60] sm:$0xff] }
 0x252   : > { %720 = vmax.xlane.f32.xlu0 %v717_v55 }
 0x2df   : > { %v721_v11 = vpop.xlane.xlu0 %720 }
 0x2e0   : > { %v722_v12 = vsub.f32 %v717_v55, %v721_v11  ;;  %v9860_v55 = vpack.c.bf16 %v820_v52, %v819_v51  ;;  %v843_v11 = vld [vmem:[#allocation11 + $0xe0] sm:$0xff]  ;;  %v9888_v51 = vpack.c.bf16 %v934_v49, %v931_v47  ;;  %v960_v47 = vld [vmem:[#allocation12 + $0x118] sm:$0xff] }
 0x2e1   : > { %v941_v52 = vld [vmem:[#allocation12 + $0x80] sm:$0xff] }
 0x2e2   : > { %v723_v13 = vmul.f32 1.442695, %v722_v12  ;;  %9861 = vmatpush3.bf16.msra.mxu0 %v9860_v55  ;;  %v844_v12 = vld [vmem:[#allocation11 + $0xe8] sm:$0xff]  ;;  %v940_v55 = vld [vmem:[#allocation12 + $0x78] sm:$0xff]  ;;  %v961_v49 = vld [vmem:[#allocation12 + $0x120] sm:$0xff] }
 0x2e3   : > { %9863 = vmatprep.subr.bf16.mxu0 %v9862_v56  ;;  %v9874_v17 = vpack.c.bf16 %v844_v12, %v843_v11  ;;  %v9892_v56 = vpack.c.bf16 %v940_v55, %v937_v53  ;;  %v955_v11 = vld [vmem:[#allocation12 + $0xf0] sm:$0xff]  ;;  %v966_v53 = vld [vmem:[#allocation12 + $0x148] sm:$0xff]  ;;  %v968_v55 = vld [vmem:[#allocation12 + $0x158] sm:$0xff] }
 0x2e4   : > { %11878 = vpow2.f32 %v723_v13  ;;  %v9872_v13 = vpack.c.bf16 %v826_v10, %v825_v7  ;;  %v956_v7 = vld [vmem:[#allocation12 + $0xf8] sm:$0xff]  ;;  %v959_v10 = vld [vmem:[#allocation12 + $0x110] sm:$0xff] }
 0x2e5   : > { %v9902_v12 = vpack.c.bf16 %v959_v10, %v956_v7  ;;  %v1131_v10 = vld [vmem:[#allocation14] sm:$0xff] }
 0x2e6   : > { %9865 = vmatpush3.bf16.msra.mxu0 %v9864_v62  ;;  %v946_v62 = vld [vmem:[#allocation12 + $0xa8] sm:$0xff] }
 0x2e7   : > { %9867 = vmatprep.subr.bf16.mxu0 %v9866_v63  ;;  %v9896_v63 = vpack.c.bf16 %v946_v62, %v943_v60  ;;  %v970_v60 = vld [vmem:[#allocation12 + $0x168] sm:$0xff]  ;;  %v969_v62 = vld [vmem:[#allocation12 + $0x160] sm:$0xff] }
 0x2ea   : > { %9869 = vmatpush3.bf16.msra.mxu0 %v9868_v5  ;;  %v952_v5 = vld [vmem:[#allocation12 + $0xd8] sm:$0xff] }
 0x2eb   : > { %9871 = vmatprep.subr.bf16.mxu0 %v9870_v6  ;;  %v9900_v6 = vpack.c.bf16 %v952_v5, %v949_v2  ;;  %v1135_v2 = vld [vmem:[#allocation14 + $0x20] sm:$0xff] }
 0x2ee   : > { %v12973_v16 = vpop.eup %11878  ;;  %9873 = vmatpush3.bf16.msra.mxu0 %v9872_v13  ;;  %v958_v13 = vld [vmem:[#allocation12 + $0x108] sm:$0xff] }
 0x2ef   : > { %725 = vadd.xlane.f32.xlu0 %v12973_v16  ;;  %9875 = vmatprep.subr.bf16.mxu0 %v9874_v17  ;;  %v9904_v17 = vpack.c.bf16 %v958_v13, %v955_v11  ;;  %v1133_v13 = vld [vmem:[#allocation14 + $0x10] sm:$0xff] }
 0x2f2   : > { %9877 = vmatpush3.bf16.msra.mxu0 %v9876_v25  ;;  %v930_v25 = vld [vmem:[#allocation12 + $0x28] sm:$0xff] }
 0x2f3   : > { %9879 = vmatprep.subr.bf16.mxu0 %v9878_v29  ;;  %v9915_v29 = vpack.c.bf16 %v930_v25, %v927_v23  ;;  %v1137_v25 = vld [vmem:[#allocation14 + $0x30] sm:$0xff] }
 0x2f6   : > { %9881 = vmatpush3.bf16.msra.mxu0 %v9880_v32  ;;  %v936_v32 = vld [vmem:[#allocation12 + $0x58] sm:$0xff] }
 0x2f7   : > { %9914 = vmatprep.subr.bf16.mxu0 %v12431_v59 }
 0x37c   : > { %v726_v35 = vpop.xlane.xlu0 %725 }
 0x37d   : > { %11880 = vrcp.f32 %v726_v35 }
 0x387   : > { %v11881_v36 = vpop.eup %11880 }
 0x388   : > { %v728_v37 = vmul.f32 %v11881_v36, %v12973_v16  ;;  %v938_v16 = vld [vmem:[#allocation12 + $0x68] sm:$0xff]  ;;  %v9918_v36 = vpack.c.bf16 %v936_v32, %v933_v31  ;;  %v9942_v31 = vpack.c.bf16 %v1141_v19, %v1138_v18  ;;  %v1167_v19 = vld [vmem:[#allocation14 + $0x120] sm:$0xff] }
 0x389   : > { %v9890_v54 = vpack.c.bf16 %v941_v52, %v938_v16  ;;  %v963_v52 = vld [vmem:[#allocation12 + $0x130] sm:$0xff]  ;;  %v1140_v32 = vld [vmem:[#allocation14 + $0x48] sm:$0xff] }
 0x38a   : > { %8987 = vmatmul.mubr.f32.vlgmr.msra.gmra.mrb[0].mxu1 %v728_v37  ;;  %1493 = vst [vmem:[%s12918_s23 + $0x18] sm:$0xff] %v728_v37  ;;  %v939_v37 = vld [vmem:[#allocation12 + $0x70] sm:$0xff] }
 0x38b   : > { %1054 = vmatprep.mubr.f32.mxu1 %v12433_v24  ;;  %9885 = vmatpush1.bf16.msra.mxu1 %v9884_v44  ;;  %v9921_v40 = vpack.c.bf16 %v942_v38, %v939_v37  ;;  %v954_v44 = vld [vmem:[#allocation12 + $0xe8] sm:$0xff]  ;;  %v1147_v38 = vld [vmem:[#allocation14 + $0x80] sm:$0xff] }
 0x38c   : > { %9887 = vmatprep.subr.bf16.mxu1 %v9886_v48  ;;  %v9930_v48 = vpack.c.bf16 %v960_v47, %v957_v46  ;;  %v1144_v37 = vld [vmem:[#allocation14 + $0x68] sm:$0xff]  ;;  %v1150_v46 = vld [vmem:[#allocation14 + $0x98] sm:$0xff]  ;;  %v1153_v47 = vld [vmem:[#allocation14 + $0xb0] sm:$0xff] }
 0x38f   : > { %9889 = vmatpush1.bf16.msra.mxu1 %v9888_v51  ;;  %v964_v51 = vld [vmem:[#allocation12 + $0x138] sm:$0xff] }
 0x390   : > { %9891 = vmatprep.subr.bf16.mxu1 %v9890_v54  ;;  %v9908_v16 = vpack.c.bf16 %v964_v51, %v961_v49  ;;  %v9933_v54 = vpack.c.bf16 %v966_v53, %v963_v52  ;;  %v1149_v49 = vld [vmem:[#allocation14 + $0x90] sm:$0xff]  ;;  %v1152_v52 = vld [vmem:[#allocation14 + $0xa8] sm:$0xff]  ;;  %v1151_v53 = vld [vmem:[#allocation14 + $0xa0] sm:$0xff] }
 0x393   : > { %9893 = vmatpush1.bf16.msra.mxu1 %v9892_v56  ;;  %v971_v56 = vld [vmem:[#allocation12 + $0x170] sm:$0xff] }
 0x394   : > { %9895 = vmatprep.subr.bf16.mxu1 %v9894_v61  ;;  %v9910_v57 = vpack.c.bf16 %v971_v56, %v968_v55  ;;  %v9912_v61 = vpack.c.bf16 %v970_v60, %v967_v58  ;;  %v1156_v55 = vld [vmem:[#allocation14 + $0xc8] sm:$0xff]  ;;  %v1159_v56 = vld [vmem:[#allocation14 + $0xe0] sm:$0xff] }
 0x395   : > { %v1155_v58 = vld [vmem:[#allocation14 + $0xc0] sm:$0xff] }
 0x397   : > { %9897 = vmatpush1.bf16.msra.mxu1 %v9896_v63  ;;  %v972_v63 = vld [vmem:[#allocation12 + $0x178] sm:$0xff] }
 0x398   : > { %9899 = vmatprep.subr.bf16.mxu1 %v9898_v3  ;;  %v9936_v0 = vpack.c.bf16 %v972_v63, %v969_v62  ;;  %v9938_v3 = vpack.c.bf16 %v1135_v2, %v1132_v1  ;;  %v1158_v62 = vld [vmem:[#allocation14 + $0xd8] sm:$0xff]  ;;  %v1157_v63 = vld [vmem:[#allocation14 + $0xd0] sm:$0xff] }
 0x399   : > { %v1162_v1 = vld [vmem:[#allocation14 + $0xf8] sm:$0xff]  ;;  %v1165_v2 = vld [vmem:[#allocation14 + $0x110] sm:$0xff] }
 0x39b   : > { %9901 = vmatpush1.bf16.msra.mxu1 %v9900_v6  ;;  %v7911_v6 = vld [vmem:[%s13925_s22] ss:$0 sm:$0xff] }
 0x39c   : > { %9903 = vmatprep.subr.bf16.mxu1 %v9902_v12  ;;  %v1134_v12 = vld [vmem:[#allocation14 + $0x18] sm:$0xff] }
 0x39d   : > { %v9940_v23 = vpack.c.bf16 %v1134_v12, %v1131_v10  ;;  %v1164_v10 = vld [vmem:[#allocation14 + $0x108] sm:$0xff]  ;;  %v1166_v12 = vld [vmem:[#allocation14 + $0x118] sm:$0xff] }
 0x39f   : > { %9905 = vmatpush1.bf16.msra.mxu1 %v9904_v17  ;;  %v1136_v17 = vld [vmem:[#allocation14 + $0x28] sm:$0xff] }
 0x3a0   : > { %9907 = vmatprep.subr.bf16.mxu1 %v9906_v22 }
 0x3a3   : > { %9909 = vmatpush1.bf16.msra.mxu1 %v9908_v16  ;;  %v9950_v16 = vpack.c.bf16 %v1153_v47, %v1150_v46  ;;  %v1364_v47 = vld [vmem:[#allocation15 + $0x30] sm:$0xff] }
 0x3a4   : > { %9911 = vmatprep.subr.bf16.mxu1 %v9910_v57  ;;  %v9952_v57 = vpack.c.bf16 %v1152_v52, %v1149_v49  ;;  %v1368_v49 = vld [vmem:[#allocation15 + $0x50] sm:$0xff]  ;;  %v1371_v52 = vld [vmem:[#allocation15 + $0x68] sm:$0xff] }
 0x3a7   : > { %9913 = vmatpush1.bf16.msra.mxu1 %v9912_v61  ;;  %v9954_v61 = vpack.c.bf16 %v1159_v56, %v1156_v55  ;;  %v1370_v55 = vld [vmem:[#allocation15 + $0x60] sm:$0xff]  ;;  %v1372_v56 = vld [vmem:[#allocation15 + $0x70] sm:$0xff] }
 0x3a8   : > { %9939 = vmatprep.subr.bf16.mxu1 %v9938_v3  ;;  %v9956_v3 = vpack.c.bf16 %v1158_v62, %v1155_v58  ;;  %v1375_v58 = vld [vmem:[#allocation15 + $0x88] sm:$0xff] }
 0x45d   : > { %v811_v30 = vpop.f32.mrb[0].mxu1 }
 0x45e   : > { %v8988_v35 = vpop.f32.mrb[1].mxu1  ;;  %918 = vmatprep.mubr.f32.mxu0 %v811_v30 }
 0x45f   : > { %919 = vmatmul.mubr.f32.vlgmr.msra.gmra.mrb[2].mxu0 %v12961_v50  ;;  %v951_v50 = vld [vmem:[#allocation12 + $0xd0] sm:$0xff]  ;;  %v1139_v35 = vld [vmem:[#allocation14 + $0x40] sm:$0xff] }
 0x460   : > { %9916 = vmatpush3.bf16.msra.mxu0 %v9915_v29  ;;  %9021 = vmatprep.mubr.msk.f32.mxu0 %vm12432_vm0, %v12433_v24  ;;  %v9927_v45 = vpack.c.bf16 %v954_v44, %v951_v50  ;;  %v12998_v29 = vpack.c.bf16 %v1136_v17, %v1133_v13  ;;  %v1146_v50 = vld [vmem:[#allocation14 + $0x78] sm:$0xff]  ;;  %v1145_v44 = vld [vmem:[#allocation14 + $0x70] sm:$0xff]  ;;  %v1168_v13 = vld [vmem:[#allocation14 + $0x128] sm:$0xff] }
 0x461   : > { %9917 = vmatprep.subr.bf16.mxu0 %v12431_v59  ;;  %v1171_v17 = vld [vmem:[#allocation14 + $0x140] sm:$0xff] }
 0x464   : > { %9919 = vmatpush3.bf16.msra.mxu0 %v9918_v36  ;;  %v1142_v36 = vld [vmem:[#allocation14 + $0x58] sm:$0xff] }
 0x465   : > { %9920 = vmatprep.subr.bf16.mxu0 %v12431_v59  ;;  %v13001_v42 = vpack.c.bf16 %v1142_v36, %v1139_v35  ;;  %v1177_v35 = vld [vmem:[#allocation14 + $0x170] sm:$0xff] }
 0x468   : > { %9922 = vmatpush3.bf16.msra.mxu0 %v9921_v40  ;;  %v9944_v40 = vpack.c.bf16 %v1140_v32, %v1137_v25  ;;  %v1170_v25 = vld [vmem:[#allocation14 + $0x138] sm:$0xff] }
 0x469   : > { %9923 = vmatprep.subr.bf16.mxu0 %v12431_v59  ;;  %v1174_v32 = vld [vmem:[#allocation14 + $0x158] sm:$0xff]  ;;  %v9964_v36 = vpack.c.bf16 %v1170_v25, %v1167_v19  ;;  %v1384_v19 = vld [vmem:[#allocation15 + $0xd0] sm:$0xff] }
 0x46c   : > { %9925 = vmatpush3.bf16.msra.mxu0 %v9924_v43  ;;  %v9946_v43 = vpack.c.bf16 %v1147_v38, %v1144_v37  ;;  %v1173_v37 = vld [vmem:[#allocation14 + $0x150] sm:$0xff] }
 0x46d   : > { %9926 = vmatprep.subr.bf16.mxu0 %v12431_v59 }
 0x470   : > { %9928 = vmatpush3.bf16.msra.mxu0 %v9927_v45  ;;  %v1148_v45 = vld [vmem:[#allocation14 + $0x88] sm:$0xff] }
 0x471   : > { %9929 = vmatprep.subr.bf16.mxu0 %v12431_v59  ;;  %v13008_v51 = vpack.c.bf16 %v1148_v45, %v1145_v44 }
 0x474   : > { %9931 = vmatpush3.bf16.msra.mxu0 %v9930_v48  ;;  %v9948_v48 = vpack.c.bf16 %v1146_v50, %v1143_v41  ;;  %v1176_v41 = vld [vmem:[#allocation14 + $0x168] sm:$0xff]  ;;  %v1178_v50 = vld [vmem:[#allocation14 + $0x178] sm:$0xff] }
 0x475   : > { %9932 = vmatprep.subr.bf16.mxu0 %v12431_v59  ;;  %v9968_v44 = vpack.c.bf16 %v1176_v41, %v1173_v37  ;;  %v1387_v37 = vld [vmem:[#allocation15 + $0xe8] sm:$0xff]  ;;  %v1386_v41 = vld [vmem:[#allocation15 + $0xe0] sm:$0xff] }
 0x478   : > { %9934 = vmatpush3.bf16.msra.mxu0 %v9933_v54  ;;  %v1154_v54 = vld [vmem:[#allocation14 + $0xb8] sm:$0xff] }
 0x479   : > { %9935 = vmatprep.subr.bf16.mxu0 %v12431_v59  ;;  %v13012_v60 = vpack.c.bf16 %v1154_v54, %v1151_v53  ;;  %v1373_v53 = vld [vmem:[#allocation15 + $0x78] sm:$0xff] }
 0x47a   : > { %v10006_v54 = vpack.c.bf16 %v1373_v53, %v1371_v52 }
 0x47c   : > { %9937 = vmatpush3.bf16.msra.mxu0 %v9936_v0  ;;  %v1160_v0 = vld [vmem:[#allocation14 + $0xe8] sm:$0xff] }
 0x47d   : > { %9970 = vmatprep.subr.bf16.mxu0 %v12431_v59 }
 0x532   : > { %v8070_v5 = vpop.f32.mrb[2].mxu0 }
 0x533   : > { %v8071_v7 = vpop.f32.mrb[3].mxu0 }
 0x534   : > { %v8072_v11 = vadd.f32 %v8071_v7, %v8070_v5  ;;  %v1161_v5 = vld [vmem:[#allocation14 + $0xf0] sm:$0xff]  ;;  %v9958_v7 = vpack.c.bf16 %v1165_v2, %v1162_v1  ;;  %v1379_v2 = vld [vmem:[#allocation15 + $0xa8] sm:$0xff] }
 0x535   : > { %v9960_v18 = vpack.c.bf16 %v1164_v10, %v1161_v5  ;;  %v1380_v10 = vld [vmem:[#allocation15 + $0xb0] sm:$0xff] }
 0x536   : > { %v921_v22 = vadd.f32 %v8072_v11, %v7911_v6  ;;  %v13016_v6 = vpack.c.bf16 %v1160_v0, %v1157_v63  ;;  %v1163_v11 = vld [vmem:[#allocation14 + $0x100] sm:$0xff]  ;;  %v1376_v0 = vld [vmem:[#allocation15 + $0x90] sm:$0xff] }
 0x537   : > { %v1374_v63 = vld [vmem:[#allocation15 + $0x80] sm:$0xff] }
 0x538   : > { %v924_v30 = vmax.f32 %v921_v22, 0.0  ;;  %v13020_v22 = vpack.c.bf16 %v1166_v12, %v1163_v11  ;;  %v10012_v1 = vpack.c.bf16 %v1376_v0, %v1374_v63  ;;  %v1383_v12 = vld [vmem:[#allocation15 + $0xc8] sm:$0xff] }
 0x53a   : > { %1055 = vmatmul.mubr.f32.vlgmr.msra.gmra.mrb[2].mxu1 %v924_v30  ;;  %9022 = vmatmul.mubr.f32.vlgmr.msra.gmra.mrb[4].mxu0 %v924_v30  ;;  %v1169_v30 = vld [vmem:[#allocation14 + $0x130] sm:$0xff] }
 0x53b   : > { %9941 = vmatpush1.bf16.msra.mxu1 %v9940_v23  ;;  %9972 = vmatpush3.bf16.msra.mxu0 %v12998_v29  ;;  %v9962_v23 = vpack.c.bf16 %v1171_v17, %v1168_v13  ;;  %v1385_v13 = vld [vmem:[#allocation15 + $0xd8] sm:$0xff] }
 0x53c   : > { %9943 = vmatprep.subr.bf16.mxu1 %v9942_v31  ;;  %9973 = vmatprep.subr.bf16.mxu0 %v12431_v59  ;;  %v1172_v31 = vld [vmem:[#allocation14 + $0x148] sm:$0xff]  ;;  %v10018_v17 = vpack.c.bf16 %v1385_v13, %v1383_v12 }
 0x53d   : > { %1260 = vmatprep.mubr.f32.mxu1 %v12433_v24  ;;  %9056 = vmatprep.mubr.msk.f32.mxu0 %vm12432_vm0, %v12433_v24  ;;  %v9989_v38 = vpack.c.bf16 %v1172_v31, %v1169_v30  ;;  %v1525_v30 = vld [vmem:[#allocation9 + $0xe8] sm:$0xff]  ;;  %v1508_v31 = vld [vmem:[#allocation9 + $0x60] sm:$0xff] }
 0x53f   : > { %9945 = vmatpush1.bf16.msra.mxu1 %v9944_v40  ;;  %9975 = vmatpush3.bf16.msra.mxu0 %v13001_v42  ;;  %v9966_v40 = vpack.c.bf16 %v1177_v35, %v1174_v32  ;;  %v1509_v32 = vld [vmem:[#allocation9 + $0x68] sm:$0xff] }
 0x540   : > { %9947 = vmatprep.subr.bf16.mxu1 %v9946_v43  ;;  %9976 = vmatprep.subr.bf16.mxu0 %v12431_v59  ;;  %v1175_v43 = vld [vmem:[#allocation14 + $0x160] sm:$0xff] }
 0x541   : > { %v9992_v45 = vpack.c.bf16 %v1178_v50, %v1175_v43  ;;  %v1388_v43 = vld [vmem:[#allocation15 + $0xf0] sm:$0xff] }
 0x542   : > { %v1526_v50 = vld [vmem:[#allocation9 + $0xf0] sm:$0xff] }
 0x543   : > { %9949 = vmatpush1.bf16.msra.mxu1 %v9948_v48  ;;  %9978 = vmatpush3.bf16.msra.mxu0 %v13008_v51 }
 0x544   : > { %9951 = vmatprep.subr.bf16.mxu1 %v9950_v16  ;;  %9979 = vmatprep.subr.bf16.mxu0 %v12431_v59 }
 0x547   : > { %9953 = vmatpush1.bf16.msra.mxu1 %v9952_v57  ;;  %9981 = vmatpush3.bf16.msra.mxu0 %v13012_v60  ;;  %v10008_v57 = vpack.c.bf16 %v1372_v56, %v1370_v55 }
 0x548   : > { %9955 = vmatprep.subr.bf16.mxu1 %v9954_v61  ;;  %9982 = vmatprep.subr.bf16.mxu0 %v12431_v59  ;;  %v1377_v61 = vld [vmem:[#allocation15 + $0x98] sm:$0xff] }
 0x549   : > { %v10010_v62 = vpack.c.bf16 %v1377_v61, %v1375_v58 }
 0x54b   : > { %9957 = vmatpush1.bf16.msra.mxu1 %v9956_v3  ;;  %9984 = vmatpush3.bf16.msra.mxu0 %v13016_v6  ;;  %v1381_v3 = vld [vmem:[#allocation15 + $0xb8] sm:$0xff] }
 0x54c   : > { %9959 = vmatprep.subr.bf16.mxu1 %v9958_v7  ;;  %9985 = vmatprep.subr.bf16.mxu0 %v12431_v59  ;;  %v10014_v5 = vpack.c.bf16 %v1381_v3, %v1379_v2  ;;  %v1378_v7 = vld [vmem:[#allocation15 + $0xa0] sm:$0xff] }
 0x54d   : > { %v10016_v11 = vpack.c.bf16 %v1380_v10, %v1378_v7 }
 0x54f   : > { %9961 = vmatpush1.bf16.msra.mxu1 %v9960_v18  ;;  %9987 = vmatpush3.bf16.msra.mxu0 %v13020_v22  ;;  %v1382_v18 = vld [vmem:[#allocation15 + $0xc0] sm:$0xff] }
 0x550   : > { %9963 = vmatprep.subr.bf16.mxu1 %v9962_v23  ;;  %9988 = vmatprep.subr.bf16.mxu0 %v12431_v59  ;;  %v1524_v23 = vld [vmem:[#allocation9 + $0xe0] sm:$0xff]  ;;  %v10020_v25 = vpack.c.bf16 %v1384_v19, %v1382_v18 }
 0x551   : > { %v10050_v35 = vpack.c.bf16 %v1525_v30, %v1524_v23  ;;  %v12038_v23 = vld [vmem:[#allocation2] sm:$0xff] }
 0x553   : > { %9965 = vmatpush1.bf16.msra.mxu1 %v9964_v36  ;;  %9990 = vmatpush3.bf16.msra.mxu0 %v9989_v38  ;;  %v10052_v36 = vpack.c.bf16 %v1509_v32, %v1508_v31  ;;  %v1389_v38 = vld [vmem:[#allocation15 + $0xf8] sm:$0xff] }
 0x554   : > { %9967 = vmatprep.subr.bf16.mxu1 %v9966_v40  ;;  %9991 = vmatprep.subr.bf16.mxu0 %v12431_v59  ;;  %v10022_v40 = vpack.c.bf16 %v1389_v38, %v1387_v37  ;;  %v13063_v32 = vld [vmem:[%s12889_s13 + $0x8] sm:$0xff] }
 0x557   : > { %9969 = vmatpush1.bf16.msra.mxu1 %v9968_v44  ;;  %9993 = vmatpush3.bf16.msra.mxu0 %v9992_v45  ;;  %v10024_v44 = vpack.c.bf16 %v1388_v43, %v1386_v41  ;;  %v1527_v45 = vld [vmem:[#allocation9 + $0xf8] sm:$0xff] }
 0x558   : > { %10027 = vmatprep.subr.bf16.mxu0 %v12921_v4  ;;  %v1359_v4 = vld [vmem:[#allocation15 + $0x8] sm:$0xff] }
 0x55a   : > { %1261 = vmatmul.mubr.f32.vlgmr.msra.gmra.mrb[2].mxu1 %v12940_v26  ;;  %9057 = vmatmul.mubr.f32.vlgmr.msra.gmra.mrb[6].mxu0 %v12940_v26  ;;  %v1360_v26 = vld [vmem:[#allocation15 + $0x10] sm:$0xff] }
 0x55b   : > { %10029 = vmatpush3.bf16.msra.mxu0 %v12923_v8  ;;  %1466 = vmatprep.mubr.f32.mxu1 %v12433_v24  ;;  %v1361_v8 = vld [vmem:[#allocation15 + $0x18] sm:$0xff] }
 0x55c   : > { %10031 = vmatprep.subr.bf16.mxu0 %v12925_v9  ;;  %v9994_v9 = vpack.c.bf16 %v1361_v8, %v1359_v4  ;;  %v1510_v4 = vld [vmem:[#allocation9 + $0x70] sm:$0xff]  ;;  %v1511_v8 = vld [vmem:[#allocation9 + $0x78] sm:$0xff] }
 0x55e   : > { %9995 = vmatprep.subr.bf16.mxu1 %v9994_v9  ;;  %v10054_v9 = vpack.c.bf16 %v1527_v45, %v1526_v50  ;;  %v1614_v50 = vld [vmem:[#allocation8] sm:$0xff]  ;;  %v1616_v45 = vld [vmem:[#allocation8 + $0x10] sm:$0xff] }
 0x55f   : > { %10033 = vmatpush3.bf16.msra.mxu0 %v12929_v14  ;;  %v1358_v14 = vld [vmem:[#allocation15] sm:$0xff] }
 0x560   : > { %10035 = vmatprep.subr.bf16.mxu0 %v12932_v15  ;;  %v9996_v15 = vpack.c.bf16 %v1360_v26, %v1358_v14  ;;  %v10056_v14 = vpack.c.bf16 %v1511_v8, %v1510_v4  ;;  %v1617_v8 = vld [vmem:[#allocation8 + $0x18] sm:$0xff] }
 0x562   : > { %9997 = vmatpush1.bf16.msra.mxu1 %v9996_v15 }
 0x563   : > { %10037 = vmatpush3.bf16.msra.mxu0 %v12935_v20  ;;  %v1363_v20 = vld [vmem:[#allocation15 + $0x28] sm:$0xff] }
 0x564   : > { %10039 = vmatprep.subr.bf16.mxu0 %v12938_v21  ;;  %v1365_v21 = vld [vmem:[#allocation15 + $0x38] sm:$0xff] }
 0x565   : > { %v9998_v46 = vpack.c.bf16 %v1365_v21, %v1363_v20  ;;  %v975_v20 = vlaneseq }
 0x567   : > { %10041 = vmatpush3.bf16.msra.mxu0 %v12944_v27  ;;  %v1362_v27 = vld [vmem:[#allocation15 + $0x20] sm:$0xff]  ;;  %9999 = vmatprep.subr.bf16.mxu1 %v9998_v46  ;;  %v976_v21 = vshrl.u32 %v975_v20, 7  ;;  %v1620_v20 = vld [vmem:[#allocation8 + $0x30] sm:$0xff] }
 0x568   : > { %10043 = vmatprep.subr.bf16.mxu0 %v12947_v28  ;;  %v10000_v28 = vpack.c.bf16 %v1364_v47, %v1362_v27  ;;  %v1179_v27 = vld [vmem:[%s13926_s7] sm:$0x7] }
 0x569   : > { %v13042_v46 = vsub.s32 0, %v976_v21  ;;  %v973_v47 = vld [vmem:[%s13927_s25] sm:$0x7]  ;;  %v13056_v0 = vsub.s32 2, %v976_v21 }
 0x56a   : > { %10001 = vmatpush1.bf16.msra.mxu1 %v10000_v28  ;;  %v13050_v28 = vsub.s32 1, %v976_v21  ;;  %v1621_v21 = vld [vmem:[#allocation8 + $0x38] sm:$0xff] }
 0x56b   : > { %10045 = vmatpush3.bf16.msra.mxu0 %v12950_v33  ;;  %v1367_v33 = vld [vmem:[#allocation15 + $0x48] sm:$0xff]  ;;  %v986_v3 = vrot.slane %v973_v47, %v13056_v0 }
 0x56c   : > { %10047 = vmatprep.subr.bf16.mxu0 %v12953_v34  ;;  %v1369_v34 = vld [vmem:[#allocation15 + $0x58] sm:$0xff] }
 0x56d   : > { %v10002_v48 = vpack.c.bf16 %v1369_v34, %v1367_v33  ;;  %v978_v33 = vrot.slane %v973_v47, %v13042_v46  ;;  %v1184_v34 = vrot.slane %v1179_v27, %v13042_v46 }
 0x56f   : > { %10049 = vmatpush3.bf16.msra.mxu0 %v12956_v39  ;;  %v1366_v39 = vld [vmem:[#allocation15 + $0x40] sm:$0xff]  ;;  %10003 = vmatprep.subr.bf16.mxu1 %v10002_v48  ;;  %v982_v48 = vrot.slane %v973_v47, %v13050_v28 }
 0x570   : > { %v10004_v16 = vpack.c.bf16 %v1368_v49, %v1366_v39  ;;  %10051 = vmatprep.subr.bf16.mxu0 %v10050_v35  ;;  %v1188_v39 = vrot.slane %v1179_v27, %v13050_v28  ;;  %v11650_v49 = vadd.f32 %v1184_v34, %v978_v33  ;;  %v1622_v47 = vld [vmem:[#allocation8 + $0x40] sm:$0xff]  ;;  %v1623_v33 = vld [vmem:[#allocation8 + $0x48] sm:$0xff] }
 0x571   : > { %v10071_v34 = vpack.c.bf16 %v1623_v33, %v1622_v47  ;;  %v1710_v47 = vld [vmem:[#allocation11 + $0x50] sm:$0xff]  ;;  %v1711_v33 = vld [vmem:[#allocation11 + $0x58] sm:$0xff] }
 0x572   : > { %10005 = vmatpush1.bf16.msra.mxu1 %v10004_v16  ;;  %v11652_v52 = vadd.f32 %v1188_v39, %v982_v48 }
 0x573   : > { %10007 = vmatprep.subr.bf16.mxu1 %v10006_v54  ;;  %10053 = vmatpush3.bf16.msra.mxu0 %v10052_v36 }
 0x574   : > { %10055 = vmatprep.subr.bf16.mxu0 %v10054_v9  ;;  %v10062_v9 = vpack.c.bf16 %v1617_v8, %v1616_v45  ;;  %v1724_v45 = vld [vmem:[#allocation11 + $0xc0] sm:$0xff] }
 0x576   : > { %10009 = vmatpush1.bf16.msra.mxu1 %v10008_v57 }
 0x577   : > { %10011 = vmatprep.subr.bf16.mxu1 %v10010_v62  ;;  %10057 = vmatpush3.bf16.msra.mxu0 %v10056_v14  ;;  %v1618_v14 = vld [vmem:[#allocation8 + $0x20] sm:$0xff] }
 0x57a   : > { %10013 = vmatpush1.bf16.msra.mxu1 %v10012_v1  ;;  %v1192_v1 = vrot.slane %v1179_v27, %v13056_v0  ;;  %v10068_v27 = vpack.c.bf16 %v1621_v21, %v1620_v20  ;;  %v1727_v20 = vld [vmem:[#allocation11 + $0xd8] sm:$0xff] }
 0x57b   : > { %10015 = vmatprep.subr.bf16.mxu1 %v10014_v5 }
 0x57e   : > { %10017 = vmatpush1.bf16.msra.mxu1 %v10016_v11 }
 0x57f   : > { %10019 = vmatprep.subr.bf16.mxu1 %v10018_v17 }
 0x582   : > { %10021 = vmatpush1.bf16.msra.mxu1 %v10020_v25 }
 0x583   : > { %10023 = vmatprep.subr.bf16.mxu1 %v10022_v40  ;;  %v7915_v40 = vld [vmem:[%s13924_s4] ss:$0 sm:$0xff] }
 0x586   : > { %10025 = vmatpush1.bf16.msra.mxu1 %v10024_v44  ;;  %v1615_v44 = vld [vmem:[#allocation8 + $0x8] sm:$0xff] }
 0x587   : > { %10058 = vmatprep.subr.bf16.mxu1 %v12431_v59  ;;  %v10059_v4 = vpack.c.bf16 %v1615_v44, %v1614_v50  ;;  %v1706_v50 = vld [vmem:[#allocation11 + $0x30] sm:$0xff]  ;;  %v1707_v44 = vld [vmem:[#allocation11 + $0x38] sm:$0xff] }
 0x588   : > { %v10096_v8 = vpack.c.bf16 %v1707_v44, %v1706_v50  ;;  %v1832_v50 = vld [vmem:[#allocation12 + $0xb0] sm:$0xff] }
 0x60d   : > { %v1127_v26 = vpop.f32.mrb[4].mxu0 }
 0x60e   : > { %v9023_v15 = vpop.f32.mrb[5].mxu0  ;;  %v1128_v11 = vadd.f32 %v1127_v26, %v986_v3  ;;  %v1619_v26 = vld [vmem:[#allocation8 + $0x28] sm:$0xff] }
 0x60f   : > { %v10065_v15 = vpack.c.bf16 %v1619_v26, %v1618_v14  ;;  %v1708_v14 = vld [vmem:[#allocation11 + $0x40] sm:$0xff]  ;;  %v1709_v26 = vld [vmem:[#allocation11 + $0x48] sm:$0xff] }
 0x610   : > { %v10100_v21 = vpack.c.bf16 %v1709_v26, %v1708_v14  ;;  %v1838_v14 = vld [vmem:[#allocation12 + $0xe0] sm:$0xff] }
 0x62d   : > { %v1262_v16 = vpop.f32.mrb[2].mxu1  ;;  %v1333_v53 = vpop.f32.mrb[6].mxu0 }
 0x62e   : > { %v11651_v54 = vadd.f32 %v11650_v49, %v1262_v16  ;;  %v1264_v55 = vpop.f32.mrb[3].mxu1  ;;  %v9058_v56 = vpop.f32.mrb[7].mxu0  ;;  %v1334_v7 = vadd.f32 %v1333_v53, %v1192_v1  ;;  %v1625_v53 = vld [vmem:[#allocation8 + $0x58] sm:$0xff]  ;;  %v1717_v1 = vld [vmem:[#allocation11 + $0x88] sm:$0xff] }
 0x62f   : > { %v11653_v58 = vadd.f32 %v11652_v52, %v1264_v55  ;;  %v1624_v52 = vld [vmem:[#allocation8 + $0x50] sm:$0xff]  ;;  %v1626_v55 = vld [vmem:[#allocation8 + $0x60] sm:$0xff]  ;;  %v1627_v56 = vld [vmem:[#allocation8 + $0x68] sm:$0xff] }
 0x630   : > { %v7912_v57 = vmul.f32 -1.442695, %v11651_v54  ;;  %v10074_v54 = vpack.c.bf16 %v1625_v53, %v1624_v52  ;;  %v1712_v52 = vld [vmem:[#allocation11 + $0x60] sm:$0xff]  ;;  %v1713_v53 = vld [vmem:[#allocation11 + $0x68] sm:$0xff] }
 0x631   : > { %v7913_v61 = vmul.f32 -1.442695, %v11653_v58  ;;  %v1628_v58 = vld [vmem:[#allocation8 + $0x70] sm:$0xff] }
 0x632   : > { %11882 = vpow2.f32 %v7912_v57  ;;  %v10077_v57 = vpack.c.bf16 %v1627_v56, %v1626_v55  ;;  %v1731_v55 = vld [vmem:[#allocation11 + $0xf8] sm:$0xff]  ;;  %v10108_v56 = vpack.c.bf16 %v1713_v53, %v1712_v52  ;;  %v1850_v52 = vld [vmem:[#allocation12 + $0x140] sm:$0xff] }
 0x633   : > { %11884 = vpow2.f32 %v7913_v61  ;;  %v1629_v61 = vld [vmem:[#allocation8 + $0x78] sm:$0xff] }
 0x63c   : > { %v11883_v62 = vpop.eup %11882 }
 0x63d   : > { %v1341_v63 = vadd.f32 1.0, %v11883_v62  ;;  %v11885_v2 = vpop.eup %11884  ;;  %v10080_v62 = vpack.c.bf16 %v1629_v61, %v1628_v58  ;;  %v1714_v58 = vld [vmem:[#allocation11 + $0x70] sm:$0xff]  ;;  %v1715_v61 = vld [vmem:[#allocation11 + $0x78] sm:$0xff] }
 0x63e   : > { %v1348_v5 = vadd.f32 1.0, %v11885_v2  ;;  %v1700_v2 = vld [vmem:[#allocation11] sm:$0xff] }
 0x63f   : > { %11886 = vrcp.f32 %v1341_v63  ;;  %v1716_v63 = vld [vmem:[#allocation11 + $0x80] sm:$0xff] }
 0x640   : > { %11888 = vrcp.f32 %v1348_v5  ;;  %v10082_v3 = vpack.c.bf16 %v1717_v1, %v1716_v63  ;;  %v1701_v5 = vld [vmem:[#allocation11 + $0x8] sm:$0xff] }
 0x642   : > { %10083 = vmatprep.subr.bf16.mxu0 %v10082_v3  ;;  %v1811_v3 = vld [vmem:[#allocation12 + $0x8] sm:$0xff] }
 0x649   : > { %v11887_v10 = vpop.eup %11886 }
 0x64a   : > { %v1351_v12 = vmul.f32 %v11887_v10, %v1334_v7  ;;  %v11889_v17 = vpop.eup %11888  ;;  %v1718_v7 = vld [vmem:[#allocation11 + $0x90] sm:$0xff]  ;;  %v1719_v10 = vld [vmem:[#allocation11 + $0x98] sm:$0xff] }
 0x64b   : > { %v1354_v18 = vsub.f32 1.0, %v11889_v17  ;;  %v1356_v25 = vmul.f32 %v12038_v23, %v11889_v17  ;;  %v1703_v17 = vld [vmem:[#allocation11 + $0x18] sm:$0xff] }
 0x64c   : > { %v1352_v13 = vadd.f32 %v1351_v12, %v1128_v11  ;;  %v10084_v11 = vpack.c.bf16 %v1701_v5, %v1700_v2  ;;  %v10086_v12 = vpack.c.bf16 %v1719_v10, %v1718_v7  ;;  %v1814_v5 = vld [vmem:[#allocation12 + $0x20] sm:$0xff] }
 0x64d   : > { %v1810_v7 = vld [vmem:[#allocation12] sm:$0xff]  ;;  %v10114_v10 = vpack.c.bf16 %v1814_v5, %v1811_v3 }
 0x64e   : > { %11890 = vtanh.f32 %v1352_v13  ;;  %v1702_v13 = vld [vmem:[#allocation11 + $0x10] sm:$0xff]  ;;  %v1830_v5 = vld [vmem:[#allocation12 + $0xa0] sm:$0xff] }
 0x64f   : > { %v10088_v23 = vpack.c.bf16 %v1703_v17, %v1702_v13  ;;  %v1817_v13 = vld [vmem:[#allocation12 + $0x38] sm:$0xff]  ;;  %v1820_v17 = vld [vmem:[#allocation12 + $0x50] sm:$0xff] }
 0x658   : > { %v11891_v19 = vpop.eup %11890 }
 0x659   : > { %v1355_v30 = vmul.f32 %v11891_v19, %v1354_v18  ;;  %v1720_v18 = vld [vmem:[#allocation11 + $0xa0] sm:$0xff]  ;;  %v1721_v19 = vld [vmem:[#allocation11 + $0xa8] sm:$0xff] }
 0x65b   : > { %v13060_v31 = vadd.f32 %v1356_v25, %v1355_v30  ;;  %v10090_v25 = vpack.c.bf16 %v1721_v19, %v1720_v18  ;;  %v1704_v30 = vld [vmem:[#allocation11 + $0x20] sm:$0xff]  ;;  %v1816_v18 = vld [vmem:[#allocation12 + $0x30] sm:$0xff]  ;;  %v10118_v19 = vpack.c.bf16 %v1820_v17, %v1817_v13  ;;  %v1845_v17 = vld [vmem:[#allocation12 + $0x118] sm:$0xff] }
 0x65c   : > { %v1842_v13 = vld [vmem:[#allocation12 + $0x100] sm:$0xff] }
 0x65d   : > { %1467 = vmatmul.mubr.f32.vlgmr.msra.gmra.mrb[4].mxu1 %v13060_v31  ;;  %1492 = vst [vmem:[%s12918_s23 + $0x10] sm:$0xff] %v13060_v31  ;;  %1599 = vmatprep.mubr.f32.mxu0 %v13060_v31 }
 0x65e   : > { %1600 = vmatmul.mubr.f32.vlgmr.msra.gmra.mrb[8].mxu0 %v13063_v32  ;;  %9091 = vmatprep.mubr.msk.f32.mxu1 %vm12432_vm0, %v12433_v24 }
 0x65f   : > { %10060 = vmatpush3.bf16.msra.mxu1 %v10059_v4  ;;  %10085 = vmatpush3.bf16.msra.mxu0 %v10084_v11  ;;  %v1725_v4 = vld [vmem:[#allocation11 + $0xc8] sm:$0xff]  ;;  %v1813_v11 = vld [vmem:[#allocation12 + $0x18] sm:$0xff] }
 0x660   : > { %10061 = vmatprep.subr.bf16.mxu1 %v12431_v59  ;;  %10087 = vmatprep.subr.bf16.mxu0 %v10086_v12  ;;  %v10116_v12 = vpack.c.bf16 %v1813_v11, %v1810_v7  ;;  %v1833_v7 = vld [vmem:[#allocation12 + $0xb8] sm:$0xff]  ;;  %v1839_v11 = vld [vmem:[#allocation12 + $0xe8] sm:$0xff] }
 0x663   : > { %10063 = vmatpush3.bf16.msra.mxu1 %v10062_v9  ;;  %10089 = vmatpush3.bf16.msra.mxu0 %v10088_v23  ;;  %v10098_v9 = vpack.c.bf16 %v1725_v4, %v1724_v45  ;;  %v1819_v23 = vld [vmem:[#allocation12 + $0x48] sm:$0xff]  ;;  %v1828_v45 = vld [vmem:[#allocation12 + $0x90] sm:$0xff] }
 0x664   : > { %10064 = vmatprep.subr.bf16.mxu1 %v12431_v59  ;;  %10091 = vmatprep.subr.bf16.mxu0 %v10090_v25  ;;  %v10120_v25 = vpack.c.bf16 %v1819_v23, %v1816_v18  ;;  %v1831_v4 = vld [vmem:[#allocation12 + $0xa8] sm:$0xff]  ;;  %v10162_v18 = vpack.c.bf16 %v1845_v17, %v1842_v13  ;;  %v1849_v23 = vld [vmem:[#allocation12 + $0x138] sm:$0xff]  ;;  %v2040_v13 = vld [vmem:[#allocation14 + $0xc0] sm:$0xff] }
 0x665   : > { %v2043_v17 = vld [vmem:[#allocation14 + $0xd8] sm:$0xff] }
 0x667   : > { %10066 = vmatpush3.bf16.msra.mxu1 %v10065_v15  ;;  %v1726_v15 = vld [vmem:[#allocation11 + $0xd0] sm:$0xff] }
 0x668   : > { %10067 = vmatprep.subr.bf16.mxu1 %v12431_v59 }
 0x66b   : > { %10069 = vmatpush3.bf16.msra.mxu1 %v10068_v27  ;;  %v10102_v27 = vpack.c.bf16 %v1727_v20, %v1726_v15  ;;  %v1834_v15 = vld [vmem:[#allocation12 + $0xc0] sm:$0xff]  ;;  %v1837_v20 = vld [vmem:[#allocation12 + $0xd8] sm:$0xff] }
 0x66c   : > { %10070 = vmatprep.subr.bf16.mxu1 %v12431_v59 }
 0x66f   : > { %10072 = vmatpush3.bf16.msra.mxu1 %v10071_v34  ;;  %v1728_v34 = vld [vmem:[#allocation11 + $0xe0] sm:$0xff] }
 0x670   : > { %10073 = vmatprep.subr.bf16.mxu1 %v12431_v59 }
 0x673   : > { %10075 = vmatpush3.bf16.msra.mxu1 %v10074_v54  ;;  %v1730_v54 = vld [vmem:[#allocation11 + $0xf0] sm:$0xff] }
 0x674   : > { %10076 = vmatprep.subr.bf16.mxu1 %v12431_v59 }
 0x677   : > { %10078 = vmatpush3.bf16.msra.mxu1 %v10077_v57  ;;  %v10110_v57 = vpack.c.bf16 %v1731_v55, %v1730_v54  ;;  %v1812_v54 = vld [vmem:[#allocation12 + $0x10] sm:$0xff]  ;;  %v1815_v55 = vld [vmem:[#allocation12 + $0x28] sm:$0xff] }
 0x678   : > { %10079 = vmatprep.subr.bf16.mxu1 %v12431_v59 }
 0x67b   : > { %10081 = vmatpush3.bf16.msra.mxu1 %v10080_v62  ;;  %v10112_v62 = vpack.c.bf16 %v1715_v61, %v1714_v58  ;;  %v1818_v58 = vld [vmem:[#allocation12 + $0x40] sm:$0xff]  ;;  %v1821_v61 = vld [vmem:[#allocation12 + $0x58] sm:$0xff] }
 0x67c   : > { %10115 = vmatprep.subr.bf16.mxu1 %v10114_v10  ;;  %v10156_v10 = vpack.c.bf16 %v1833_v7, %v1830_v5  ;;  %v2034_v5 = vld [vmem:[#allocation14 + $0x90] sm:$0xff]  ;;  %v2037_v7 = vld [vmem:[#allocation14 + $0xa8] sm:$0xff] }
 0x730   : > { %v13072_v35 = vpop.f32.mrb[4].mxu1 }
 0x731   : > { %v13074_v36 = vpop.f32.mrb[5].mxu1  ;;  %v8139_v37 = vpop.f32.mrb[8].mxu0 }
 0x732   : > { %v8140_v38 = vpop.f32.mrb[9].mxu0 }
 0x733   : > { %v8141_v41 = vadd.f32 %v8140_v38, %v8139_v37  ;;  %v1705_v37 = vld [vmem:[#allocation11 + $0x28] sm:$0xff]  ;;  %v1722_v38 = vld [vmem:[#allocation11 + $0xb0] sm:$0xff] }
 0x735   : > { %v1602_v43 = vadd.f32 %v8141_v41, %v7915_v40  ;;  %v1723_v40 = vld [vmem:[#allocation11 + $0xb8] sm:$0xff]  ;;  %v10092_v41 = vpack.c.bf16 %v1705_v37, %v1704_v30  ;;  %v1826_v30 = vld [vmem:[#allocation12 + $0x80] sm:$0xff] }
 0x737   : > { %1605 = vmax.xlane.f32.xlu1 %v1602_v43  ;;  %10093 = vmatpush3.bf16.msra.mxu0 %v10092_v41 }
 0x7c4   : > { %v1606_v48 = vpop.xlane.xlu1 %1605 }
 0x7c5   : > { %v1607_v39 = vsub.f32 %v1602_v43, %v1606_v48  ;;  %v10094_v43 = vpack.c.bf16 %v1723_v40, %v1722_v38  ;;  %v1729_v48 = vld [vmem:[#allocation11 + $0xe8] sm:$0xff]  ;;  %v1822_v38 = vld [vmem:[#allocation12 + $0x60] sm:$0xff]  ;;  %v1825_v40 = vld [vmem:[#allocation12 + $0x78] sm:$0xff] }
 0x7c6   : > { %v10124_v41 = vpack.c.bf16 %v1825_v40, %v1822_v38  ;;  %v1853_v38 = vld [vmem:[#allocation12 + $0x158] sm:$0xff]  ;;  %v1856_v40 = vld [vmem:[#allocation12 + $0x170] sm:$0xff] }
 0x7c7   : > { %v1608_v49 = vmul.f32 1.442695, %v1607_v39  ;;  %10095 = vmatprep.subr.bf16.mxu0 %v10094_v43  ;;  %v10104_v39 = vpack.c.bf16 %v1711_v33, %v1710_v47  ;;  %v1829_v43 = vld [vmem:[#allocation12 + $0x98] sm:$0xff]  ;;  %v1844_v47 = vld [vmem:[#allocation12 + $0x110] sm:$0xff] }
 0x7c8   : > { %10097 = vmatpush3.bf16.msra.mxu0 %v10096_v8  ;;  %v10126_v44 = vpack.c.bf16 %v1832_v50, %v1829_v43  ;;  %v10128_v8 = vpack.c.bf16 %v1831_v4, %v1828_v45  ;;  %v1852_v43 = vld [vmem:[#allocation12 + $0x150] sm:$0xff]  ;;  %v1855_v50 = vld [vmem:[#allocation12 + $0x168] sm:$0xff]  ;;  %v1857_v4 = vld [vmem:[#allocation12 + $0x178] sm:$0xff] }
 0x7c9   : > { %11892 = vpow2.f32 %v1608_v49  ;;  %10099 = vmatprep.subr.bf16.mxu0 %v10098_v9  ;;  %v10106_v49 = vpack.c.bf16 %v1729_v48, %v1728_v34  ;;  %v1835_v9 = vld [vmem:[#allocation12 + $0xc8] sm:$0xff]  ;;  %v1840_v34 = vld [vmem:[#allocation12 + $0xf0] sm:$0xff]  ;;  %v10144_v45 = vpack.c.bf16 %v1855_v50, %v1852_v43  ;;  %v2059_v50 = vld [vmem:[#allocation14 + $0x158] sm:$0xff] }
 0x7ca   : > { %v10130_v26 = vpack.c.bf16 %v1838_v14, %v1835_v9  ;;  %v1843_v48 = vld [vmem:[#allocation12 + $0x108] sm:$0xff]  ;;  %v2020_v14 = vld [vmem:[#allocation14 + $0x20] sm:$0xff] }
 0x7cb   : > { %v2017_v9 = vld [vmem:[#allocation14 + $0x8] sm:$0xff] }
 0x7cc   : > { %10101 = vmatpush3.bf16.msra.mxu0 %v10100_v21  ;;  %v10132_v21 = vpack.c.bf16 %v1837_v20, %v1834_v15  ;;  %v7916_v20 = vld [vmem:[%s13925_s22] ss:$0 sm:$0xff] }
 0x7cd   : > { %10103 = vmatprep.subr.bf16.mxu0 %v10102_v27  ;;  %v1841_v27 = vld [vmem:[#allocation12 + $0xf8] sm:$0xff]  ;;  %v2057_v43 = vld [vmem:[#allocation14 + $0x148] sm:$0xff] }
 0x7ce   : > { %v10134_v33 = vpack.c.bf16 %v1844_v47, %v1841_v27  ;;  %v2016_v47 = vld [vmem:[#allocation14] sm:$0xff] }
 0x7d0   : > { %10105 = vmatpush3.bf16.msra.mxu0 %v10104_v39  ;;  %v10136_v39 = vpack.c.bf16 %v1843_v48, %v1840_v34  ;;  %v2023_v34 = vld [vmem:[#allocation14 + $0x38] sm:$0xff]  ;;  %v2026_v48 = vld [vmem:[#allocation14 + $0x50] sm:$0xff] }
 0x7d1   : > { %10107 = vmatprep.subr.bf16.mxu0 %v10106_v49  ;;  %v1847_v49 = vld [vmem:[#allocation12 + $0x128] sm:$0xff] }
 0x7d2   : > { %v10138_v53 = vpack.c.bf16 %v1850_v52, %v1847_v49 }
 0x7d3   : > { %v13084_v16 = vpop.eup %11892 }
 0x7d4   : > { %1610 = vadd.xlane.f32.xlu1 %v13084_v16  ;;  %10109 = vmatpush3.bf16.msra.mxu0 %v10108_v56  ;;  %v10147_v56 = vpack.c.bf16 %v1815_v55, %v1812_v54  ;;  %v2022_v54 = vld [vmem:[#allocation14 + $0x30] sm:$0xff]  ;;  %v2025_v55 = vld [vmem:[#allocation14 + $0x48] sm:$0xff] }
 0x7d5   : > { %10111 = vmatprep.subr.bf16.mxu0 %v10110_v57 }
 0x7d8   : > { %10113 = vmatpush3.bf16.msra.mxu0 %v10112_v62 }
 0x7d9   : > { %10146 = vmatprep.subr.bf16.mxu0 %v12431_v59 }
 0x861   : > { %v1611_v63 = vpop.xlane.xlu1 %1610 }
 0x862   : > { %11894 = vrcp.f32 %v1611_v63  ;;  %v10150_v63 = vpack.c.bf16 %v1821_v61, %v1818_v58  ;;  %v10176_v58 = vpack.c.bf16 %v2025_v55, %v2022_v54  ;;  %v2248_v55 = vld [vmem:[#allocation15 + $0x28] sm:$0xff] }
 0x86c   : > { %v11895_v1 = vpop.eup %11894 }
 0x86d   : > { %v1613_v2 = vmul.f32 %v11895_v1, %v13084_v16  ;;  %v1823_v16 = vld [vmem:[#allocation12 + $0x68] sm:$0xff]  ;;  %v1824_v1 = vld [vmem:[#allocation12 + $0x70] sm:$0xff] }
 0x86e   : > { %v10122_v37 = vpack.c.bf16 %v1826_v30, %v1823_v16  ;;  %v1851_v30 = vld [vmem:[#allocation12 + $0x148] sm:$0xff] }
 0x86f   : > { %9092 = vmatmul.mubr.f32.vlgmr.msra.gmra.mrb[6].mxu1 %v1613_v2  ;;  %7922 = vst [vmem:[%s12918_s23 + $0x38] sm:$0xff] %v1613_v2  ;;  %v1827_v2 = vld [vmem:[#allocation12 + $0x88] sm:$0xff] }
 0x870   : > { %1939 = vmatprep.mubr.f32.mxu1 %v12433_v24  ;;  %10117 = vmatpush1.bf16.msra.mxu1 %v10116_v12  ;;  %v10153_v3 = vpack.c.bf16 %v1827_v2, %v1824_v1  ;;  %v2035_v1 = vld [vmem:[#allocation14 + $0x98] sm:$0xff]  ;;  %v2038_v2 = vld [vmem:[#allocation14 + $0xb0] sm:$0xff] }
 0x871   : > { %10119 = vmatprep.subr.bf16.mxu1 %v10118_v19  ;;  %v1846_v19 = vld [vmem:[#allocation12 + $0x120] sm:$0xff] }
 0x872   : > { %v10140_v16 = vpack.c.bf16 %v1849_v23, %v1846_v19  ;;  %v10188_v19 = vpack.c.bf16 %v2043_v17, %v2040_v13  ;;  %v2402_v13 = vld [vmem:[#allocation9 + $0xa0] sm:$0xff] }
 0x874   : > { %10121 = vmatpush1.bf16.msra.mxu1 %v10120_v25  ;;  %v1848_v25 = vld [vmem:[#allocation12 + $0x130] sm:$0xff] }
 0x875   : > { %10123 = vmatprep.subr.bf16.mxu1 %v10122_v37  ;;  %v10165_v37 = vpack.c.bf16 %v1851_v30, %v1848_v25  ;;  %v2046_v25 = vld [vmem:[#allocation14 + $0xf0] sm:$0xff]  ;;  %v2056_v30 = vld [vmem:[#allocation14 + $0x140] sm:$0xff] }
 0x878   : > { %10125 = vmatpush1.bf16.msra.mxu1 %v10124_v41  ;;  %v10142_v41 = vpack.c.bf16 %v1856_v40, %v1853_v38  ;;  %v2052_v38 = vld [vmem:[#allocation14 + $0x120] sm:$0xff] }
 0x879   : > { %10127 = vmatprep.subr.bf16.mxu1 %v10126_v44  ;;  %v1854_v44 = vld [vmem:[#allocation12 + $0x160] sm:$0xff] }
 0x87c   : > { %10129 = vmatpush1.bf16.msra.mxu1 %v10128_v8  ;;  %v10168_v8 = vpack.c.bf16 %v1857_v4, %v1854_v44  ;;  %v2062_v44 = vld [vmem:[#allocation14 + $0x170] sm:$0xff] }
 0x87d   : > { %10131 = vmatprep.subr.bf16.mxu1 %v10130_v26  ;;  %v10170_v26 = vpack.c.bf16 %v2020_v14, %v2017_v9  ;;  %v2061_v9 = vld [vmem:[#allocation14 + $0x168] sm:$0xff]  ;;  %v2060_v14 = vld [vmem:[#allocation14 + $0x160] sm:$0xff] }
 0x880   : > { %10133 = vmatpush1.bf16.msra.mxu1 %v10132_v21 }
 0x881   : > { %10135 = vmatprep.subr.bf16.mxu1 %v10134_v33  ;;  %v2019_v33 = vld [vmem:[#allocation14 + $0x18] sm:$0xff] }
 0x882   : > { %v10172_v49 = vpack.c.bf16 %v2019_v33, %v2016_v47  ;;  %v2243_v47 = vld [vmem:[#allocation15] sm:$0xff]  ;;  %v2245_v33 = vld [vmem:[#allocation15 + $0x10] sm:$0xff] }
 0x884   : > { %10137 = vmatpush1.bf16.msra.mxu1 %v10136_v39 }
 0x885   : > { %10139 = vmatprep.subr.bf16.mxu1 %v10138_v53  ;;  %v10174_v53 = vpack.c.bf16 %v2026_v48, %v2023_v34  ;;  %v2398_v34 = vld [vmem:[#allocation9 + $0x80] sm:$0xff]  ;;  %v10228_v48 = vpack.c.bf16 %v2245_v33, %v2243_v47  ;;  %v2264_v33 = vld [vmem:[#allocation15 + $0xa8] sm:$0xff] }
 0x888   : > { %10141 = vmatpush1.bf16.msra.mxu1 %v10140_v16  ;;  %v2049_v16 = vld [vmem:[#allocation14 + $0x108] sm:$0xff] }
 0x889   : > { %10143 = vmatprep.subr.bf16.mxu1 %v10142_v41  ;;  %v2055_v41 = vld [vmem:[#allocation14 + $0x138] sm:$0xff] }
 0x88c   : > { %10145 = vmatpush1.bf16.msra.mxu1 %v10144_v45  ;;  %v10196_v45 = vpack.c.bf16 %v2055_v41, %v2052_v38  ;;  %v2257_v38 = vld [vmem:[#allocation15 + $0x70] sm:$0xff] }
 0x88d   : > { %10171 = vmatprep.subr.bf16.mxu1 %v10170_v26  ;;  %v2063_v26 = vld [vmem:[#allocation14 + $0x178] sm:$0xff] }
 0x942   : > { %v1696_v57 = vpop.f32.mrb[6].mxu1 }
 0x943   : > { %v9093_v62 = vpop.f32.mrb[7].mxu1  ;;  %1803 = vmatprep.mubr.f32.mxu0 %v1696_v57  ;;  %v2032_v57 = vld [vmem:[#allocation14 + $0x80] sm:$0xff] }
 0x944   : > { %1804 = vmatmul.mubr.f32.vlgmr.msra.gmra.mrb[10].mxu0 %v13063_v32  ;;  %v1836_v32 = vld [vmem:[#allocation12 + $0xd0] sm:$0xff]  ;;  %v2028_v62 = vld [vmem:[#allocation14 + $0x60] sm:$0xff] }
 0x945   : > { %10148 = vmatpush3.bf16.msra.mxu0 %v10147_v56  ;;  %9126 = vmatprep.mubr.msk.f32.mxu0 %vm12432_vm0, %v12433_v24  ;;  %v10159_v12 = vpack.c.bf16 %v1839_v11, %v1836_v32  ;;  %v2029_v56 = vld [vmem:[#allocation14 + $0x68] sm:$0xff]  ;;  %v2044_v32 = vld [vmem:[#allocation14 + $0xe0] sm:$0xff]  ;;  %v10184_v11 = vpack.c.bf16 %v2037_v7, %v2034_v5 }
 0x946   : > { %10149 = vmatprep.subr.bf16.mxu0 %v12431_v59  ;;  %v10178_v61 = vpack.c.bf16 %v2032_v57, %v2029_v56  ;;  %v2250_v56 = vld [vmem:[#allocation15 + $0x38] sm:$0xff]  ;;  %v2252_v7 = vld [vmem:[#allocation15 + $0x48] sm:$0xff] }
 0x947   : > { %v10230_v57 = vpack.c.bf16 %v2250_v56, %v2248_v55  ;;  %v2392_v55 = vld [vmem:[#allocation9 + $0x50] sm:$0xff]  ;;  %v2393_v56 = vld [vmem:[#allocation9 + $0x58] sm:$0xff] }
 0x949   : > { %10151 = vmatpush3.bf16.msra.mxu0 %v10150_v63  ;;  %v2031_v63 = vld [vmem:[#allocation14 + $0x78] sm:$0xff] }
 0x94a   : > { %10152 = vmatprep.subr.bf16.mxu0 %v12431_v59 }
 0x94d   : > { %10154 = vmatpush3.bf16.msra.mxu0 %v10153_v3  ;;  %v10180_v3 = vpack.c.bf16 %v2031_v63, %v2028_v62  ;;  %v2400_v62 = vld [vmem:[#allocation9 + $0x90] sm:$0xff] }
 0x94e   : > { %10155 = vmatprep.subr.bf16.mxu0 %v12431_v59 }
 0x951   : > { %10157 = vmatpush3.bf16.msra.mxu0 %v10156_v10  ;;  %v2041_v10 = vld [vmem:[#allocation14 + $0xc8] sm:$0xff] }
 0x952   : > { %10158 = vmatprep.subr.bf16.mxu0 %v12431_v59 }
 0x955   : > { %10160 = vmatpush3.bf16.msra.mxu0 %v10159_v12  ;;  %v10186_v12 = vpack.c.bf16 %v2044_v32, %v2041_v10  ;;  %v2254_v10 = vld [vmem:[#allocation15 + $0x58] sm:$0xff] }
 0x956   : > { %10161 = vmatprep.subr.bf16.mxu0 %v12431_v59  ;;  %v10234_v32 = vpack.c.bf16 %v2254_v10, %v2252_v7  ;;  %v2394_v7 = vld [vmem:[#allocation9 + $0x60] sm:$0xff]  ;;  %v2395_v10 = vld [vmem:[#allocation9 + $0x68] sm:$0xff] }
 0x959   : > { %10163 = vmatpush3.bf16.msra.mxu0 %v10162_v18  ;;  %v2050_v18 = vld [vmem:[#allocation14 + $0x110] sm:$0xff] }
 0x95a   : > { %10164 = vmatprep.subr.bf16.mxu0 %v12431_v59 }
 0x95d   : > { %10166 = vmatpush3.bf16.msra.mxu0 %v10165_v37  ;;  %v10192_v37 = vpack.c.bf16 %v2049_v16, %v2046_v25  ;;  %v2256_v16 = vld [vmem:[#allocation15 + $0x68] sm:$0xff] }
 0x95e   : > { %10167 = vmatprep.subr.bf16.mxu0 %v12431_v59 }
 0x961   : > { %10169 = vmatpush3.bf16.msra.mxu0 %v10168_v8  ;;  %v2058_v8 = vld [vmem:[#allocation14 + $0x150] sm:$0xff] }
 0x962   : > { %10202 = vmatprep.subr.bf16.mxu0 %v12431_v59 }
 0xa17   : > { %v8191_v15 = vpop.f32.mrb[10].mxu0 }
 0xa18   : > { %v8192_v21 = vpop.f32.mrb[11].mxu0 }
 0xa19   : > { %v8193_v27 = vadd.f32 %v8192_v21, %v8191_v15  ;;  %v10200_v15 = vpack.c.bf16 %v2061_v9, %v2058_v8  ;;  %v2246_v21 = vld [vmem:[#allocation15 + $0x18] sm:$0xff]  ;;  %v2259_v9 = vld [vmem:[#allocation15 + $0x80] sm:$0xff] }
 0xa1a   : > { %v2262_v8 = vld [vmem:[#allocation15 + $0x98] sm:$0xff] }
 0xa1b   : > { %v1806_v39 = vadd.f32 %v8193_v27, %v7916_v20  ;;  %v10224_v20 = vpack.c.bf16 %v2063_v26, %v2060_v14  ;;  %v2261_v14 = vld [vmem:[#allocation15 + $0x90] sm:$0xff]  ;;  %v2406_v26 = vld [vmem:[#allocation9 + $0xc0] sm:$0xff] }
 0xa1d   : > { %v1809_v52 = vmax.f32 %v1806_v39, 0.0  ;;  %v2399_v39 = vld [vmem:[#allocation9 + $0x88] sm:$0xff] }
 0xa1f   : > { %1940 = vmatmul.mubr.f32.vlgmr.msra.gmra.mrb[8].mxu1 %v1809_v52  ;;  %9127 = vmatmul.mubr.f32.vlgmr.msra.gmra.mrb[12].mxu0 %v1809_v52  ;;  %v2383_v52 = vld [vmem:[#allocation9 + $0x8] sm:$0xff] }
 0xa20   : > { %10173 = vmatpush1.bf16.msra.mxu1 %v10172_v49  ;;  %10204 = vmatpush3.bf16.msra.mxu0 %v12998_v29  ;;  %v10182_v29 = vpack.c.bf16 %v2038_v2, %v2035_v1  ;;  %v2382_v49 = vld [vmem:[#allocation9] sm:$0xff]  ;;  %v2401_v1 = vld [vmem:[#allocation9 + $0x98] sm:$0xff]  ;;  %v2384_v2 = vld [vmem:[#allocation9 + $0x10] sm:$0xff] }
 0xa21   : > { %10175 = vmatprep.subr.bf16.mxu1 %v10174_v53  ;;  %10205 = vmatprep.subr.bf16.mxu0 %v12431_v59  ;;  %v10258_v53 = vpack.c.bf16 %v2399_v39, %v2398_v34  ;;  %v10260_v54 = vpack.c.bf16 %v2383_v52, %v2382_v49  ;;  %v2266_v34 = vld [vmem:[#allocation15 + $0xb8] sm:$0xff]  ;;  %v2263_v39 = vld [vmem:[#allocation15 + $0xa0] sm:$0xff]  ;;  %v2265_v49 = vld [vmem:[#allocation15 + $0xb0] sm:$0xff] }
 0xa22   : > { %2145 = vmatprep.mubr.f32.mxu1 %v12433_v24  ;;  %9161 = vmatprep.mubr.msk.f32.mxu0 %vm12432_vm0, %v12433_v24  ;;  %v2408_v52 = vld [vmem:[#allocation9 + $0xd0] sm:$0xff] }
 0xa24   : > { %10177 = vmatpush1.bf16.msra.mxu1 %v10176_v58  ;;  %10207 = vmatpush3.bf16.msra.mxu0 %v13001_v42  ;;  %v2047_v42 = vld [vmem:[#allocation14 + $0xf8] sm:$0xff]  ;;  %v2247_v58 = vld [vmem:[#allocation15 + $0x20] sm:$0xff] }
 0xa25   : > { %10179 = vmatprep.subr.bf16.mxu1 %v10178_v61  ;;  %10208 = vmatprep.subr.bf16.mxu0 %v12431_v59  ;;  %v10190_v23 = vpack.c.bf16 %v2050_v18, %v2047_v42  ;;  %v2249_v61 = vld [vmem:[#allocation15 + $0x30] sm:$0xff]  ;;  %v2403_v42 = vld [vmem:[#allocation9 + $0xa8] sm:$0xff]  ;;  %v2386_v18 = vld [vmem:[#allocation9 + $0x20] sm:$0xff] }
 0xa26   : > { %v10232_v63 = vpack.c.bf16 %v2249_v61, %v2247_v58  ;;  %v10280_v58 = vpack.c.bf16 %v2393_v56, %v2392_v55  ;;  %v2268_v61 = vld [vmem:[#allocation15 + $0xc8] sm:$0xff] }
 0xa28   : > { %10181 = vmatpush1.bf16.msra.mxu1 %v10180_v3  ;;  %10210 = vmatpush3.bf16.msra.mxu0 %v13008_v51  ;;  %v2053_v51 = vld [vmem:[#allocation14 + $0x128] sm:$0xff]  ;;  %v2385_v3 = vld [vmem:[#allocation9 + $0x18] sm:$0xff] }
 0xa29   : > { %10183 = vmatprep.subr.bf16.mxu1 %v10182_v29  ;;  %10211 = vmatprep.subr.bf16.mxu0 %v12431_v59  ;;  %v10194_v40 = vpack.c.bf16 %v2056_v30, %v2053_v51  ;;  %v10262_v29 = vpack.c.bf16 %v2401_v1, %v2400_v62  ;;  %v10264_v5 = vpack.c.bf16 %v2385_v3, %v2384_v2  ;;  %v2258_v51 = vld [vmem:[#allocation15 + $0x78] sm:$0xff]  ;;  %v2267_v1 = vld [vmem:[#allocation15 + $0xc0] sm:$0xff]  ;;  %v2269_v2 = vld [vmem:[#allocation15 + $0xd0] sm:$0xff] }
 0xa2a   : > { %v10238_v30 = vpack.c.bf16 %v2258_v51, %v2256_v16  ;;  %v2270_v62 = vld [vmem:[#allocation15 + $0xd8] sm:$0xff]  ;;  %v2410_v3 = vld [vmem:[#allocation9 + $0xe0] sm:$0xff]  ;;  %v2396_v16 = vld [vmem:[#allocation9 + $0x70] sm:$0xff] }
 0xa2b   : > { %v2397_v51 = vld [vmem:[#allocation9 + $0x78] sm:$0xff] }
 0xa2c   : > { %10185 = vmatpush1.bf16.msra.mxu1 %v10184_v11  ;;  %10213 = vmatpush3.bf16.msra.mxu0 %v13012_v60  ;;  %v2054_v60 = vld [vmem:[#allocation14 + $0x130] sm:$0xff]  ;;  %v2251_v11 = vld [vmem:[#allocation15 + $0x40] sm:$0xff] }
 0xa2d   : > { %10187 = vmatprep.subr.bf16.mxu1 %v10186_v12  ;;  %10214 = vmatprep.subr.bf16.mxu0 %v12431_v59  ;;  %v10221_v4 = vpack.c.bf16 %v2057_v43, %v2054_v60  ;;  %v2253_v12 = vld [vmem:[#allocation15 + $0x50] sm:$0xff]  ;;  %v2405_v60 = vld [vmem:[#allocation9 + $0xb8] sm:$0xff] }
 0xa2e   : > { %v10236_v17 = vpack.c.bf16 %v2253_v12, %v2251_v11  ;;  %v2388_v43 = vld [vmem:[#allocation9 + $0x30] sm:$0xff]  ;;  %v10284_v11 = vpack.c.bf16 %v2395_v10, %v2394_v7  ;;  %v2272_v12 = vld [vmem:[#allocation15 + $0xe8] sm:$0xff] }
 0xa30   : > { %10189 = vmatpush1.bf16.msra.mxu1 %v10188_v19  ;;  %10216 = vmatpush3.bf16.msra.mxu0 %v13016_v6  ;;  %v10198_v6 = vpack.c.bf16 %v2062_v44, %v2059_v50  ;;  %v2387_v19 = vld [vmem:[#allocation9 + $0x28] sm:$0xff]  ;;  %v2389_v50 = vld [vmem:[#allocation9 + $0x38] sm:$0xff] }
 0xa31   : > { %10191 = vmatprep.subr.bf16.mxu1 %v10190_v23  ;;  %10217 = vmatprep.subr.bf16.mxu0 %v12431_v59  ;;  %v10266_v23 = vpack.c.bf16 %v2403_v42, %v2402_v13  ;;  %v10268_v25 = vpack.c.bf16 %v2387_v19, %v2386_v18  ;;  %v2274_v13 = vld [vmem:[#allocation15 + $0xf8] sm:$0xff]  ;;  %v2271_v42 = vld [vmem:[#allocation15 + $0xe0] sm:$0xff]  ;;  %v2273_v18 = vld [vmem:[#allocation15 + $0xf0] sm:$0xff] }
 0xa32   : > { %v2412_v19 = vld [vmem:[#allocation9 + $0xf0] sm:$0xff] }
 0xa34   : > { %10193 = vmatpush1.bf16.msra.mxu1 %v10192_v37  ;;  %10219 = vmatpush3.bf16.msra.mxu0 %v13020_v22  ;;  %v2244_v22 = vld [vmem:[#allocation15 + $0x8] sm:$0xff]  ;;  %v2255_v37 = vld [vmem:[#allocation15 + $0x60] sm:$0xff] }
 0xa35   : > { %10195 = vmatprep.subr.bf16.mxu1 %v10194_v40  ;;  %10220 = vmatprep.subr.bf16.mxu0 %v12431_v59  ;;  %v10226_v27 = vpack.c.bf16 %v2246_v21, %v2244_v22  ;;  %v2404_v40 = vld [vmem:[#allocation9 + $0xb0] sm:$0xff]  ;;  %v10240_v41 = vpack.c.bf16 %v2257_v38, %v2255_v37  ;;  %v2390_v22 = vld [vmem:[#allocation9 + $0x40] sm:$0xff]  ;;  %v2391_v21 = vld [vmem:[#allocation9 + $0x48] sm:$0xff]  ;;  %v10288_v37 = vpack.c.bf16 %v2397_v51, %v2396_v16 }
 0xa36   : > { %v10270_v44 = vpack.c.bf16 %v2405_v60, %v2404_v40  ;;  %v10276_v47 = vpack.c.bf16 %v2391_v21, %v2390_v22  ;;  %v1858_v60 = vld [vmem:[%s13928_s21] sm:$0x7]  ;;  %v2507_v16 = vld [vmem:[#allocation8 + $0x38] sm:$0xff] }
 0xa38   : > { %10197 = vmatpush1.bf16.msra.mxu1 %v10196_v45  ;;  %10222 = vmatpush3.bf16.msra.mxu0 %v10221_v4  ;;  %v10272_v45 = vpack.c.bf16 %v2389_v50, %v2388_v43  ;;  %v2260_v4 = vld [vmem:[#allocation15 + $0x88] sm:$0xff]  ;;  %v1863_v43 = vrot.slane %v1858_v60, %v13042_v46 }
 0xa39   : > { %10199 = vmatprep.subr.bf16.mxu1 %v10198_v6  ;;  %10223 = vmatprep.subr.bf16.mxu0 %v12431_v59  ;;  %v10242_v6 = vpack.c.bf16 %v2262_v8, %v2260_v4 }
 0xa3c   : > { %10201 = vmatpush1.bf16.msra.mxu1 %v10200_v15  ;;  %10225 = vmatpush3.bf16.msra.mxu0 %v10224_v20  ;;  %v10244_v15 = vpack.c.bf16 %v2261_v14, %v2259_v9  ;;  %v2407_v20 = vld [vmem:[#allocation9 + $0xc8] sm:$0xff] }
 0xa3d   : > { %10227 = vmatprep.subr.bf16.mxu1 %v10226_v27  ;;  %10259 = vmatprep.subr.bf16.mxu0 %v10258_v53  ;;  %v10274_v27 = vpack.c.bf16 %v2407_v20, %v2406_v26  ;;  %v10248_v53 = vpack.c.bf16 %v2265_v49, %v2263_v39 }
 0xa3f   : > { %2146 = vmatmul.mubr.f32.vlgmr.msra.gmra.mrb[8].mxu1 %v13060_v31  ;;  %9162 = vmatmul.mubr.f32.vlgmr.msra.gmra.mrb[14].mxu0 %v13060_v31 }
 0xa40   : > { %2351 = vmatprep.mubr.f32.mxu1 %v12433_v24  ;;  %10229 = vmatpush1.bf16.msra.mxu1 %v10228_v48  ;;  %v10246_v48 = vpack.c.bf16 %v2266_v34, %v2264_v33 }
 0xa41   : > { %10261 = vmatpush3.bf16.msra.mxu0 %v10260_v54  ;;  %10231 = vmatprep.subr.bf16.mxu1 %v10230_v57  ;;  %v2409_v54 = vld [vmem:[#allocation9 + $0xd8] sm:$0xff] }
 0xa42   : > { %10263 = vmatprep.subr.bf16.mxu0 %v10262_v29  ;;  %v10278_v57 = vpack.c.bf16 %v2409_v54, %v2408_v52  ;;  %v10252_v29 = vpack.c.bf16 %v2269_v2, %v2267_v1  ;;  %v13143_v1 = vld [vmem:[%s12889_s13 + $0x10] sm:$0xff] }
 0xa44   : > { %10233 = vmatpush1.bf16.msra.mxu1 %v10232_v63  ;;  %v10250_v63 = vpack.c.bf16 %v2270_v62, %v2268_v61 }
 0xa45   : > { %10265 = vmatpush3.bf16.msra.mxu0 %v10264_v5  ;;  %10235 = vmatprep.subr.bf16.mxu1 %v10234_v32  ;;  %v2411_v5 = vld [vmem:[#allocation9 + $0xe8] sm:$0xff] }
 0xa46   : > { %10267 = vmatprep.subr.bf16.mxu0 %v10266_v23  ;;  %v10282_v32 = vpack.c.bf16 %v2411_v5, %v2410_v3  ;;  %v10256_v23 = vpack.c.bf16 %v2273_v18, %v2271_v42  ;;  %v7924_v5 = vld [vmem:[%s13924_s4] ss:$0 sm:$0xff]  ;;  %v2504_v18 = vld [vmem:[#allocation8 + $0x20] sm:$0xff] }
 0xa48   : > { %10237 = vmatpush1.bf16.msra.mxu1 %v10236_v17  ;;  %v10254_v17 = vpack.c.bf16 %v2274_v13, %v2272_v12  ;;  %v2502_v12 = vld [vmem:[#allocation8 + $0x10] sm:$0xff] }
 0xa49   : > { %10269 = vmatpush3.bf16.msra.mxu0 %v10268_v25  ;;  %10239 = vmatprep.subr.bf16.mxu1 %v10238_v30  ;;  %v2413_v25 = vld [vmem:[#allocation9 + $0xf8] sm:$0xff] }
 0xa4a   : > { %10271 = vmatprep.subr.bf16.mxu0 %v10270_v44  ;;  %v10286_v30 = vpack.c.bf16 %v2413_v25, %v2412_v19  ;;  %v1867_v44 = vrot.slane %v1858_v60, %v13050_v28  ;;  %v2505_v19 = vld [vmem:[#allocation8 + $0x28] sm:$0xff]  ;;  %v2506_v25 = vld [vmem:[#allocation8 + $0x30] sm:$0xff] }
 0xa4b   : > { %v10300_v51 = vpack.c.bf16 %v2507_v16, %v2506_v25  ;;  %v2597_v25 = vld [vmem:[#allocation11 + $0x58] sm:$0xff]  ;;  %v2614_v16 = vld [vmem:[#allocation11 + $0xe0] sm:$0xff] }
 0xa4c   : > { %10241 = vmatpush1.bf16.msra.mxu1 %v10240_v41  ;;  %v2064_v41 = vld [vmem:[%s13926_s7] sm:$0x7] }
 0xa4d   : > { %10273 = vmatpush3.bf16.msra.mxu0 %v10272_v45  ;;  %10243 = vmatprep.subr.bf16.mxu1 %v10242_v6  ;;  %v2069_v50 = vrot.slane %v2064_v41, %v13042_v46  ;;  %v2073_v45 = vrot.slane %v2064_v41, %v13050_v28  ;;  %v2077_v34 = vrot.slane %v2064_v41, %v13056_v0 }
 0xa4e   : > { %10275 = vmatprep.subr.bf16.mxu0 %v10274_v27 }
 0xa4f   : > { %v11654_v4 = vadd.f32 %v2069_v50, %v1863_v43  ;;  %v11656_v9 = vadd.f32 %v2073_v45, %v1867_v44  ;;  %v2510_v50 = vld [vmem:[#allocation8 + $0x50] sm:$0xff]  ;;  %v2511_v44 = vld [vmem:[#allocation8 + $0x58] sm:$0xff] }
 0xa50   : > { %10245 = vmatpush1.bf16.msra.mxu1 %v10244_v15  ;;  %v10306_v45 = vpack.c.bf16 %v2511_v44, %v2510_v50 }
 0xa51   : > { %10277 = vmatpush3.bf16.msra.mxu0 %v10276_v47  ;;  %10247 = vmatprep.subr.bf16.mxu1 %v10246_v48  ;;  %v1871_v48 = vrot.slane %v1858_v60, %v13056_v0 }
 0xa52   : > { %10279 = vmatprep.subr.bf16.mxu0 %v10278_v57 }
 0xa54   : > { %10249 = vmatpush1.bf16.msra.mxu1 %v10248_v53 }
 0xa55   : > { %10281 = vmatpush3.bf16.msra.mxu0 %v10280_v58  ;;  %10251 = vmatprep.subr.bf16.mxu1 %v10250_v63 }
 0xa56   : > { %10283 = vmatprep.subr.bf16.mxu0 %v10282_v32  ;;  %v2500_v32 = vld [vmem:[#allocation8] sm:$0xff] }
 0xa58   : > { %10253 = vmatpush1.bf16.msra.mxu1 %v10252_v29 }
 0xa59   : > { %10285 = vmatpush3.bf16.msra.mxu0 %v10284_v11  ;;  %10255 = vmatprep.subr.bf16.mxu1 %v10254_v17  ;;  %v2501_v11 = vld [vmem:[#allocation8 + $0x8] sm:$0xff]  ;;  %v2503_v17 = vld [vmem:[#allocation8 + $0x18] sm:$0xff] }
 0xa5a   : > { %10287 = vmatprep.subr.bf16.mxu0 %v10286_v30  ;;  %v10291_v13 = vpack.c.bf16 %v2501_v11, %v2500_v32  ;;  %v10294_v42 = vpack.c.bf16 %v2503_v17, %v2502_v12  ;;  %v2508_v30 = vld [vmem:[#allocation8 + $0x40] sm:$0xff]  ;;  %v2612_v17 = vld [vmem:[#allocation11 + $0xd0] sm:$0xff] }
 0xa5b   : > { %v2594_v12 = vld [vmem:[#allocation11 + $0x40] sm:$0xff] }
 0xa5c   : > { %10257 = vmatpush1.bf16.msra.mxu1 %v10256_v23  ;;  %v10297_v23 = vpack.c.bf16 %v2505_v19, %v2504_v18 }
 0xa5d   : > { %10290 = vmatprep.subr.bf16.mxu1 %v12431_v59  ;;  %10289 = vmatpush3.bf16.msra.mxu0 %v10288_v37  ;;  %v2509_v37 = vld [vmem:[#allocation8 + $0x48] sm:$0xff] }
 0xaf2   : > { %v2012_v38 = vpop.f32.mrb[12].mxu0 }
 0xaf3   : > { %v9128_v40 = vpop.f32.mrb[13].mxu0  ;;  %v2013_v53 = vadd.f32 %v2012_v38, %v1871_v48  ;;  %v10303_v38 = vpack.c.bf16 %v2509_v37, %v2508_v30 }
 0xb12   : > { %v2147_v8 = vpop.f32.mrb[8].mxu1  ;;  %v2218_v6 = vpop.f32.mrb[14].mxu0 }
 0xb13   : > { %v11655_v14 = vadd.f32 %v11654_v4, %v2147_v8  ;;  %v2149_v26 = vpop.f32.mrb[9].mxu1  ;;  %v9163_v15 = vpop.f32.mrb[15].mxu0  ;;  %v2219_v49 = vadd.f32 %v2218_v6, %v2077_v34  ;;  %v2512_v4 = vld [vmem:[#allocation8 + $0x60] sm:$0xff]  ;;  %v2513_v8 = vld [vmem:[#allocation8 + $0x68] sm:$0xff] }
 0xb14   : > { %v11657_v22 = vadd.f32 %v11656_v9, %v2149_v26  ;;  %v10309_v6 = vpack.c.bf16 %v2513_v8, %v2512_v4  ;;  %v2514_v9 = vld [vmem:[#allocation8 + $0x70] sm:$0xff]  ;;  %v2602_v15 = vld [vmem:[#allocation11 + $0x80] sm:$0xff]  ;;  %v2601_v4 = vld [vmem:[#allocation11 + $0x78] sm:$0xff] }
 0xb15   : > { %v7917_v20 = vmul.f32 -1.442695, %v11655_v14  ;;  %v2515_v14 = vld [vmem:[#allocation8 + $0x78] sm:$0xff] }
 0xb16   : > { %v7918_v21 = vmul.f32 -1.442695, %v11657_v22  ;;  %v10312_v26 = vpack.c.bf16 %v2515_v14, %v2514_v9  ;;  %v2586_v22 = vld [vmem:[#allocation11] sm:$0xff] }
 0xb17   : > { %11896 = vpow2.f32 %v7917_v20  ;;  %v2603_v20 = vld [vmem:[#allocation11 + $0x88] sm:$0xff] }
 0xb18   : > { %11898 = vpow2.f32 %v7918_v21  ;;  %v10314_v21 = vpack.c.bf16 %v2603_v20, %v2602_v15  ;;  %v2700_v15 = vld [vmem:[#allocation12 + $0x20] sm:$0xff] }
 0xb19   : > { %v2696_v20 = vld [vmem:[#allocation12] sm:$0xff] }
 0xb1a   : > { %10315 = vmatprep.subr.bf16.mxu0 %v10314_v21  ;;  %v2699_v21 = vld [vmem:[#allocation12 + $0x18] sm:$0xff] }
 0xb21   : > { %v11897_v27 = vpop.eup %11896 }
 0xb22   : > { %v2226_v47 = vadd.f32 1.0, %v11897_v27  ;;  %v11899_v33 = vpop.eup %11898  ;;  %v2587_v27 = vld [vmem:[#allocation11 + $0x8] sm:$0xff] }
 0xb23   : > { %v2233_v39 = vadd.f32 1.0, %v11899_v33  ;;  %v2605_v33 = vld [vmem:[#allocation11 + $0x98] sm:$0xff]  ;;  %v10316_v34 = vpack.c.bf16 %v2587_v27, %v2586_v22  ;;  %v10348_v27 = vpack.c.bf16 %v2699_v21, %v2696_v20  ;;  %v2728_v20 = vld [vmem:[#allocation12 + $0x100] sm:$0xff] }
 0xb24   : > { %11900 = vrcp.f32 %v2226_v47  ;;  %v2604_v47 = vld [vmem:[#allocation11 + $0x90] sm:$0xff] }
 0xb25   : > { %11902 = vrcp.f32 %v2233_v39  ;;  %v10318_v48 = vpack.c.bf16 %v2605_v33, %v2604_v47  ;;  %v2588_v39 = vld [vmem:[#allocation11 + $0x10] sm:$0xff]  ;;  %v2703_v47 = vld [vmem:[#allocation12 + $0x38] sm:$0xff] }
 0xb26   : > { %v2706_v33 = vld [vmem:[#allocation12 + $0x50] sm:$0xff] }
 0xb2e   : > { %v11901_v52 = vpop.eup %11900 }
 0xb2f   : > { %v2236_v54 = vmul.f32 %v11901_v52, %v2219_v49  ;;  %v11903_v56 = vpop.eup %11902  ;;  %v2589_v49 = vld [vmem:[#allocation11 + $0x18] sm:$0xff]  ;;  %v2606_v52 = vld [vmem:[#allocation11 + $0xa0] sm:$0xff] }
 0xb30   : > { %v2239_v57 = vsub.f32 1.0, %v11903_v56  ;;  %v2241_v62 = vmul.f32 %v11903_v56, %v13060_v31  ;;  %v2590_v56 = vld [vmem:[#allocation11 + $0x20] sm:$0xff] }
 0xb31   : > { %v2237_v55 = vadd.f32 %v2236_v54, %v2013_v53  ;;  %v2607_v53 = vld [vmem:[#allocation11 + $0xa8] sm:$0xff]  ;;  %v10320_v54 = vpack.c.bf16 %v2589_v49, %v2588_v39 }
 0xb32   : > { %v2705_v39 = vld [vmem:[#allocation12 + $0x48] sm:$0xff] }
 0xb33   : > { %11904 = vtanh.f32 %v2237_v55  ;;  %v10322_v55 = vpack.c.bf16 %v2607_v53, %v2606_v52  ;;  %v2712_v52 = vld [vmem:[#allocation12 + $0x80] sm:$0xff] }
 0xb3d   : > { %v11905_v58 = vpop.eup %11904 }
 0xb3e   : > { %v2240_v61 = vmul.f32 %v11905_v58, %v2239_v57  ;;  %v2591_v57 = vld [vmem:[#allocation11 + $0x28] sm:$0xff]  ;;  %v2608_v58 = vld [vmem:[#allocation11 + $0xb0] sm:$0xff] }
 0xb40   : > { %v13140_v63 = vadd.f32 %v2241_v62, %v2240_v61  ;;  %v2609_v61 = vld [vmem:[#allocation11 + $0xb8] sm:$0xff]  ;;  %v10324_v62 = vpack.c.bf16 %v2591_v57, %v2590_v56 }
 0xb41   : > { %v2715_v57 = vld [vmem:[#allocation12 + $0x98] sm:$0xff] }
 0xb42   : > { %2352 = vmatmul.mubr.f32.vlgmr.msra.gmra.mrb[10].mxu1 %v13140_v63  ;;  %7921 = vst [vmem:[%s12918_s23 + $0x30] sm:$0xff] %v13140_v63  ;;  %2485 = vmatprep.mubr.f32.mxu0 %v13140_v63 }
 0xb43   : > { %2486 = vmatmul.mubr.f32.vlgmr.msra.gmra.mrb[16].mxu0 %v13143_v1  ;;  %9196 = vmatprep.mubr.msk.f32.mxu1 %vm12432_vm0, %v12433_v24 }
 0xb44   : > { %10292 = vmatpush3.bf16.msra.mxu1 %v10291_v13  ;;  %10317 = vmatpush3.bf16.msra.mxu0 %v10316_v34  ;;  %v2595_v13 = vld [vmem:[#allocation11 + $0x48] sm:$0xff]  ;;  %v2702_v34 = vld [vmem:[#allocation12 + $0x30] sm:$0xff] }
 0xb45   : > { %10293 = vmatprep.subr.bf16.mxu1 %v12431_v59  ;;  %10319 = vmatprep.subr.bf16.mxu0 %v10318_v48  ;;  %v10332_v18 = vpack.c.bf16 %v2595_v13, %v2594_v12  ;;  %v10350_v48 = vpack.c.bf16 %v2706_v33, %v2703_v47  ;;  %v10352_v49 = vpack.c.bf16 %v2705_v39, %v2702_v34  ;;  %v2727_v13 = vld [vmem:[#allocation12 + $0xf8] sm:$0xff]  ;;  %v2734_v33 = vld [vmem:[#allocation12 + $0x130] sm:$0xff] }
 0xb46   : > { %v2735_v47 = vld [vmem:[#allocation12 + $0x138] sm:$0xff] }
 0xb48   : > { %10295 = vmatpush3.bf16.msra.mxu1 %v10294_v42  ;;  %10321 = vmatpush3.bf16.msra.mxu0 %v10320_v54  ;;  %v2613_v42 = vld [vmem:[#allocation11 + $0xd8] sm:$0xff]  ;;  %v2708_v54 = vld [vmem:[#allocation12 + $0x60] sm:$0xff] }
 0xb49   : > { %10296 = vmatprep.subr.bf16.mxu1 %v12431_v59  ;;  %10323 = vmatprep.subr.bf16.mxu0 %v10322_v55  ;;  %v10334_v19 = vpack.c.bf16 %v2613_v42, %v2612_v17  ;;  %v2711_v55 = vld [vmem:[#allocation12 + $0x78] sm:$0xff]  ;;  %v2730_v17 = vld [vmem:[#allocation12 + $0x110] sm:$0xff] }
 0xb4a   : > { %v10356_v56 = vpack.c.bf16 %v2711_v55, %v2708_v54  ;;  %v10366_v42 = vpack.c.bf16 %v2730_v17, %v2727_v13  ;;  %v2741_v54 = vld [vmem:[#allocation12 + $0x168] sm:$0xff]  ;;  %v2740_v55 = vld [vmem:[#allocation12 + $0x160] sm:$0xff]  ;;  %v2909_v17 = vld [vmem:[#allocation14 + $0x38] sm:$0xff] }
 0xb4b   : > { %v2907_v13 = vld [vmem:[#allocation14 + $0x28] sm:$0xff] }
 0xb4c   : > { %10298 = vmatpush3.bf16.msra.mxu1 %v10297_v23  ;;  %10325 = vmatpush3.bf16.msra.mxu0 %v10324_v62  ;;  %v2596_v23 = vld [vmem:[#allocation11 + $0x50] sm:$0xff] }
 0xb4d   : > { %10299 = vmatprep.subr.bf16.mxu1 %v12431_v59  ;;  %v10336_v30 = vpack.c.bf16 %v2597_v25, %v2596_v23  ;;  %v2714_v62 = vld [vmem:[#allocation12 + $0x90] sm:$0xff]  ;;  %v2733_v25 = vld [vmem:[#allocation12 + $0x128] sm:$0xff] }
 0xb50   : > { %10301 = vmatpush3.bf16.msra.mxu1 %v10300_v51  ;;  %v2615_v51 = vld [vmem:[#allocation11 + $0xe8] sm:$0xff] }
 0xb51   : > { %10302 = vmatprep.subr.bf16.mxu1 %v12431_v59  ;;  %v10338_v37 = vpack.c.bf16 %v2615_v51, %v2614_v16  ;;  %v2736_v16 = vld [vmem:[#allocation12 + $0x140] sm:$0xff] }
 0xb52   : > { %v10370_v51 = vpack.c.bf16 %v2736_v16, %v2733_v25  ;;  %v2908_v25 = vld [vmem:[#allocation14 + $0x30] sm:$0xff] }
 0xb54   : > { %10304 = vmatpush3.bf16.msra.mxu1 %v10303_v38  ;;  %v2598_v38 = vld [vmem:[#allocation11 + $0x60] sm:$0xff] }
 0xb55   : > { %10305 = vmatprep.subr.bf16.mxu1 %v12431_v59 }
 0xb58   : > { %10307 = vmatpush3.bf16.msra.mxu1 %v10306_v45  ;;  %v2600_v45 = vld [vmem:[#allocation11 + $0x70] sm:$0xff] }
 0xb59   : > { %10308 = vmatprep.subr.bf16.mxu1 %v12431_v59  ;;  %v10344_v8 = vpack.c.bf16 %v2601_v4, %v2600_v45  ;;  %v2710_v45 = vld [vmem:[#allocation12 + $0x70] sm:$0xff]  ;;  %v2713_v4 = vld [vmem:[#allocation12 + $0x88] sm:$0xff] }
 0xb5c   : > { %10310 = vmatpush3.bf16.msra.mxu1 %v10309_v6 }
 0xb5d   : > { %10311 = vmatprep.subr.bf16.mxu1 %v12431_v59 }
 0xb60   : > { %10313 = vmatpush3.bf16.msra.mxu1 %v10312_v26  ;;  %v2697_v26 = vld [vmem:[#allocation12 + $0x8] sm:$0xff] }
 0xb61   : > { %v10346_v22 = vpack.c.bf16 %v2700_v15, %v2697_v26  ;;  %v2725_v26 = vld [vmem:[#allocation12 + $0xe8] sm:$0xff] }
 0xb63   : > { %10347 = vmatprep.subr.bf16.mxu1 %v10346_v22  ;;  %v2731_v22 = vld [vmem:[#allocation12 + $0x118] sm:$0xff] }
 0xb64   : > { %v10394_v21 = vpack.c.bf16 %v2731_v22, %v2728_v20  ;;  %v2923_v22 = vld [vmem:[#allocation14 + $0xa8] sm:$0xff] }
 0xc15   : > { %v13152_v2 = vpop.f32.mrb[10].mxu1 }
 0xc16   : > { %v13154_v3 = vpop.f32.mrb[11].mxu1  ;;  %v8260_v31 = vpop.f32.mrb[16].mxu0 }
 0xc17   : > { %v8261_v29 = vpop.f32.mrb[17].mxu0 }
 0xc18   : > { %v8262_v7 = vadd.f32 %v8261_v29, %v8260_v31  ;;  %v10326_v31 = vpack.c.bf16 %v2609_v61, %v2608_v58  ;;  %v2592_v29 = vld [vmem:[#allocation11 + $0x30] sm:$0xff] }
 0xc19   : > { %v2718_v58 = vld [vmem:[#allocation12 + $0xb0] sm:$0xff] }
 0xc1a   : > { %v2488_v10 = vadd.f32 %v8262_v7, %v7924_v5  ;;  %v2593_v5 = vld [vmem:[#allocation11 + $0x38] sm:$0xff]  ;;  %v2610_v7 = vld [vmem:[#allocation11 + $0xc0] sm:$0xff]  ;;  %10327 = vmatprep.subr.bf16.mxu0 %v10326_v31  ;;  %v10358_v61 = vpack.c.bf16 %v2718_v58, %v2715_v57  ;;  %v2717_v31 = vld [vmem:[#allocation12 + $0xa8] sm:$0xff] }
 0xc1b   : > { %v10328_v32 = vpack.c.bf16 %v2593_v5, %v2592_v29  ;;  %v10360_v29 = vpack.c.bf16 %v2717_v31, %v2714_v62  ;;  %v2721_v5 = vld [vmem:[#allocation12 + $0xc8] sm:$0xff]  ;;  %v2743_v57 = vld [vmem:[#allocation12 + $0x178] sm:$0xff]  ;;  %v2906_v62 = vld [vmem:[#allocation14 + $0x20] sm:$0xff] }
 0xc1c   : > { %2491 = vmax.xlane.f32.xlu0 %v2488_v10  ;;  %v10400_v58 = vpack.c.bf16 %v2743_v57, %v2740_v55  ;;  %v2936_v55 = vld [vmem:[#allocation14 + $0x110] sm:$0xff] }
 0xc1d   : > { %10329 = vmatpush3.bf16.msra.mxu0 %v10328_v32  ;;  %v2720_v32 = vld [vmem:[#allocation12 + $0xc0] sm:$0xff] }
 0xca9   : > { %v2492_v40 = vpop.xlane.xlu0 %2491 }
 0xcaa   : > { %v2493_v41 = vsub.f32 %v2488_v10, %v2492_v40  ;;  %v2611_v10 = vld [vmem:[#allocation11 + $0xc8] sm:$0xff] }
 0xcab   : > { %v10330_v11 = vpack.c.bf16 %v2611_v10, %v2610_v7  ;;  %v2599_v40 = vld [vmem:[#allocation11 + $0x68] sm:$0xff]  ;;  %v2724_v7 = vld [vmem:[#allocation12 + $0xe0] sm:$0xff] }
 0xcac   : > { %v2494_v60 = vmul.f32 1.442695, %v2493_v41  ;;  %v2616_v41 = vld [vmem:[#allocation11 + $0xf0] sm:$0xff]  ;;  %v10340_v50 = vpack.c.bf16 %v2599_v40, %v2598_v38  ;;  %v10362_v10 = vpack.c.bf16 %v2724_v7, %v2721_v5  ;;  %v7925_v5 = vld [vmem:[%s13925_s22] ss:$0 sm:$0xff] }
 0xcad   : > { %10331 = vmatprep.subr.bf16.mxu0 %v10330_v11  ;;  %v2723_v11 = vld [vmem:[#allocation12 + $0xd8] sm:$0xff] }
 0xcae   : > { %11906 = vpow2.f32 %v2494_v60  ;;  %10333 = vmatpush3.bf16.msra.mxu0 %v10332_v18  ;;  %v2617_v60 = vld [vmem:[#allocation11 + $0xf8] sm:$0xff]  ;;  %v10364_v12 = vpack.c.bf16 %v2723_v11, %v2720_v32  ;;  %v2726_v18 = vld [vmem:[#allocation12 + $0xf0] sm:$0xff] }
 0xcaf   : > { %10335 = vmatprep.subr.bf16.mxu0 %v10334_v19  ;;  %v10342_v44 = vpack.c.bf16 %v2617_v60, %v2616_v41  ;;  %v2729_v19 = vld [vmem:[#allocation12 + $0x108] sm:$0xff]  ;;  %v2704_v41 = vld [vmem:[#allocation12 + $0x40] sm:$0xff]  ;;  %v2707_v60 = vld [vmem:[#allocation12 + $0x58] sm:$0xff] }
 0xcb0   : > { %v10368_v23 = vpack.c.bf16 %v2729_v19, %v2726_v18  ;;  %v2905_v11 = vld [vmem:[#allocation14 + $0x18] sm:$0xff] }
 0xcb2   : > { %10337 = vmatpush3.bf16.msra.mxu0 %v10336_v30  ;;  %v2698_v30 = vld [vmem:[#allocation12 + $0x10] sm:$0xff] }
 0xcb3   : > { %10339 = vmatprep.subr.bf16.mxu0 %v10338_v37  ;;  %v2701_v37 = vld [vmem:[#allocation12 + $0x28] sm:$0xff] }
 0xcb4   : > { %v10379_v38 = vpack.c.bf16 %v2701_v37, %v2698_v30  ;;  %v2911_v30 = vld [vmem:[#allocation14 + $0x48] sm:$0xff]  ;;  %v2910_v37 = vld [vmem:[#allocation14 + $0x40] sm:$0xff] }
 0xcb6   : > { %10341 = vmatpush3.bf16.msra.mxu0 %v10340_v50 }
 0xcb7   : > { %10343 = vmatprep.subr.bf16.mxu0 %v10342_v44  ;;  %v10382_v44 = vpack.c.bf16 %v2707_v60, %v2704_v41  ;;  %v2918_v41 = vld [vmem:[#allocation14 + $0x80] sm:$0xff]  ;;  %v10408_v60 = vpack.c.bf16 %v2911_v30, %v2908_v25  ;;  %v2947_v30 = vld [vmem:[#allocation14 + $0x168] sm:$0xff] }
 0xcb8   : > { %v13164_v43 = vpop.eup %11906 }
 0xcb9   : > { %2496 = vadd.xlane.f32.xlu1 %v13164_v43 }
 0xcba   : > { %10345 = vmatpush3.bf16.msra.mxu0 %v10344_v8  ;;  %v10385_v8 = vpack.c.bf16 %v2713_v4, %v2710_v45  ;;  %v2917_v4 = vld [vmem:[#allocation14 + $0x78] sm:$0xff] }
 0xcbb   : > { %10378 = vmatprep.subr.bf16.mxu0 %v12431_v59 }
 0xd46   : > { %v2497_v6 = vpop.xlane.xlu1 %2496 }
 0xd47   : > { %11908 = vrcp.f32 %v2497_v6  ;;  %v2716_v6 = vld [vmem:[#allocation12 + $0xa0] sm:$0xff] }
 0xd51   : > { %v11909_v9 = vpop.eup %11908 }
 0xd52   : > { %v2499_v14 = vmul.f32 %v11909_v9, %v13164_v43  ;;  %v2709_v43 = vld [vmem:[#allocation12 + $0x68] sm:$0xff]  ;;  %v2719_v9 = vld [vmem:[#allocation12 + $0xb8] sm:$0xff] }
 0xd53   : > { %v10354_v53 = vpack.c.bf16 %v2712_v52, %v2709_v43  ;;  %v2742_v43 = vld [vmem:[#allocation12 + $0x170] sm:$0xff] }
 0xd54   : > { %9197 = vmatmul.mubr.f32.vlgmr.msra.gmra.mrb[12].mxu1 %v2499_v14  ;;  %7931 = vst [vmem:[%s12918_s23 + $0x58] sm:$0xff] %v2499_v14  ;;  %v10388_v14 = vpack.c.bf16 %v2719_v9, %v2716_v6  ;;  %v2919_v6 = vld [vmem:[#allocation14 + $0x88] sm:$0xff]  ;;  %v2921_v9 = vld [vmem:[#allocation14 + $0x98] sm:$0xff] }
 0xd55   : > { %2825 = vmatprep.mubr.f32.mxu1 %v12433_v24  ;;  %10349 = vmatpush1.bf16.msra.mxu1 %v10348_v27  ;;  %v2732_v27 = vld [vmem:[#allocation12 + $0x120] sm:$0xff] }
 0xd56   : > { %10351 = vmatprep.subr.bf16.mxu1 %v10350_v48  ;;  %v10372_v34 = vpack.c.bf16 %v2735_v47, %v2732_v27  ;;  %v2737_v48 = vld [vmem:[#allocation12 + $0x148] sm:$0xff]  ;;  %v2925_v27 = vld [vmem:[#allocation14 + $0xb8] sm:$0xff] }
 0xd57   : > { %v10397_v39 = vpack.c.bf16 %v2737_v48, %v2734_v33  ;;  %v2927_v47 = vld [vmem:[#allocation14 + $0xc8] sm:$0xff]  ;;  %v2930_v33 = vld [vmem:[#allocation14 + $0xe0] sm:$0xff] }
 0xd59   : > { %10353 = vmatpush1.bf16.msra.mxu1 %v10352_v49  ;;  %v2739_v49 = vld [vmem:[#allocation12 + $0x158] sm:$0xff] }
 0xd5a   : > { %10355 = vmatprep.subr.bf16.mxu1 %v10354_v53  ;;  %v10374_v52 = vpack.c.bf16 %v2742_v43, %v2739_v49  ;;  %v2738_v53 = vld [vmem:[#allocation12 + $0x150] sm:$0xff]  ;;  %v10418_v49 = vpack.c.bf16 %v2930_v33, %v2927_v47  ;;  %v2929_v43 = vld [vmem:[#allocation14 + $0xd8] sm:$0xff] }
 0xd5b   : > { %v3286_v47 = vld [vmem:[#allocation9 + $0x90] sm:$0xff] }
 0xd5d   : > { %10357 = vmatpush1.bf16.msra.mxu1 %v10356_v56  ;;  %v10376_v56 = vpack.c.bf16 %v2741_v54, %v2738_v53  ;;  %v2931_v53 = vld [vmem:[#allocation14 + $0xe8] sm:$0xff]  ;;  %v2933_v54 = vld [vmem:[#allocation14 + $0xf8] sm:$0xff] }
 0xd5e   : > { %10359 = vmatprep.subr.bf16.mxu1 %v10358_v61  ;;  %v2903_v61 = vld [vmem:[#allocation14 + $0x8] sm:$0xff] }
 0xd5f   : > { %v10402_v31 = vpack.c.bf16 %v2906_v62, %v2903_v61  ;;  %v10422_v61 = vpack.c.bf16 %v2936_v55, %v2933_v54  ;;  %v2935_v62 = vld [vmem:[#allocation14 + $0x108] sm:$0xff]  ;;  %v3137_v55 = vld [vmem:[#allocation15 + $0x40] sm:$0xff] }
 0xd61   : > { %10361 = vmatpush1.bf16.msra.mxu1 %v10360_v29 }
 0xd62   : > { %10363 = vmatprep.subr.bf16.mxu1 %v10362_v10  ;;  %v2902_v10 = vld [vmem:[#allocation14] sm:$0xff] }
 0xd63   : > { %v10404_v19 = vpack.c.bf16 %v2905_v11, %v2902_v10  ;;  %v2938_v11 = vld [vmem:[#allocation14 + $0x120] sm:$0xff] }
 0xd65   : > { %10365 = vmatpush1.bf16.msra.mxu1 %v10364_v12  ;;  %v2904_v12 = vld [vmem:[#allocation14 + $0x10] sm:$0xff] }
 0xd66   : > { %10367 = vmatprep.subr.bf16.mxu1 %v10366_v42  ;;  %v2912_v42 = vld [vmem:[#allocation14 + $0x50] sm:$0xff] }
 0xd69   : > { %10369 = vmatpush1.bf16.msra.mxu1 %v10368_v23  ;;  %v10435_v23 = vpack.c.bf16 %v2907_v13, %v2904_v12  ;;  %v2941_v13 = vld [vmem:[#allocation14 + $0x138] sm:$0xff] }
 0xd6a   : > { %10371 = vmatprep.subr.bf16.mxu1 %v10370_v51  ;;  %v10406_v51 = vpack.c.bf16 %v2912_v42, %v2909_v17  ;;  %v2940_v17 = vld [vmem:[#allocation14 + $0x130] sm:$0xff]  ;;  %v2943_v42 = vld [vmem:[#allocation14 + $0x148] sm:$0xff] }
 0xd6b   : > { %v10453_v25 = vpack.c.bf16 %v2943_v42, %v2940_v17  ;;  %v3291_v42 = vld [vmem:[#allocation9 + $0xb8] sm:$0xff] }
 0xd6d   : > { %10373 = vmatpush1.bf16.msra.mxu1 %v10372_v34 }
 0xd6e   : > { %10375 = vmatprep.subr.bf16.mxu1 %v10374_v52  ;;  %v2928_v52 = vld [vmem:[#allocation14 + $0xd0] sm:$0xff] }
 0xd6f   : > { %v10447_v57 = vpack.c.bf16 %v2931_v53, %v2928_v52  ;;  %v3138_v52 = vld [vmem:[#allocation15 + $0x48] sm:$0xff]  ;;  %v3140_v53 = vld [vmem:[#allocation15 + $0x58] sm:$0xff] }
 0xd70   : > { %v10466_v54 = vpack.c.bf16 %v3140_v53, %v3138_v52  ;;  %v3297_v52 = vld [vmem:[#allocation9 + $0xe8] sm:$0xff]  ;;  %v3280_v53 = vld [vmem:[#allocation9 + $0x60] sm:$0xff] }
 0xd71   : > { %10377 = vmatpush1.bf16.msra.mxu1 %v10376_v56 }
 0xd72   : > { %10403 = vmatprep.subr.bf16.mxu1 %v10402_v31  ;;  %v2934_v31 = vld [vmem:[#allocation14 + $0x100] sm:$0xff] }
 0xe27   : > { %v2582_v40 = vpop.f32.mrb[12].mxu1 }
 0xe28   : > { %v9198_v50 = vpop.f32.mrb[13].mxu1  ;;  %2689 = vmatprep.mubr.f32.mxu0 %v2582_v40  ;;  %v2915_v40 = vld [vmem:[#allocation14 + $0x68] sm:$0xff] }
 0xe29   : > { %2690 = vmatmul.mubr.f32.vlgmr.msra.gmra.mrb[18].mxu0 %v13143_v1  ;;  %v2722_v1 = vld [vmem:[#allocation12 + $0xd0] sm:$0xff]  ;;  %v10410_v45 = vpack.c.bf16 %v2918_v41, %v2915_v40 }
 0xe2a   : > { %10380 = vmatpush3.bf16.msra.mxu0 %v10379_v38  ;;  %9231 = vmatprep.mubr.msk.f32.mxu0 %vm12432_vm0, %v12433_v24  ;;  %v10391_v15 = vpack.c.bf16 %v2725_v26, %v2722_v1  ;;  %v2913_v38 = vld [vmem:[#allocation14 + $0x58] sm:$0xff] }
 0xe2b   : > { %10381 = vmatprep.subr.bf16.mxu0 %v12431_v59  ;;  %v10438_v50 = vpack.c.bf16 %v2913_v38, %v2910_v37  ;;  %v2946_v37 = vld [vmem:[#allocation14 + $0x160] sm:$0xff]  ;;  %v2949_v38 = vld [vmem:[#allocation14 + $0x178] sm:$0xff] }
 0xe2c   : > { %v10456_v41 = vpack.c.bf16 %v2949_v38, %v2946_v37  ;;  %v3145_v37 = vld [vmem:[#allocation15 + $0x80] sm:$0xff]  ;;  %v3147_v38 = vld [vmem:[#allocation15 + $0x90] sm:$0xff] }
 0xe2e   : > { %10383 = vmatpush3.bf16.msra.mxu0 %v10382_v44  ;;  %v2914_v44 = vld [vmem:[#allocation14 + $0x60] sm:$0xff] }
 0xe2f   : > { %10384 = vmatprep.subr.bf16.mxu0 %v12431_v59  ;;  %v10412_v1 = vpack.c.bf16 %v2917_v4, %v2914_v44  ;;  %v3131_v4 = vld [vmem:[#allocation15 + $0x10] sm:$0xff] }
 0xe32   : > { %10386 = vmatpush3.bf16.msra.mxu0 %v10385_v8  ;;  %v2916_v8 = vld [vmem:[#allocation14 + $0x70] sm:$0xff] }
 0xe33   : > { %10387 = vmatprep.subr.bf16.mxu0 %v12431_v59  ;;  %v10441_v26 = vpack.c.bf16 %v2919_v6, %v2916_v8  ;;  %v3284_v8 = vld [vmem:[#allocation9 + $0x80] sm:$0xff] }
 0xe36   : > { %10389 = vmatpush3.bf16.msra.mxu0 %v10388_v14  ;;  %v2924_v14 = vld [vmem:[#allocation14 + $0xb0] sm:$0xff] }
 0xe37   : > { %10390 = vmatprep.subr.bf16.mxu0 %v12431_v59  ;;  %v10414_v20 = vpack.c.bf16 %v2924_v14, %v2921_v9  ;;  %v3285_v9 = vld [vmem:[#allocation9 + $0x88] sm:$0xff]  ;;  %v3268_v14 = vld [vmem:[#allocation9] sm:$0xff] }
 0xe3a   : > { %10392 = vmatpush3.bf16.msra.mxu0 %v10391_v15  ;;  %v2920_v15 = vld [vmem:[#allocation14 + $0x90] sm:$0xff] }
 0xe3b   : > { %10393 = vmatprep.subr.bf16.mxu0 %v12431_v59  ;;  %v10416_v34 = vpack.c.bf16 %v2923_v22, %v2920_v15  ;;  %v3136_v22 = vld [vmem:[#allocation15 + $0x38] sm:$0xff] }
 0xe3e   : > { %10395 = vmatpush3.bf16.msra.mxu0 %v10394_v21  ;;  %v2922_v21 = vld [vmem:[#allocation14 + $0xa0] sm:$0xff] }
 0xe3f   : > { %10396 = vmatprep.subr.bf16.mxu0 %v12431_v59  ;;  %v10444_v48 = vpack.c.bf16 %v2925_v27, %v2922_v21  ;;  %v3133_v21 = vld [vmem:[#allocation15 + $0x20] sm:$0xff]  ;;  %v3135_v27 = vld [vmem:[#allocation15 + $0x30] sm:$0xff] }
 0xe40   : > { %v10464_v33 = vpack.c.bf16 %v3135_v27, %v3133_v21 }
 0xe42   : > { %10398 = vmatpush3.bf16.msra.mxu0 %v10397_v39  ;;  %v2926_v39 = vld [vmem:[#allocation14 + $0xc0] sm:$0xff] }
 0xe43   : > { %10399 = vmatprep.subr.bf16.mxu0 %v12431_v59  ;;  %v10420_v56 = vpack.c.bf16 %v2929_v43, %v2926_v39  ;;  %v3271_v39 = vld [vmem:[#allocation9 + $0x18] sm:$0xff] }
 0xe46   : > { %10401 = vmatpush3.bf16.msra.mxu0 %v10400_v58  ;;  %v2932_v58 = vld [vmem:[#allocation14 + $0xf0] sm:$0xff] }
 0xe47   : > { %10434 = vmatprep.subr.bf16.mxu0 %v12431_v59  ;;  %v10424_v10 = vpack.c.bf16 %v2935_v62, %v2932_v58  ;;  %v3272_v62 = vld [vmem:[#allocation9 + $0x20] sm:$0xff] }
 0xefc   : > { %v8312_v29 = vpop.f32.mrb[18].mxu0 }
 0xefd   : > { %v8313_v7 = vpop.f32.mrb[19].mxu0 }
 0xefe   : > { %v8314_v32 = vadd.f32 %v8313_v7, %v8312_v29  ;;  %v2937_v29 = vld [vmem:[#allocation14 + $0x118] sm:$0xff]  ;;  %v2942_v7 = vld [vmem:[#allocation14 + $0x140] sm:$0xff] }
 0xf00   : > { %v2692_v18 = vadd.f32 %v8314_v32, %v7925_v5  ;;  %v2939_v5 = vld [vmem:[#allocation14 + $0x128] sm:$0xff]  ;;  %v10450_v32 = vpack.c.bf16 %v2937_v29, %v2934_v31 }
 0xf01   : > { %v10426_v12 = vpack.c.bf16 %v2942_v7, %v2939_v5  ;;  %v3273_v31 = vld [vmem:[#allocation9 + $0x28] sm:$0xff] }
 0xf02   : > { %v2695_v16 = vmax.f32 %v2692_v18, 0.0  ;;  %v2945_v18 = vld [vmem:[#allocation14 + $0x158] sm:$0xff]  ;;  %v10500_v5 = vpack.c.bf16 %v3273_v31, %v3272_v62  ;;  %v3142_v7 = vld [vmem:[#allocation15 + $0x68] sm:$0xff]  ;;  %v3157_v62 = vld [vmem:[#allocation15 + $0xe0] sm:$0xff] }
 0xf03   : > { %v3159_v31 = vld [vmem:[#allocation15 + $0xf0] sm:$0xff] }
 0xf04   : > { %2826 = vmatmul.mubr.f32.vlgmr.msra.gmra.mrb[14].mxu1 %v2695_v16  ;;  %9232 = vmatmul.mubr.f32.vlgmr.msra.gmra.mrb[20].mxu0 %v2695_v16  ;;  %v2944_v16 = vld [vmem:[#allocation14 + $0x150] sm:$0xff] }
 0xf05   : > { %10405 = vmatpush1.bf16.msra.mxu1 %v10404_v19  ;;  %10436 = vmatpush3.bf16.msra.mxu0 %v10435_v23  ;;  %v2948_v19 = vld [vmem:[#allocation14 + $0x170] sm:$0xff]  ;;  %v10428_v23 = vpack.c.bf16 %v2941_v13, %v2938_v11  ;;  %v10432_v40 = vpack.c.bf16 %v2947_v30, %v2944_v16  ;;  %v3141_v11 = vld [vmem:[#allocation15 + $0x60] sm:$0xff]  ;;  %v3146_v16 = vld [vmem:[#allocation15 + $0x88] sm:$0xff] }
 0xf06   : > { %10407 = vmatprep.subr.bf16.mxu1 %v10406_v51  ;;  %10437 = vmatprep.subr.bf16.mxu0 %v12431_v59  ;;  %v10430_v51 = vpack.c.bf16 %v2948_v19, %v2945_v18  ;;  %v3290_v13 = vld [vmem:[#allocation9 + $0xb0] sm:$0xff]  ;;  %v3275_v19 = vld [vmem:[#allocation9 + $0x38] sm:$0xff] }
 0xf07   : > { %3031 = vmatprep.mubr.f32.mxu1 %v12433_v24  ;;  %9266 = vmatprep.mubr.msk.f32.mxu0 %vm12432_vm0, %v12433_v24  ;;  %v3274_v18 = vld [vmem:[#allocation9 + $0x30] sm:$0xff] }
 0xf09   : > { %10409 = vmatpush1.bf16.msra.mxu1 %v10408_v60  ;;  %10439 = vmatpush3.bf16.msra.mxu0 %v10438_v50  ;;  %v3130_v60 = vld [vmem:[#allocation15 + $0x8] sm:$0xff]  ;;  %v3132_v50 = vld [vmem:[#allocation15 + $0x18] sm:$0xff] }
 0xf0a   : > { %10411 = vmatprep.subr.bf16.mxu1 %v10410_v45  ;;  %10440 = vmatprep.subr.bf16.mxu0 %v12431_v59  ;;  %v10458_v44 = vpack.c.bf16 %v3132_v50, %v3130_v60  ;;  %v3129_v45 = vld [vmem:[#allocation15] sm:$0xff]  ;;  %v3293_v60 = vld [vmem:[#allocation9 + $0xc8] sm:$0xff] }
 0xf0b   : > { %v10460_v6 = vpack.c.bf16 %v3131_v4, %v3129_v45  ;;  %v3276_v50 = vld [vmem:[#allocation9 + $0x40] sm:$0xff] }
 0xf0d   : > { %10413 = vmatpush1.bf16.msra.mxu1 %v10412_v1  ;;  %10442 = vmatpush3.bf16.msra.mxu0 %v10441_v26  ;;  %v3269_v1 = vld [vmem:[#allocation9 + $0x8] sm:$0xff]  ;;  %v10490_v26 = vpack.c.bf16 %v3285_v9, %v3284_v8 }
 0xf0e   : > { %10415 = vmatprep.subr.bf16.mxu1 %v10414_v20  ;;  %10443 = vmatprep.subr.bf16.mxu0 %v12431_v59  ;;  %v10492_v15 = vpack.c.bf16 %v3269_v1, %v3268_v14  ;;  %v3134_v20 = vld [vmem:[#allocation15 + $0x28] sm:$0xff]  ;;  %v3149_v14 = vld [vmem:[#allocation15 + $0xa0] sm:$0xff]  ;;  %v3151_v1 = vld [vmem:[#allocation15 + $0xb0] sm:$0xff] }
 0xf0f   : > { %v3150_v8 = vld [vmem:[#allocation15 + $0xa8] sm:$0xff] }
 0xf11   : > { %10417 = vmatpush1.bf16.msra.mxu1 %v10416_v34  ;;  %10445 = vmatpush3.bf16.msra.mxu0 %v10444_v48  ;;  %v3287_v34 = vld [vmem:[#allocation9 + $0x98] sm:$0xff]  ;;  %v3270_v48 = vld [vmem:[#allocation9 + $0x10] sm:$0xff] }
 0xf12   : > { %10419 = vmatprep.subr.bf16.mxu1 %v10418_v49  ;;  %10446 = vmatprep.subr.bf16.mxu0 %v12431_v59  ;;  %v10494_v49 = vpack.c.bf16 %v3287_v34, %v3286_v47  ;;  %v10496_v43 = vpack.c.bf16 %v3271_v39, %v3270_v48  ;;  %v3154_v47 = vld [vmem:[#allocation15 + $0xc8] sm:$0xff]  ;;  %v3153_v48 = vld [vmem:[#allocation15 + $0xc0] sm:$0xff]  ;;  %v3155_v39 = vld [vmem:[#allocation15 + $0xd0] sm:$0xff] }
 0xf15   : > { %10421 = vmatpush1.bf16.msra.mxu1 %v10420_v56  ;;  %10448 = vmatpush3.bf16.msra.mxu0 %v10447_v57  ;;  %v3139_v56 = vld [vmem:[#allocation15 + $0x50] sm:$0xff]  ;;  %v3288_v57 = vld [vmem:[#allocation9 + $0xa0] sm:$0xff] }
 0xf16   : > { %10423 = vmatprep.subr.bf16.mxu1 %v10422_v61  ;;  %10449 = vmatprep.subr.bf16.mxu0 %v12431_v59  ;;  %v10468_v58 = vpack.c.bf16 %v3139_v56, %v3137_v55  ;;  %v3289_v61 = vld [vmem:[#allocation9 + $0xa8] sm:$0xff] }
 0xf17   : > { %v10498_v29 = vpack.c.bf16 %v3289_v61, %v3288_v57  ;;  %v3158_v57 = vld [vmem:[#allocation15 + $0xe8] sm:$0xff] }
 0xf19   : > { %10425 = vmatpush1.bf16.msra.mxu1 %v10424_v10  ;;  %10451 = vmatpush3.bf16.msra.mxu0 %v10450_v32  ;;  %v3144_v10 = vld [vmem:[#allocation15 + $0x78] sm:$0xff] }
 0xf1a   : > { %10427 = vmatprep.subr.bf16.mxu1 %v10426_v12  ;;  %10452 = vmatprep.subr.bf16.mxu0 %v12431_v59  ;;  %v10470_v32 = vpack.c.bf16 %v3144_v10, %v3142_v7  ;;  %v3143_v12 = vld [vmem:[#allocation15 + $0x70] sm:$0xff]  ;;  %v3299_v7 = vld [vmem:[#allocation9 + $0xf8] sm:$0xff] }
 0xf1b   : > { %v10472_v17 = vpack.c.bf16 %v3143_v12, %v3141_v11  ;;  %v3282_v10 = vld [vmem:[#allocation9 + $0x70] sm:$0xff] }
 0xf1d   : > { %10429 = vmatpush1.bf16.msra.mxu1 %v10428_v23  ;;  %10454 = vmatpush3.bf16.msra.mxu0 %v10453_v25  ;;  %v10502_v23 = vpack.c.bf16 %v3291_v42, %v3290_v13  ;;  %v10504_v25 = vpack.c.bf16 %v3275_v19, %v3274_v18  ;;  %v2950_v42 = vld [vmem:[%s13926_s7] sm:$0x7] }
 0xf1e   : > { %10431 = vmatprep.subr.bf16.mxu1 %v10430_v51  ;;  %10455 = vmatprep.subr.bf16.mxu0 %v12431_v59  ;;  %v3148_v51 = vld [vmem:[#allocation15 + $0x98] sm:$0xff]  ;;  %v2744_v18 = vld [vmem:[%s13928_s21] sm:$0x7] }
 0xf1f   : > { %v10474_v30 = vpack.c.bf16 %v3148_v51, %v3146_v16  ;;  %v2749_v19 = vrot.slane %v2744_v18, %v13042_v46  ;;  %v2959_v16 = vrot.slane %v2950_v42, %v13050_v28 }
 0xf21   : > { %10433 = vmatpush1.bf16.msra.mxu1 %v10432_v40  ;;  %10457 = vmatpush3.bf16.msra.mxu0 %v10456_v41  ;;  %v3292_v40 = vld [vmem:[#allocation9 + $0xc0] sm:$0xff]  ;;  %v10476_v41 = vpack.c.bf16 %v3147_v38, %v3145_v37 }
 0xf22   : > { %10459 = vmatprep.subr.bf16.mxu1 %v10458_v44  ;;  %10491 = vmatprep.subr.bf16.mxu0 %v10490_v26  ;;  %v3277_v44 = vld [vmem:[#allocation9 + $0x48] sm:$0xff]  ;;  %v10506_v45 = vpack.c.bf16 %v3293_v60, %v3292_v40  ;;  %v3294_v26 = vld [vmem:[#allocation9 + $0xd0] sm:$0xff] }
 0xf23   : > { %v10508_v4 = vpack.c.bf16 %v3277_v44, %v3276_v50 }
 0xf24   : > { %3032 = vmatmul.mubr.f32.vlgmr.msra.gmra.mrb[14].mxu1 %v13140_v63  ;;  %9267 = vmatmul.mubr.f32.vlgmr.msra.gmra.mrb[22].mxu0 %v13140_v63  ;;  %v10462_v63 = vpack.c.bf16 %v3136_v22, %v3134_v20  ;;  %v3295_v20 = vld [vmem:[#allocation9 + $0xd8] sm:$0xff]  ;;  %v3278_v22 = vld [vmem:[#allocation9 + $0x50] sm:$0xff] }
 0xf25   : > { %3237 = vmatprep.mubr.f32.mxu1 %v12433_v24  ;;  %10461 = vmatpush1.bf16.msra.mxu1 %v10460_v6  ;;  %v3152_v6 = vld [vmem:[#allocation15 + $0xb8] sm:$0xff]  ;;  %v10510_v21 = vpack.c.bf16 %v3295_v20, %v3294_v26 }
 0xf26   : > { %10493 = vmatpush3.bf16.msra.mxu0 %v10492_v15  ;;  %10463 = vmatprep.subr.bf16.mxu1 %v10462_v63  ;;  %v10478_v9 = vpack.c.bf16 %v3152_v6, %v3150_v8  ;;  %v10480_v15 = vpack.c.bf16 %v3151_v1, %v3149_v14  ;;  %v3279_v63 = vld [vmem:[#allocation9 + $0x58] sm:$0xff]  ;;  %v2757_v14 = vrot.slane %v2744_v18, %v13056_v0 }
 0xf27   : > { %10495 = vmatprep.subr.bf16.mxu0 %v10494_v49  ;;  %v10512_v27 = vpack.c.bf16 %v3279_v63, %v3278_v22  ;;  %v3296_v49 = vld [vmem:[#allocation9 + $0xe0] sm:$0xff] }
 0xf28   : > { %v10514_v55 = vpack.c.bf16 %v3297_v52, %v3296_v49  ;;  %v13217_v49 = vld [vmem:[%s12889_s13 + $0x18] sm:$0xff] }
 0xf29   : > { %10465 = vmatpush1.bf16.msra.mxu1 %v10464_v33  ;;  %v3156_v33 = vld [vmem:[#allocation15 + $0xd8] sm:$0xff] }
 0xf2a   : > { %10497 = vmatpush3.bf16.msra.mxu0 %v10496_v43  ;;  %10467 = vmatprep.subr.bf16.mxu1 %v10466_v54  ;;  %v10482_v34 = vpack.c.bf16 %v3156_v33, %v3154_v47  ;;  %v10484_v43 = vpack.c.bf16 %v3155_v39, %v3153_v48  ;;  %v3281_v54 = vld [vmem:[#allocation9 + $0x68] sm:$0xff] }
 0xf2b   : > { %10499 = vmatprep.subr.bf16.mxu0 %v10498_v29  ;;  %v10516_v56 = vpack.c.bf16 %v3281_v54, %v3280_v53  ;;  %v3298_v29 = vld [vmem:[#allocation9 + $0xf0] sm:$0xff] }
 0xf2c   : > { %v10518_v11 = vpack.c.bf16 %v3299_v7, %v3298_v29  ;;  %v3389_v29 = vld [vmem:[#allocation8 + $0x18] sm:$0xff]  ;;  %v3390_v7 = vld [vmem:[#allocation8 + $0x20] sm:$0xff] }
 0xf2d   : > { %10469 = vmatpush1.bf16.msra.mxu1 %v10468_v58  ;;  %v3160_v58 = vld [vmem:[#allocation15 + $0xf8] sm:$0xff] }
 0xf2e   : > { %10501 = vmatpush3.bf16.msra.mxu0 %v10500_v5  ;;  %10471 = vmatprep.subr.bf16.mxu1 %v10470_v32  ;;  %v10486_v61 = vpack.c.bf16 %v3160_v58, %v3158_v57  ;;  %v10488_v5 = vpack.c.bf16 %v3159_v31, %v3157_v62  ;;  %v3283_v32 = vld [vmem:[#allocation9 + $0x78] sm:$0xff]  ;;  %v3386_v58 = vld [vmem:[#allocation8] sm:$0xff]  ;;  %v3388_v62 = vld [vmem:[#allocation8 + $0x10] sm:$0xff] }
 0xf2f   : > { %10503 = vmatprep.subr.bf16.mxu0 %v10502_v23  ;;  %v10520_v12 = vpack.c.bf16 %v3283_v32, %v3282_v10  ;;  %v2955_v23 = vrot.slane %v2950_v42, %v13042_v46  ;;  %v3391_v10 = vld [vmem:[#allocation8 + $0x28] sm:$0xff] }
 0xf30   : > { %v10529_v32 = vpack.c.bf16 %v3391_v10, %v3390_v7  ;;  %v3498_v7 = vld [vmem:[#allocation11 + $0xd0] sm:$0xff]  ;;  %v3499_v10 = vld [vmem:[#allocation11 + $0xd8] sm:$0xff] }
 0xf31   : > { %10473 = vmatpush1.bf16.msra.mxu1 %v10472_v17  ;;  %v11658_v51 = vadd.f32 %v2955_v23, %v2749_v19 }
 0xf32   : > { %10505 = vmatpush3.bf16.msra.mxu0 %v10504_v25  ;;  %10475 = vmatprep.subr.bf16.mxu1 %v10474_v30  ;;  %v2753_v25 = vrot.slane %v2744_v18, %v13050_v28 }
 0xf33   : > { %10507 = vmatprep.subr.bf16.mxu0 %v10506_v45 }
 0xf34   : > { %v11660_v38 = vadd.f32 %v2959_v16, %v2753_v25 }
 0xf35   : > { %10477 = vmatpush1.bf16.msra.mxu1 %v10476_v41 }
 0xf36   : > { %10509 = vmatpush3.bf16.msra.mxu0 %v10508_v4  ;;  %10479 = vmatprep.subr.bf16.mxu1 %v10478_v9  ;;  %v2963_v9 = vrot.slane %v2950_v42, %v13056_v0  ;;  %v3395_v42 = vld [vmem:[#allocation8 + $0x48] sm:$0xff] }
 0xf37   : > { %10511 = vmatprep.subr.bf16.mxu0 %v10510_v21 }
 0xf39   : > { %10481 = vmatpush1.bf16.msra.mxu1 %v10480_v15 }
 0xf3a   : > { %10513 = vmatpush3.bf16.msra.mxu0 %v10512_v27  ;;  %10483 = vmatprep.subr.bf16.mxu1 %v10482_v34  ;;  %v12039_v34 = vld [vmem:[%s12918_s23 + $0x30] sm:$0xff] }
 0xf3b   : > { %10515 = vmatprep.subr.bf16.mxu0 %v10514_v55  ;;  %v7933_v55 = vld [vmem:[%s13924_s4] ss:$0 sm:$0xff] }
 0xf3d   : > { %10485 = vmatpush1.bf16.msra.mxu1 %v10484_v43 }
 0xf3e   : > { %10517 = vmatpush3.bf16.msra.mxu0 %v10516_v56  ;;  %10487 = vmatprep.subr.bf16.mxu1 %v10486_v61  ;;  %v3387_v61 = vld [vmem:[#allocation8 + $0x8] sm:$0xff] }
 0xf3f   : > { %10519 = vmatprep.subr.bf16.mxu0 %v10518_v11  ;;  %v10523_v31 = vpack.c.bf16 %v3387_v61, %v3386_v58  ;;  %v3392_v11 = vld [vmem:[#allocation8 + $0x30] sm:$0xff]  ;;  %v3496_v58 = vld [vmem:[#allocation11 + $0xc0] sm:$0xff]  ;;  %v3497_v61 = vld [vmem:[#allocation11 + $0xc8] sm:$0xff] }
 0xf41   : > { %10489 = vmatpush1.bf16.msra.mxu1 %v10488_v5  ;;  %v10526_v5 = vpack.c.bf16 %v3389_v29, %v3388_v62  ;;  %v3480_v29 = vld [vmem:[#allocation11 + $0x40] sm:$0xff] }
 0xf42   : > { %10522 = vmatprep.subr.bf16.mxu1 %v12431_v59  ;;  %10521 = vmatpush3.bf16.msra.mxu0 %v10520_v12  ;;  %v3393_v12 = vld [vmem:[#allocation8 + $0x38] sm:$0xff] }
 0xfd7   : > { %v2898_v13 = vpop.f32.mrb[20].mxu0 }
 0xfd8   : > { %v9233_v17 = vpop.f32.mrb[21].mxu0  ;;  %v2899_v20 = vadd.f32 %v2898_v13, %v2757_v14  ;;  %v10532_v13 = vpack.c.bf16 %v3393_v12, %v3392_v11  ;;  %v3490_v14 = vld [vmem:[#allocation11 + $0x90] sm:$0xff]  ;;  %v10566_v11 = vpack.c.bf16 %v3499_v10, %v3498_v7  ;;  %v3613_v10 = vld [vmem:[#allocation12 + $0xf8] sm:$0xff] }
 0xfd9   : > { %v3394_v17 = vld [vmem:[#allocation8 + $0x40] sm:$0xff]  ;;  %v3482_v12 = vld [vmem:[#allocation11 + $0x50] sm:$0xff] }
 0xfda   : > { %v10535_v18 = vpack.c.bf16 %v3395_v42, %v3394_v17  ;;  %v3500_v17 = vld [vmem:[#allocation11 + $0xe0] sm:$0xff]  ;;  %v3501_v42 = vld [vmem:[#allocation11 + $0xe8] sm:$0xff] }
 0xff7   : > { %v3033_v30 = vpop.f32.mrb[14].mxu1  ;;  %v3104_v37 = vpop.f32.mrb[22].mxu0 }
 0xff8   : > { %v11659_v40 = vadd.f32 %v11658_v51, %v3033_v30  ;;  %v3035_v41 = vpop.f32.mrb[15].mxu1  ;;  %v9268_v60 = vpop.f32.mrb[23].mxu0  ;;  %v3105_v26 = vadd.f32 %v3104_v37, %v2963_v9  ;;  %v3396_v51 = vld [vmem:[#allocation8 + $0x50] sm:$0xff]  ;;  %v3397_v30 = vld [vmem:[#allocation8 + $0x58] sm:$0xff]  ;;  %v3473_v9 = vld [vmem:[#allocation11 + $0x8] sm:$0xff] }
 0xff9   : > { %v11661_v44 = vadd.f32 %v11660_v38, %v3035_v41  ;;  %v10538_v37 = vpack.c.bf16 %v3397_v30, %v3396_v51  ;;  %v3398_v38 = vld [vmem:[#allocation8 + $0x60] sm:$0xff]  ;;  %v3400_v60 = vld [vmem:[#allocation8 + $0x70] sm:$0xff]  ;;  %v3503_v30 = vld [vmem:[#allocation11 + $0xf8] sm:$0xff] }
 0xffa   : > { %v7926_v50 = vmul.f32 -1.442695, %v11659_v40  ;;  %v3399_v40 = vld [vmem:[#allocation8 + $0x68] sm:$0xff]  ;;  %v3502_v51 = vld [vmem:[#allocation11 + $0xf0] sm:$0xff] }
 0xffb   : > { %v7927_v45 = vmul.f32 -1.442695, %v11661_v44  ;;  %v10541_v41 = vpack.c.bf16 %v3399_v40, %v3398_v38  ;;  %v10574_v38 = vpack.c.bf16 %v3503_v30, %v3502_v51  ;;  %v3486_v40 = vld [vmem:[#allocation11 + $0x70] sm:$0xff] }
 0xffc   : > { %11910 = vpow2.f32 %v7926_v50  ;;  %v3401_v50 = vld [vmem:[#allocation8 + $0x78] sm:$0xff] }
 0xffd   : > { %11912 = vpow2.f32 %v7927_v45  ;;  %v10544_v44 = vpack.c.bf16 %v3401_v50, %v3400_v60  ;;  %v3488_v45 = vld [vmem:[#allocation11 + $0x80] sm:$0xff] }
0x1006   : > { %v11911_v4 = vpop.eup %11910 }
0x1007   : > { %v3112_v8 = vadd.f32 1.0, %v11911_v4  ;;  %v11913_v6 = vpop.eup %11912  ;;  %v3489_v4 = vld [vmem:[#allocation11 + $0x88] sm:$0xff] }
0x1008   : > { %v3119_v1 = vadd.f32 1.0, %v11913_v6  ;;  %v10546_v6 = vpack.c.bf16 %v3489_v4, %v3488_v45  ;;  %v3583_v4 = vld [vmem:[#allocation12 + $0x8] sm:$0xff] }
0x1009   : > { %11914 = vrcp.f32 %v3112_v8  ;;  %v3472_v8 = vld [vmem:[#allocation11] sm:$0xff] }
0x100a   : > { %11916 = vrcp.f32 %v3119_v1  ;;  %v3491_v1 = vld [vmem:[#allocation11 + $0x98] sm:$0xff]  ;;  %10547 = vmatprep.subr.bf16.mxu0 %v10546_v6  ;;  %v3582_v6 = vld [vmem:[#allocation12] sm:$0xff] }
0x1013   : > { %v11915_v15 = vpop.eup %11914 }
0x1014   : > { %v3122_v22 = vmul.f32 %v11915_v15, %v3105_v26  ;;  %v11917_v21 = vpop.eup %11916  ;;  %v10548_v26 = vpack.c.bf16 %v3473_v9, %v3472_v8  ;;  %v10550_v15 = vpack.c.bf16 %v3491_v1, %v3490_v14  ;;  %v3586_v8 = vld [vmem:[#allocation12 + $0x20] sm:$0xff]  ;;  %v3585_v14 = vld [vmem:[#allocation12 + $0x18] sm:$0xff] }
0x1015   : > { %v3125_v27 = vsub.f32 1.0, %v11917_v21  ;;  %v3127_v48 = vmul.f32 %v12039_v34, %v11917_v21  ;;  %v3493_v21 = vld [vmem:[#allocation11 + $0xa8] sm:$0xff]  ;;  %v10578_v9 = vpack.c.bf16 %v3586_v8, %v3583_v4  ;;  %v10580_v1 = vpack.c.bf16 %v3585_v14, %v3582_v6  ;;  %v3605_v4 = vld [vmem:[#allocation12 + $0xb8] sm:$0xff]  ;;  %v3614_v14 = vld [vmem:[#allocation12 + $0x100] sm:$0xff] }
0x1016   : > { %v3123_v63 = vadd.f32 %v3122_v22, %v2899_v20  ;;  %v3474_v20 = vld [vmem:[#allocation11 + $0x10] sm:$0xff]  ;;  %v3475_v22 = vld [vmem:[#allocation11 + $0x18] sm:$0xff]  ;;  %v3477_v34 = vld [vmem:[#allocation11 + $0x28] sm:$0xff] }
0x1017   : > { %v3611_v6 = vld [vmem:[#allocation12 + $0xe8] sm:$0xff] }
0x1018   : > { %11918 = vtanh.f32 %v3123_v63  ;;  %v3492_v63 = vld [vmem:[#allocation11 + $0xa0] sm:$0xff] }
0x1022   : > { %v11919_v47 = vpop.eup %11918 }
0x1023   : > { %v3126_v33 = vmul.f32 %v11919_v47, %v3125_v27  ;;  %v10552_v27 = vpack.c.bf16 %v3475_v22, %v3474_v20  ;;  %v10554_v47 = vpack.c.bf16 %v3493_v21, %v3492_v63  ;;  %v3588_v20 = vld [vmem:[#allocation12 + $0x30] sm:$0xff]  ;;  %v3591_v63 = vld [vmem:[#allocation12 + $0x48] sm:$0xff] }
0x1024   : > { %v10584_v21 = vpack.c.bf16 %v3591_v63, %v3588_v20  ;;  %v3621_v20 = vld [vmem:[#allocation12 + $0x138] sm:$0xff] }
0x1025   : > { %v13214_v39 = vadd.f32 %v3127_v48, %v3126_v33  ;;  %v3476_v33 = vld [vmem:[#allocation11 + $0x20] sm:$0xff]  ;;  %v3494_v48 = vld [vmem:[#allocation11 + $0xb0] sm:$0xff] }
0x1027   : > { %3238 = vmatmul.mubr.f32.vlgmr.msra.gmra.mrb[16].mxu1 %v13214_v39  ;;  %7930 = vst [vmem:[%s12918_s23 + $0x50] sm:$0xff] %v13214_v39  ;;  %3371 = vmatprep.mubr.f32.mxu0 %v13214_v39 }
0x1028   : > { %3372 = vmatmul.mubr.f32.vlgmr.msra.gmra.mrb[24].mxu0 %v13217_v49  ;;  %9301 = vmatprep.mubr.msk.f32.mxu1 %vm12432_vm0, %v12433_v24 }
0x1029   : > { %10524 = vmatpush3.bf16.msra.mxu1 %v10523_v31  ;;  %10549 = vmatpush3.bf16.msra.mxu0 %v10548_v26  ;;  %v10562_v31 = vpack.c.bf16 %v3497_v61, %v3496_v58  ;;  %v3589_v26 = vld [vmem:[#allocation12 + $0x38] sm:$0xff]  ;;  %v3607_v61 = vld [vmem:[#allocation12 + $0xc8] sm:$0xff] }
0x102a   : > { %10525 = vmatprep.subr.bf16.mxu1 %v12431_v59  ;;  %10551 = vmatprep.subr.bf16.mxu0 %v10550_v15  ;;  %v3592_v15 = vld [vmem:[#allocation12 + $0x50] sm:$0xff] }
0x102b   : > { %v10582_v22 = vpack.c.bf16 %v3592_v15, %v3589_v26  ;;  %v3618_v15 = vld [vmem:[#allocation12 + $0x120] sm:$0xff] }
0x102c   : > { %v10604_v63 = vpack.c.bf16 %v3621_v20, %v3618_v15  ;;  %v3809_v15 = vld [vmem:[#allocation14 + $0xa8] sm:$0xff]  ;;  %v3808_v20 = vld [vmem:[#allocation14 + $0xa0] sm:$0xff] }
0x102d   : > { %10527 = vmatpush3.bf16.msra.mxu1 %v10526_v5  ;;  %10553 = vmatpush3.bf16.msra.mxu0 %v10552_v27  ;;  %v3481_v5 = vld [vmem:[#allocation11 + $0x48] sm:$0xff]  ;;  %v3598_v27 = vld [vmem:[#allocation12 + $0x80] sm:$0xff] }
0x102e   : > { %10528 = vmatprep.subr.bf16.mxu1 %v12431_v59  ;;  %10555 = vmatprep.subr.bf16.mxu0 %v10554_v47 }
0x1031   : > { %10530 = vmatpush3.bf16.msra.mxu1 %v10529_v32  ;;  %v10564_v32 = vpack.c.bf16 %v3481_v5, %v3480_v29  ;;  %v3606_v29 = vld [vmem:[#allocation12 + $0xc0] sm:$0xff]  ;;  %v3609_v5 = vld [vmem:[#allocation12 + $0xd8] sm:$0xff] }
0x1032   : > { %10531 = vmatprep.subr.bf16.mxu1 %v12431_v59  ;;  %v10596_v7 = vpack.c.bf16 %v3609_v5, %v3606_v29  ;;  %v3788_v5 = vld [vmem:[#allocation14] sm:$0xff] }
0x1035   : > { %10533 = vmatpush3.bf16.msra.mxu1 %v10532_v13  ;;  %v3483_v13 = vld [vmem:[#allocation11 + $0x58] sm:$0xff] }
0x1036   : > { %10534 = vmatprep.subr.bf16.mxu1 %v12431_v59 }
0x1039   : > { %10536 = vmatpush3.bf16.msra.mxu1 %v10535_v18  ;;  %v10568_v18 = vpack.c.bf16 %v3483_v13, %v3482_v12  ;;  %v3612_v12 = vld [vmem:[#allocation12 + $0xf0] sm:$0xff]  ;;  %v3615_v13 = vld [vmem:[#allocation12 + $0x108] sm:$0xff] }
0x103a   : > { %10537 = vmatprep.subr.bf16.mxu1 %v12431_v59 }
0x103d   : > { %10539 = vmatpush3.bf16.msra.mxu1 %v10538_v37 }
0x103e   : > { %10540 = vmatprep.subr.bf16.mxu1 %v12431_v59 }
0x1041   : > { %10542 = vmatpush3.bf16.msra.mxu1 %v10541_v41  ;;  %v3487_v41 = vld [vmem:[#allocation11 + $0x78] sm:$0xff] }
0x1042   : > { %10543 = vmatprep.subr.bf16.mxu1 %v12431_v59  ;;  %v10576_v60 = vpack.c.bf16 %v3487_v41, %v3486_v40 }
0x1045   : > { %10545 = vmatpush3.bf16.msra.mxu1 %v10544_v44 }
0x1046   : > { %10579 = vmatprep.subr.bf16.mxu1 %v10578_v9 }
0x10fa   : > { %v13226_v43 = vpop.f32.mrb[16].mxu1 }
0x10fb   : > { %v13228_v52 = vpop.f32.mrb[17].mxu1  ;;  %v8381_v53 = vpop.f32.mrb[24].mxu0 }
0x10fc   : > { %v8382_v54 = vpop.f32.mrb[25].mxu0 }
0x10fd   : > { %v8383_v56 = vadd.f32 %v8382_v54, %v8381_v53  ;;  %v3495_v53 = vld [vmem:[#allocation11 + $0xb8] sm:$0xff]  ;;  %v10556_v54 = vpack.c.bf16 %v3477_v34, %v3476_v33  ;;  %v3594_v33 = vld [vmem:[#allocation12 + $0x60] sm:$0xff] }
0x10fe   : > { %v3597_v34 = vld [vmem:[#allocation12 + $0x78] sm:$0xff] }
0x10ff   : > { %v3374_v57 = vadd.f32 %v8383_v56, %v7933_v55  ;;  %v10558_v55 = vpack.c.bf16 %v3495_v53, %v3494_v48  ;;  %v3478_v56 = vld [vmem:[#allocation11 + $0x30] sm:$0xff]  ;;  %10557 = vmatpush3.bf16.msra.mxu0 %v10556_v54  ;;  %v10588_v48 = vpack.c.bf16 %v3597_v34, %v3594_v33  ;;  %v3601_v53 = vld [vmem:[#allocation12 + $0x98] sm:$0xff] }
0x1100   : > { %v3604_v54 = vld [vmem:[#allocation12 + $0xb0] sm:$0xff] }
0x1101   : > { %3377 = vmax.xlane.f32.xlu0 %v3374_v57  ;;  %10559 = vmatprep.subr.bf16.mxu0 %v10558_v55  ;;  %v10590_v55 = vpack.c.bf16 %v3604_v54, %v3601_v53  ;;  %v3624_v34 = vld [vmem:[#allocation12 + $0x150] sm:$0xff]  ;;  %v3626_v53 = vld [vmem:[#allocation12 + $0x160] sm:$0xff] }
0x118e   : > { %v3378_v19 = vpop.xlane.xlu0 %3377 }
0x118f   : > { %v3379_v23 = vsub.f32 %v3374_v57, %v3378_v19  ;;  %v3479_v57 = vld [vmem:[#allocation11 + $0x38] sm:$0xff]  ;;  %v10570_v19 = vpack.c.bf16 %v3501_v42, %v3500_v17  ;;  %v10600_v17 = vpack.c.bf16 %v3615_v13, %v3612_v12  ;;  %v3619_v42 = vld [vmem:[#allocation12 + $0x128] sm:$0xff]  ;;  %v3798_v13 = vld [vmem:[#allocation14 + $0x50] sm:$0xff] }
0x1190   : > { %v10560_v62 = vpack.c.bf16 %v3479_v57, %v3478_v56  ;;  %v3600_v56 = vld [vmem:[#allocation12 + $0x90] sm:$0xff]  ;;  %v3603_v57 = vld [vmem:[#allocation12 + $0xa8] sm:$0xff]  ;;  %v3795_v12 = vld [vmem:[#allocation14 + $0x38] sm:$0xff] }
0x1191   : > { %v3380_v25 = vmul.f32 1.442695, %v3379_v23  ;;  %v3484_v23 = vld [vmem:[#allocation11 + $0x60] sm:$0xff]  ;;  %v10592_v58 = vpack.c.bf16 %v3603_v57, %v3600_v56  ;;  %v3789_v57 = vld [vmem:[#allocation14 + $0x8] sm:$0xff] }
0x1192   : > { %10561 = vmatpush3.bf16.msra.mxu0 %v10560_v62  ;;  %v3610_v62 = vld [vmem:[#allocation12 + $0xe0] sm:$0xff] }
0x1193   : > { %11920 = vpow2.f32 %v3380_v25  ;;  %10563 = vmatprep.subr.bf16.mxu0 %v10562_v31  ;;  %v3485_v25 = vld [vmem:[#allocation11 + $0x68] sm:$0xff]  ;;  %v10594_v31 = vpack.c.bf16 %v3610_v62, %v3607_v61 }
0x1194   : > { %v10572_v37 = vpack.c.bf16 %v3485_v25, %v3484_v23  ;;  %v3584_v23 = vld [vmem:[#allocation12 + $0x10] sm:$0xff]  ;;  %v3587_v25 = vld [vmem:[#allocation12 + $0x28] sm:$0xff] }
0x1195   : > { %v10611_v51 = vpack.c.bf16 %v3587_v25, %v3584_v23  ;;  %v10638_v25 = vpack.c.bf16 %v3798_v13, %v3795_v12  ;;  %v3827_v13 = vld [vmem:[#allocation14 + $0x138] sm:$0xff] }
0x1196   : > { %10565 = vmatpush3.bf16.msra.mxu0 %v10564_v32  ;;  %v3616_v32 = vld [vmem:[#allocation12 + $0x110] sm:$0xff] }
0x1197   : > { %10567 = vmatprep.subr.bf16.mxu0 %v10566_v11  ;;  %v10598_v11 = vpack.c.bf16 %v3616_v32, %v3613_v10  ;;  %v3791_v10 = vld [vmem:[#allocation14 + $0x18] sm:$0xff]  ;;  %v3790_v32 = vld [vmem:[#allocation14 + $0x10] sm:$0xff] }
0x119a   : > { %10569 = vmatpush3.bf16.msra.mxu0 %v10568_v18  ;;  %v3622_v18 = vld [vmem:[#allocation12 + $0x140] sm:$0xff] }
0x119b   : > { %10571 = vmatprep.subr.bf16.mxu0 %v10570_v19  ;;  %v10602_v19 = vpack.c.bf16 %v3622_v18, %v3619_v42  ;;  %v10636_v42 = vpack.c.bf16 %v3791_v10, %v3788_v5  ;;  %v3825_v5 = vld [vmem:[#allocation14 + $0x128] sm:$0xff] }
0x119d   : > { %v13238_v16 = vpop.eup %11920 }
0x119e   : > { %3382 = vadd.xlane.f32.xlu1 %v13238_v16  ;;  %10573 = vmatpush3.bf16.msra.mxu0 %v10572_v37  ;;  %v3590_v37 = vld [vmem:[#allocation12 + $0x40] sm:$0xff] }
0x119f   : > { %10575 = vmatprep.subr.bf16.mxu0 %v10574_v38  ;;  %v3593_v38 = vld [vmem:[#allocation12 + $0x58] sm:$0xff] }
0x11a0   : > { %v10614_v41 = vpack.c.bf16 %v3593_v38, %v3590_v37  ;;  %v3799_v37 = vld [vmem:[#allocation14 + $0x58] sm:$0xff]  ;;  %v3801_v38 = vld [vmem:[#allocation14 + $0x68] sm:$0xff] }
0x11a2   : > { %10577 = vmatpush3.bf16.msra.mxu0 %v10576_v60  ;;  %v3596_v60 = vld [vmem:[#allocation12 + $0x70] sm:$0xff] }
0x11a3   : > { %10610 = vmatprep.subr.bf16.mxu0 %v12431_v59 }
0x122b   : > { %v3383_v50 = vpop.xlane.xlu1 %3382 }
0x122c   : > { %11922 = vrcp.f32 %v3383_v50  ;;  %v3599_v50 = vld [vmem:[#allocation12 + $0x88] sm:$0xff] }
0x1236   : > { %v11923_v44 = vpop.eup %11922 }
0x1237   : > { %v3385_v45 = vmul.f32 %v11923_v44, %v13238_v16  ;;  %v3595_v16 = vld [vmem:[#allocation12 + $0x68] sm:$0xff]  ;;  %v10617_v44 = vpack.c.bf16 %v3599_v50, %v3596_v60  ;;  %v3800_v50 = vld [vmem:[#allocation14 + $0x60] sm:$0xff] }
0x1238   : > { %v10586_v47 = vpack.c.bf16 %v3598_v27, %v3595_v16  ;;  %v3625_v27 = vld [vmem:[#allocation12 + $0x158] sm:$0xff] }
0x1239   : > { %9302 = vmatmul.mubr.f32.vlgmr.msra.gmra.mrb[18].mxu1 %v3385_v45  ;;  %7940 = vst [vmem:[%s12918_s23 + $0x78] sm:$0xff] %v3385_v45  ;;  %v3602_v45 = vld [vmem:[#allocation12 + $0xa0] sm:$0xff] }
0x123a   : > { %3711 = vmatprep.mubr.f32.mxu1 %v12433_v24  ;;  %10581 = vmatpush1.bf16.msra.mxu1 %v10580_v1  ;;  %v10620_v8 = vpack.c.bf16 %v3605_v4, %v3602_v45  ;;  %v3617_v1 = vld [vmem:[#allocation12 + $0x118] sm:$0xff]  ;;  %v3802_v4 = vld [vmem:[#allocation14 + $0x70] sm:$0xff] }
0x123b   : > { %10583 = vmatprep.subr.bf16.mxu1 %v10582_v22  ;;  %v10626_v26 = vpack.c.bf16 %v3617_v1, %v3614_v14  ;;  %v3620_v22 = vld [vmem:[#allocation12 + $0x130] sm:$0xff]  ;;  %v3803_v45 = vld [vmem:[#allocation14 + $0x78] sm:$0xff] }
0x123c   : > { %v3806_v1 = vld [vmem:[#allocation14 + $0x90] sm:$0xff] }
0x123e   : > { %10585 = vmatpush1.bf16.msra.mxu1 %v10584_v21  ;;  %v3623_v21 = vld [vmem:[#allocation12 + $0x148] sm:$0xff] }
0x123f   : > { %10587 = vmatprep.subr.bf16.mxu1 %v10586_v47  ;;  %v10629_v16 = vpack.c.bf16 %v3623_v21, %v3620_v22  ;;  %v3628_v47 = vld [vmem:[#allocation12 + $0x170] sm:$0xff]  ;;  %v3811_v22 = vld [vmem:[#allocation14 + $0xb8] sm:$0xff]  ;;  %v3816_v21 = vld [vmem:[#allocation14 + $0xe0] sm:$0xff] }
0x1240   : > { %v10606_v33 = vpack.c.bf16 %v3628_v47, %v3625_v27  ;;  %v10676_v27 = vpack.c.bf16 %v3811_v22, %v3808_v20  ;;  %v3812_v47 = vld [vmem:[#allocation14 + $0xc0] sm:$0xff]  ;;  %v4020_v20 = vld [vmem:[#allocation15 + $0x28] sm:$0xff]  ;;  %v4022_v22 = vld [vmem:[#allocation15 + $0x38] sm:$0xff] }
0x1242   : > { %10589 = vmatpush1.bf16.msra.mxu1 %v10588_v48  ;;  %v3627_v48 = vld [vmem:[#allocation12 + $0x168] sm:$0xff] }
0x1243   : > { %10591 = vmatprep.subr.bf16.mxu1 %v10590_v55  ;;  %v10608_v54 = vpack.c.bf16 %v3627_v48, %v3624_v34  ;;  %v3629_v55 = vld [vmem:[#allocation12 + $0x178] sm:$0xff]  ;;  %v3814_v48 = vld [vmem:[#allocation14 + $0xd0] sm:$0xff] }
0x1244   : > { %v10632_v56 = vpack.c.bf16 %v3629_v55, %v3626_v53  ;;  %v3815_v34 = vld [vmem:[#allocation14 + $0xd8] sm:$0xff]  ;;  %v3817_v53 = vld [vmem:[#allocation14 + $0xe8] sm:$0xff]  ;;  %v3822_v55 = vld [vmem:[#allocation14 + $0x110] sm:$0xff] }
0x1246   : > { %10593 = vmatpush1.bf16.msra.mxu1 %v10592_v58  ;;  %v3792_v58 = vld [vmem:[#allocation14 + $0x20] sm:$0xff] }
0x1247   : > { %10595 = vmatprep.subr.bf16.mxu1 %v10594_v31  ;;  %v10634_v61 = vpack.c.bf16 %v3792_v58, %v3789_v57  ;;  %v7934_v31 = vld [vmem:[%s13925_s22] ss:$0 sm:$0xff]  ;;  %v10679_v57 = vpack.c.bf16 %v3817_v53, %v3814_v48  ;;  %v3818_v58 = vld [vmem:[#allocation14 + $0xf0] sm:$0xff] }
0x124a   : > { %10597 = vmatpush1.bf16.msra.mxu1 %v10596_v7 }
0x124b   : > { %10599 = vmatprep.subr.bf16.mxu1 %v10598_v11  ;;  %v3793_v11 = vld [vmem:[#allocation14 + $0x28] sm:$0xff] }
0x124c   : > { %v10667_v18 = vpack.c.bf16 %v3793_v11, %v3790_v32  ;;  %v3824_v11 = vld [vmem:[#allocation14 + $0x120] sm:$0xff] }
0x124e   : > { %10601 = vmatpush1.bf16.msra.mxu1 %v10600_v17 }
0x124f   : > { %10603 = vmatprep.subr.bf16.mxu1 %v10602_v19  ;;  %v3794_v19 = vld [vmem:[#allocation14 + $0x30] sm:$0xff] }
0x1252   : > { %10605 = vmatpush1.bf16.msra.mxu1 %v10604_v63  ;;  %v3813_v63 = vld [vmem:[#allocation14 + $0xc8] sm:$0xff] }
0x1253   : > { %10607 = vmatprep.subr.bf16.mxu1 %v10606_v33  ;;  %v10650_v33 = vpack.c.bf16 %v3816_v21, %v3813_v63  ;;  %v4019_v63 = vld [vmem:[#allocation15 + $0x20] sm:$0xff]  ;;  %v4021_v21 = vld [vmem:[#allocation15 + $0x30] sm:$0xff] }
0x1256   : > { %10609 = vmatpush1.bf16.msra.mxu1 %v10608_v54  ;;  %v3819_v54 = vld [vmem:[#allocation14 + $0xf8] sm:$0xff] }
0x1257   : > { %10635 = vmatprep.subr.bf16.mxu1 %v10634_v61  ;;  %v10654_v61 = vpack.c.bf16 %v3822_v55, %v3819_v54  ;;  %v4024_v54 = vld [vmem:[#allocation15 + $0x48] sm:$0xff]  ;;  %v4026_v55 = vld [vmem:[#allocation15 + $0x58] sm:$0xff] }
0x130c   : > { %v3468_v30 = vpop.f32.mrb[18].mxu1 }
0x130d   : > { %v9303_v40 = vpop.f32.mrb[19].mxu1  ;;  %3575 = vmatprep.mubr.f32.mxu0 %v3468_v30  ;;  %v3796_v30 = vld [vmem:[#allocation14 + $0x40] sm:$0xff] }
0x130e   : > { %3576 = vmatmul.mubr.f32.vlgmr.msra.gmra.mrb[26].mxu0 %v13217_v49  ;;  %v3608_v49 = vld [vmem:[#allocation12 + $0xd0] sm:$0xff]  ;;  %v3804_v40 = vld [vmem:[#allocation14 + $0x80] sm:$0xff]  ;;  %v10670_v60 = vpack.c.bf16 %v3799_v37, %v3796_v30  ;;  %v3833_v37 = vld [vmem:[#allocation14 + $0x168] sm:$0xff] }
0x130f   : > { %10612 = vmatpush3.bf16.msra.mxu0 %v10611_v51  ;;  %9336 = vmatprep.mubr.msk.f32.mxu0 %vm12432_vm0, %v12433_v24  ;;  %v10623_v9 = vpack.c.bf16 %v3611_v6, %v3608_v49  ;;  %v3797_v51 = vld [vmem:[#allocation14 + $0x48] sm:$0xff]  ;;  %v3807_v49 = vld [vmem:[#allocation14 + $0x98] sm:$0xff]  ;;  %v3810_v6 = vld [vmem:[#allocation14 + $0xb0] sm:$0xff] }
0x1310   : > { %10613 = vmatprep.subr.bf16.mxu0 %v12431_v59 }
0x1313   : > { %10615 = vmatpush3.bf16.msra.mxu0 %v10614_v41  ;;  %v10640_v41 = vpack.c.bf16 %v3797_v51, %v3794_v19  ;;  %v3834_v19 = vld [vmem:[#allocation14 + $0x170] sm:$0xff] }
0x1314   : > { %10616 = vmatprep.subr.bf16.mxu0 %v12431_v59  ;;  %v3830_v51 = vld [vmem:[#allocation14 + $0x150] sm:$0xff] }
0x1317   : > { %10618 = vmatpush3.bf16.msra.mxu0 %v10617_v44  ;;  %v10642_v44 = vpack.c.bf16 %v3804_v40, %v3801_v38  ;;  %v3832_v38 = vld [vmem:[#allocation14 + $0x160] sm:$0xff]  ;;  %v3835_v40 = vld [vmem:[#allocation14 + $0x178] sm:$0xff] }
0x1318   : > { %10619 = vmatprep.subr.bf16.mxu0 %v12431_v59 }
0x131b   : > { %10621 = vmatpush3.bf16.msra.mxu0 %v10620_v8  ;;  %v3805_v8 = vld [vmem:[#allocation14 + $0x88] sm:$0xff] }
0x131c   : > { %10622 = vmatprep.subr.bf16.mxu0 %v12431_v59  ;;  %v10673_v14 = vpack.c.bf16 %v3805_v8, %v3802_v4  ;;  %v4015_v4 = vld [vmem:[#allocation15] sm:$0xff]  ;;  %v4017_v8 = vld [vmem:[#allocation15 + $0x10] sm:$0xff] }
0x131f   : > { %10624 = vmatpush3.bf16.msra.mxu0 %v10623_v9  ;;  %v10644_v9 = vpack.c.bf16 %v3803_v45, %v3800_v50  ;;  %v4016_v50 = vld [vmem:[#allocation15 + $0x8] sm:$0xff] }
0x1320   : > { %10625 = vmatprep.subr.bf16.mxu0 %v12431_v59 }
0x1323   : > { %10627 = vmatpush3.bf16.msra.mxu0 %v10626_v26  ;;  %v10646_v26 = vpack.c.bf16 %v3810_v6, %v3807_v49  ;;  %v4170_v49 = vld [vmem:[#allocation9 + $0x80] sm:$0xff]  ;;  %v10692_v6 = vpack.c.bf16 %v4017_v8, %v4015_v4  ;;  %v4163_v8 = vld [vmem:[#allocation9 + $0x48] sm:$0xff] }
0x1324   : > { %10628 = vmatprep.subr.bf16.mxu0 %v12431_v59  ;;  %v4162_v4 = vld [vmem:[#allocation9 + $0x40] sm:$0xff] }
0x1327   : > { %10630 = vmatpush3.bf16.msra.mxu0 %v10629_v16  ;;  %v10648_v16 = vpack.c.bf16 %v3809_v15, %v3806_v1  ;;  %v4155_v1 = vld [vmem:[#allocation9 + $0x8] sm:$0xff] }
0x1328   : > { %10631 = vmatprep.subr.bf16.mxu0 %v12431_v59 }
0x132b   : > { %10633 = vmatpush3.bf16.msra.mxu0 %v10632_v56  ;;  %v10652_v56 = vpack.c.bf16 %v3815_v34, %v3812_v47  ;;  %v4173_v47 = vld [vmem:[#allocation9 + $0x98] sm:$0xff] }
0x132c   : > { %10666 = vmatprep.subr.bf16.mxu0 %v12431_v59  ;;  %v4157_v34 = vld [vmem:[#allocation9 + $0x18] sm:$0xff] }
0x13e1   : > { %v8433_v62 = vpop.f32.mrb[26].mxu0 }
0x13e2   : > { %v8434_v29 = vpop.f32.mrb[27].mxu0 }
0x13e3   : > { %v8435_v7 = vadd.f32 %v8434_v29, %v8433_v62  ;;  %v3821_v62 = vld [vmem:[#allocation14 + $0x108] sm:$0xff]  ;;  %v3823_v29 = vld [vmem:[#allocation14 + $0x118] sm:$0xff] }
0x13e4   : > { %v10656_v10 = vpack.c.bf16 %v3821_v62, %v3818_v58  ;;  %v4025_v58 = vld [vmem:[#allocation15 + $0x50] sm:$0xff] }
0x13e5   : > { %v3578_v17 = vadd.f32 %v8435_v7, %v7934_v31  ;;  %v3820_v31 = vld [vmem:[#allocation14 + $0x100] sm:$0xff] }
0x13e6   : > { %v3828_v7 = vld [vmem:[#allocation14 + $0x140] sm:$0xff]  ;;  %v10682_v32 = vpack.c.bf16 %v3823_v29, %v3820_v31  ;;  %v4175_v31 = vld [vmem:[#allocation9 + $0xa8] sm:$0xff] }
0x13e7   : > { %v3581_v23 = vmax.f32 %v3578_v17, 0.0  ;;  %v10658_v12 = vpack.c.bf16 %v3828_v7, %v3825_v5  ;;  %v3826_v17 = vld [vmem:[#allocation14 + $0x130] sm:$0xff]  ;;  %v4158_v29 = vld [vmem:[#allocation9 + $0x20] sm:$0xff]  ;;  %v4159_v5 = vld [vmem:[#allocation9 + $0x28] sm:$0xff] }
0x13e9   : > { %3712 = vmatmul.mubr.f32.vlgmr.msra.gmra.mrb[20].mxu1 %v3581_v23  ;;  %9337 = vmatmul.mubr.f32.vlgmr.msra.gmra.mrb[28].mxu0 %v3581_v23  ;;  %v10660_v23 = vpack.c.bf16 %v3827_v13, %v3824_v11  ;;  %v4030_v11 = vld [vmem:[#allocation15 + $0x78] sm:$0xff]  ;;  %v4027_v13 = vld [vmem:[#allocation15 + $0x60] sm:$0xff] }
0x13ea   : > { %10637 = vmatpush1.bf16.msra.mxu1 %v10636_v42  ;;  %10668 = vmatpush3.bf16.msra.mxu0 %v10667_v18  ;;  %v3829_v42 = vld [vmem:[#allocation14 + $0x148] sm:$0xff]  ;;  %v3831_v18 = vld [vmem:[#allocation14 + $0x158] sm:$0xff] }
0x13eb   : > { %10639 = vmatprep.subr.bf16.mxu1 %v10638_v25  ;;  %10669 = vmatprep.subr.bf16.mxu0 %v12431_v59  ;;  %v10685_v25 = vpack.c.bf16 %v3829_v42, %v3826_v17  ;;  %v10662_v30 = vpack.c.bf16 %v3834_v19, %v3831_v18  ;;  %v4029_v17 = vld [vmem:[#allocation15 + $0x70] sm:$0xff]  ;;  %v4177_v19 = vld [vmem:[#allocation9 + $0xb8] sm:$0xff] }
0x13ec   : > { %3917 = vmatprep.mubr.f32.mxu1 %v12433_v24  ;;  %9371 = vmatprep.mubr.msk.f32.mxu0 %vm12432_vm0, %v12433_v24  ;;  %v4176_v42 = vld [vmem:[#allocation9 + $0xb0] sm:$0xff]  ;;  %v10704_v18 = vpack.c.bf16 %v4029_v17, %v4027_v13  ;;  %v4169_v17 = vld [vmem:[#allocation9 + $0x78] sm:$0xff] }
0x13ed   : > { %v4168_v13 = vld [vmem:[#allocation9 + $0x70] sm:$0xff] }
0x13ee   : > { %10641 = vmatpush1.bf16.msra.mxu1 %v10640_v41  ;;  %10671 = vmatpush3.bf16.msra.mxu0 %v10670_v60  ;;  %v10664_v41 = vpack.c.bf16 %v3833_v37, %v3830_v51  ;;  %v10688_v60 = vpack.c.bf16 %v3835_v40, %v3832_v38  ;;  %v10734_v51 = vpack.c.bf16 %v4177_v19, %v4176_v42  ;;  %v4032_v37 = vld [vmem:[#allocation15 + $0x88] sm:$0xff]  ;;  %v4034_v38 = vld [vmem:[#allocation15 + $0x98] sm:$0xff] }
0x13ef   : > { %10643 = vmatprep.subr.bf16.mxu1 %v10642_v44  ;;  %10672 = vmatprep.subr.bf16.mxu0 %v12431_v59  ;;  %v4018_v44 = vld [vmem:[#allocation15 + $0x18] sm:$0xff]  ;;  %v10706_v40 = vpack.c.bf16 %v4034_v38, %v4032_v37 }
0x13f0   : > { %v10690_v45 = vpack.c.bf16 %v4018_v44, %v4016_v50  ;;  %v4178_v50 = vld [vmem:[#allocation9 + $0xc0] sm:$0xff] }
0x13f2   : > { %10645 = vmatpush1.bf16.msra.mxu1 %v10644_v9  ;;  %10674 = vmatpush3.bf16.msra.mxu0 %v10673_v14  ;;  %v4171_v9 = vld [vmem:[#allocation9 + $0x88] sm:$0xff]  ;;  %v4154_v14 = vld [vmem:[#allocation9] sm:$0xff] }
0x13f3   : > { %10647 = vmatprep.subr.bf16.mxu1 %v10646_v26  ;;  %10675 = vmatprep.subr.bf16.mxu0 %v12431_v59  ;;  %v10722_v26 = vpack.c.bf16 %v4171_v9, %v4170_v49  ;;  %v10724_v15 = vpack.c.bf16 %v4155_v1, %v4154_v14  ;;  %v4036_v9 = vld [vmem:[#allocation15 + $0xa8] sm:$0xff]  ;;  %v4038_v14 = vld [vmem:[#allocation15 + $0xb8] sm:$0xff] }
0x13f4   : > { %v10710_v1 = vpack.c.bf16 %v4038_v14, %v4036_v9 }
0x13f6   : > { %10649 = vmatpush1.bf16.msra.mxu1 %v10648_v16  ;;  %10677 = vmatpush3.bf16.msra.mxu0 %v10676_v27  ;;  %v4172_v16 = vld [vmem:[#allocation9 + $0x90] sm:$0xff]  ;;  %v10696_v27 = vpack.c.bf16 %v4021_v21, %v4019_v63  ;;  %v4165_v21 = vld [vmem:[#allocation9 + $0x58] sm:$0xff] }
0x13f7   : > { %10651 = vmatprep.subr.bf16.mxu1 %v10650_v33  ;;  %10678 = vmatprep.subr.bf16.mxu0 %v12431_v59  ;;  %v4156_v33 = vld [vmem:[#allocation9 + $0x10] sm:$0xff]  ;;  %v10726_v48 = vpack.c.bf16 %v4173_v47, %v4172_v16  ;;  %v4040_v47 = vld [vmem:[#allocation15 + $0xc8] sm:$0xff] }
0x13f8   : > { %v10728_v53 = vpack.c.bf16 %v4157_v34, %v4156_v33  ;;  %v4164_v63 = vld [vmem:[#allocation9 + $0x50] sm:$0xff]  ;;  %v4042_v33 = vld [vmem:[#allocation15 + $0xd8] sm:$0xff] }
0x13f9   : > { %v10714_v34 = vpack.c.bf16 %v4042_v33, %v4040_v47 }
0x13fa   : > { %10653 = vmatpush1.bf16.msra.mxu1 %v10652_v56  ;;  %10680 = vmatpush3.bf16.msra.mxu0 %v10679_v57  ;;  %v10698_v56 = vpack.c.bf16 %v4026_v55, %v4024_v54  ;;  %v4023_v57 = vld [vmem:[#allocation15 + $0x40] sm:$0xff] }
0x13fb   : > { %10655 = vmatprep.subr.bf16.mxu1 %v10654_v61  ;;  %10681 = vmatprep.subr.bf16.mxu0 %v12431_v59  ;;  %v4174_v61 = vld [vmem:[#allocation9 + $0xa0] sm:$0xff]  ;;  %v10700_v62 = vpack.c.bf16 %v4025_v58, %v4023_v57  ;;  %v4167_v58 = vld [vmem:[#allocation9 + $0x68] sm:$0xff] }
0x13fc   : > { %v10730_v7 = vpack.c.bf16 %v4175_v31, %v4174_v61  ;;  %v4182_v54 = vld [vmem:[#allocation9 + $0xe0] sm:$0xff]  ;;  %v4044_v31 = vld [vmem:[#allocation15 + $0xe8] sm:$0xff] }
0x13fd   : > { %v4166_v57 = vld [vmem:[#allocation9 + $0x60] sm:$0xff] }
0x13fe   : > { %10657 = vmatpush1.bf16.msra.mxu1 %v10656_v10  ;;  %10683 = vmatpush3.bf16.msra.mxu0 %v10682_v32  ;;  %v10732_v10 = vpack.c.bf16 %v4159_v5, %v4158_v29  ;;  %v4028_v32 = vld [vmem:[#allocation15 + $0x68] sm:$0xff]  ;;  %v4046_v29 = vld [vmem:[#allocation15 + $0xf8] sm:$0xff] }
0x13ff   : > { %10659 = vmatprep.subr.bf16.mxu1 %v10658_v12  ;;  %10684 = vmatprep.subr.bf16.mxu0 %v12431_v59  ;;  %v10702_v12 = vpack.c.bf16 %v4030_v11, %v4028_v32  ;;  %v10718_v5 = vpack.c.bf16 %v4046_v29, %v4044_v31  ;;  %v4184_v32 = vld [vmem:[#allocation9 + $0xf0] sm:$0xff]  ;;  %v7942_v31 = vld [vmem:[%s13924_s4] ss:$0 sm:$0xff] }
0x1402   : > { %10661 = vmatpush1.bf16.msra.mxu1 %v10660_v23  ;;  %10686 = vmatpush3.bf16.msra.mxu0 %v10685_v25  ;;  %v4160_v23 = vld [vmem:[#allocation9 + $0x30] sm:$0xff]  ;;  %v4161_v25 = vld [vmem:[#allocation9 + $0x38] sm:$0xff] }
0x1403   : > { %10663 = vmatprep.subr.bf16.mxu1 %v10662_v30  ;;  %10687 = vmatprep.subr.bf16.mxu0 %v12431_v59  ;;  %v10736_v30 = vpack.c.bf16 %v4161_v25, %v4160_v23  ;;  %v3836_v25 = vld [vmem:[%s13926_s7] sm:$0x7] }
0x1404   : > { %v3841_v37 = vrot.slane %v3836_v25, %v13042_v46 }
0x1406   : > { %10665 = vmatpush1.bf16.msra.mxu1 %v10664_v41  ;;  %10689 = vmatpush3.bf16.msra.mxu0 %v10688_v60  ;;  %v4031_v41 = vld [vmem:[#allocation15 + $0x80] sm:$0xff]  ;;  %v4033_v60 = vld [vmem:[#allocation15 + $0x90] sm:$0xff] }
0x1407   : > { %10691 = vmatprep.subr.bf16.mxu1 %v10690_v45  ;;  %10723 = vmatprep.subr.bf16.mxu0 %v10722_v26  ;;  %v10708_v44 = vpack.c.bf16 %v4033_v60, %v4031_v41  ;;  %v4179_v45 = vld [vmem:[#allocation9 + $0xc8] sm:$0xff]  ;;  %v4035_v26 = vld [vmem:[#allocation15 + $0xa0] sm:$0xff] }
0x1408   : > { %v10738_v49 = vpack.c.bf16 %v4179_v45, %v4178_v50 }
0x1409   : > { %3918 = vmatmul.mubr.f32.vlgmr.msra.gmra.mrb[20].mxu1 %v13214_v39  ;;  %9372 = vmatmul.mubr.f32.vlgmr.msra.gmra.mrb[30].mxu0 %v13214_v39  ;;  %v10694_v39 = vpack.c.bf16 %v4022_v22, %v4020_v20  ;;  %v4180_v20 = vld [vmem:[#allocation9 + $0xd0] sm:$0xff] }
0x140a   : > { %4123 = vmatprep.mubr.f32.mxu1 %v12433_v24  ;;  %10693 = vmatpush1.bf16.msra.mxu1 %v10692_v6  ;;  %v10740_v6 = vpack.c.bf16 %v4163_v8, %v4162_v4 }
0x140b   : > { %10725 = vmatpush3.bf16.msra.mxu0 %v10724_v15  ;;  %10695 = vmatprep.subr.bf16.mxu1 %v10694_v39  ;;  %v4037_v15 = vld [vmem:[#allocation15 + $0xb0] sm:$0xff]  ;;  %v4181_v39 = vld [vmem:[#allocation9 + $0xd8] sm:$0xff] }
0x140c   : > { %10727 = vmatprep.subr.bf16.mxu0 %v10726_v48  ;;  %v10712_v22 = vpack.c.bf16 %v4037_v15, %v4035_v26  ;;  %v10742_v16 = vpack.c.bf16 %v4181_v39, %v4180_v20  ;;  %v4039_v48 = vld [vmem:[#allocation15 + $0xc0] sm:$0xff]  ;;  %v3849_v15 = vrot.slane %v3836_v25, %v13056_v0 }
0x140e   : > { %10697 = vmatpush1.bf16.msra.mxu1 %v10696_v27  ;;  %v10744_v27 = vpack.c.bf16 %v4165_v21, %v4164_v63 }
0x140f   : > { %10729 = vmatpush3.bf16.msra.mxu0 %v10728_v53  ;;  %10699 = vmatprep.subr.bf16.mxu1 %v10698_v56  ;;  %v4041_v53 = vld [vmem:[#allocation15 + $0xd0] sm:$0xff]  ;;  %v4183_v56 = vld [vmem:[#allocation9 + $0xe8] sm:$0xff] }
0x1410   : > { %10731 = vmatprep.subr.bf16.mxu0 %v10730_v7  ;;  %v10716_v55 = vpack.c.bf16 %v4041_v53, %v4039_v48  ;;  %v10746_v61 = vpack.c.bf16 %v4183_v56, %v4182_v54  ;;  %v4043_v7 = vld [vmem:[#allocation15 + $0xe0] sm:$0xff]  ;;  %v12040_v53 = vld [vmem:[%s12918_s23 + $0x50] sm:$0xff] }
0x1411   : > { %v13291_v56 = vld [vmem:[%s12889_s13 + $0x20] sm:$0xff] }
0x1412   : > { %10701 = vmatpush1.bf16.msra.mxu1 %v10700_v62  ;;  %v10748_v62 = vpack.c.bf16 %v4167_v58, %v4166_v57 }
0x1413   : > { %10733 = vmatpush3.bf16.msra.mxu0 %v10732_v10  ;;  %10703 = vmatprep.subr.bf16.mxu1 %v10702_v12  ;;  %v4045_v10 = vld [vmem:[#allocation15 + $0xf0] sm:$0xff]  ;;  %v4185_v12 = vld [vmem:[#allocation9 + $0xf8] sm:$0xff] }
0x1414   : > { %10735 = vmatprep.subr.bf16.mxu0 %v10734_v51  ;;  %v10720_v11 = vpack.c.bf16 %v4045_v10, %v4043_v7  ;;  %v10750_v42 = vpack.c.bf16 %v4185_v12, %v4184_v32  ;;  %v3630_v51 = vld [vmem:[%s13928_s21] sm:$0x7]  ;;  %v4272_v7 = vld [vmem:[#allocation8] sm:$0xff]  ;;  %v4274_v32 = vld [vmem:[#allocation8 + $0x10] sm:$0xff] }
0x1415   : > { %v3639_v38 = vrot.slane %v3630_v51, %v13050_v28  ;;  %v3643_v20 = vrot.slane %v3630_v51, %v13056_v0  ;;  %v4273_v10 = vld [vmem:[#allocation8 + $0x8] sm:$0xff]  ;;  %v4275_v12 = vld [vmem:[#allocation8 + $0x18] sm:$0xff] }
0x1416   : > { %10705 = vmatpush1.bf16.msra.mxu1 %v10704_v18  ;;  %v10752_v18 = vpack.c.bf16 %v4169_v17, %v4168_v13  ;;  %v10758_v13 = vpack.c.bf16 %v4275_v12, %v4274_v32  ;;  %v4276_v17 = vld [vmem:[#allocation8 + $0x20] sm:$0xff] }
0x1417   : > { %10737 = vmatpush3.bf16.msra.mxu0 %v10736_v30  ;;  %10707 = vmatprep.subr.bf16.mxu1 %v10706_v40  ;;  %v3635_v30 = vrot.slane %v3630_v51, %v13042_v46  ;;  %v3845_v40 = vrot.slane %v3836_v25, %v13050_v28  ;;  %v4280_v51 = vld [vmem:[#allocation8 + $0x40] sm:$0xff] }
0x1418   : > { %10739 = vmatprep.subr.bf16.mxu0 %v10738_v49  ;;  %v4382_v32 = vld [vmem:[#allocation11 + $0xc0] sm:$0xff] }
0x1419   : > { %v11662_v41 = vadd.f32 %v3841_v37, %v3635_v30  ;;  %v4281_v30 = vld [vmem:[#allocation8 + $0x48] sm:$0xff] }
0x141a   : > { %10709 = vmatpush1.bf16.msra.mxu1 %v10708_v44  ;;  %v11664_v44 = vadd.f32 %v3845_v40, %v3639_v38  ;;  %v10767_v37 = vpack.c.bf16 %v4281_v30, %v4280_v51  ;;  %v4368_v51 = vld [vmem:[#allocation11 + $0x50] sm:$0xff]  ;;  %v4369_v30 = vld [vmem:[#allocation11 + $0x58] sm:$0xff] }
0x141b   : > { %10741 = vmatpush3.bf16.msra.mxu0 %v10740_v6  ;;  %10711 = vmatprep.subr.bf16.mxu1 %v10710_v1 }
0x141c   : > { %10743 = vmatprep.subr.bf16.mxu0 %v10742_v16 }
0x141e   : > { %10713 = vmatpush1.bf16.msra.mxu1 %v10712_v22 }
0x141f   : > { %10745 = vmatpush3.bf16.msra.mxu0 %v10744_v27  ;;  %10715 = vmatprep.subr.bf16.mxu1 %v10714_v34 }
0x1420   : > { %10747 = vmatprep.subr.bf16.mxu0 %v10746_v61 }
0x1422   : > { %10717 = vmatpush1.bf16.msra.mxu1 %v10716_v55 }
0x1423   : > { %10749 = vmatpush3.bf16.msra.mxu0 %v10748_v62  ;;  %10719 = vmatprep.subr.bf16.mxu1 %v10718_v5 }
0x1424   : > { %10751 = vmatprep.subr.bf16.mxu0 %v10750_v42  ;;  %v4277_v42 = vld [vmem:[#allocation8 + $0x28] sm:$0xff] }
0x1426   : > { %10721 = vmatpush1.bf16.msra.mxu1 %v10720_v11  ;;  %v10755_v11 = vpack.c.bf16 %v4273_v10, %v4272_v7  ;;  %v4364_v7 = vld [vmem:[#allocation11 + $0x30] sm:$0xff]  ;;  %v4365_v10 = vld [vmem:[#allocation11 + $0x38] sm:$0xff] }
0x1427   : > { %10754 = vmatprep.subr.bf16.mxu1 %v12431_v59  ;;  %10753 = vmatpush3.bf16.msra.mxu0 %v10752_v18  ;;  %v10761_v18 = vpack.c.bf16 %v4277_v42, %v4276_v17  ;;  %v10792_v12 = vpack.c.bf16 %v4365_v10, %v4364_v7  ;;  %v4366_v17 = vld [vmem:[#allocation11 + $0x40] sm:$0xff]  ;;  %v4367_v42 = vld [vmem:[#allocation11 + $0x48] sm:$0xff]  ;;  %v4490_v7 = vld [vmem:[#allocation12 + $0xb0] sm:$0xff] }
0x14bc   : > { %v3784_v19 = vpop.f32.mrb[28].mxu0 }
0x14bd   : > { %v9338_v23 = vpop.f32.mrb[29].mxu0  ;;  %v3785_v21 = vadd.f32 %v3784_v19, %v3643_v20  ;;  %v4278_v19 = vld [vmem:[#allocation8 + $0x30] sm:$0xff] }
0x14be   : > { %v4279_v23 = vld [vmem:[#allocation8 + $0x38] sm:$0xff] }
0x14bf   : > { %v10764_v25 = vpack.c.bf16 %v4279_v23, %v4278_v19  ;;  %v4385_v19 = vld [vmem:[#allocation11 + $0xd8] sm:$0xff]  ;;  %v10796_v23 = vpack.c.bf16 %v4367_v42, %v4366_v17  ;;  %v4496_v17 = vld [vmem:[#allocation12 + $0xe0] sm:$0xff] }
0x14dc   : > { %v3919_v60 = vpop.f32.mrb[20].mxu1  ;;  %v3990_v50 = vpop.f32.mrb[30].mxu0 }
0x14dd   : > { %v11663_v45 = vadd.f32 %v11662_v41, %v3919_v60  ;;  %v3921_v4 = vpop.f32.mrb[21].mxu1  ;;  %v9373_v8 = vpop.f32.mrb[31].mxu0  ;;  %v3991_v39 = vadd.f32 %v3990_v50, %v3849_v15  ;;  %v4282_v50 = vld [vmem:[#allocation8 + $0x50] sm:$0xff]  ;;  %v4358_v15 = vld [vmem:[#allocation11] sm:$0xff] }
0x14de   : > { %v11665_v6 = vadd.f32 %v11664_v44, %v3921_v4  ;;  %v4283_v44 = vld [vmem:[#allocation8 + $0x58] sm:$0xff]  ;;  %v4284_v4 = vld [vmem:[#allocation8 + $0x60] sm:$0xff]  ;;  %v4285_v8 = vld [vmem:[#allocation8 + $0x68] sm:$0xff] }
0x14df   : > { %v7935_v49 = vmul.f32 -1.442695, %v11663_v45  ;;  %v10770_v45 = vpack.c.bf16 %v4283_v44, %v4282_v50  ;;  %v4370_v50 = vld [vmem:[#allocation11 + $0x60] sm:$0xff]  ;;  %v4371_v44 = vld [vmem:[#allocation11 + $0x68] sm:$0xff] }
0x14e0   : > { %v7936_v9 = vmul.f32 -1.442695, %v11665_v6  ;;  %v4286_v6 = vld [vmem:[#allocation8 + $0x70] sm:$0xff] }
0x14e1   : > { %11924 = vpow2.f32 %v7935_v49  ;;  %v10773_v49 = vpack.c.bf16 %v4285_v8, %v4284_v4  ;;  %v4389_v4 = vld [vmem:[#allocation11 + $0xf8] sm:$0xff]  ;;  %v10804_v8 = vpack.c.bf16 %v4371_v44, %v4370_v50  ;;  %v4508_v50 = vld [vmem:[#allocation12 + $0x140] sm:$0xff] }
0x14e2   : > { %11926 = vpow2.f32 %v7936_v9  ;;  %v4287_v9 = vld [vmem:[#allocation8 + $0x78] sm:$0xff] }
0x14eb   : > { %v11925_v14 = vpop.eup %11924 }
0x14ec   : > { %v3998_v1 = vadd.f32 1.0, %v11925_v14  ;;  %v11927_v26 = vpop.eup %11926  ;;  %v10776_v14 = vpack.c.bf16 %v4287_v9, %v4286_v6  ;;  %v4372_v6 = vld [vmem:[#allocation11 + $0x70] sm:$0xff]  ;;  %v4373_v9 = vld [vmem:[#allocation11 + $0x78] sm:$0xff] }
0x14ed   : > { %v4005_v22 = vadd.f32 1.0, %v11927_v26  ;;  %v4375_v26 = vld [vmem:[#allocation11 + $0x88] sm:$0xff] }
0x14ee   : > { %11928 = vrcp.f32 %v3998_v1  ;;  %v4374_v1 = vld [vmem:[#allocation11 + $0x80] sm:$0xff] }
0x14ef   : > { %11930 = vrcp.f32 %v4005_v22  ;;  %v10778_v20 = vpack.c.bf16 %v4375_v26, %v4374_v1  ;;  %v4359_v22 = vld [vmem:[#allocation11 + $0x8] sm:$0xff] }
0x14f1   : > { %10779 = vmatprep.subr.bf16.mxu0 %v10778_v20  ;;  %v4469_v20 = vld [vmem:[#allocation12 + $0x8] sm:$0xff] }
0x14f8   : > { %v11929_v63 = vpop.eup %11928 }
0x14f9   : > { %v4008_v16 = vmul.f32 %v11929_v63, %v3991_v39  ;;  %v11931_v47 = vpop.eup %11930  ;;  %v4376_v39 = vld [vmem:[#allocation11 + $0x90] sm:$0xff]  ;;  %v4377_v63 = vld [vmem:[#allocation11 + $0x98] sm:$0xff] }
0x14fa   : > { %v4011_v33 = vsub.f32 1.0, %v11931_v47  ;;  %v4013_v54 = vmul.f32 %v12040_v53, %v11931_v47  ;;  %v4361_v47 = vld [vmem:[#allocation11 + $0x18] sm:$0xff] }
0x14fb   : > { %v4009_v27 = vadd.f32 %v4008_v16, %v3785_v21  ;;  %v10780_v21 = vpack.c.bf16 %v4359_v22, %v4358_v15  ;;  %v10782_v16 = vpack.c.bf16 %v4377_v63, %v4376_v39  ;;  %v4472_v22 = vld [vmem:[#allocation12 + $0x20] sm:$0xff] }
0x14fc   : > { %v4468_v39 = vld [vmem:[#allocation12] sm:$0xff]  ;;  %v10810_v63 = vpack.c.bf16 %v4472_v22, %v4469_v20 }
0x14fd   : > { %11932 = vtanh.f32 %v4009_v27  ;;  %v4360_v27 = vld [vmem:[#allocation11 + $0x10] sm:$0xff]  ;;  %v4488_v22 = vld [vmem:[#allocation12 + $0xa0] sm:$0xff] }
0x1507   : > { %v11933_v34 = vpop.eup %11932 }
0x1508   : > { %v4012_v48 = vmul.f32 %v11933_v34, %v4011_v33  ;;  %v4378_v33 = vld [vmem:[#allocation11 + $0xa0] sm:$0xff]  ;;  %v4379_v34 = vld [vmem:[#allocation11 + $0xa8] sm:$0xff] }
0x1509   : > { %v10786_v53 = vpack.c.bf16 %v4379_v34, %v4378_v33  ;;  %v4474_v33 = vld [vmem:[#allocation12 + $0x30] sm:$0xff] }
0x150a   : > { %v13288_v55 = vadd.f32 %v4013_v54, %v4012_v48  ;;  %v10784_v48 = vpack.c.bf16 %v4361_v47, %v4360_v27  ;;  %v4362_v54 = vld [vmem:[#allocation11 + $0x20] sm:$0xff]  ;;  %v4475_v27 = vld [vmem:[#allocation12 + $0x38] sm:$0xff]  ;;  %v4478_v47 = vld [vmem:[#allocation12 + $0x50] sm:$0xff] }
0x150b   : > { %v10814_v34 = vpack.c.bf16 %v4478_v47, %v4475_v27  ;;  %v4500_v27 = vld [vmem:[#allocation12 + $0x100] sm:$0xff]  ;;  %v4503_v47 = vld [vmem:[#allocation12 + $0x118] sm:$0xff] }
0x150c   : > { %4124 = vmatmul.mubr.f32.vlgmr.msra.gmra.mrb[22].mxu1 %v13288_v55  ;;  %7939 = vst [vmem:[%s12918_s23 + $0x70] sm:$0xff] %v13288_v55  ;;  %4257 = vmatprep.mubr.f32.mxu0 %v13288_v55 }
0x150d   : > { %4258 = vmatmul.mubr.f32.vlgmr.msra.gmra.mrb[32].mxu0 %v13291_v56  ;;  %9406 = vmatprep.mubr.msk.f32.mxu1 %vm12432_vm0, %v12433_v24 }
0x150e   : > { %10756 = vmatpush3.bf16.msra.mxu1 %v10755_v11  ;;  %10781 = vmatpush3.bf16.msra.mxu0 %v10780_v21  ;;  %v4383_v11 = vld [vmem:[#allocation11 + $0xc8] sm:$0xff]  ;;  %v4471_v21 = vld [vmem:[#allocation12 + $0x18] sm:$0xff] }
0x150f   : > { %10757 = vmatprep.subr.bf16.mxu1 %v12431_v59  ;;  %10783 = vmatprep.subr.bf16.mxu0 %v10782_v16  ;;  %v10812_v16 = vpack.c.bf16 %v4471_v21, %v4468_v39  ;;  %v4491_v39 = vld [vmem:[#allocation12 + $0xb8] sm:$0xff]  ;;  %v4497_v21 = vld [vmem:[#allocation12 + $0xe8] sm:$0xff] }
0x1512   : > { %10759 = vmatpush3.bf16.msra.mxu1 %v10758_v13  ;;  %10785 = vmatpush3.bf16.msra.mxu0 %v10784_v48  ;;  %v10794_v13 = vpack.c.bf16 %v4383_v11, %v4382_v32  ;;  %v4477_v48 = vld [vmem:[#allocation12 + $0x48] sm:$0xff]  ;;  %v4486_v32 = vld [vmem:[#allocation12 + $0x90] sm:$0xff] }
0x1513   : > { %10760 = vmatprep.subr.bf16.mxu1 %v12431_v59  ;;  %10787 = vmatprep.subr.bf16.mxu0 %v10786_v53  ;;  %v10816_v53 = vpack.c.bf16 %v4477_v48, %v4474_v33  ;;  %v4489_v11 = vld [vmem:[#allocation12 + $0xa8] sm:$0xff]  ;;  %v10858_v33 = vpack.c.bf16 %v4503_v47, %v4500_v27  ;;  %v4507_v48 = vld [vmem:[#allocation12 + $0x138] sm:$0xff]  ;;  %v4696_v27 = vld [vmem:[#allocation14 + $0xb0] sm:$0xff] }
0x1516   : > { %10762 = vmatpush3.bf16.msra.mxu1 %v10761_v18  ;;  %v4384_v18 = vld [vmem:[#allocation11 + $0xd0] sm:$0xff] }
0x1517   : > { %10763 = vmatprep.subr.bf16.mxu1 %v12431_v59 }
0x151a   : > { %10765 = vmatpush3.bf16.msra.mxu1 %v10764_v25  ;;  %v10798_v25 = vpack.c.bf16 %v4385_v19, %v4384_v18  ;;  %v4492_v18 = vld [vmem:[#allocation12 + $0xc0] sm:$0xff]  ;;  %v4495_v19 = vld [vmem:[#allocation12 + $0xd8] sm:$0xff] }
0x151b   : > { %10766 = vmatprep.subr.bf16.mxu1 %v12431_v59 }
0x151e   : > { %10768 = vmatpush3.bf16.msra.mxu1 %v10767_v37  ;;  %v4386_v37 = vld [vmem:[#allocation11 + $0xe0] sm:$0xff] }
0x151f   : > { %10769 = vmatprep.subr.bf16.mxu1 %v12431_v59 }
0x1522   : > { %10771 = vmatpush3.bf16.msra.mxu1 %v10770_v45  ;;  %v4388_v45 = vld [vmem:[#allocation11 + $0xf0] sm:$0xff] }
0x1523   : > { %10772 = vmatprep.subr.bf16.mxu1 %v12431_v59 }
0x1526   : > { %10774 = vmatpush3.bf16.msra.mxu1 %v10773_v49  ;;  %v10806_v49 = vpack.c.bf16 %v4389_v4, %v4388_v45  ;;  %v4470_v45 = vld [vmem:[#allocation12 + $0x10] sm:$0xff]  ;;  %v4473_v4 = vld [vmem:[#allocation12 + $0x28] sm:$0xff] }
0x1527   : > { %10775 = vmatprep.subr.bf16.mxu1 %v12431_v59 }
0x152a   : > { %10777 = vmatpush3.bf16.msra.mxu1 %v10776_v14  ;;  %v10808_v14 = vpack.c.bf16 %v4373_v9, %v4372_v6  ;;  %v4476_v6 = vld [vmem:[#allocation12 + $0x40] sm:$0xff]  ;;  %v4479_v9 = vld [vmem:[#allocation12 + $0x58] sm:$0xff] }
0x152b   : > { %10811 = vmatprep.subr.bf16.mxu1 %v10810_v63  ;;  %v10852_v63 = vpack.c.bf16 %v4491_v39, %v4488_v22  ;;  %v4686_v22 = vld [vmem:[#allocation14 + $0x60] sm:$0xff] }
0x15df   : > { %v13300_v57 = vpop.f32.mrb[22].mxu1 }
0x15e0   : > { %v13302_v58 = vpop.f32.mrb[23].mxu1  ;;  %v8502_v61 = vpop.f32.mrb[32].mxu0 }
0x15e1   : > { %v8503_v62 = vpop.f32.mrb[33].mxu0 }
0x15e2   : > { %v8504_v29 = vadd.f32 %v8503_v62, %v8502_v61  ;;  %v4363_v61 = vld [vmem:[#allocation11 + $0x28] sm:$0xff]  ;;  %v4380_v62 = vld [vmem:[#allocation11 + $0xb0] sm:$0xff] }
0x15e4   : > { %v4260_v5 = vadd.f32 %v8504_v29, %v7942_v31  ;;  %v4381_v31 = vld [vmem:[#allocation11 + $0xb8] sm:$0xff]  ;;  %v10788_v29 = vpack.c.bf16 %v4363_v61, %v4362_v54  ;;  %v4484_v54 = vld [vmem:[#allocation12 + $0x80] sm:$0xff] }
0x15e6   : > { %4263 = vmax.xlane.f32.xlu0 %v4260_v5  ;;  %10789 = vmatpush3.bf16.msra.mxu0 %v10788_v29 }
0x1673   : > { %v4264_v38 = vpop.xlane.xlu0 %4263 }
0x1674   : > { %v4265_v40 = vsub.f32 %v4260_v5, %v4264_v38  ;;  %v10790_v5 = vpack.c.bf16 %v4381_v31, %v4380_v62  ;;  %v4387_v38 = vld [vmem:[#allocation11 + $0xe8] sm:$0xff]  ;;  %v4480_v62 = vld [vmem:[#allocation12 + $0x60] sm:$0xff]  ;;  %v4483_v31 = vld [vmem:[#allocation12 + $0x78] sm:$0xff] }
0x1675   : > { %v10820_v29 = vpack.c.bf16 %v4483_v31, %v4480_v62  ;;  %v4511_v62 = vld [vmem:[#allocation12 + $0x158] sm:$0xff]  ;;  %v4514_v31 = vld [vmem:[#allocation12 + $0x170] sm:$0xff] }
0x1676   : > { %v4266_v41 = vmul.f32 1.442695, %v4265_v40  ;;  %10791 = vmatprep.subr.bf16.mxu0 %v10790_v5  ;;  %v10800_v40 = vpack.c.bf16 %v4369_v30, %v4368_v51  ;;  %v4487_v5 = vld [vmem:[#allocation12 + $0x98] sm:$0xff]  ;;  %v4502_v51 = vld [vmem:[#allocation12 + $0x110] sm:$0xff] }
0x1677   : > { %10793 = vmatpush3.bf16.msra.mxu0 %v10792_v12  ;;  %v10822_v10 = vpack.c.bf16 %v4490_v7, %v4487_v5  ;;  %v10824_v12 = vpack.c.bf16 %v4489_v11, %v4486_v32  ;;  %v4510_v5 = vld [vmem:[#allocation12 + $0x150] sm:$0xff]  ;;  %v4513_v7 = vld [vmem:[#allocation12 + $0x168] sm:$0xff]  ;;  %v4515_v11 = vld [vmem:[#allocation12 + $0x178] sm:$0xff] }
0x1678   : > { %11934 = vpow2.f32 %v4266_v41  ;;  %10795 = vmatprep.subr.bf16.mxu0 %v10794_v13  ;;  %v10802_v41 = vpack.c.bf16 %v4387_v38, %v4386_v37  ;;  %v4493_v13 = vld [vmem:[#allocation12 + $0xc8] sm:$0xff]  ;;  %v4498_v37 = vld [vmem:[#allocation12 + $0xf0] sm:$0xff]  ;;  %v10840_v32 = vpack.c.bf16 %v4513_v7, %v4510_v5  ;;  %v4698_v5 = vld [vmem:[#allocation14 + $0xc0] sm:$0xff] }
0x1679   : > { %v10826_v42 = vpack.c.bf16 %v4496_v17, %v4493_v13  ;;  %v4501_v38 = vld [vmem:[#allocation12 + $0x108] sm:$0xff]  ;;  %v4678_v17 = vld [vmem:[#allocation14 + $0x20] sm:$0xff] }
0x167a   : > { %v4675_v13 = vld [vmem:[#allocation14 + $0x8] sm:$0xff] }
0x167b   : > { %10797 = vmatpush3.bf16.msra.mxu0 %v10796_v23  ;;  %v10828_v23 = vpack.c.bf16 %v4495_v19, %v4492_v18  ;;  %v7943_v19 = vld [vmem:[%s13925_s22] ss:$0 sm:$0xff] }
0x167c   : > { %10799 = vmatprep.subr.bf16.mxu0 %v10798_v25  ;;  %v4499_v25 = vld [vmem:[#allocation12 + $0xf8] sm:$0xff] }
0x167d   : > { %v10830_v30 = vpack.c.bf16 %v4502_v51, %v4499_v25  ;;  %v4674_v25 = vld [vmem:[#allocation14] sm:$0xff] }
0x167f   : > { %10801 = vmatpush3.bf16.msra.mxu0 %v10800_v40  ;;  %v10832_v40 = vpack.c.bf16 %v4501_v38, %v4498_v37  ;;  %v4676_v37 = vld [vmem:[#allocation14 + $0x10] sm:$0xff]  ;;  %v4679_v38 = vld [vmem:[#allocation14 + $0x28] sm:$0xff] }
0x1680   : > { %10803 = vmatprep.subr.bf16.mxu0 %v10802_v41  ;;  %v4505_v41 = vld [vmem:[#allocation12 + $0x128] sm:$0xff] }
0x1681   : > { %v10834_v44 = vpack.c.bf16 %v4508_v50, %v4505_v41  ;;  %v4684_v41 = vld [vmem:[#allocation14 + $0x50] sm:$0xff] }
0x1682   : > { %v13312_v60 = vpop.eup %11934 }
0x1683   : > { %4268 = vadd.xlane.f32.xlu1 %v13312_v60  ;;  %10805 = vmatpush3.bf16.msra.mxu0 %v10804_v8  ;;  %v10843_v8 = vpack.c.bf16 %v4473_v4, %v4470_v45  ;;  %v10899_v45 = vpack.c.bf16 %v4679_v38, %v4676_v37  ;;  %v4680_v4 = vld [vmem:[#allocation14 + $0x30] sm:$0xff]  ;;  %v4714_v37 = vld [vmem:[#allocation14 + $0x140] sm:$0xff] }
0x1684   : > { %10807 = vmatprep.subr.bf16.mxu0 %v10806_v49 }
0x1687   : > { %10809 = vmatpush3.bf16.msra.mxu0 %v10808_v14 }
0x1688   : > { %10842 = vmatprep.subr.bf16.mxu0 %v12431_v59 }
0x1710   : > { %v4269_v1 = vpop.xlane.xlu1 %4268 }
0x1711   : > { %11936 = vrcp.f32 %v4269_v1  ;;  %v10846_v1 = vpack.c.bf16 %v4479_v9, %v4476_v6  ;;  %v4683_v6 = vld [vmem:[#allocation14 + $0x48] sm:$0xff]  ;;  %v4682_v9 = vld [vmem:[#allocation14 + $0x40] sm:$0xff] }
0x171b   : > { %v11937_v26 = vpop.eup %11936 }
0x171c   : > { %v4271_v15 = vmul.f32 %v11937_v26, %v13312_v60  ;;  %v4481_v60 = vld [vmem:[#allocation12 + $0x68] sm:$0xff]  ;;  %v4482_v26 = vld [vmem:[#allocation12 + $0x70] sm:$0xff] }
0x171d   : > { %v10818_v61 = vpack.c.bf16 %v4484_v54, %v4481_v60  ;;  %v4509_v54 = vld [vmem:[#allocation12 + $0x148] sm:$0xff] }
0x171e   : > { %9407 = vmatmul.mubr.f32.vlgmr.msra.gmra.mrb[24].mxu1 %v4271_v15  ;;  %7949 = vst [vmem:[%s12918_s23 + $0x98] sm:$0xff] %v4271_v15  ;;  %v4485_v15 = vld [vmem:[#allocation12 + $0x88] sm:$0xff] }
0x171f   : > { %4597 = vmatprep.mubr.f32.mxu1 %v12433_v24  ;;  %10813 = vmatpush1.bf16.msra.mxu1 %v10812_v16  ;;  %v10849_v20 = vpack.c.bf16 %v4485_v15, %v4482_v26  ;;  %v4690_v26 = vld [vmem:[#allocation14 + $0x80] sm:$0xff]  ;;  %v10872_v15 = vpack.c.bf16 %v4683_v6, %v4680_v4  ;;  %v4715_v4 = vld [vmem:[#allocation14 + $0x148] sm:$0xff] }
0x1720   : > { %10815 = vmatprep.subr.bf16.mxu1 %v10814_v34  ;;  %v4504_v34 = vld [vmem:[#allocation12 + $0x120] sm:$0xff] }
0x1721   : > { %v10836_v60 = vpack.c.bf16 %v4507_v48, %v4504_v34  ;;  %v4692_v34 = vld [vmem:[#allocation14 + $0x90] sm:$0xff] }
0x1723   : > { %10817 = vmatpush1.bf16.msra.mxu1 %v10816_v53  ;;  %v4506_v53 = vld [vmem:[#allocation12 + $0x130] sm:$0xff] }
0x1724   : > { %10819 = vmatprep.subr.bf16.mxu1 %v10818_v61  ;;  %v10861_v61 = vpack.c.bf16 %v4509_v54, %v4506_v53  ;;  %v4695_v53 = vld [vmem:[#allocation14 + $0xa8] sm:$0xff]  ;;  %v4697_v54 = vld [vmem:[#allocation14 + $0xb8] sm:$0xff] }
0x1727   : > { %10821 = vmatpush1.bf16.msra.mxu1 %v10820_v29  ;;  %v10838_v29 = vpack.c.bf16 %v4514_v31, %v4511_v62  ;;  %v4702_v62 = vld [vmem:[#allocation14 + $0xe0] sm:$0xff]  ;;  %v10880_v31 = vpack.c.bf16 %v4695_v53, %v4692_v34  ;;  %v5057_v34 = vld [vmem:[#allocation9 + $0x88] sm:$0xff] }
0x1728   : > { %10823 = vmatprep.subr.bf16.mxu1 %v10822_v10  ;;  %v4512_v10 = vld [vmem:[#allocation12 + $0x160] sm:$0xff]  ;;  %v5041_v53 = vld [vmem:[#allocation9 + $0x8] sm:$0xff] }
0x172b   : > { %10825 = vmatpush1.bf16.msra.mxu1 %v10824_v12  ;;  %v10864_v12 = vpack.c.bf16 %v4515_v11, %v4512_v10  ;;  %v4701_v10 = vld [vmem:[#allocation14 + $0xd8] sm:$0xff]  ;;  %v4703_v11 = vld [vmem:[#allocation14 + $0xe8] sm:$0xff] }
0x172c   : > { %10827 = vmatprep.subr.bf16.mxu1 %v10826_v42  ;;  %v10866_v42 = vpack.c.bf16 %v4678_v17, %v4675_v13  ;;  %v4708_v13 = vld [vmem:[#allocation14 + $0x110] sm:$0xff]  ;;  %v10884_v17 = vpack.c.bf16 %v4701_v10, %v4698_v5  ;;  %v5059_v10 = vld [vmem:[#allocation9 + $0x98] sm:$0xff] }
0x172d   : > { %v5058_v5 = vld [vmem:[#allocation9 + $0x90] sm:$0xff] }
0x172f   : > { %10829 = vmatpush1.bf16.msra.mxu1 %v10828_v23 }
0x1730   : > { %10831 = vmatprep.subr.bf16.mxu1 %v10830_v30  ;;  %v4677_v30 = vld [vmem:[#allocation14 + $0x18] sm:$0xff] }
0x1733   : > { %10833 = vmatpush1.bf16.msra.mxu1 %v10832_v40  ;;  %v4681_v40 = vld [vmem:[#allocation14 + $0x38] sm:$0xff] }
0x1734   : > { %10835 = vmatprep.subr.bf16.mxu1 %v10834_v44  ;;  %v10868_v44 = vpack.c.bf16 %v4677_v30, %v4674_v25  ;;  %v4706_v25 = vld [vmem:[#allocation14 + $0x100] sm:$0xff]  ;;  %v4711_v30 = vld [vmem:[#allocation14 + $0x128] sm:$0xff] }
0x1737   : > { %10837 = vmatpush1.bf16.msra.mxu1 %v10836_v60  ;;  %v4694_v60 = vld [vmem:[#allocation14 + $0xa0] sm:$0xff] }
0x1738   : > { %10839 = vmatprep.subr.bf16.mxu1 %v10838_v29  ;;  %v10908_v29 = vpack.c.bf16 %v4697_v54, %v4694_v60 }
0x173b   : > { %10841 = vmatpush1.bf16.msra.mxu1 %v10840_v32  ;;  %v4700_v32 = vld [vmem:[#allocation14 + $0xd0] sm:$0xff] }
0x173c   : > { %10867 = vmatprep.subr.bf16.mxu1 %v10866_v42  ;;  %v10911_v42 = vpack.c.bf16 %v4703_v11, %v4700_v32  ;;  %v5042_v32 = vld [vmem:[#allocation9 + $0x10] sm:$0xff]  ;;  %v5043_v11 = vld [vmem:[#allocation9 + $0x18] sm:$0xff] }
0x17f1   : > { %v4354_v49 = vpop.f32.mrb[24].mxu1 }
0x17f2   : > { %v9408_v14 = vpop.f32.mrb[25].mxu1  ;;  %4461 = vmatprep.mubr.f32.mxu0 %v4354_v49  ;;  %v10870_v49 = vpack.c.bf16 %v4684_v41, %v4681_v40  ;;  %v4710_v41 = vld [vmem:[#allocation14 + $0x120] sm:$0xff] }
0x17f3   : > { %4462 = vmatmul.mubr.f32.vlgmr.msra.gmra.mrb[34].mxu0 %v13291_v56  ;;  %v4494_v56 = vld [vmem:[#allocation12 + $0xd0] sm:$0xff]  ;;  %v4685_v14 = vld [vmem:[#allocation14 + $0x58] sm:$0xff] }
0x17f4   : > { %10844 = vmatpush3.bf16.msra.mxu0 %v10843_v8  ;;  %9441 = vmatprep.mubr.msk.f32.mxu0 %vm12432_vm0, %v12433_v24  ;;  %v10855_v16 = vpack.c.bf16 %v4497_v21, %v4494_v56  ;;  %v4688_v56 = vld [vmem:[#allocation14 + $0x70] sm:$0xff]  ;;  %v4691_v21 = vld [vmem:[#allocation14 + $0x88] sm:$0xff] }
0x17f5   : > { %10845 = vmatprep.subr.bf16.mxu0 %v12431_v59 }
0x17f8   : > { %10847 = vmatpush3.bf16.msra.mxu0 %v10846_v1  ;;  %v4687_v1 = vld [vmem:[#allocation14 + $0x68] sm:$0xff] }
0x17f9   : > { %10848 = vmatprep.subr.bf16.mxu0 %v12431_v59  ;;  %v10874_v39 = vpack.c.bf16 %v4690_v26, %v4687_v1  ;;  %v4719_v26 = vld [vmem:[#allocation14 + $0x168] sm:$0xff] }
0x17fc   : > { %10850 = vmatpush3.bf16.msra.mxu0 %v10849_v20  ;;  %v10902_v20 = vpack.c.bf16 %v4685_v14, %v4682_v9  ;;  %v4716_v14 = vld [vmem:[#allocation14 + $0x150] sm:$0xff] }
0x17fd   : > { %10851 = vmatprep.subr.bf16.mxu0 %v12431_v59 }
0x1800   : > { %10853 = vmatpush3.bf16.msra.mxu0 %v10852_v63  ;;  %v4689_v63 = vld [vmem:[#allocation14 + $0x78] sm:$0xff] }
0x1801   : > { %10854 = vmatprep.subr.bf16.mxu0 %v12431_v59  ;;  %v10876_v47 = vpack.c.bf16 %v4689_v63, %v4686_v22  ;;  %v10896_v22 = vpack.c.bf16 %v4719_v26, %v4716_v14  ;;  %v4902_v63 = vld [vmem:[#allocation15 + $0x8] sm:$0xff]  ;;  %v5046_v14 = vld [vmem:[#allocation9 + $0x30] sm:$0xff] }
0x1804   : > { %10856 = vmatpush3.bf16.msra.mxu0 %v10855_v16  ;;  %v4693_v16 = vld [vmem:[#allocation14 + $0x98] sm:$0xff] }
0x1805   : > { %10857 = vmatprep.subr.bf16.mxu0 %v12431_v59  ;;  %v10878_v48 = vpack.c.bf16 %v4696_v27, %v4693_v16  ;;  %v4901_v16 = vld [vmem:[#allocation15] sm:$0xff]  ;;  %v4903_v27 = vld [vmem:[#allocation15 + $0x10] sm:$0xff] }
0x1808   : > { %10859 = vmatpush3.bf16.msra.mxu0 %v10858_v33  ;;  %v10905_v33 = vpack.c.bf16 %v4691_v21, %v4688_v56  ;;  %v4904_v56 = vld [vmem:[#allocation15 + $0x18] sm:$0xff] }
0x1809   : > { %10860 = vmatprep.subr.bf16.mxu0 %v12431_v59  ;;  %v10922_v21 = vpack.c.bf16 %v4904_v56, %v4902_v63  ;;  %v4917_v63 = vld [vmem:[#allocation15 + $0x80] sm:$0xff]  ;;  %v4919_v56 = vld [vmem:[#allocation15 + $0x90] sm:$0xff] }
0x180c   : > { %10862 = vmatpush3.bf16.msra.mxu0 %v10861_v61  ;;  %v4699_v61 = vld [vmem:[#allocation14 + $0xc8] sm:$0xff] }
0x180d   : > { %10863 = vmatprep.subr.bf16.mxu0 %v12431_v59  ;;  %v10882_v7 = vpack.c.bf16 %v4702_v62, %v4699_v61  ;;  %v4906_v61 = vld [vmem:[#allocation15 + $0x28] sm:$0xff]  ;;  %v4908_v62 = vld [vmem:[#allocation15 + $0x38] sm:$0xff] }
0x1810   : > { %10865 = vmatpush3.bf16.msra.mxu0 %v10864_v12  ;;  %v4705_v12 = vld [vmem:[#allocation14 + $0xf8] sm:$0xff] }
0x1811   : > { %10898 = vmatprep.subr.bf16.mxu0 %v12431_v59 }
0x18c6   : > { %v8554_v18 = vpop.f32.mrb[34].mxu0 }
0x18c7   : > { %v8555_v23 = vpop.f32.mrb[35].mxu0 }
0x18c8   : > { %v8556_v51 = vadd.f32 %v8555_v23, %v8554_v18  ;;  %v4704_v18 = vld [vmem:[#allocation14 + $0xf0] sm:$0xff]  ;;  %v4707_v23 = vld [vmem:[#allocation14 + $0x108] sm:$0xff] }
0x18c9   : > { %v10888_v38 = vpack.c.bf16 %v4707_v23, %v4704_v18  ;;  %v4911_v23 = vld [vmem:[#allocation15 + $0x50] sm:$0xff] }
0x18ca   : > { %v4464_v50 = vadd.f32 %v8556_v51, %v7943_v19  ;;  %v10886_v19 = vpack.c.bf16 %v4708_v13, %v4705_v12  ;;  %v4709_v51 = vld [vmem:[#allocation14 + $0x118] sm:$0xff]  ;;  %v10958_v12 = vpack.c.bf16 %v5059_v10, %v5058_v5  ;;  %v10960_v13 = vpack.c.bf16 %v5043_v11, %v5042_v32  ;;  %v5050_v5 = vld [vmem:[#allocation9 + $0x50] sm:$0xff]  ;;  %v4926_v11 = vld [vmem:[#allocation15 + $0xc8] sm:$0xff] }
0x18cb   : > { %v10914_v40 = vpack.c.bf16 %v4709_v51, %v4706_v25  ;;  %v5060_v25 = vld [vmem:[#allocation9 + $0xa0] sm:$0xff] }
0x18cc   : > { %v4467_v8 = vmax.f32 %v4464_v50, 0.0  ;;  %v10890_v50 = vpack.c.bf16 %v4714_v37, %v4711_v30  ;;  %v5061_v30 = vld [vmem:[#allocation9 + $0xa8] sm:$0xff]  ;;  %v5044_v37 = vld [vmem:[#allocation9 + $0x20] sm:$0xff] }
0x18ce   : > { %4598 = vmatmul.mubr.f32.vlgmr.msra.gmra.mrb[26].mxu1 %v4467_v8  ;;  %9442 = vmatmul.mubr.f32.vlgmr.msra.gmra.mrb[36].mxu0 %v4467_v8  ;;  %v4717_v8 = vld [vmem:[#allocation14 + $0x158] sm:$0xff] }
0x18cf   : > { %10869 = vmatpush1.bf16.msra.mxu1 %v10868_v44  ;;  %10900 = vmatpush3.bf16.msra.mxu0 %v10899_v45  ;;  %v4713_v44 = vld [vmem:[#allocation14 + $0x138] sm:$0xff]  ;;  %v4712_v45 = vld [vmem:[#allocation14 + $0x130] sm:$0xff] }
0x18d0   : > { %10871 = vmatprep.subr.bf16.mxu1 %v10870_v49  ;;  %10901 = vmatprep.subr.bf16.mxu0 %v12431_v59  ;;  %v4720_v49 = vld [vmem:[#allocation14 + $0x170] sm:$0xff]  ;;  %v10892_v6 = vpack.c.bf16 %v4713_v44, %v4710_v41  ;;  %v10917_v9 = vpack.c.bf16 %v4715_v4, %v4712_v45  ;;  %v4916_v44 = vld [vmem:[#allocation15 + $0x78] sm:$0xff]  ;;  %v4913_v4 = vld [vmem:[#allocation15 + $0x60] sm:$0xff] }
0x18d1   : > { %4803 = vmatprep.mubr.f32.mxu1 %v12433_v24  ;;  %9476 = vmatprep.mubr.msk.f32.mxu0 %vm12432_vm0, %v12433_v24  ;;  %v10894_v1 = vpack.c.bf16 %v4720_v49, %v4717_v8  ;;  %v4915_v8 = vld [vmem:[#allocation15 + $0x70] sm:$0xff] }
0x18d2   : > { %v5062_v49 = vld [vmem:[#allocation9 + $0xb0] sm:$0xff] }
0x18d3   : > { %10873 = vmatpush1.bf16.msra.mxu1 %v10872_v15  ;;  %10903 = vmatpush3.bf16.msra.mxu0 %v10902_v20  ;;  %v4718_v15 = vld [vmem:[#allocation14 + $0x160] sm:$0xff]  ;;  %v4721_v20 = vld [vmem:[#allocation14 + $0x178] sm:$0xff] }
0x18d4   : > { %10875 = vmatprep.subr.bf16.mxu1 %v10874_v39  ;;  %10904 = vmatprep.subr.bf16.mxu0 %v12431_v59  ;;  %v10920_v39 = vpack.c.bf16 %v4721_v20, %v4718_v15  ;;  %v4918_v20 = vld [vmem:[#allocation15 + $0x88] sm:$0xff] }
0x18d7   : > { %10877 = vmatpush1.bf16.msra.mxu1 %v10876_v47  ;;  %10906 = vmatpush3.bf16.msra.mxu0 %v10905_v33  ;;  %v5056_v47 = vld [vmem:[#allocation9 + $0x80] sm:$0xff]  ;;  %v10924_v33 = vpack.c.bf16 %v4903_v27, %v4901_v16  ;;  %v10940_v16 = vpack.c.bf16 %v4919_v56, %v4917_v63  ;;  %v5065_v27 = vld [vmem:[#allocation9 + $0xc8] sm:$0xff] }
0x18d8   : > { %10879 = vmatprep.subr.bf16.mxu1 %v10878_v48  ;;  %10907 = vmatprep.subr.bf16.mxu0 %v12431_v59  ;;  %v5040_v48 = vld [vmem:[#allocation9] sm:$0xff]  ;;  %v10954_v60 = vpack.c.bf16 %v5057_v34, %v5056_v47 }
0x18d9   : > { %v10956_v54 = vpack.c.bf16 %v5041_v53, %v5040_v48  ;;  %v5048_v47 = vld [vmem:[#allocation9 + $0x40] sm:$0xff]  ;;  %v4922_v53 = vld [vmem:[#allocation15 + $0xa8] sm:$0xff] }
0x18db   : > { %10881 = vmatpush1.bf16.msra.mxu1 %v10880_v31  ;;  %10909 = vmatpush3.bf16.msra.mxu0 %v10908_v29  ;;  %v4905_v31 = vld [vmem:[#allocation15 + $0x20] sm:$0xff]  ;;  %v4907_v29 = vld [vmem:[#allocation15 + $0x30] sm:$0xff] }
0x18dc   : > { %10883 = vmatprep.subr.bf16.mxu1 %v10882_v7  ;;  %10910 = vmatprep.subr.bf16.mxu0 %v12431_v59  ;;  %v10928_v7 = vpack.c.bf16 %v4907_v29, %v4905_v31  ;;  %v5067_v29 = vld [vmem:[#allocation9 + $0xd8] sm:$0xff] }
0x18df   : > { %10885 = vmatpush1.bf16.msra.mxu1 %v10884_v17  ;;  %10912 = vmatpush3.bf16.msra.mxu0 %v10911_v42  ;;  %v4910_v17 = vld [vmem:[#allocation15 + $0x48] sm:$0xff]  ;;  %v4912_v42 = vld [vmem:[#allocation15 + $0x58] sm:$0xff] }
0x18e0   : > { %10887 = vmatprep.subr.bf16.mxu1 %v10886_v19  ;;  %10913 = vmatprep.subr.bf16.mxu0 %v12431_v59  ;;  %v10930_v18 = vpack.c.bf16 %v4912_v42, %v4910_v17  ;;  %v4909_v19 = vld [vmem:[#allocation15 + $0x40] sm:$0xff]  ;;  %v4927_v42 = vld [vmem:[#allocation15 + $0xd0] sm:$0xff] }
0x18e1   : > { %v10932_v51 = vpack.c.bf16 %v4911_v23, %v4909_v19  ;;  %v4925_v17 = vld [vmem:[#allocation15 + $0xc0] sm:$0xff]  ;;  %v5069_v23 = vld [vmem:[#allocation9 + $0xe8] sm:$0xff] }
0x18e2   : > { %v10948_v19 = vpack.c.bf16 %v4927_v42, %v4925_v17 }
0x18e3   : > { %10889 = vmatpush1.bf16.msra.mxu1 %v10888_v38  ;;  %10915 = vmatpush3.bf16.msra.mxu0 %v10914_v40  ;;  %v5045_v38 = vld [vmem:[#allocation9 + $0x28] sm:$0xff]  ;;  %v10962_v40 = vpack.c.bf16 %v5061_v30, %v5060_v25  ;;  %v5052_v25 = vld [vmem:[#allocation9 + $0x60] sm:$0xff] }
0x18e4   : > { %10891 = vmatprep.subr.bf16.mxu1 %v10890_v50  ;;  %10916 = vmatprep.subr.bf16.mxu0 %v12431_v59  ;;  %v10964_v41 = vpack.c.bf16 %v5045_v38, %v5044_v37  ;;  %v4914_v50 = vld [vmem:[#allocation15 + $0x68] sm:$0xff] }
0x18e5   : > { %v10934_v45 = vpack.c.bf16 %v4916_v44, %v4914_v50  ;;  %v4930_v38 = vld [vmem:[#allocation15 + $0xe8] sm:$0xff]  ;;  %v4929_v50 = vld [vmem:[#allocation15 + $0xe0] sm:$0xff]  ;;  %v4931_v44 = vld [vmem:[#allocation15 + $0xf0] sm:$0xff] }
0x18e7   : > { %10893 = vmatpush1.bf16.msra.mxu1 %v10892_v6  ;;  %10918 = vmatpush3.bf16.msra.mxu0 %v10917_v9  ;;  %v10936_v6 = vpack.c.bf16 %v4915_v8, %v4913_v4  ;;  %v5063_v9 = vld [vmem:[#allocation9 + $0xb8] sm:$0xff]  ;;  %v10952_v4 = vpack.c.bf16 %v4931_v44, %v4929_v50 }
0x18e8   : > { %10895 = vmatprep.subr.bf16.mxu1 %v10894_v1  ;;  %10919 = vmatprep.subr.bf16.mxu0 %v12431_v59  ;;  %v5047_v1 = vld [vmem:[#allocation9 + $0x38] sm:$0xff]  ;;  %v10966_v26 = vpack.c.bf16 %v5063_v9, %v5062_v49  ;;  %v5054_v49 = vld [vmem:[#allocation9 + $0x70] sm:$0xff] }
0x18e9   : > { %v10968_v15 = vpack.c.bf16 %v5047_v1, %v5046_v14  ;;  %v5071_v8 = vld [vmem:[#allocation9 + $0xf8] sm:$0xff] }
0x18eb   : > { %10897 = vmatpush1.bf16.msra.mxu1 %v10896_v22  ;;  %10921 = vmatpush3.bf16.msra.mxu0 %v10920_v39  ;;  %v4920_v22 = vld [vmem:[#allocation15 + $0x98] sm:$0xff] }
0x18ec   : > { %10923 = vmatprep.subr.bf16.mxu1 %v10922_v21  ;;  %10955 = vmatprep.subr.bf16.mxu0 %v10954_v60  ;;  %v10938_v39 = vpack.c.bf16 %v4920_v22, %v4918_v20  ;;  %v5064_v21 = vld [vmem:[#allocation9 + $0xc0] sm:$0xff]  ;;  %v4924_v60 = vld [vmem:[#allocation15 + $0xb8] sm:$0xff]  ;;  %v4516_v20 = vld [vmem:[%s13928_s21] sm:$0x7] }
0x18ed   : > { %v10970_v34 = vpack.c.bf16 %v5065_v27, %v5064_v21  ;;  %v4521_v22 = vrot.slane %v4516_v20, %v13042_v46  ;;  %v4525_v63 = vrot.slane %v4516_v20, %v13050_v28 }
0x18ee   : > { %4804 = vmatmul.mubr.f32.vlgmr.msra.gmra.mrb[26].mxu1 %v13288_v55  ;;  %9477 = vmatmul.mubr.f32.vlgmr.msra.gmra.mrb[38].mxu0 %v13288_v55  ;;  %v10926_v55 = vpack.c.bf16 %v4908_v62, %v4906_v61  ;;  %v4921_v61 = vld [vmem:[#allocation15 + $0xa0] sm:$0xff]  ;;  %v4923_v62 = vld [vmem:[#allocation15 + $0xb0] sm:$0xff] }
0x18ef   : > { %5009 = vmatprep.mubr.f32.mxu1 %v12433_v24  ;;  %10925 = vmatpush1.bf16.msra.mxu1 %v10924_v33  ;;  %v5049_v33 = vld [vmem:[#allocation9 + $0x48] sm:$0xff]  ;;  %v10944_v31 = vpack.c.bf16 %v4923_v62, %v4921_v61 }
0x18f0   : > { %10957 = vmatpush3.bf16.msra.mxu0 %v10956_v54  ;;  %10927 = vmatprep.subr.bf16.mxu1 %v10926_v55  ;;  %v10972_v48 = vpack.c.bf16 %v5049_v33, %v5048_v47  ;;  %v10942_v54 = vpack.c.bf16 %v4924_v60, %v4922_v53  ;;  %v5066_v55 = vld [vmem:[#allocation9 + $0xd0] sm:$0xff] }
0x18f1   : > { %10959 = vmatprep.subr.bf16.mxu0 %v10958_v12  ;;  %v10974_v10 = vpack.c.bf16 %v5067_v29, %v5066_v55  ;;  %v4928_v12 = vld [vmem:[#allocation15 + $0xd8] sm:$0xff]  ;;  %v4529_v29 = vrot.slane %v4516_v20, %v13056_v0 }
0x18f2   : > { %v5165_v20 = vld [vmem:[#allocation8 + $0x38] sm:$0xff] }
0x18f3   : > { %10929 = vmatpush1.bf16.msra.mxu1 %v10928_v7  ;;  %v5051_v7 = vld [vmem:[#allocation9 + $0x58] sm:$0xff] }
0x18f4   : > { %10961 = vmatpush3.bf16.msra.mxu0 %v10960_v13  ;;  %10931 = vmatprep.subr.bf16.mxu1 %v10930_v18  ;;  %v10976_v32 = vpack.c.bf16 %v5051_v7, %v5050_v5  ;;  %v10946_v13 = vpack.c.bf16 %v4928_v12, %v4926_v11  ;;  %v5068_v18 = vld [vmem:[#allocation9 + $0xe0] sm:$0xff] }
0x18f5   : > { %10963 = vmatprep.subr.bf16.mxu0 %v10962_v40  ;;  %v10978_v30 = vpack.c.bf16 %v5069_v23, %v5068_v18  ;;  %v4932_v40 = vld [vmem:[#allocation15 + $0xf8] sm:$0xff] }
0x18f7   : > { %10933 = vmatpush1.bf16.msra.mxu1 %v10932_v51  ;;  %v5053_v51 = vld [vmem:[#allocation9 + $0x68] sm:$0xff] }
0x18f8   : > { %10965 = vmatpush3.bf16.msra.mxu0 %v10964_v41  ;;  %10935 = vmatprep.subr.bf16.mxu1 %v10934_v45  ;;  %v10980_v37 = vpack.c.bf16 %v5053_v51, %v5052_v25  ;;  %v10950_v41 = vpack.c.bf16 %v4932_v40, %v4930_v38  ;;  %v5070_v45 = vld [vmem:[#allocation9 + $0xf0] sm:$0xff]  ;;  %v13365_v51 = vld [vmem:[%s12889_s13 + $0x28] sm:$0xff] }
0x18f9   : > { %10967 = vmatprep.subr.bf16.mxu0 %v10966_v26  ;;  %v10982_v9 = vpack.c.bf16 %v5071_v8, %v5070_v45  ;;  %v5158_v45 = vld [vmem:[#allocation8] sm:$0xff]  ;;  %v5160_v8 = vld [vmem:[#allocation8 + $0x10] sm:$0xff] }
0x18fb   : > { %10937 = vmatpush1.bf16.msra.mxu1 %v10936_v6  ;;  %v5055_v6 = vld [vmem:[#allocation9 + $0x78] sm:$0xff] }
0x18fc   : > { %10969 = vmatpush3.bf16.msra.mxu0 %v10968_v15  ;;  %10939 = vmatprep.subr.bf16.mxu1 %v10938_v39  ;;  %v10984_v14 = vpack.c.bf16 %v5055_v6, %v5054_v49  ;;  %v4722_v15 = vld [vmem:[%s13926_s7] sm:$0x7]  ;;  %v5161_v6 = vld [vmem:[#allocation8 + $0x18] sm:$0xff] }
0x18fd   : > { %10971 = vmatprep.subr.bf16.mxu0 %v10970_v34  ;;  %v4727_v39 = vrot.slane %v4722_v15, %v13042_v46  ;;  %v4731_v56 = vrot.slane %v4722_v15, %v13050_v28 }
0x18ff   : > { %10941 = vmatpush1.bf16.msra.mxu1 %v10940_v16  ;;  %v11666_v21 = vadd.f32 %v4727_v39, %v4521_v22  ;;  %v11668_v47 = vadd.f32 %v4731_v56, %v4525_v63  ;;  %v5166_v39 = vld [vmem:[#allocation8 + $0x40] sm:$0xff]  ;;  %v5167_v63 = vld [vmem:[#allocation8 + $0x48] sm:$0xff] }
0x1900   : > { %10973 = vmatpush3.bf16.msra.mxu0 %v10972_v48  ;;  %10943 = vmatprep.subr.bf16.mxu1 %v10942_v54  ;;  %v10999_v56 = vpack.c.bf16 %v5167_v63, %v5166_v39 }
0x1901   : > { %10975 = vmatprep.subr.bf16.mxu0 %v10974_v10 }
0x1903   : > { %10945 = vmatpush1.bf16.msra.mxu1 %v10944_v31  ;;  %v4735_v31 = vrot.slane %v4722_v15, %v13056_v0  ;;  %v5164_v15 = vld [vmem:[#allocation8 + $0x30] sm:$0xff] }
0x1904   : > { %10977 = vmatpush3.bf16.msra.mxu0 %v10976_v32  ;;  %10947 = vmatprep.subr.bf16.mxu1 %v10946_v13  ;;  %v10996_v22 = vpack.c.bf16 %v5165_v20, %v5164_v15  ;;  %v5253_v15 = vld [vmem:[#allocation11 + $0x48] sm:$0xff]  ;;  %v5270_v20 = vld [vmem:[#allocation11 + $0xd0] sm:$0xff] }
0x1905   : > { %10979 = vmatprep.subr.bf16.mxu0 %v10978_v30 }
0x1907   : > { %10949 = vmatpush1.bf16.msra.mxu1 %v10948_v19  ;;  %v12041_v19 = vld [vmem:[%s12918_s23 + $0x70] sm:$0xff] }
0x1908   : > { %10981 = vmatpush3.bf16.msra.mxu0 %v10980_v37  ;;  %10951 = vmatprep.subr.bf16.mxu1 %v10950_v41  ;;  %v7951_v41 = vld [vmem:[%s13924_s4] ss:$0 sm:$0xff] }
0x1909   : > { %10983 = vmatprep.subr.bf16.mxu0 %v10982_v9  ;;  %v10990_v9 = vpack.c.bf16 %v5161_v6, %v5160_v8  ;;  %v5250_v8 = vld [vmem:[#allocation11 + $0x30] sm:$0xff]  ;;  %v5268_v6 = vld [vmem:[#allocation11 + $0xc0] sm:$0xff] }
0x190b   : > { %10953 = vmatpush1.bf16.msra.mxu1 %v10952_v4  ;;  %v5159_v4 = vld [vmem:[#allocation8 + $0x8] sm:$0xff] }
0x190c   : > { %10986 = vmatprep.subr.bf16.mxu1 %v12431_v59  ;;  %10985 = vmatpush3.bf16.msra.mxu0 %v10984_v14  ;;  %v10987_v49 = vpack.c.bf16 %v5159_v4, %v5158_v45  ;;  %v5162_v14 = vld [vmem:[#allocation8 + $0x20] sm:$0xff] }
0x19a1   : > { %v4670_v1 = vpop.f32.mrb[36].mxu0 }
0x19a2   : > { %v9443_v26 = vpop.f32.mrb[37].mxu0  ;;  %v4671_v32 = vadd.f32 %v4670_v1, %v4529_v29  ;;  %v5163_v1 = vld [vmem:[#allocation8 + $0x28] sm:$0xff] }
0x19a3   : > { %v10993_v26 = vpack.c.bf16 %v5163_v1, %v5162_v14  ;;  %v5261_v29 = vld [vmem:[#allocation11 + $0x88] sm:$0xff] }
0x19c1   : > { %v4805_v16 = vpop.f32.mrb[26].mxu1  ;;  %v4876_v27 = vpop.f32.mrb[38].mxu0 }
0x19c2   : > { %v11667_v33 = vadd.f32 %v11666_v21, %v4805_v16  ;;  %v4807_v34 = vpop.f32.mrb[27].mxu1  ;;  %v9478_v48 = vpop.f32.mrb[39].mxu0  ;;  %v4877_v7 = vadd.f32 %v4876_v27, %v4735_v31  ;;  %v5260_v31 = vld [vmem:[#allocation11 + $0x80] sm:$0xff] }
0x19c3   : > { %v11669_v60 = vadd.f32 %v11668_v47, %v4807_v34  ;;  %v5169_v34 = vld [vmem:[#allocation8 + $0x58] sm:$0xff] }
0x19c4   : > { %v7944_v53 = vmul.f32 -1.442695, %v11667_v33  ;;  %v5168_v33 = vld [vmem:[#allocation8 + $0x50] sm:$0xff] }
0x19c5   : > { %v7945_v54 = vmul.f32 -1.442695, %v11669_v60  ;;  %v11002_v48 = vpack.c.bf16 %v5169_v34, %v5168_v33  ;;  %v5171_v60 = vld [vmem:[#allocation8 + $0x68] sm:$0xff] }
0x19c6   : > { %11938 = vpow2.f32 %v7944_v53  ;;  %v5170_v53 = vld [vmem:[#allocation8 + $0x60] sm:$0xff] }
0x19c7   : > { %11940 = vpow2.f32 %v7945_v54  ;;  %v11005_v54 = vpack.c.bf16 %v5171_v60, %v5170_v53  ;;  %v5257_v53 = vld [vmem:[#allocation11 + $0x68] sm:$0xff]  ;;  %v5274_v60 = vld [vmem:[#allocation11 + $0xf0] sm:$0xff] }
0x19d0   : > { %v11939_v61 = vpop.eup %11938 }
0x19d1   : > { %v4884_v62 = vadd.f32 1.0, %v11939_v61  ;;  %v11941_v55 = vpop.eup %11940  ;;  %v5172_v61 = vld [vmem:[#allocation8 + $0x70] sm:$0xff] }
0x19d2   : > { %v4891_v5 = vadd.f32 1.0, %v11941_v55 }
0x19d3   : > { %11942 = vrcp.f32 %v4884_v62  ;;  %v5173_v62 = vld [vmem:[#allocation8 + $0x78] sm:$0xff] }
0x19d4   : > { %11944 = vrcp.f32 %v4891_v5  ;;  %v11008_v55 = vpack.c.bf16 %v5173_v62, %v5172_v61  ;;  %v5244_v5 = vld [vmem:[#allocation11] sm:$0xff] }
0x19dd   : > { %v11943_v10 = vpop.eup %11942 }
0x19de   : > { %v4894_v11 = vmul.f32 %v11943_v10, %v4877_v7  ;;  %v11945_v13 = vpop.eup %11944  ;;  %v11010_v7 = vpack.c.bf16 %v5261_v29, %v5260_v31  ;;  %v5245_v10 = vld [vmem:[#allocation11 + $0x8] sm:$0xff]  ;;  %v5259_v31 = vld [vmem:[#allocation11 + $0x78] sm:$0xff] }
0x19df   : > { %v4897_v17 = vsub.f32 1.0, %v11945_v13  ;;  %v4899_v23 = vmul.f32 %v12041_v19, %v11945_v13  ;;  %v5265_v19 = vld [vmem:[#allocation11 + $0xa8] sm:$0xff] }
0x19e0   : > { %v4895_v12 = vadd.f32 %v4894_v11, %v4671_v32  ;;  %v5262_v32 = vld [vmem:[#allocation11 + $0x90] sm:$0xff]  ;;  %v5263_v11 = vld [vmem:[#allocation11 + $0x98] sm:$0xff]  ;;  %11011 = vmatprep.subr.bf16.mxu0 %v11010_v7 }
0x19e1   : > { %v11014_v13 = vpack.c.bf16 %v5263_v11, %v5262_v32  ;;  %v5355_v32 = vld [vmem:[#allocation12 + $0x8] sm:$0xff]  ;;  %v5358_v11 = vld [vmem:[#allocation12 + $0x20] sm:$0xff] }
0x19e2   : > { %11946 = vtanh.f32 %v4895_v12  ;;  %v11012_v12 = vpack.c.bf16 %v5245_v10, %v5244_v5 }
0x19ec   : > { %v11947_v42 = vpop.eup %11946 }
0x19ed   : > { %v4898_v18 = vmul.f32 %v11947_v42, %v4897_v17  ;;  %v5246_v17 = vld [vmem:[#allocation11 + $0x10] sm:$0xff]  ;;  %v5247_v42 = vld [vmem:[#allocation11 + $0x18] sm:$0xff] }
0x19ef   : > { %v13362_v25 = vadd.f32 %v4899_v23, %v4898_v18  ;;  %v5264_v18 = vld [vmem:[#allocation11 + $0xa0] sm:$0xff]  ;;  %v11016_v23 = vpack.c.bf16 %v5247_v42, %v5246_v17  ;;  %v5357_v17 = vld [vmem:[#allocation12 + $0x18] sm:$0xff] }
0x19f1   : > { %5010 = vmatmul.mubr.f32.vlgmr.msra.gmra.mrb[28].mxu1 %v13362_v25  ;;  %7948 = vst [vmem:[%s12918_s23 + $0x90] sm:$0xff] %v13362_v25  ;;  %5143 = vmatprep.mubr.f32.mxu0 %v13362_v25 }
0x19f2   : > { %5144 = vmatmul.mubr.f32.vlgmr.msra.gmra.mrb[40].mxu0 %v13365_v51  ;;  %9511 = vmatprep.mubr.msk.f32.mxu1 %vm12432_vm0, %v12433_v24 }
0x19f3   : > { %10988 = vmatpush3.bf16.msra.mxu1 %v10987_v49  ;;  %11013 = vmatpush3.bf16.msra.mxu0 %v11012_v12  ;;  %v5251_v49 = vld [vmem:[#allocation11 + $0x38] sm:$0xff]  ;;  %v5354_v12 = vld [vmem:[#allocation12] sm:$0xff] }
0x19f4   : > { %10989 = vmatprep.subr.bf16.mxu1 %v12431_v59  ;;  %11015 = vmatprep.subr.bf16.mxu0 %v11014_v13  ;;  %v11024_v14 = vpack.c.bf16 %v5251_v49, %v5250_v8  ;;  %v11042_v13 = vpack.c.bf16 %v5358_v11, %v5355_v32  ;;  %v11044_v42 = vpack.c.bf16 %v5357_v17, %v5354_v12  ;;  %v5373_v49 = vld [vmem:[#allocation12 + $0x98] sm:$0xff]  ;;  %v5368_v32 = vld [vmem:[#allocation12 + $0x70] sm:$0xff]  ;;  %v5371_v11 = vld [vmem:[#allocation12 + $0x88] sm:$0xff] }
0x19f5   : > { %v11081_v12 = vpack.c.bf16 %v5371_v11, %v5368_v32  ;;  %v5377_v17 = vld [vmem:[#allocation12 + $0xb8] sm:$0xff]  ;;  %v5573_v11 = vld [vmem:[#allocation14 + $0x68] sm:$0xff] }
0x19f6   : > { %v5571_v32 = vld [vmem:[#allocation14 + $0x58] sm:$0xff] }
0x19f7   : > { %10991 = vmatpush3.bf16.msra.mxu1 %v10990_v9  ;;  %11017 = vmatpush3.bf16.msra.mxu0 %v11016_v23  ;;  %v5269_v9 = vld [vmem:[#allocation11 + $0xc8] sm:$0xff]  ;;  %v5360_v23 = vld [vmem:[#allocation12 + $0x30] sm:$0xff] }
0x19f8   : > { %10992 = vmatprep.subr.bf16.mxu1 %v12431_v59  ;;  %v11026_v1 = vpack.c.bf16 %v5269_v9, %v5268_v6  ;;  %v5376_v6 = vld [vmem:[#allocation12 + $0xb0] sm:$0xff] }
0x19f9   : > { %v11054_v9 = vpack.c.bf16 %v5376_v6, %v5373_v49  ;;  %v5400_v49 = vld [vmem:[#allocation12 + $0x170] sm:$0xff] }
0x19fb   : > { %10994 = vmatpush3.bf16.msra.mxu1 %v10993_v26  ;;  %v5252_v26 = vld [vmem:[#allocation11 + $0x40] sm:$0xff] }
0x19fc   : > { %10995 = vmatprep.subr.bf16.mxu1 %v12431_v59  ;;  %v11028_v39 = vpack.c.bf16 %v5253_v15, %v5252_v26  ;;  %v5379_v15 = vld [vmem:[#allocation12 + $0xc8] sm:$0xff] }
0x19ff   : > { %10997 = vmatpush3.bf16.msra.mxu1 %v10996_v22  ;;  %v5271_v22 = vld [vmem:[#allocation11 + $0xd8] sm:$0xff] }
0x1a00   : > { %10998 = vmatprep.subr.bf16.mxu1 %v12431_v59  ;;  %v11030_v63 = vpack.c.bf16 %v5271_v22, %v5270_v20  ;;  %v5382_v20 = vld [vmem:[#allocation12 + $0xe0] sm:$0xff] }
0x1a01   : > { %v11058_v22 = vpack.c.bf16 %v5382_v20, %v5379_v15  ;;  %v5401_v15 = vld [vmem:[#allocation12 + $0x178] sm:$0xff] }
0x1a03   : > { %11000 = vmatpush3.bf16.msra.mxu1 %v10999_v56  ;;  %v5254_v56 = vld [vmem:[#allocation11 + $0x50] sm:$0xff] }
0x1a04   : > { %11001 = vmatprep.subr.bf16.mxu1 %v12431_v59 }
0x1a07   : > { %11003 = vmatpush3.bf16.msra.mxu1 %v11002_v48  ;;  %v5256_v48 = vld [vmem:[#allocation11 + $0x60] sm:$0xff] }
0x1a08   : > { %11004 = vmatprep.subr.bf16.mxu1 %v12431_v59  ;;  %v11036_v61 = vpack.c.bf16 %v5257_v53, %v5256_v48  ;;  %v5391_v53 = vld [vmem:[#allocation12 + $0x128] sm:$0xff] }
0x1a0b   : > { %11006 = vmatpush3.bf16.msra.mxu1 %v11005_v54  ;;  %v5275_v54 = vld [vmem:[#allocation11 + $0xf8] sm:$0xff] }
0x1a0c   : > { %11007 = vmatprep.subr.bf16.mxu1 %v12431_v59  ;;  %v11038_v62 = vpack.c.bf16 %v5275_v54, %v5274_v60  ;;  %v5394_v60 = vld [vmem:[#allocation12 + $0x140] sm:$0xff] }
0x1a0d   : > { %v11066_v54 = vpack.c.bf16 %v5394_v60, %v5391_v53  ;;  %v5565_v53 = vld [vmem:[#allocation14 + $0x28] sm:$0xff]  ;;  %v5567_v60 = vld [vmem:[#allocation14 + $0x38] sm:$0xff] }
0x1a0f   : > { %11009 = vmatpush3.bf16.msra.mxu1 %v11008_v55  ;;  %v5258_v55 = vld [vmem:[#allocation11 + $0x70] sm:$0xff] }
0x1a10   : > { %v11040_v29 = vpack.c.bf16 %v5259_v31, %v5258_v55  ;;  %11043 = vmatprep.subr.bf16.mxu1 %v11042_v13  ;;  %v5374_v13 = vld [vmem:[#allocation12 + $0xa0] sm:$0xff] }
0x1ac4   : > { %v13374_v30 = vpop.f32.mrb[28].mxu1 }
0x1ac5   : > { %v13376_v37 = vpop.f32.mrb[29].mxu1  ;;  %v8623_v38 = vpop.f32.mrb[40].mxu0 }
0x1ac6   : > { %v8624_v40 = vpop.f32.mrb[41].mxu0 }
0x1ac7   : > { %v8625_v50 = vadd.f32 %v8624_v40, %v8623_v38  ;;  %v11018_v38 = vpack.c.bf16 %v5265_v19, %v5264_v18  ;;  %v5248_v40 = vld [vmem:[#allocation11 + $0x20] sm:$0xff]  ;;  %v5361_v18 = vld [vmem:[#allocation12 + $0x38] sm:$0xff]  ;;  %v5364_v19 = vld [vmem:[#allocation12 + $0x50] sm:$0xff] }
0x1ac9   : > { %v5146_v44 = vadd.f32 %v8625_v50, %v7951_v41  ;;  %v5249_v41 = vld [vmem:[#allocation11 + $0x28] sm:$0xff]  ;;  %v5266_v50 = vld [vmem:[#allocation11 + $0xb0] sm:$0xff]  ;;  %11019 = vmatprep.subr.bf16.mxu0 %v11018_v38  ;;  %v11046_v38 = vpack.c.bf16 %v5364_v19, %v5361_v18 }
0x1aca   : > { %v11020_v45 = vpack.c.bf16 %v5249_v41, %v5248_v40  ;;  %v5363_v40 = vld [vmem:[#allocation12 + $0x48] sm:$0xff] }
0x1acb   : > { %5149 = vmax.xlane.f32.xlu0 %v5146_v44  ;;  %v11048_v41 = vpack.c.bf16 %v5363_v40, %v5360_v23  ;;  %v5383_v18 = vld [vmem:[#allocation12 + $0xe8] sm:$0xff]  ;;  %v5386_v23 = vld [vmem:[#allocation12 + $0x100] sm:$0xff] }
0x1acc   : > { %11021 = vmatpush3.bf16.msra.mxu0 %v11020_v45  ;;  %v5366_v45 = vld [vmem:[#allocation12 + $0x60] sm:$0xff] }
0x1b58   : > { %v5150_v21 = vpop.xlane.xlu0 %5149 }
0x1b59   : > { %v5151_v16 = vsub.f32 %v5146_v44, %v5150_v21  ;;  %v5267_v44 = vld [vmem:[#allocation11 + $0xb8] sm:$0xff] }
0x1b5a   : > { %v11022_v4 = vpack.c.bf16 %v5267_v44, %v5266_v50  ;;  %v5255_v21 = vld [vmem:[#allocation11 + $0x58] sm:$0xff]  ;;  %v5370_v50 = vld [vmem:[#allocation12 + $0x80] sm:$0xff] }
0x1b5b   : > { %v5152_v27 = vmul.f32 1.442695, %v5151_v16  ;;  %v5272_v16 = vld [vmem:[#allocation11 + $0xe0] sm:$0xff]  ;;  %v11032_v33 = vpack.c.bf16 %v5255_v21, %v5254_v56  ;;  %v5385_v21 = vld [vmem:[#allocation12 + $0xf8] sm:$0xff] }
0x1b5c   : > { %11023 = vmatprep.subr.bf16.mxu0 %v11022_v4  ;;  %v5369_v4 = vld [vmem:[#allocation12 + $0x78] sm:$0xff] }
0x1b5d   : > { %11948 = vpow2.f32 %v5152_v27  ;;  %11025 = vmatpush3.bf16.msra.mxu0 %v11024_v14  ;;  %v5273_v27 = vld [vmem:[#allocation11 + $0xe8] sm:$0xff]  ;;  %v11052_v8 = vpack.c.bf16 %v5369_v4, %v5366_v45  ;;  %v5372_v14 = vld [vmem:[#allocation12 + $0x90] sm:$0xff] }
0x1b5e   : > { %11027 = vmatprep.subr.bf16.mxu0 %v11026_v1  ;;  %v11034_v34 = vpack.c.bf16 %v5273_v27, %v5272_v16  ;;  %v5375_v1 = vld [vmem:[#allocation12 + $0xa8] sm:$0xff]  ;;  %v5388_v16 = vld [vmem:[#allocation12 + $0x110] sm:$0xff] }
0x1b5f   : > { %v11056_v26 = vpack.c.bf16 %v5375_v1, %v5372_v14  ;;  %v11062_v27 = vpack.c.bf16 %v5388_v16, %v5385_v21  ;;  %v5395_v45 = vld [vmem:[#allocation12 + $0x148] sm:$0xff]  ;;  %v5398_v1 = vld [vmem:[#allocation12 + $0x160] sm:$0xff] }
0x1b60   : > { %v5399_v14 = vld [vmem:[#allocation12 + $0x168] sm:$0xff]  ;;  %v11096_v20 = vpack.c.bf16 %v5401_v15, %v5398_v1  ;;  %v5584_v1 = vld [vmem:[#allocation14 + $0xc0] sm:$0xff]  ;;  %v5587_v15 = vld [vmem:[#allocation14 + $0xd8] sm:$0xff] }
0x1b61   : > { %11029 = vmatpush3.bf16.msra.mxu0 %v11028_v39  ;;  %v5378_v39 = vld [vmem:[#allocation12 + $0xc0] sm:$0xff]  ;;  %v7952_v21 = vld [vmem:[%s13925_s22] ss:$0 sm:$0xff] }
0x1b62   : > { %11031 = vmatprep.subr.bf16.mxu0 %v11030_v63  ;;  %v5381_v63 = vld [vmem:[#allocation12 + $0xd8] sm:$0xff] }
0x1b63   : > { %v11060_v56 = vpack.c.bf16 %v5381_v63, %v5378_v39  ;;  %v5564_v39 = vld [vmem:[#allocation14 + $0x20] sm:$0xff] }
0x1b65   : > { %11033 = vmatpush3.bf16.msra.mxu0 %v11032_v33  ;;  %v5384_v33 = vld [vmem:[#allocation12 + $0xf0] sm:$0xff] }
0x1b66   : > { %11035 = vmatprep.subr.bf16.mxu0 %v11034_v34  ;;  %v5387_v34 = vld [vmem:[#allocation12 + $0x108] sm:$0xff] }
0x1b67   : > { %v13386_v47 = vpop.eup %11948  ;;  %v11064_v48 = vpack.c.bf16 %v5387_v34, %v5384_v33  ;;  %v5563_v34 = vld [vmem:[#allocation14 + $0x18] sm:$0xff] }
0x1b68   : > { %5154 = vadd.xlane.f32.xlu1 %v13386_v47 }
0x1b69   : > { %11037 = vmatpush3.bf16.msra.mxu0 %v11036_v61  ;;  %v5356_v61 = vld [vmem:[#allocation12 + $0x10] sm:$0xff] }
0x1b6a   : > { %11039 = vmatprep.subr.bf16.mxu0 %v11038_v62  ;;  %v5359_v62 = vld [vmem:[#allocation12 + $0x28] sm:$0xff] }
0x1b6b   : > { %v11075_v55 = vpack.c.bf16 %v5359_v62, %v5356_v61 }
0x1b6d   : > { %11041 = vmatpush3.bf16.msra.mxu0 %v11040_v29  ;;  %v5362_v29 = vld [vmem:[#allocation12 + $0x40] sm:$0xff] }
0x1b6e   : > { %11074 = vmatprep.subr.bf16.mxu0 %v12431_v59 }
0x1bf5   : > { %v5155_v5 = vpop.xlane.xlu1 %5154 }
0x1bf6   : > { %11950 = vrcp.f32 %v5155_v5  ;;  %v5365_v5 = vld [vmem:[#allocation12 + $0x58] sm:$0xff] }
0x1c00   : > { %v11951_v7 = vpop.eup %11950 }
0x1c01   : > { %v5157_v10 = vmul.f32 %v11951_v7, %v13386_v47  ;;  %v5367_v47 = vld [vmem:[#allocation12 + $0x68] sm:$0xff] }
0x1c02   : > { %v11050_v44 = vpack.c.bf16 %v5370_v50, %v5367_v47  ;;  %v5393_v47 = vld [vmem:[#allocation12 + $0x138] sm:$0xff]  ;;  %v5392_v50 = vld [vmem:[#allocation12 + $0x130] sm:$0xff] }
0x1c03   : > { %9512 = vmatmul.mubr.f32.vlgmr.msra.gmra.mrb[30].mxu1 %v5157_v10  ;;  %7958 = vst [vmem:[%s12918_s23 + $0xb8] sm:$0xff] %v5157_v10  ;;  %v11078_v10 = vpack.c.bf16 %v5365_v5, %v5362_v29  ;;  %v11093_v4 = vpack.c.bf16 %v5395_v45, %v5392_v50  ;;  %v5578_v50 = vld [vmem:[#allocation14 + $0x90] sm:$0xff]  ;;  %v5581_v45 = vld [vmem:[#allocation14 + $0xa8] sm:$0xff] }
0x1c04   : > { %5483 = vmatprep.mubr.f32.mxu1 %v12433_v24  ;;  %11045 = vmatpush1.bf16.msra.mxu1 %v11044_v42  ;;  %v11084_v42 = vpack.c.bf16 %v5377_v17, %v5374_v13 }
0x1c05   : > { %11047 = vmatprep.subr.bf16.mxu1 %v11046_v38  ;;  %v5389_v38 = vld [vmem:[#allocation12 + $0x118] sm:$0xff] }
0x1c06   : > { %v11090_v40 = vpack.c.bf16 %v5389_v38, %v5386_v23  ;;  %v5577_v23 = vld [vmem:[#allocation14 + $0x88] sm:$0xff]  ;;  %v5579_v38 = vld [vmem:[#allocation14 + $0x98] sm:$0xff] }
0x1c08   : > { %11049 = vmatpush1.bf16.msra.mxu1 %v11048_v41  ;;  %v5390_v41 = vld [vmem:[#allocation12 + $0x120] sm:$0xff] }
0x1c09   : > { %11051 = vmatprep.subr.bf16.mxu1 %v11050_v44  ;;  %v11068_v44 = vpack.c.bf16 %v5393_v47, %v5390_v41 }
0x1c0c   : > { %11053 = vmatpush1.bf16.msra.mxu1 %v11052_v8  ;;  %v5397_v8 = vld [vmem:[#allocation12 + $0x158] sm:$0xff] }
0x1c0d   : > { %11055 = vmatprep.subr.bf16.mxu1 %v11054_v9  ;;  %v11070_v6 = vpack.c.bf16 %v5400_v49, %v5397_v8  ;;  %v5396_v9 = vld [vmem:[#allocation12 + $0x150] sm:$0xff]  ;;  %v5583_v8 = vld [vmem:[#allocation14 + $0xb8] sm:$0xff]  ;;  %v5585_v49 = vld [vmem:[#allocation14 + $0xc8] sm:$0xff] }
0x1c10   : > { %11057 = vmatpush1.bf16.msra.mxu1 %v11056_v26  ;;  %v11072_v26 = vpack.c.bf16 %v5399_v14, %v5396_v9  ;;  %v11112_v9 = vpack.c.bf16 %v5581_v45, %v5578_v50  ;;  %v5942_v50 = vld [vmem:[#allocation9 + $0x80] sm:$0xff]  ;;  %v5943_v45 = vld [vmem:[#allocation9 + $0x88] sm:$0xff] }
0x1c11   : > { %11059 = vmatprep.subr.bf16.mxu1 %v11058_v22  ;;  %v5561_v22 = vld [vmem:[#allocation14 + $0x8] sm:$0xff] }
0x1c12   : > { %v11098_v63 = vpack.c.bf16 %v5564_v39, %v5561_v22  ;;  %v5589_v22 = vld [vmem:[#allocation14 + $0xe8] sm:$0xff]  ;;  %v5591_v39 = vld [vmem:[#allocation14 + $0xf8] sm:$0xff] }
0x1c14   : > { %11061 = vmatpush1.bf16.msra.mxu1 %v11060_v56 }
0x1c15   : > { %11063 = vmatprep.subr.bf16.mxu1 %v11062_v27  ;;  %v5560_v27 = vld [vmem:[#allocation14] sm:$0xff] }
0x1c16   : > { %v11100_v62 = vpack.c.bf16 %v5563_v34, %v5560_v27  ;;  %v5592_v34 = vld [vmem:[#allocation14 + $0x100] sm:$0xff] }
0x1c18   : > { %11065 = vmatpush1.bf16.msra.mxu1 %v11064_v48  ;;  %v5562_v48 = vld [vmem:[#allocation14 + $0x10] sm:$0xff] }
0x1c19   : > { %11067 = vmatprep.subr.bf16.mxu1 %v11066_v54  ;;  %v5570_v54 = vld [vmem:[#allocation14 + $0x50] sm:$0xff] }
0x1c1a   : > { %v11102_v5 = vpack.c.bf16 %v5570_v54, %v5567_v60  ;;  %v5600_v60 = vld [vmem:[#allocation14 + $0x140] sm:$0xff] }
0x1c1c   : > { %11069 = vmatpush1.bf16.msra.mxu1 %v11068_v44 }
0x1c1d   : > { %11071 = vmatprep.subr.bf16.mxu1 %v11070_v6  ;;  %v5588_v6 = vld [vmem:[#allocation14 + $0xe0] sm:$0xff] }
0x1c20   : > { %11073 = vmatpush1.bf16.msra.mxu1 %v11072_v26  ;;  %v11114_v26 = vpack.c.bf16 %v5588_v6, %v5585_v49  ;;  %v11186_v49 = vpack.c.bf16 %v5943_v45, %v5942_v50  ;;  %v5934_v45 = vld [vmem:[#allocation9 + $0x40] sm:$0xff] }
0x1c21   : > { %11099 = vmatprep.subr.bf16.mxu1 %v11098_v63  ;;  %v5594_v63 = vld [vmem:[#allocation14 + $0x110] sm:$0xff] }
0x1c22   : > { %v11118_v27 = vpack.c.bf16 %v5594_v63, %v5591_v39  ;;  %v5928_v39 = vld [vmem:[#allocation9 + $0x10] sm:$0xff]  ;;  %v5929_v63 = vld [vmem:[#allocation9 + $0x18] sm:$0xff] }
0x1cd6   : > { %v5240_v31 = vpop.f32.mrb[30].mxu1 }
0x1cd7   : > { %v9513_v7 = vpop.f32.mrb[31].mxu1  ;;  %5347 = vmatprep.mubr.f32.mxu0 %v5240_v31  ;;  %v5566_v31 = vld [vmem:[#allocation14 + $0x30] sm:$0xff] }
0x1cd8   : > { %5348 = vmatmul.mubr.f32.vlgmr.msra.gmra.mrb[42].mxu0 %v13365_v51  ;;  %v5380_v51 = vld [vmem:[#allocation12 + $0xd0] sm:$0xff]  ;;  %v5569_v7 = vld [vmem:[#allocation14 + $0x48] sm:$0xff] }
0x1cd9   : > { %11076 = vmatpush3.bf16.msra.mxu0 %v11075_v55  ;;  %9546 = vmatprep.mubr.msk.f32.mxu0 %vm12432_vm0, %v12433_v24  ;;  %v11087_v19 = vpack.c.bf16 %v5383_v18, %v5380_v51  ;;  %v11131_v55 = vpack.c.bf16 %v5565_v53, %v5562_v48  ;;  %v11104_v13 = vpack.c.bf16 %v5569_v7, %v5566_v31  ;;  %v5575_v18 = vld [vmem:[#allocation14 + $0x78] sm:$0xff]  ;;  %v5597_v53 = vld [vmem:[#allocation14 + $0x128] sm:$0xff] }
0x1cda   : > { %11077 = vmatprep.subr.bf16.mxu0 %v12431_v59  ;;  %v5595_v48 = vld [vmem:[#allocation14 + $0x118] sm:$0xff] }
0x1cdb   : > { %v5599_v31 = vld [vmem:[#allocation14 + $0x138] sm:$0xff] }
0x1cdc   : > { %v5603_v7 = vld [vmem:[#allocation14 + $0x158] sm:$0xff] }
0x1cdd   : > { %11079 = vmatpush3.bf16.msra.mxu0 %v11078_v10  ;;  %v5568_v10 = vld [vmem:[#allocation14 + $0x40] sm:$0xff] }
0x1cde   : > { %11080 = vmatprep.subr.bf16.mxu0 %v12431_v59  ;;  %v11134_v17 = vpack.c.bf16 %v5571_v32, %v5568_v10  ;;  %v5606_v10 = vld [vmem:[#allocation14 + $0x170] sm:$0xff] }
0x1ce1   : > { %11082 = vmatpush3.bf16.msra.mxu0 %v11081_v12  ;;  %v5576_v12 = vld [vmem:[#allocation14 + $0x80] sm:$0xff] }
0x1ce2   : > { %11083 = vmatprep.subr.bf16.mxu0 %v12431_v59  ;;  %v11106_v51 = vpack.c.bf16 %v5576_v12, %v5573_v11  ;;  %v5602_v12 = vld [vmem:[#allocation14 + $0x150] sm:$0xff] }
0x1ce5   : > { %11085 = vmatpush3.bf16.msra.mxu0 %v11084_v42  ;;  %v5572_v42 = vld [vmem:[#allocation14 + $0x60] sm:$0xff] }
0x1ce6   : > { %11086 = vmatprep.subr.bf16.mxu0 %v12431_v59  ;;  %v11108_v41 = vpack.c.bf16 %v5575_v18, %v5572_v42  ;;  %v5604_v42 = vld [vmem:[#allocation14 + $0x160] sm:$0xff] }
0x1ce9   : > { %11088 = vmatpush3.bf16.msra.mxu0 %v11087_v19  ;;  %v5574_v19 = vld [vmem:[#allocation14 + $0x70] sm:$0xff] }
0x1cea   : > { %11089 = vmatprep.subr.bf16.mxu0 %v12431_v59  ;;  %v11137_v47 = vpack.c.bf16 %v5577_v23, %v5574_v19  ;;  %v5788_v23 = vld [vmem:[#allocation15 + $0x8] sm:$0xff] }
0x1ced   : > { %11091 = vmatpush3.bf16.msra.mxu0 %v11090_v40  ;;  %v5582_v40 = vld [vmem:[#allocation14 + $0xb0] sm:$0xff] }
0x1cee   : > { %11092 = vmatprep.subr.bf16.mxu0 %v12431_v59  ;;  %v11110_v44 = vpack.c.bf16 %v5582_v40, %v5579_v38  ;;  %v5790_v38 = vld [vmem:[#allocation15 + $0x18] sm:$0xff] }
0x1cef   : > { %v11154_v40 = vpack.c.bf16 %v5790_v38, %v5788_v23  ;;  %v5806_v23 = vld [vmem:[#allocation15 + $0x98] sm:$0xff] }
0x1cf1   : > { %11094 = vmatpush3.bf16.msra.mxu0 %v11093_v4  ;;  %v5580_v4 = vld [vmem:[#allocation14 + $0xa0] sm:$0xff] }
0x1cf2   : > { %11095 = vmatprep.subr.bf16.mxu0 %v12431_v59  ;;  %v11140_v14 = vpack.c.bf16 %v5583_v8, %v5580_v4  ;;  %v5926_v4 = vld [vmem:[#allocation9] sm:$0xff]  ;;  %v5927_v8 = vld [vmem:[#allocation9 + $0x8] sm:$0xff] }
0x1cf3   : > { %v11188_v6 = vpack.c.bf16 %v5927_v8, %v5926_v4  ;;  %v5935_v4 = vld [vmem:[#allocation9 + $0x48] sm:$0xff] }
0x1cf5   : > { %11097 = vmatpush3.bf16.msra.mxu0 %v11096_v20  ;;  %v5586_v20 = vld [vmem:[#allocation14 + $0xd0] sm:$0xff] }
0x1cf6   : > { %11130 = vmatprep.subr.bf16.mxu0 %v12431_v59 }
0x1dab   : > { %v8675_v56 = vpop.f32.mrb[42].mxu0 }
0x1dac   : > { %v8676_v16 = vpop.f32.mrb[43].mxu0 }
0x1dad   : > { %v8677_v33 = vadd.f32 %v8676_v16, %v8675_v56  ;;  %v11116_v56 = vpack.c.bf16 %v5587_v15, %v5584_v1  ;;  %v5590_v16 = vld [vmem:[#allocation14 + $0xf0] sm:$0xff]  ;;  %v5791_v1 = vld [vmem:[#allocation15 + $0x20] sm:$0xff] }
0x1dae   : > { %v5944_v15 = vld [vmem:[#allocation9 + $0x90] sm:$0xff] }
0x1daf   : > { %v5350_v61 = vadd.f32 %v8677_v33, %v7952_v21  ;;  %v11143_v21 = vpack.c.bf16 %v5589_v22, %v5586_v20  ;;  %v5593_v33 = vld [vmem:[#allocation14 + $0x108] sm:$0xff]  ;;  %v5945_v22 = vld [vmem:[#allocation9 + $0x98] sm:$0xff] }
0x1db0   : > { %v11120_v54 = vpack.c.bf16 %v5593_v33, %v5590_v16  ;;  %v5796_v16 = vld [vmem:[#allocation15 + $0x48] sm:$0xff] }
0x1db1   : > { %v5353_v29 = vmax.f32 %v5350_v61, 0.0  ;;  %v11146_v61 = vpack.c.bf16 %v5595_v48, %v5592_v34  ;;  %v5795_v34 = vld [vmem:[#allocation15 + $0x40] sm:$0xff]  ;;  %v5797_v48 = vld [vmem:[#allocation15 + $0x50] sm:$0xff] }
0x1db3   : > { %5484 = vmatmul.mubr.f32.vlgmr.msra.gmra.mrb[32].mxu1 %v5353_v29  ;;  %9547 = vmatmul.mubr.f32.vlgmr.msra.gmra.mrb[44].mxu0 %v5353_v29  ;;  %v5598_v29 = vld [vmem:[#allocation14 + $0x130] sm:$0xff] }
0x1db4   : > { %11101 = vmatpush1.bf16.msra.mxu1 %v11100_v62  ;;  %11132 = vmatpush3.bf16.msra.mxu0 %v11131_v55  ;;  %v5596_v62 = vld [vmem:[#allocation14 + $0x120] sm:$0xff]  ;;  %v11122_v55 = vpack.c.bf16 %v5600_v60, %v5597_v53  ;;  %v11164_v60 = vpack.c.bf16 %v5797_v48, %v5795_v34  ;;  %v5813_v34 = vld [vmem:[#allocation15 + $0xd0] sm:$0xff] }
0x1db5   : > { %11103 = vmatprep.subr.bf16.mxu1 %v11102_v5  ;;  %11133 = vmatprep.subr.bf16.mxu0 %v12431_v59  ;;  %v5601_v5 = vld [vmem:[#allocation14 + $0x148] sm:$0xff]  ;;  %v11124_v32 = vpack.c.bf16 %v5599_v31, %v5596_v62  ;;  %v5946_v53 = vld [vmem:[#allocation9 + $0xa0] sm:$0xff] }
0x1db6   : > { %5689 = vmatprep.mubr.f32.mxu1 %v12433_v24  ;;  %9581 = vmatprep.mubr.msk.f32.mxu0 %vm12432_vm0, %v12433_v24  ;;  %v11149_v11 = vpack.c.bf16 %v5601_v5, %v5598_v29  ;;  %v5931_v62 = vld [vmem:[#allocation9 + $0x28] sm:$0xff]  ;;  %v5802_v5 = vld [vmem:[#allocation15 + $0x78] sm:$0xff]  ;;  %v5954_v48 = vld [vmem:[#allocation9 + $0xe0] sm:$0xff] }
0x1db7   : > { %v5800_v29 = vld [vmem:[#allocation15 + $0x68] sm:$0xff] }
0x1db8   : > { %11105 = vmatpush1.bf16.msra.mxu1 %v11104_v13  ;;  %11135 = vmatpush3.bf16.msra.mxu0 %v11134_v17  ;;  %v11126_v13 = vpack.c.bf16 %v5606_v10, %v5603_v7  ;;  %v5605_v17 = vld [vmem:[#allocation14 + $0x168] sm:$0xff]  ;;  %v11166_v7 = vpack.c.bf16 %v5802_v5, %v5800_v29  ;;  %v5799_v10 = vld [vmem:[#allocation15 + $0x60] sm:$0xff]  ;;  %v5818_v29 = vld [vmem:[#allocation15 + $0xf8] sm:$0xff] }
0x1db9   : > { %11107 = vmatprep.subr.bf16.mxu1 %v11106_v51  ;;  %11136 = vmatprep.subr.bf16.mxu0 %v12431_v59  ;;  %v5607_v51 = vld [vmem:[#allocation14 + $0x178] sm:$0xff]  ;;  %v11128_v18 = vpack.c.bf16 %v5605_v17, %v5602_v12  ;;  %v5932_v17 = vld [vmem:[#allocation9 + $0x30] sm:$0xff] }
0x1dba   : > { %v11152_v19 = vpack.c.bf16 %v5607_v51, %v5604_v42  ;;  %v5933_v42 = vld [vmem:[#allocation9 + $0x38] sm:$0xff] }
0x1dbc   : > { %11109 = vmatpush1.bf16.msra.mxu1 %v11108_v41  ;;  %11138 = vmatpush3.bf16.msra.mxu0 %v11137_v47  ;;  %v5787_v41 = vld [vmem:[#allocation15] sm:$0xff]  ;;  %v5789_v47 = vld [vmem:[#allocation15 + $0x10] sm:$0xff] }
0x1dbd   : > { %11111 = vmatprep.subr.bf16.mxu1 %v11110_v44  ;;  %11139 = vmatprep.subr.bf16.mxu0 %v12431_v59  ;;  %v11156_v44 = vpack.c.bf16 %v5789_v47, %v5787_v41  ;;  %v5805_v41 = vld [vmem:[#allocation15 + $0x90] sm:$0xff]  ;;  %v5950_v47 = vld [vmem:[#allocation9 + $0xc0] sm:$0xff] }
0x1dc0   : > { %11113 = vmatpush1.bf16.msra.mxu1 %v11112_v9  ;;  %11141 = vmatpush3.bf16.msra.mxu0 %v11140_v14  ;;  %v5792_v9 = vld [vmem:[#allocation15 + $0x28] sm:$0xff]  ;;  %v5794_v14 = vld [vmem:[#allocation15 + $0x38] sm:$0xff] }
0x1dc1   : > { %11115 = vmatprep.subr.bf16.mxu1 %v11114_v26  ;;  %11142 = vmatprep.subr.bf16.mxu0 %v12431_v59  ;;  %v5793_v26 = vld [vmem:[#allocation15 + $0x30] sm:$0xff] }
0x1dc2   : > { %v11160_v20 = vpack.c.bf16 %v5793_v26, %v5791_v1  ;;  %v5809_v1 = vld [vmem:[#allocation15 + $0xb0] sm:$0xff] }
0x1dc3   : > { %v5952_v26 = vld [vmem:[#allocation9 + $0xd0] sm:$0xff] }
0x1dc4   : > { %11117 = vmatpush1.bf16.msra.mxu1 %v11116_v56  ;;  %11144 = vmatpush3.bf16.msra.mxu0 %v11143_v21  ;;  %v11190_v56 = vpack.c.bf16 %v5945_v22, %v5944_v15  ;;  %v11192_v21 = vpack.c.bf16 %v5929_v63, %v5928_v39  ;;  %v5936_v22 = vld [vmem:[#allocation9 + $0x50] sm:$0xff]  ;;  %v5937_v39 = vld [vmem:[#allocation9 + $0x58] sm:$0xff] }
0x1dc5   : > { %11119 = vmatprep.subr.bf16.mxu1 %v11118_v27  ;;  %11145 = vmatprep.subr.bf16.mxu0 %v12431_v59  ;;  %v5798_v27 = vld [vmem:[#allocation15 + $0x58] sm:$0xff] }
0x1dc6   : > { %v11162_v33 = vpack.c.bf16 %v5798_v27, %v5796_v16  ;;  %v5814_v16 = vld [vmem:[#allocation15 + $0xd8] sm:$0xff] }
0x1dc8   : > { %11121 = vmatpush1.bf16.msra.mxu1 %v11120_v54  ;;  %11147 = vmatpush3.bf16.msra.mxu0 %v11146_v61  ;;  %v5947_v54 = vld [vmem:[#allocation9 + $0xa8] sm:$0xff]  ;;  %v5930_v61 = vld [vmem:[#allocation9 + $0x20] sm:$0xff] }
0x1dc9   : > { %11123 = vmatprep.subr.bf16.mxu1 %v11122_v55  ;;  %11148 = vmatprep.subr.bf16.mxu0 %v12431_v59  ;;  %v11194_v55 = vpack.c.bf16 %v5947_v54, %v5946_v53  ;;  %v11196_v31 = vpack.c.bf16 %v5931_v62, %v5930_v61  ;;  %v5938_v54 = vld [vmem:[#allocation9 + $0x60] sm:$0xff]  ;;  %v5939_v61 = vld [vmem:[#allocation9 + $0x68] sm:$0xff] }
0x1dcc   : > { %11125 = vmatpush1.bf16.msra.mxu1 %v11124_v32  ;;  %11150 = vmatpush3.bf16.msra.mxu0 %v11149_v11  ;;  %v5801_v32 = vld [vmem:[#allocation15 + $0x70] sm:$0xff] }
0x1dcd   : > { %11127 = vmatprep.subr.bf16.mxu1 %v11126_v13  ;;  %11151 = vmatprep.subr.bf16.mxu0 %v12431_v59  ;;  %v5948_v11 = vld [vmem:[#allocation9 + $0xb0] sm:$0xff]  ;;  %v11168_v12 = vpack.c.bf16 %v5801_v32, %v5799_v10  ;;  %v5949_v13 = vld [vmem:[#allocation9 + $0xb8] sm:$0xff] }
0x1dce   : > { %v11198_v51 = vpack.c.bf16 %v5949_v13, %v5948_v11  ;;  %v5817_v10 = vld [vmem:[#allocation15 + $0xf0] sm:$0xff] }
0x1dcf   : > { %v5956_v32 = vld [vmem:[#allocation9 + $0xf0] sm:$0xff] }
0x1dd0   : > { %11129 = vmatpush1.bf16.msra.mxu1 %v11128_v18  ;;  %11153 = vmatpush3.bf16.msra.mxu0 %v11152_v19  ;;  %v11200_v18 = vpack.c.bf16 %v5933_v42, %v5932_v17  ;;  %v5804_v19 = vld [vmem:[#allocation15 + $0x88] sm:$0xff]  ;;  %v5940_v13 = vld [vmem:[#allocation9 + $0x70] sm:$0xff]  ;;  %v5941_v17 = vld [vmem:[#allocation9 + $0x78] sm:$0xff] }
0x1dd1   : > { %11155 = vmatprep.subr.bf16.mxu1 %v11154_v40  ;;  %11187 = vmatprep.subr.bf16.mxu0 %v11186_v49  ;;  %v11170_v38 = vpack.c.bf16 %v5806_v23, %v5804_v19  ;;  %v5803_v40 = vld [vmem:[#allocation15 + $0x80] sm:$0xff]  ;;  %v11204_v49 = vpack.c.bf16 %v5935_v4, %v5934_v45  ;;  %v5608_v23 = vld [vmem:[%s13926_s7] sm:$0x7] }
0x1dd2   : > { %v11172_v50 = vpack.c.bf16 %v5805_v41, %v5803_v40  ;;  %v5613_v41 = vrot.slane %v5608_v23, %v13042_v46 }
0x1dd3   : > { %5690 = vmatmul.mubr.f32.vlgmr.msra.gmra.mrb[32].mxu1 %v13362_v25  ;;  %9582 = vmatmul.mubr.f32.vlgmr.msra.gmra.mrb[46].mxu0 %v13362_v25  ;;  %v11158_v25 = vpack.c.bf16 %v5794_v14, %v5792_v9  ;;  %v5810_v9 = vld [vmem:[#allocation15 + $0xb8] sm:$0xff] }
0x1dd4   : > { %5895 = vmatprep.mubr.f32.mxu1 %v12433_v24  ;;  %11157 = vmatpush1.bf16.msra.mxu1 %v11156_v44  ;;  %v5951_v44 = vld [vmem:[#allocation9 + $0xc8] sm:$0xff] }
0x1dd5   : > { %11189 = vmatpush3.bf16.msra.mxu0 %v11188_v6  ;;  %11159 = vmatprep.subr.bf16.mxu1 %v11158_v25  ;;  %v11202_v8 = vpack.c.bf16 %v5951_v44, %v5950_v47  ;;  %v5808_v6 = vld [vmem:[#allocation15 + $0xa8] sm:$0xff]  ;;  %v5807_v25 = vld [vmem:[#allocation15 + $0xa0] sm:$0xff] }
0x1dd6   : > { %11191 = vmatprep.subr.bf16.mxu0 %v11190_v56  ;;  %v11174_v14 = vpack.c.bf16 %v5810_v9, %v5808_v6  ;;  %v11176_v15 = vpack.c.bf16 %v5809_v1, %v5807_v25  ;;  %v11208_v56 = vpack.c.bf16 %v5937_v39, %v5936_v22  ;;  %v5621_v22 = vrot.slane %v5608_v23, %v13056_v0 }
0x1dd8   : > { %11161 = vmatpush1.bf16.msra.mxu1 %v11160_v20  ;;  %v5953_v20 = vld [vmem:[#allocation9 + $0xd8] sm:$0xff] }
0x1dd9   : > { %11193 = vmatpush3.bf16.msra.mxu0 %v11192_v21  ;;  %11163 = vmatprep.subr.bf16.mxu1 %v11162_v33  ;;  %v11206_v63 = vpack.c.bf16 %v5953_v20, %v5952_v26  ;;  %v5812_v21 = vld [vmem:[#allocation15 + $0xc8] sm:$0xff]  ;;  %v5811_v33 = vld [vmem:[#allocation15 + $0xc0] sm:$0xff] }
0x1dda   : > { %11195 = vmatprep.subr.bf16.mxu0 %v11194_v55  ;;  %v11178_v27 = vpack.c.bf16 %v5814_v16, %v5812_v21  ;;  %v11180_v53 = vpack.c.bf16 %v5813_v34, %v5811_v33  ;;  %v11212_v55 = vpack.c.bf16 %v5939_v61, %v5938_v54  ;;  %v12042_v54 = vld [vmem:[%s12918_s23 + $0x90] sm:$0xff] }
0x1ddc   : > { %11165 = vmatpush1.bf16.msra.mxu1 %v11164_v60  ;;  %v5955_v60 = vld [vmem:[#allocation9 + $0xe8] sm:$0xff] }
0x1ddd   : > { %11197 = vmatpush3.bf16.msra.mxu0 %v11196_v31  ;;  %11167 = vmatprep.subr.bf16.mxu1 %v11166_v7  ;;  %v11210_v62 = vpack.c.bf16 %v5955_v60, %v5954_v48  ;;  %v5816_v31 = vld [vmem:[#allocation15 + $0xe8] sm:$0xff]  ;;  %v5815_v7 = vld [vmem:[#allocation15 + $0xe0] sm:$0xff] }
0x1dde   : > { %11199 = vmatprep.subr.bf16.mxu0 %v11198_v51  ;;  %v11182_v5 = vpack.c.bf16 %v5818_v29, %v5816_v31  ;;  %v11184_v11 = vpack.c.bf16 %v5817_v10, %v5815_v7  ;;  %v11216_v51 = vpack.c.bf16 %v5941_v17, %v5940_v13  ;;  %v7960_v10 = vld [vmem:[%s13924_s4] ss:$0 sm:$0xff]  ;;  %v6046_v17 = vld [vmem:[#allocation8 + $0x10] sm:$0xff] }
0x1ddf   : > { %v6045_v13 = vld [vmem:[#allocation8 + $0x8] sm:$0xff] }
0x1de0   : > { %11169 = vmatpush1.bf16.msra.mxu1 %v11168_v12  ;;  %v5957_v12 = vld [vmem:[#allocation9 + $0xf8] sm:$0xff] }
0x1de1   : > { %11201 = vmatpush3.bf16.msra.mxu0 %v11200_v18  ;;  %11171 = vmatprep.subr.bf16.mxu1 %v11170_v38  ;;  %v11214_v42 = vpack.c.bf16 %v5957_v12, %v5956_v32  ;;  %v5402_v38 = vld [vmem:[%s13928_s21] sm:$0x7]  ;;  %v6044_v12 = vld [vmem:[#allocation8] sm:$0xff] }
0x1de2   : > { %11203 = vmatprep.subr.bf16.mxu0 %v11202_v8  ;;  %v5407_v40 = vrot.slane %v5402_v38, %v13042_v46  ;;  %v5411_v47 = vrot.slane %v5402_v38, %v13050_v28  ;;  %v5415_v39 = vrot.slane %v5402_v38, %v13056_v0 }
0x1de4   : > { %11173 = vmatpush1.bf16.msra.mxu1 %v11172_v50  ;;  %v5617_v50 = vrot.slane %v5608_v23, %v13050_v28  ;;  %v11670_v44 = vadd.f32 %v5613_v41, %v5407_v40  ;;  %v6049_v23 = vld [vmem:[#allocation8 + $0x28] sm:$0xff]  ;;  %v6050_v40 = vld [vmem:[#allocation8 + $0x30] sm:$0xff]  ;;  %v6051_v41 = vld [vmem:[#allocation8 + $0x38] sm:$0xff] }
0x1de5   : > { %11205 = vmatpush3.bf16.msra.mxu0 %v11204_v49  ;;  %11175 = vmatprep.subr.bf16.mxu1 %v11174_v14 }
0x1de6   : > { %11207 = vmatprep.subr.bf16.mxu0 %v11206_v63  ;;  %v11672_v8 = vadd.f32 %v5617_v50, %v5411_v47  ;;  %v11228_v47 = vpack.c.bf16 %v6051_v41, %v6050_v40  ;;  %v6052_v50 = vld [vmem:[#allocation8 + $0x40] sm:$0xff] }
0x1de7   : > { %v6138_v41 = vld [vmem:[#allocation11 + $0x40] sm:$0xff] }
0x1de8   : > { %11177 = vmatpush1.bf16.msra.mxu1 %v11176_v15 }
0x1de9   : > { %11209 = vmatpush3.bf16.msra.mxu0 %v11208_v56  ;;  %11179 = vmatprep.subr.bf16.mxu1 %v11178_v27 }
0x1dea   : > { %11211 = vmatprep.subr.bf16.mxu0 %v11210_v62 }
0x1dec   : > { %11181 = vmatpush1.bf16.msra.mxu1 %v11180_v53 }
0x1ded   : > { %11213 = vmatpush3.bf16.msra.mxu0 %v11212_v55  ;;  %11183 = vmatprep.subr.bf16.mxu1 %v11182_v5  ;;  %v13439_v55 = vld [vmem:[%s12889_s13 + $0x30] sm:$0xff] }
0x1dee   : > { %11215 = vmatprep.subr.bf16.mxu0 %v11214_v42  ;;  %v11219_v42 = vpack.c.bf16 %v6045_v13, %v6044_v12  ;;  %v6152_v12 = vld [vmem:[#allocation11 + $0xb0] sm:$0xff]  ;;  %v6153_v13 = vld [vmem:[#allocation11 + $0xb8] sm:$0xff] }
0x1df0   : > { %11185 = vmatpush1.bf16.msra.mxu1 %v11184_v11 }
0x1df1   : > { %11218 = vmatprep.subr.bf16.mxu1 %v12431_v59  ;;  %11217 = vmatpush3.bf16.msra.mxu0 %v11216_v51  ;;  %v6047_v51 = vld [vmem:[#allocation8 + $0x18] sm:$0xff] }
0x1e86   : > { %v5556_v18 = vpop.f32.mrb[44].mxu0 }
0x1e87   : > { %v9548_v19 = vpop.f32.mrb[45].mxu0  ;;  %v5557_v16 = vadd.f32 %v5556_v18, %v5415_v39  ;;  %v11222_v18 = vpack.c.bf16 %v6047_v51, %v6046_v17  ;;  %v6136_v51 = vld [vmem:[#allocation11 + $0x30] sm:$0xff] }
0x1e88   : > { %v6048_v19 = vld [vmem:[#allocation8 + $0x20] sm:$0xff] }
0x1e89   : > { %v11225_v38 = vpack.c.bf16 %v6049_v23, %v6048_v19  ;;  %v6154_v19 = vld [vmem:[#allocation11 + $0xc0] sm:$0xff]  ;;  %v6155_v23 = vld [vmem:[#allocation11 + $0xc8] sm:$0xff] }
0x1e8a   : > { %v11258_v40 = vpack.c.bf16 %v6155_v23, %v6154_v19  ;;  %v6259_v23 = vld [vmem:[#allocation12 + $0x98] sm:$0xff] }
0x1ea6   : > { %v5691_v45 = vpop.f32.mrb[32].mxu1  ;;  %v5762_v4 = vpop.f32.mrb[46].mxu0 }
0x1ea7   : > { %v11671_v49 = vadd.f32 %v11670_v44, %v5691_v45  ;;  %v5693_v6 = vpop.f32.mrb[33].mxu1  ;;  %v9583_v9 = vpop.f32.mrb[47].mxu0  ;;  %v5763_v56 = vadd.f32 %v5762_v4, %v5621_v22  ;;  %v6053_v44 = vld [vmem:[#allocation8 + $0x48] sm:$0xff]  ;;  %v6059_v22 = vld [vmem:[#allocation8 + $0x78] sm:$0xff] }
0x1ea8   : > { %v11673_v25 = vadd.f32 %v11672_v8, %v5693_v6  ;;  %v11231_v45 = vpack.c.bf16 %v6053_v44, %v6052_v50  ;;  %v6054_v9 = vld [vmem:[#allocation8 + $0x50] sm:$0xff]  ;;  %v6157_v44 = vld [vmem:[#allocation11 + $0xd8] sm:$0xff] }
0x1ea9   : > { %v7953_v14 = vmul.f32 -1.442695, %v11671_v49  ;;  %v6156_v50 = vld [vmem:[#allocation11 + $0xd0] sm:$0xff] }
0x1eaa   : > { %v7954_v1 = vmul.f32 -1.442695, %v11673_v25 }
0x1eab   : > { %11952 = vpow2.f32 %v7953_v14  ;;  %v6055_v14 = vld [vmem:[#allocation8 + $0x58] sm:$0xff] }
0x1eac   : > { %11954 = vpow2.f32 %v7954_v1  ;;  %v11234_v25 = vpack.c.bf16 %v6055_v14, %v6054_v9  ;;  %v6056_v1 = vld [vmem:[#allocation8 + $0x60] sm:$0xff]  ;;  %v6159_v14 = vld [vmem:[#allocation11 + $0xe8] sm:$0xff] }
0x1ead   : > { %v6158_v9 = vld [vmem:[#allocation11 + $0xe0] sm:$0xff] }
0x1eb5   : > { %v11953_v26 = vpop.eup %11952 }
0x1eb6   : > { %v5770_v15 = vadd.f32 1.0, %v11953_v26  ;;  %v11955_v20 = vpop.eup %11954  ;;  %v6057_v26 = vld [vmem:[#allocation8 + $0x68] sm:$0xff] }
0x1eb7   : > { %v5777_v63 = vadd.f32 1.0, %v11955_v20  ;;  %v6058_v20 = vld [vmem:[#allocation8 + $0x70] sm:$0xff] }
0x1eb8   : > { %11956 = vrcp.f32 %v5770_v15  ;;  %v11237_v15 = vpack.c.bf16 %v6057_v26, %v6056_v1  ;;  %v11240_v39 = vpack.c.bf16 %v6059_v22, %v6058_v20  ;;  %v11266_v1 = vpack.c.bf16 %v6159_v14, %v6158_v9  ;;  %v6142_v26 = vld [vmem:[#allocation11 + $0x60] sm:$0xff]  ;;  %v6160_v20 = vld [vmem:[#allocation11 + $0xf0] sm:$0xff]  ;;  %v6161_v22 = vld [vmem:[#allocation11 + $0xf8] sm:$0xff] }
0x1eb9   : > { %11958 = vrcp.f32 %v5777_v63  ;;  %v6146_v63 = vld [vmem:[#allocation11 + $0x80] sm:$0xff]  ;;  %v6271_v14 = vld [vmem:[#allocation12 + $0xf8] sm:$0xff] }
0x1ec2   : > { %v11957_v21 = vpop.eup %11956 }
0x1ec3   : > { %v5780_v27 = vmul.f32 %v11957_v21, %v5763_v56  ;;  %v11959_v34 = vpop.eup %11958  ;;  %v6147_v56 = vld [vmem:[#allocation11 + $0x88] sm:$0xff]  ;;  %v6130_v21 = vld [vmem:[#allocation11] sm:$0xff] }
0x1ec4   : > { %v5783_v48 = vsub.f32 1.0, %v11959_v34  ;;  %v5785_v61 = vmul.f32 %v12042_v54, %v11959_v34  ;;  %v6149_v34 = vld [vmem:[#allocation11 + $0x98] sm:$0xff] }
0x1ec5   : > { %v5781_v33 = vadd.f32 %v5780_v27, %v5557_v16  ;;  %v11242_v16 = vpack.c.bf16 %v6147_v56, %v6146_v63  ;;  %v6131_v27 = vld [vmem:[#allocation11 + $0x8] sm:$0xff]  ;;  %v6133_v54 = vld [vmem:[#allocation11 + $0x18] sm:$0xff]  ;;  %v11270_v63 = vpack.c.bf16 %v6161_v22, %v6160_v20  ;;  %v6144_v56 = vld [vmem:[#allocation11 + $0x70] sm:$0xff] }
0x1ec6   : > { %v6277_v22 = vld [vmem:[#allocation12 + $0x128] sm:$0xff] }
0x1ec7   : > { %11960 = vtanh.f32 %v5781_v33  ;;  %v6148_v33 = vld [vmem:[#allocation11 + $0x90] sm:$0xff]  ;;  %11243 = vmatprep.subr.bf16.mxu0 %v11242_v16 }
0x1ed1   : > { %v11961_v53 = vpop.eup %11960 }
0x1ed2   : > { %v5784_v60 = vmul.f32 %v11961_v53, %v5783_v48  ;;  %v11244_v48 = vpack.c.bf16 %v6131_v27, %v6130_v21  ;;  %v11246_v53 = vpack.c.bf16 %v6149_v34, %v6148_v33  ;;  %v6145_v21 = vld [vmem:[#allocation11 + $0x78] sm:$0xff] }
0x1ed3   : > { %v11272_v16 = vpack.c.bf16 %v6145_v21, %v6144_v56  ;;  %v6242_v56 = vld [vmem:[#allocation12 + $0x10] sm:$0xff]  ;;  %v6245_v21 = vld [vmem:[#allocation12 + $0x28] sm:$0xff] }
0x1ed4   : > { %v13436_v62 = vadd.f32 %v5785_v61, %v5784_v60  ;;  %v6132_v60 = vld [vmem:[#allocation11 + $0x10] sm:$0xff]  ;;  %v6150_v61 = vld [vmem:[#allocation11 + $0xa0] sm:$0xff] }
0x1ed6   : > { %5896 = vmatmul.mubr.f32.vlgmr.msra.gmra.mrb[34].mxu1 %v13436_v62  ;;  %7957 = vst [vmem:[%s12918_s23 + $0xb0] sm:$0xff] %v13436_v62  ;;  %6029 = vmatprep.mubr.f32.mxu0 %v13436_v62 }
0x1ed7   : > { %6030 = vmatmul.mubr.f32.vlgmr.msra.gmra.mrb[48].mxu0 %v13439_v55  ;;  %9616 = vmatprep.mubr.msk.f32.mxu1 %vm12432_vm0, %v12433_v24 }
0x1ed8   : > { %11220 = vmatpush3.bf16.msra.mxu1 %v11219_v42  ;;  %11245 = vmatpush3.bf16.msra.mxu0 %v11244_v48  ;;  %v11254_v42 = vpack.c.bf16 %v6153_v13, %v6152_v12  ;;  %v6241_v48 = vld [vmem:[#allocation12 + $0x8] sm:$0xff] }
0x1ed9   : > { %11221 = vmatprep.subr.bf16.mxu1 %v12431_v59  ;;  %11247 = vmatprep.subr.bf16.mxu0 %v11246_v53  ;;  %v6244_v53 = vld [vmem:[#allocation12 + $0x20] sm:$0xff]  ;;  %v6249_v12 = vld [vmem:[#allocation12 + $0x48] sm:$0xff] }
0x1edc   : > { %11223 = vmatpush3.bf16.msra.mxu1 %v11222_v18  ;;  %v6137_v18 = vld [vmem:[#allocation11 + $0x38] sm:$0xff] }
0x1edd   : > { %11224 = vmatprep.subr.bf16.mxu1 %v12431_v59 }
0x1ee0   : > { %11226 = vmatpush3.bf16.msra.mxu1 %v11225_v38  ;;  %v11256_v38 = vpack.c.bf16 %v6137_v18, %v6136_v51  ;;  %v6252_v51 = vld [vmem:[#allocation12 + $0x60] sm:$0xff]  ;;  %v6255_v18 = vld [vmem:[#allocation12 + $0x78] sm:$0xff] }
0x1ee1   : > { %11227 = vmatprep.subr.bf16.mxu1 %v12431_v59  ;;  %v11284_v19 = vpack.c.bf16 %v6255_v18, %v6252_v51  ;;  %v6278_v51 = vld [vmem:[#allocation12 + $0x130] sm:$0xff] }
0x1ee4   : > { %11229 = vmatpush3.bf16.msra.mxu1 %v11228_v47  ;;  %v6139_v47 = vld [vmem:[#allocation11 + $0x48] sm:$0xff] }
0x1ee5   : > { %11230 = vmatprep.subr.bf16.mxu1 %v12431_v59 }
0x1ee8   : > { %11232 = vmatpush3.bf16.msra.mxu1 %v11231_v45  ;;  %v11260_v45 = vpack.c.bf16 %v6139_v47, %v6138_v41  ;;  %v6258_v41 = vld [vmem:[#allocation12 + $0x90] sm:$0xff]  ;;  %v6261_v47 = vld [vmem:[#allocation12 + $0xa8] sm:$0xff] }
0x1ee9   : > { %11233 = vmatprep.subr.bf16.mxu1 %v12431_v59 }
0x1eec   : > { %11235 = vmatpush3.bf16.msra.mxu1 %v11234_v25 }
0x1eed   : > { %11236 = vmatprep.subr.bf16.mxu1 %v12431_v59 }
0x1ef0   : > { %11238 = vmatpush3.bf16.msra.mxu1 %v11237_v15  ;;  %v6143_v15 = vld [vmem:[#allocation11 + $0x68] sm:$0xff] }
0x1ef1   : > { %11239 = vmatprep.subr.bf16.mxu1 %v12431_v59 }
0x1ef4   : > { %11241 = vmatpush3.bf16.msra.mxu1 %v11240_v39  ;;  %v11268_v39 = vpack.c.bf16 %v6143_v15, %v6142_v26  ;;  %v6270_v26 = vld [vmem:[#allocation12 + $0xf0] sm:$0xff]  ;;  %v6273_v15 = vld [vmem:[#allocation12 + $0x108] sm:$0xff] }
0x1ef5   : > { %v11296_v20 = vpack.c.bf16 %v6273_v15, %v6270_v26  ;;  %v6446_v15 = vld [vmem:[#allocation14] sm:$0xff] }
0x1fa9   : > { %v13448_v31 = vpop.f32.mrb[34].mxu1 }
0x1faa   : > { %v13450_v29 = vpop.f32.mrb[35].mxu1  ;;  %v8744_v5 = vpop.f32.mrb[48].mxu0 }
0x1fab   : > { %v8745_v7 = vpop.f32.mrb[49].mxu0 }
0x1fac   : > { %v8746_v32 = vadd.f32 %v8745_v7, %v8744_v5  ;;  %v6151_v5 = vld [vmem:[#allocation11 + $0xa8] sm:$0xff]  ;;  %v11248_v7 = vpack.c.bf16 %v6133_v54, %v6132_v60  ;;  %v6240_v60 = vld [vmem:[#allocation12] sm:$0xff]  ;;  %v11274_v54 = vpack.c.bf16 %v6244_v53, %v6241_v48 }
0x1fae   : > { %v6032_v11 = vadd.f32 %v8746_v32, %v7960_v10  ;;  %v11250_v10 = vpack.c.bf16 %v6151_v5, %v6150_v61  ;;  %v6134_v32 = vld [vmem:[#allocation11 + $0x20] sm:$0xff]  ;;  %11249 = vmatpush3.bf16.msra.mxu0 %v11248_v7  ;;  %v6243_v61 = vld [vmem:[#allocation12 + $0x18] sm:$0xff]  ;;  %11275 = vmatprep.subr.bf16.mxu1 %v11274_v54  ;;  %v6257_v54 = vld [vmem:[#allocation12 + $0x88] sm:$0xff] }
0x1faf   : > { %v11276_v5 = vpack.c.bf16 %v6243_v61, %v6240_v60  ;;  %v6247_v7 = vld [vmem:[#allocation12 + $0x38] sm:$0xff]  ;;  %v6254_v60 = vld [vmem:[#allocation12 + $0x70] sm:$0xff] }
0x1fb0   : > { %6035 = vmax.xlane.f32.xlu0 %v6032_v11  ;;  %11251 = vmatprep.subr.bf16.mxu0 %v11250_v10  ;;  %v6250_v10 = vld [vmem:[#allocation12 + $0x50] sm:$0xff]  ;;  %v11313_v61 = vpack.c.bf16 %v6257_v54, %v6254_v60  ;;  %v6455_v60 = vld [vmem:[#allocation14 + $0x48] sm:$0xff]  ;;  %v6454_v54 = vld [vmem:[#allocation14 + $0x40] sm:$0xff] }
0x203d   : > { %v6036_v4 = vpop.xlane.xlu0 %6035 }
0x203e   : > { %v6037_v8 = vsub.f32 %v6032_v11, %v6036_v4  ;;  %v6135_v11 = vld [vmem:[#allocation11 + $0x28] sm:$0xff]  ;;  %v11262_v4 = vpack.c.bf16 %v6157_v44, %v6156_v50  ;;  %v11288_v50 = vpack.c.bf16 %v6261_v47, %v6258_v41  ;;  %v6282_v47 = vld [vmem:[#allocation12 + $0x150] sm:$0xff] }
0x203f   : > { %v11252_v17 = vpack.c.bf16 %v6135_v11, %v6134_v32  ;;  %v6246_v32 = vld [vmem:[#allocation12 + $0x30] sm:$0xff]  ;;  %v11278_v11 = vpack.c.bf16 %v6250_v10, %v6247_v7  ;;  %v6265_v44 = vld [vmem:[#allocation12 + $0xc8] sm:$0xff]  ;;  %v6263_v7 = vld [vmem:[#allocation12 + $0xb8] sm:$0xff] }
0x2040   : > { %v6038_v49 = vmul.f32 1.442695, %v6037_v8  ;;  %v6140_v8 = vld [vmem:[#allocation11 + $0x50] sm:$0xff]  ;;  %v11280_v13 = vpack.c.bf16 %v6249_v12, %v6246_v32  ;;  %v6269_v32 = vld [vmem:[#allocation12 + $0xe8] sm:$0xff]  ;;  %v6272_v12 = vld [vmem:[#allocation12 + $0x100] sm:$0xff] }
0x2041   : > { %11253 = vmatpush3.bf16.msra.mxu0 %v11252_v17  ;;  %v6256_v17 = vld [vmem:[#allocation12 + $0x80] sm:$0xff] }
0x2042   : > { %11962 = vpow2.f32 %v6038_v49  ;;  %11255 = vmatprep.subr.bf16.mxu0 %v11254_v42  ;;  %v6141_v49 = vld [vmem:[#allocation11 + $0x58] sm:$0xff] }
0x2043   : > { %v11264_v25 = vpack.c.bf16 %v6141_v49, %v6140_v8  ;;  %v6264_v8 = vld [vmem:[#allocation12 + $0xc0] sm:$0xff]  ;;  %v6267_v49 = vld [vmem:[#allocation12 + $0xd8] sm:$0xff] }
0x2044   : > { %v11292_v9 = vpack.c.bf16 %v6267_v49, %v6264_v8  ;;  %v6447_v49 = vld [vmem:[#allocation14 + $0x8] sm:$0xff] }
0x2045   : > { %11257 = vmatpush3.bf16.msra.mxu0 %v11256_v38  ;;  %v6262_v38 = vld [vmem:[#allocation12 + $0xb0] sm:$0xff] }
0x2046   : > { %11259 = vmatprep.subr.bf16.mxu0 %v11258_v40  ;;  %v11286_v40 = vpack.c.bf16 %v6262_v38, %v6259_v23  ;;  %v6283_v38 = vld [vmem:[#allocation12 + $0x158] sm:$0xff] }
0x2049   : > { %11261 = vmatpush3.bf16.msra.mxu0 %v11260_v45  ;;  %v6268_v45 = vld [vmem:[#allocation12 + $0xe0] sm:$0xff] }
0x204a   : > { %11263 = vmatprep.subr.bf16.mxu0 %v11262_v4  ;;  %v11290_v4 = vpack.c.bf16 %v6268_v45, %v6265_v44  ;;  %v6284_v44 = vld [vmem:[#allocation12 + $0x160] sm:$0xff] }
0x204c   : > { %v13460_v6 = vpop.eup %11962 }
0x204d   : > { %6040 = vadd.xlane.f32.xlu1 %v13460_v6  ;;  %11265 = vmatpush3.bf16.msra.mxu0 %v11264_v25  ;;  %v6274_v25 = vld [vmem:[#allocation12 + $0x110] sm:$0xff] }
0x204e   : > { %11267 = vmatprep.subr.bf16.mxu0 %v11266_v1  ;;  %v11294_v1 = vpack.c.bf16 %v6274_v25, %v6271_v14 }
0x2051   : > { %11269 = vmatpush3.bf16.msra.mxu0 %v11268_v39  ;;  %v6280_v39 = vld [vmem:[#allocation12 + $0x140] sm:$0xff] }
0x2052   : > { %11271 = vmatprep.subr.bf16.mxu0 %v11270_v63  ;;  %v11298_v63 = vpack.c.bf16 %v6280_v39, %v6277_v22  ;;  %v6449_v22 = vld [vmem:[#allocation14 + $0x18] sm:$0xff]  ;;  %v6448_v39 = vld [vmem:[#allocation14 + $0x10] sm:$0xff] }
0x2055   : > { %11273 = vmatpush3.bf16.msra.mxu0 %v11272_v16  ;;  %v11307_v16 = vpack.c.bf16 %v6245_v21, %v6242_v56  ;;  %v6453_v56 = vld [vmem:[#allocation14 + $0x38] sm:$0xff]  ;;  %v6456_v21 = vld [vmem:[#allocation14 + $0x50] sm:$0xff] }
0x2056   : > { %11306 = vmatprep.subr.bf16.mxu0 %v12431_v59 }
0x20da   : > { %v6041_v27 = vpop.xlane.xlu1 %6040 }
0x20db   : > { %11964 = vrcp.f32 %v6041_v27 }
0x20e5   : > { %v11965_v33 = vpop.eup %11964 }
0x20e6   : > { %v6043_v34 = vmul.f32 %v11965_v33, %v13460_v6  ;;  %v6253_v6 = vld [vmem:[#allocation12 + $0x68] sm:$0xff]  ;;  %v6248_v33 = vld [vmem:[#allocation12 + $0x40] sm:$0xff] }
0x20e7   : > { %v11282_v42 = vpack.c.bf16 %v6256_v17, %v6253_v6  ;;  %v6276_v17 = vld [vmem:[#allocation12 + $0x120] sm:$0xff] }
0x20e8   : > { %9617 = vmatmul.mubr.f32.vlgmr.msra.gmra.mrb[36].mxu1 %v6043_v34  ;;  %7967 = vst [vmem:[%s12918_s23 + $0xd8] sm:$0xff] %v6043_v34  ;;  %v6251_v34 = vld [vmem:[#allocation12 + $0x58] sm:$0xff] }
0x20e9   : > { %6369 = vmatprep.mubr.f32.mxu1 %v12433_v24  ;;  %11277 = vmatpush1.bf16.msra.mxu1 %v11276_v5  ;;  %v11310_v53 = vpack.c.bf16 %v6251_v34, %v6248_v33  ;;  %v6260_v5 = vld [vmem:[#allocation12 + $0xa0] sm:$0xff]  ;;  %v6452_v34 = vld [vmem:[#allocation14 + $0x30] sm:$0xff] }
0x20ea   : > { %11279 = vmatprep.subr.bf16.mxu1 %v11278_v11  ;;  %v11316_v10 = vpack.c.bf16 %v6263_v7, %v6260_v5  ;;  %v6459_v5 = vld [vmem:[#allocation14 + $0x68] sm:$0xff]  ;;  %v6462_v7 = vld [vmem:[#allocation14 + $0x80] sm:$0xff] }
0x20ed   : > { %11281 = vmatpush1.bf16.msra.mxu1 %v11280_v13  ;;  %v6275_v13 = vld [vmem:[#allocation12 + $0x118] sm:$0xff] }
0x20ee   : > { %11283 = vmatprep.subr.bf16.mxu1 %v11282_v42  ;;  %v11322_v6 = vpack.c.bf16 %v6275_v13, %v6272_v12  ;;  %v6279_v42 = vld [vmem:[#allocation12 + $0x138] sm:$0xff]  ;;  %v6460_v13 = vld [vmem:[#allocation14 + $0x70] sm:$0xff] }
0x20ef   : > { %v11300_v18 = vpack.c.bf16 %v6279_v42, %v6276_v17  ;;  %v6461_v12 = vld [vmem:[#allocation14 + $0x78] sm:$0xff]  ;;  %v6468_v42 = vld [vmem:[#allocation14 + $0xb0] sm:$0xff] }
0x20f0   : > { %v6465_v17 = vld [vmem:[#allocation14 + $0x98] sm:$0xff] }
0x20f1   : > { %11285 = vmatpush1.bf16.msra.mxu1 %v11284_v19  ;;  %v6281_v19 = vld [vmem:[#allocation12 + $0x148] sm:$0xff] }
0x20f2   : > { %11287 = vmatprep.subr.bf16.mxu1 %v11286_v40  ;;  %v11325_v23 = vpack.c.bf16 %v6281_v19, %v6278_v51  ;;  %v6286_v40 = vld [vmem:[#allocation12 + $0x170] sm:$0xff] }
0x20f3   : > { %v11302_v41 = vpack.c.bf16 %v6286_v40, %v6283_v38  ;;  %v6464_v19 = vld [vmem:[#allocation14 + $0x90] sm:$0xff]  ;;  %v6467_v38 = vld [vmem:[#allocation14 + $0xa8] sm:$0xff]  ;;  %v6466_v40 = vld [vmem:[#allocation14 + $0xa0] sm:$0xff] }
0x20f5   : > { %11289 = vmatpush1.bf16.msra.mxu1 %v11288_v50  ;;  %v6285_v50 = vld [vmem:[#allocation12 + $0x168] sm:$0xff] }
0x20f6   : > { %11291 = vmatprep.subr.bf16.mxu1 %v11290_v4  ;;  %v11304_v45 = vpack.c.bf16 %v6285_v50, %v6282_v47  ;;  %v6287_v4 = vld [vmem:[#allocation12 + $0x178] sm:$0xff]  ;;  %v6471_v47 = vld [vmem:[#allocation14 + $0xc8] sm:$0xff]  ;;  %v6474_v50 = vld [vmem:[#allocation14 + $0xe0] sm:$0xff] }
0x20f7   : > { %v11328_v8 = vpack.c.bf16 %v6287_v4, %v6284_v44  ;;  %v11344_v44 = vpack.c.bf16 %v6467_v38, %v6464_v19  ;;  %v6470_v4 = vld [vmem:[#allocation14 + $0xc0] sm:$0xff] }
0x20f8   : > { %v6673_v19 = vld [vmem:[#allocation15] sm:$0xff] }
0x20f9   : > { %11293 = vmatpush1.bf16.msra.mxu1 %v11292_v9  ;;  %v6450_v9 = vld [vmem:[#allocation14 + $0x20] sm:$0xff] }
0x20fa   : > { %11295 = vmatprep.subr.bf16.mxu1 %v11294_v1  ;;  %v11330_v14 = vpack.c.bf16 %v6450_v9, %v6447_v49  ;;  %v7961_v1 = vld [vmem:[%s13925_s22] ss:$0 sm:$0xff]  ;;  %v6473_v49 = vld [vmem:[#allocation14 + $0xd8] sm:$0xff]  ;;  %v6472_v9 = vld [vmem:[#allocation14 + $0xd0] sm:$0xff] }
0x20fb   : > { %v6828_v38 = vld [vmem:[#allocation9 + $0x80] sm:$0xff] }
0x20fd   : > { %11297 = vmatpush1.bf16.msra.mxu1 %v11296_v20 }
0x20fe   : > { %11299 = vmatprep.subr.bf16.mxu1 %v11298_v63  ;;  %v6451_v63 = vld [vmem:[#allocation14 + $0x28] sm:$0xff] }
0x20ff   : > { %v11363_v33 = vpack.c.bf16 %v6451_v63, %v6448_v39  ;;  %v6479_v39 = vld [vmem:[#allocation14 + $0x108] sm:$0xff]  ;;  %v6478_v63 = vld [vmem:[#allocation14 + $0x100] sm:$0xff] }
0x2101   : > { %11301 = vmatpush1.bf16.msra.mxu1 %v11300_v18 }
0x2102   : > { %11303 = vmatprep.subr.bf16.mxu1 %v11302_v41  ;;  %v6469_v41 = vld [vmem:[#allocation14 + $0xb8] sm:$0xff] }
0x2105   : > { %11305 = vmatpush1.bf16.msra.mxu1 %v11304_v45  ;;  %v11372_v45 = vpack.c.bf16 %v6469_v41, %v6466_v40  ;;  %v6829_v41 = vld [vmem:[#allocation9 + $0x88] sm:$0xff] }
0x2106   : > { %11331 = vmatprep.subr.bf16.mxu1 %v11330_v14  ;;  %v6475_v14 = vld [vmem:[#allocation14 + $0xe8] sm:$0xff] }
0x21bb   : > { %v6126_v27 = vpop.f32.mrb[36].mxu1 }
0x21bc   : > { %v9618_v48 = vpop.f32.mrb[37].mxu1  ;;  %6233 = vmatprep.mubr.f32.mxu0 %v6126_v27  ;;  %v11332_v27 = vpack.c.bf16 %v6449_v22, %v6446_v15  ;;  %v11375_v15 = vpack.c.bf16 %v6475_v14, %v6472_v9  ;;  %v6679_v9 = vld [vmem:[#allocation15 + $0x30] sm:$0xff] }
0x21bd   : > { %6234 = vmatmul.mubr.f32.vlgmr.msra.gmra.mrb[50].mxu0 %v13439_v55  ;;  %v6266_v55 = vld [vmem:[#allocation12 + $0xd0] sm:$0xff] }
0x21be   : > { %11308 = vmatpush3.bf16.msra.mxu0 %v11307_v16  ;;  %9651 = vmatprep.mubr.msk.f32.mxu0 %vm12432_vm0, %v12433_v24  ;;  %v11319_v11 = vpack.c.bf16 %v6269_v32, %v6266_v55  ;;  %v6458_v32 = vld [vmem:[#allocation14 + $0x60] sm:$0xff]  ;;  %v6830_v14 = vld [vmem:[#allocation9 + $0x90] sm:$0xff] }
0x21bf   : > { %11309 = vmatprep.subr.bf16.mxu0 %v12431_v59  ;;  %v11340_v51 = vpack.c.bf16 %v6461_v12, %v6458_v32  ;;  %v6490_v12 = vld [vmem:[#allocation14 + $0x160] sm:$0xff] }
0x21c2   : > { %11311 = vmatpush3.bf16.msra.mxu0 %v11310_v53  ;;  %v11334_v53 = vpack.c.bf16 %v6456_v21, %v6453_v56  ;;  %v6481_v56 = vld [vmem:[#allocation14 + $0x118] sm:$0xff]  ;;  %v6483_v21 = vld [vmem:[#allocation14 + $0x128] sm:$0xff] }
0x21c3   : > { %11312 = vmatprep.subr.bf16.mxu0 %v12431_v59 }
0x21c6   : > { %11314 = vmatpush3.bf16.msra.mxu0 %v11313_v61  ;;  %v6457_v61 = vld [vmem:[#allocation14 + $0x58] sm:$0xff] }
0x21c7   : > { %11315 = vmatprep.subr.bf16.mxu0 %v12431_v59  ;;  %v11366_v55 = vpack.c.bf16 %v6457_v61, %v6454_v54  ;;  %v6487_v54 = vld [vmem:[#allocation14 + $0x148] sm:$0xff]  ;;  %v6489_v61 = vld [vmem:[#allocation14 + $0x158] sm:$0xff] }
0x21ca   : > { %11317 = vmatpush3.bf16.msra.mxu0 %v11316_v10  ;;  %v11336_v10 = vpack.c.bf16 %v6455_v60, %v6452_v34  ;;  %v6482_v34 = vld [vmem:[#allocation14 + $0x120] sm:$0xff]  ;;  %v6484_v60 = vld [vmem:[#allocation14 + $0x130] sm:$0xff] }
0x21cb   : > { %11318 = vmatprep.subr.bf16.mxu0 %v12431_v59 }
0x21ce   : > { %11320 = vmatpush3.bf16.msra.mxu0 %v11319_v11  ;;  %v11338_v11 = vpack.c.bf16 %v6462_v7, %v6459_v5  ;;  %v6492_v5 = vld [vmem:[#allocation14 + $0x170] sm:$0xff] }
0x21cf   : > { %11321 = vmatprep.subr.bf16.mxu0 %v12431_v59  ;;  %v11358_v32 = vpack.c.bf16 %v6492_v5, %v6489_v61  ;;  %v6686_v61 = vld [vmem:[#allocation15 + $0x68] sm:$0xff]  ;;  %v6688_v5 = vld [vmem:[#allocation15 + $0x78] sm:$0xff] }
0x21d2   : > { %11323 = vmatpush3.bf16.msra.mxu0 %v11322_v6  ;;  %v6463_v6 = vld [vmem:[#allocation14 + $0x88] sm:$0xff] }
0x21d3   : > { %11324 = vmatprep.subr.bf16.mxu0 %v12431_v59  ;;  %v11369_v18 = vpack.c.bf16 %v6463_v6, %v6460_v13  ;;  %v6493_v13 = vld [vmem:[#allocation14 + $0x178] sm:$0xff] }
0x21d6   : > { %11326 = vmatpush3.bf16.msra.mxu0 %v11325_v23  ;;  %v11342_v23 = vpack.c.bf16 %v6468_v42, %v6465_v17  ;;  %v11384_v17 = vpack.c.bf16 %v6493_v13, %v6490_v12  ;;  %v6674_v42 = vld [vmem:[#allocation15 + $0x8] sm:$0xff]  ;;  %v6835_v12 = vld [vmem:[#allocation9 + $0xb8] sm:$0xff]  ;;  %v6818_v13 = vld [vmem:[#allocation9 + $0x30] sm:$0xff] }
0x21d7   : > { %11327 = vmatprep.subr.bf16.mxu0 %v12431_v59 }
0x21da   : > { %11329 = vmatpush3.bf16.msra.mxu0 %v11328_v8  ;;  %v11346_v8 = vpack.c.bf16 %v6474_v50, %v6471_v47  ;;  %v6812_v47 = vld [vmem:[#allocation9] sm:$0xff]  ;;  %v6813_v50 = vld [vmem:[#allocation9 + $0x8] sm:$0xff] }
0x21db   : > { %11362 = vmatprep.subr.bf16.mxu0 %v12431_v59 }
0x2290   : > { %v8796_v25 = vpop.f32.mrb[50].mxu0 }
0x2291   : > { %v8797_v26 = vpop.f32.mrb[51].mxu0 }
0x2292   : > { %v8798_v20 = vadd.f32 %v8797_v26, %v8796_v25  ;;  %v6477_v25 = vld [vmem:[#allocation14 + $0xf8] sm:$0xff]  ;;  %v11348_v26 = vpack.c.bf16 %v6473_v49, %v6470_v4  ;;  %v6678_v4 = vld [vmem:[#allocation15 + $0x28] sm:$0xff]  ;;  %v6677_v49 = vld [vmem:[#allocation15 + $0x20] sm:$0xff] }
0x2294   : > { %v6236_v16 = vadd.f32 %v8798_v20, %v7961_v1  ;;  %v6480_v1 = vld [vmem:[#allocation14 + $0x110] sm:$0xff] }
0x2295   : > { %v6476_v20 = vld [vmem:[#allocation14 + $0xf0] sm:$0xff]  ;;  %v11350_v22 = vpack.c.bf16 %v6480_v1, %v6477_v25  ;;  %v11392_v25 = vpack.c.bf16 %v6679_v9, %v6677_v49  ;;  %v6831_v1 = vld [vmem:[#allocation9 + $0x98] sm:$0xff]  ;;  %v6693_v9 = vld [vmem:[#allocation15 + $0xa0] sm:$0xff] }
0x2296   : > { %v6239_v48 = vmax.f32 %v6236_v16, 0.0  ;;  %v6486_v16 = vld [vmem:[#allocation14 + $0x140] sm:$0xff] }
0x2298   : > { %6370 = vmatmul.mubr.f32.vlgmr.msra.gmra.mrb[38].mxu1 %v6239_v48  ;;  %9652 = vmatmul.mubr.f32.vlgmr.msra.gmra.mrb[52].mxu0 %v6239_v48  ;;  %v11354_v48 = vpack.c.bf16 %v6486_v16, %v6483_v21  ;;  %v6681_v21 = vld [vmem:[#allocation15 + $0x40] sm:$0xff]  ;;  %v6683_v16 = vld [vmem:[#allocation15 + $0x50] sm:$0xff] }
0x2299   : > { %11333 = vmatpush1.bf16.msra.mxu1 %v11332_v27  ;;  %11364 = vmatpush3.bf16.msra.mxu0 %v11363_v33  ;;  %v11352_v27 = vpack.c.bf16 %v6479_v39, %v6476_v20  ;;  %v11378_v33 = vpack.c.bf16 %v6481_v56, %v6478_v63  ;;  %v11422_v20 = vpack.c.bf16 %v6831_v1, %v6830_v14  ;;  %v6682_v39 = vld [vmem:[#allocation15 + $0x48] sm:$0xff]  ;;  %v6684_v63 = vld [vmem:[#allocation15 + $0x58] sm:$0xff]  ;;  %v6695_v14 = vld [vmem:[#allocation15 + $0xb0] sm:$0xff] }
0x229a   : > { %11335 = vmatprep.subr.bf16.mxu1 %v11334_v53  ;;  %11365 = vmatprep.subr.bf16.mxu0 %v12431_v59  ;;  %v6485_v53 = vld [vmem:[#allocation14 + $0x138] sm:$0xff]  ;;  %v11394_v56 = vpack.c.bf16 %v6684_v63, %v6682_v39  ;;  %v11408_v1 = vpack.c.bf16 %v6695_v14, %v6693_v9  ;;  %v6698_v63 = vld [vmem:[#allocation15 + $0xc8] sm:$0xff] }
0x229b   : > { %6575 = vmatprep.mubr.f32.mxu1 %v12433_v24  ;;  %9686 = vmatprep.mubr.msk.f32.mxu0 %vm12432_vm0, %v12433_v24  ;;  %v11356_v7 = vpack.c.bf16 %v6485_v53, %v6482_v34  ;;  %v6833_v34 = vld [vmem:[#allocation9 + $0xa8] sm:$0xff] }
0x229c   : > { %v6817_v53 = vld [vmem:[#allocation9 + $0x28] sm:$0xff] }
0x229d   : > { %11337 = vmatpush1.bf16.msra.mxu1 %v11336_v10  ;;  %11367 = vmatpush3.bf16.msra.mxu0 %v11366_v55  ;;  %v11381_v10 = vpack.c.bf16 %v6487_v54, %v6484_v60  ;;  %v6488_v55 = vld [vmem:[#allocation14 + $0x150] sm:$0xff] }
0x229e   : > { %11339 = vmatprep.subr.bf16.mxu1 %v11338_v11  ;;  %11368 = vmatprep.subr.bf16.mxu0 %v12431_v59  ;;  %v6491_v11 = vld [vmem:[#allocation14 + $0x168] sm:$0xff] }
0x229f   : > { %v11360_v6 = vpack.c.bf16 %v6491_v11, %v6488_v55  ;;  %v6687_v55 = vld [vmem:[#allocation15 + $0x70] sm:$0xff] }
0x22a1   : > { %11341 = vmatpush1.bf16.msra.mxu1 %v11340_v51  ;;  %11370 = vmatpush3.bf16.msra.mxu0 %v11369_v18  ;;  %v6676_v51 = vld [vmem:[#allocation15 + $0x18] sm:$0xff] }
0x22a2   : > { %11343 = vmatprep.subr.bf16.mxu1 %v11342_v23  ;;  %11371 = vmatprep.subr.bf16.mxu0 %v12431_v59  ;;  %v11386_v18 = vpack.c.bf16 %v6676_v51, %v6674_v42  ;;  %v6675_v23 = vld [vmem:[#allocation15 + $0x10] sm:$0xff]  ;;  %v6690_v51 = vld [vmem:[#allocation15 + $0x88] sm:$0xff] }
0x22a3   : > { %v11388_v40 = vpack.c.bf16 %v6675_v23, %v6673_v19  ;;  %v6689_v23 = vld [vmem:[#allocation15 + $0x80] sm:$0xff] }
0x22a5   : > { %11345 = vmatpush1.bf16.msra.mxu1 %v11344_v44  ;;  %11373 = vmatpush3.bf16.msra.mxu0 %v11372_v45  ;;  %v11418_v44 = vpack.c.bf16 %v6829_v41, %v6828_v38  ;;  %v11420_v45 = vpack.c.bf16 %v6813_v50, %v6812_v47  ;;  %v6691_v38 = vld [vmem:[#allocation15 + $0x90] sm:$0xff]  ;;  %v6837_v47 = vld [vmem:[#allocation9 + $0xc8] sm:$0xff]  ;;  %v6820_v50 = vld [vmem:[#allocation9 + $0x40] sm:$0xff] }
0x22a6   : > { %11347 = vmatprep.subr.bf16.mxu1 %v11346_v8  ;;  %11374 = vmatprep.subr.bf16.mxu0 %v12431_v59  ;;  %v6680_v8 = vld [vmem:[#allocation15 + $0x38] sm:$0xff]  ;;  %v11404_v41 = vpack.c.bf16 %v6691_v38, %v6689_v23  ;;  %v6494_v23 = vld [vmem:[%s13926_s7] sm:$0x7] }
0x22a7   : > { %v6288_v38 = vld [vmem:[%s13928_s21] sm:$0x7] }
0x22a9   : > { %11349 = vmatpush1.bf16.msra.mxu1 %v11348_v26  ;;  %11376 = vmatpush3.bf16.msra.mxu0 %v11375_v15  ;;  %v6814_v26 = vld [vmem:[#allocation9 + $0x10] sm:$0xff]  ;;  %v6815_v15 = vld [vmem:[#allocation9 + $0x18] sm:$0xff] }
0x22aa   : > { %11351 = vmatprep.subr.bf16.mxu1 %v11350_v22  ;;  %11377 = vmatprep.subr.bf16.mxu0 %v12431_v59  ;;  %v11424_v22 = vpack.c.bf16 %v6815_v15, %v6814_v26  ;;  %v6839_v26 = vld [vmem:[#allocation9 + $0xd8] sm:$0xff]  ;;  %v6822_v15 = vld [vmem:[#allocation9 + $0x50] sm:$0xff] }
0x22ad   : > { %11353 = vmatpush1.bf16.msra.mxu1 %v11352_v27  ;;  %11379 = vmatpush3.bf16.msra.mxu0 %v11378_v33  ;;  %v6832_v27 = vld [vmem:[#allocation9 + $0xa0] sm:$0xff]  ;;  %v11396_v33 = vpack.c.bf16 %v6683_v16, %v6681_v21 }
0x22ae   : > { %11355 = vmatprep.subr.bf16.mxu1 %v11354_v48  ;;  %11380 = vmatprep.subr.bf16.mxu0 %v12431_v59  ;;  %v6816_v48 = vld [vmem:[#allocation9 + $0x20] sm:$0xff]  ;;  %v11426_v60 = vpack.c.bf16 %v6833_v34, %v6832_v27  ;;  %v6699_v27 = vld [vmem:[#allocation15 + $0xd0] sm:$0xff] }
0x22af   : > { %v11428_v54 = vpack.c.bf16 %v6817_v53, %v6816_v48  ;;  %v6697_v16 = vld [vmem:[#allocation15 + $0xc0] sm:$0xff]  ;;  %v6841_v48 = vld [vmem:[#allocation9 + $0xe8] sm:$0xff] }
0x22b0   : > { %v11412_v34 = vpack.c.bf16 %v6699_v27, %v6697_v16  ;;  %v6824_v53 = vld [vmem:[#allocation9 + $0x60] sm:$0xff] }
0x22b1   : > { %11357 = vmatpush1.bf16.msra.mxu1 %v11356_v7  ;;  %11382 = vmatpush3.bf16.msra.mxu0 %v11381_v10  ;;  %v11398_v7 = vpack.c.bf16 %v6688_v5, %v6686_v61  ;;  %v6685_v10 = vld [vmem:[#allocation15 + $0x60] sm:$0xff]  ;;  %v6702_v5 = vld [vmem:[#allocation15 + $0xe8] sm:$0xff] }
0x22b2   : > { %11359 = vmatprep.subr.bf16.mxu1 %v11358_v32  ;;  %11383 = vmatprep.subr.bf16.mxu0 %v12431_v59  ;;  %v6834_v32 = vld [vmem:[#allocation9 + $0xb0] sm:$0xff]  ;;  %v11400_v11 = vpack.c.bf16 %v6687_v55, %v6685_v10  ;;  %v6701_v55 = vld [vmem:[#allocation15 + $0xe0] sm:$0xff] }
0x22b5   : > { %11361 = vmatpush1.bf16.msra.mxu1 %v11360_v6  ;;  %11385 = vmatpush3.bf16.msra.mxu0 %v11384_v17  ;;  %v6819_v6 = vld [vmem:[#allocation9 + $0x38] sm:$0xff]  ;;  %v11430_v17 = vpack.c.bf16 %v6835_v12, %v6834_v32  ;;  %v6703_v32 = vld [vmem:[#allocation15 + $0xf0] sm:$0xff] }
0x22b6   : > { %11387 = vmatprep.subr.bf16.mxu1 %v11386_v18  ;;  %11419 = vmatprep.subr.bf16.mxu0 %v11418_v44  ;;  %v11432_v42 = vpack.c.bf16 %v6819_v6, %v6818_v13  ;;  %v6692_v18 = vld [vmem:[#allocation15 + $0x98] sm:$0xff]  ;;  %v6821_v44 = vld [vmem:[#allocation9 + $0x48] sm:$0xff]  ;;  %v11416_v12 = vpack.c.bf16 %v6703_v32, %v6701_v55  ;;  %v6826_v6 = vld [vmem:[#allocation9 + $0x70] sm:$0xff] }
0x22b7   : > { %v11402_v19 = vpack.c.bf16 %v6692_v18, %v6690_v51  ;;  %v6843_v13 = vld [vmem:[#allocation9 + $0xf8] sm:$0xff] }
0x22b8   : > { %6576 = vmatmul.mubr.f32.vlgmr.msra.gmra.mrb[38].mxu1 %v13436_v62  ;;  %9687 = vmatmul.mubr.f32.vlgmr.msra.gmra.mrb[54].mxu0 %v13436_v62  ;;  %v11390_v62 = vpack.c.bf16 %v6680_v8, %v6678_v4  ;;  %v11436_v4 = vpack.c.bf16 %v6821_v44, %v6820_v50  ;;  %v6694_v8 = vld [vmem:[#allocation15 + $0xa8] sm:$0xff]  ;;  %v6503_v50 = vrot.slane %v6494_v23, %v13050_v28 }
0x22b9   : > { %6781 = vmatprep.mubr.f32.mxu1 %v12433_v24  ;;  %11389 = vmatpush1.bf16.msra.mxu1 %v11388_v40  ;;  %v6836_v40 = vld [vmem:[#allocation9 + $0xc0] sm:$0xff] }
0x22ba   : > { %11421 = vmatpush3.bf16.msra.mxu0 %v11420_v45  ;;  %11391 = vmatprep.subr.bf16.mxu1 %v11390_v62  ;;  %v11434_v45 = vpack.c.bf16 %v6837_v47, %v6836_v40  ;;  %v6696_v62 = vld [vmem:[#allocation15 + $0xb8] sm:$0xff]  ;;  %v6293_v40 = vrot.slane %v6288_v38, %v13042_v46  ;;  %v6297_v47 = vrot.slane %v6288_v38, %v13050_v28 }
0x22bb   : > { %11423 = vmatprep.subr.bf16.mxu0 %v11422_v20  ;;  %v11406_v49 = vpack.c.bf16 %v6696_v62, %v6694_v8  ;;  %v6823_v20 = vld [vmem:[#allocation9 + $0x58] sm:$0xff] }
0x22bc   : > { %v11440_v39 = vpack.c.bf16 %v6823_v20, %v6822_v15  ;;  %v11676_v8 = vadd.f32 %v6503_v50, %v6297_v47 }
0x22bd   : > { %11393 = vmatpush1.bf16.msra.mxu1 %v11392_v25  ;;  %v6838_v25 = vld [vmem:[#allocation9 + $0xd0] sm:$0xff] }
0x22be   : > { %11425 = vmatpush3.bf16.msra.mxu0 %v11424_v22  ;;  %11395 = vmatprep.subr.bf16.mxu1 %v11394_v56  ;;  %v11438_v22 = vpack.c.bf16 %v6839_v26, %v6838_v25  ;;  %v6700_v56 = vld [vmem:[#allocation15 + $0xd8] sm:$0xff] }
0x22bf   : > { %11427 = vmatprep.subr.bf16.mxu0 %v11426_v60  ;;  %v11410_v21 = vpack.c.bf16 %v6700_v56, %v6698_v63  ;;  %v6825_v60 = vld [vmem:[#allocation9 + $0x68] sm:$0xff] }
0x22c0   : > { %v11444_v61 = vpack.c.bf16 %v6825_v60, %v6824_v53 }
0x22c1   : > { %11397 = vmatpush1.bf16.msra.mxu1 %v11396_v33  ;;  %v6840_v33 = vld [vmem:[#allocation9 + $0xe0] sm:$0xff] }
0x22c2   : > { %11429 = vmatpush3.bf16.msra.mxu0 %v11428_v54  ;;  %11399 = vmatprep.subr.bf16.mxu1 %v11398_v7  ;;  %v11442_v54 = vpack.c.bf16 %v6841_v48, %v6840_v33  ;;  %v6704_v7 = vld [vmem:[#allocation15 + $0xf8] sm:$0xff] }
0x22c3   : > { %11431 = vmatprep.subr.bf16.mxu0 %v11430_v17  ;;  %v11414_v10 = vpack.c.bf16 %v6704_v7, %v6702_v5  ;;  %v6827_v17 = vld [vmem:[#allocation9 + $0x78] sm:$0xff]  ;;  %v13513_v7 = vld [vmem:[%s12889_s13 + $0x38] sm:$0xff] }
0x22c4   : > { %v11448_v51 = vpack.c.bf16 %v6827_v17, %v6826_v6 }
0x22c5   : > { %11401 = vmatpush1.bf16.msra.mxu1 %v11400_v11  ;;  %v6842_v11 = vld [vmem:[#allocation9 + $0xf0] sm:$0xff] }
0x22c6   : > { %11433 = vmatpush3.bf16.msra.mxu0 %v11432_v42  ;;  %11403 = vmatprep.subr.bf16.mxu1 %v11402_v19  ;;  %v11446_v42 = vpack.c.bf16 %v6843_v13, %v6842_v11 }
0x22c7   : > { %11435 = vmatprep.subr.bf16.mxu0 %v11434_v45 }
0x22c9   : > { %11405 = vmatpush1.bf16.msra.mxu1 %v11404_v41  ;;  %v6499_v41 = vrot.slane %v6494_v23, %v13042_v46 }
0x22ca   : > { %11437 = vmatpush3.bf16.msra.mxu0 %v11436_v4  ;;  %11407 = vmatprep.subr.bf16.mxu1 %v11406_v49 }
0x22cb   : > { %11439 = vmatprep.subr.bf16.mxu0 %v11438_v22  ;;  %v11674_v44 = vadd.f32 %v6499_v41, %v6293_v40  ;;  %v6507_v22 = vrot.slane %v6494_v23, %v13056_v0  ;;  %v4933_v41 = vld [vmem:[%s13929_s10] sm:$0x3] }
0x22cd   : > { %11409 = vmatpush1.bf16.msra.mxu1 %v11408_v1 }
0x22ce   : > { %11441 = vmatpush3.bf16.msra.mxu0 %v11440_v39  ;;  %11411 = vmatprep.subr.bf16.mxu1 %v11410_v21  ;;  %v6301_v39 = vrot.slane %v6288_v38, %v13056_v0 }
0x22cf   : > { %11443 = vmatprep.subr.bf16.mxu0 %v11442_v54  ;;  %v12043_v54 = vld [vmem:[%s12918_s23 + $0xb0] sm:$0xff] }
0x22d1   : > { %11413 = vmatpush1.bf16.msra.mxu1 %v11412_v34 }
0x22d2   : > { %11445 = vmatpush3.bf16.msra.mxu0 %v11444_v61  ;;  %11415 = vmatprep.subr.bf16.mxu1 %v11414_v10  ;;  %v1390_v10 = vld [vmem:[%s13929_s10] sm:$0x3] }
0x22d3   : > { %11447 = vmatprep.subr.bf16.mxu0 %v11446_v42  ;;  %v1395_v32 = vrot.slane %v1390_v10, %v13042_v46  ;;  %v1399_v11 = vrot.slane %v1390_v10, %v13050_v28  ;;  %v7969_v42 = vld [vmem:[%s13924_s4] ss:$0 sm:$0xff] }
0x22d5   : > { %11417 = vmatpush1.bf16.msra.mxu1 %v11416_v12  ;;  %v3161_v12 = vld [vmem:[%s13929_s10] sm:$0x3]  ;;  %v13536_v23 = vadd.f32 %v13072_v35, %v1395_v32  ;;  %v13539_v38 = vadd.f32 %v13074_v36, %v1399_v11  ;;  %v4942_v35 = vrot.slane %v4933_v41, %v13050_v28 }
0x22d6   : > { %11450 = vmatprep.subr.bf16.mxu1 %v12431_v59  ;;  %11449 = vmatpush3.bf16.msra.mxu0 %v11448_v51 }
0x22d7   : > { %v1473_v36 = vmax.f32 %v13536_v23, %v13539_v38 }
0x236b   : > { %v6442_v18 = vpop.f32.mrb[52].mxu0 }
0x236c   : > { %v9653_v19 = vpop.f32.mrb[53].mxu0  ;;  %v6443_v16 = vadd.f32 %v6442_v18, %v6301_v39  ;;  %v3166_v18 = vrot.slane %v3161_v12, %v13042_v46  ;;  %v6935_v39 = vld [vmem:[#allocation8 + $0x28] sm:$0xff] }
0x236d   : > { %v3170_v19 = vrot.slane %v3161_v12, %v13050_v28 }
0x236e   : > { %v13545_v47 = vadd.f32 %v13226_v43, %v3166_v18 }
0x236f   : > { %v13548_v50 = vadd.f32 %v13228_v52, %v3170_v19  ;;  %v13563_v52 = vadd.f32 %v13376_v37, %v4942_v35  ;;  %v6931_v37 = vld [vmem:[#allocation8 + $0x8] sm:$0xff] }
0x238b   : > { %v6577_v45 = vpop.f32.mrb[38].mxu1  ;;  %v6648_v4 = vpop.f32.mrb[54].mxu0 }
0x238c   : > { %v11675_v62 = vadd.f32 %v11674_v44, %v6577_v45  ;;  %v6579_v49 = vpop.f32.mrb[39].mxu1  ;;  %v9688_v9 = vpop.f32.mrb[55].mxu0  ;;  %v6649_v56 = vadd.f32 %v6648_v4, %v6507_v22  ;;  %v4938_v44 = vrot.slane %v4933_v41, %v13042_v46  ;;  %v6705_v45 = vld [vmem:[%s13929_s10] sm:$0x3]  ;;  %v3244_v4 = vmax.f32 %v13545_v47, %v13548_v50  ;;  %v6934_v22 = vld [vmem:[#allocation8 + $0x20] sm:$0xff] }
0x238d   : > { %v11677_v25 = vadd.f32 %v11676_v8, %v6579_v49  ;;  %v6710_v8 = vrot.slane %v6705_v45, %v13042_v46 }
0x238e   : > { %v7962_v14 = vmul.f32 -1.442695, %v11675_v62  ;;  %v13560_v43 = vadd.f32 %v13374_v30, %v4938_v44  ;;  %v6714_v62 = vrot.slane %v6705_v45, %v13050_v28 }
0x238f   : > { %v7963_v1 = vmul.f32 -1.442695, %v11677_v25  ;;  %v6930_v25 = vld [vmem:[#allocation8] sm:$0xff] }
0x2390   : > { %11966 = vpow2.f32 %v7962_v14  ;;  %v5016_v14 = vmax.f32 %v13560_v43, %v13563_v52 }
0x2391   : > { %11968 = vpow2.f32 %v7963_v1  ;;  %v6932_v1 = vld [vmem:[#allocation8 + $0x10] sm:$0xff] }
0x239a   : > { %v11967_v26 = vpop.eup %11966 }
0x239b   : > { %v6656_v15 = vadd.f32 1.0, %v11967_v26  ;;  %v11969_v20 = vpop.eup %11968  ;;  %v11451_v26 = vpack.c.bf16 %v6931_v37, %v6930_v25 }
0x239c   : > { %v6663_v63 = vadd.f32 1.0, %v11969_v20 }
0x239d   : > { %11970 = vrcp.f32 %v6656_v15  ;;  %v6933_v15 = vld [vmem:[#allocation8 + $0x18] sm:$0xff] }
0x239e   : > { %11972 = vrcp.f32 %v6663_v63  ;;  %v11454_v20 = vpack.c.bf16 %v6933_v15, %v6932_v1  ;;  %v11457_v63 = vpack.c.bf16 %v6935_v39, %v6934_v22 }
0x23a7   : > { %v11971_v21 = vpop.eup %11970 }
0x23a8   : > { %v6666_v27 = vmul.f32 %v11971_v21, %v6649_v56  ;;  %v11973_v34 = vpop.eup %11972  ;;  %v6936_v56 = vld [vmem:[#allocation8 + $0x30] sm:$0xff]  ;;  %v6937_v21 = vld [vmem:[#allocation8 + $0x38] sm:$0xff] }
0x23a9   : > { %v6669_v48 = vsub.f32 1.0, %v11973_v34  ;;  %v6671_v61 = vmul.f32 %v12043_v54, %v11973_v34 }
0x23aa   : > { %v6667_v33 = vadd.f32 %v6666_v27, %v6443_v16  ;;  %v11460_v16 = vpack.c.bf16 %v6937_v21, %v6936_v56  ;;  %v6938_v27 = vld [vmem:[#allocation8 + $0x40] sm:$0xff] }
0x23ac   : > { %11974 = vtanh.f32 %v6667_v33  ;;  %v6939_v33 = vld [vmem:[#allocation8 + $0x48] sm:$0xff] }
0x23ad   : > { %v11463_v34 = vpack.c.bf16 %v6939_v33, %v6938_v27 }
0x23b6   : > { %v11975_v53 = vpop.eup %11974 }
0x23b7   : > { %v6670_v60 = vmul.f32 %v11975_v53, %v6669_v48 }
0x23b9   : > { %v13510_v5 = vadd.f32 %v6671_v61, %v6670_v60  ;;  %v2275_v61 = vld [vmem:[%s13929_s10] sm:$0x3] }
0x23ba   : > { %v2280_v12 = vrot.slane %v2275_v61, %v13042_v46 }
0x23bb   : > { %6782 = vmatmul.mubr.f32.vlgmr.msra.gmra.mrb[40].mxu1 %v13510_v5  ;;  %7966 = vst [vmem:[%s12918_s23 + $0xd0] sm:$0xff] %v13510_v5  ;;  %6915 = vmatprep.mubr.f32.mxu0 %v13510_v5 }
0x23bc   : > { %6916 = vmatmul.mubr.f32.vlgmr.msra.gmra.mrb[56].mxu0 %v13513_v7  ;;  %9721 = vmatprep.mubr.msk.f32.mxu1 %vm12432_vm0, %v12433_v24 }
0x23bd   : > { %11452 = vmatpush3.bf16.msra.mxu1 %v11451_v26 }
0x23be   : > { %11453 = vmatprep.subr.bf16.mxu1 %v12431_v59 }
0x23c1   : > { %11455 = vmatpush3.bf16.msra.mxu1 %v11454_v20 }
0x23c2   : > { %11456 = vmatprep.subr.bf16.mxu1 %v12431_v59 }
0x23c5   : > { %11458 = vmatpush3.bf16.msra.mxu1 %v11457_v63 }
0x23c6   : > { %11459 = vmatprep.subr.bf16.mxu1 %v12431_v59 }
0x23c9   : > { %11461 = vmatpush3.bf16.msra.mxu1 %v11460_v16 }
0x23ca   : > { %11462 = vmatprep.subr.bf16.mxu1 %v12431_v59 }
0x23cd   : > { %11464 = vmatpush3.bf16.msra.mxu1 %v11463_v34 }
0x23ce   : > { %11465 = vmatprep.subr.bf16.mxu1 %v12431_v59 }
0x248e   : > { %v6783_v55 = vpop.f32.mrb[40].mxu1 }
0x248f   : > { %v6785_v13 = vpop.f32.mrb[41].mxu1  ;;  %v8865_v6 = vpop.f32.mrb[56].mxu0  ;;  %v13567_v49 = vadd.f32 %v6783_v55, %v6710_v8 }
0x2490   : > { %v8866_v17 = vpop.f32.mrb[57].mxu0  ;;  %v13569_v9 = vadd.f32 %v6785_v13, %v6714_v62  ;;  %v2284_v13 = vrot.slane %v2275_v61, %v13050_v28  ;;  %v6940_v61 = vld [vmem:[#allocation8 + $0x50] sm:$0xff] }
0x2491   : > { %v8867_v51 = vadd.f32 %v8866_v17, %v8865_v6 }
0x2492   : > { %v6788_v30 = vmax.f32 %v13567_v49, %v13569_v9  ;;  %v13604_v41 = vadd.f32 %v13154_v3, %v2284_v13  ;;  %v6943_v13 = vld [vmem:[#allocation8 + $0x68] sm:$0xff] }
0x2493   : > { %v6918_v40 = vadd.f32 %v8867_v51, %v7969_v42  ;;  %v4047_v51 = vld [vmem:[%s13929_s10] sm:$0x3] }
0x2494   : > { %v4052_v35 = vrot.slane %v4047_v51, %v13042_v46 }
0x2495   : > { %6921 = vmax.xlane.f32.xlu0 %v6918_v40 }
0x2496   : > { %v13625_v25 = vadd.f32 %v13300_v57, %v4052_v35  ;;  %v7033_v35 = vld [vmem:[#allocation11 + $0x88] sm:$0xff] }
0x2499   : > { %1474 = vmax.xlane.f32.xlu0 %v1473_v36 }
0x249d   : > { %3245 = vmax.xlane.f32.xlu0 %v3244_v4  ;;  %v4056_v4 = vrot.slane %v4047_v51, %v13050_v28  ;;  %v6945_v51 = vld [vmem:[#allocation8 + $0x78] sm:$0xff] }
0x249f   : > { %v13632_v26 = vadd.f32 %v13302_v58, %v4056_v4  ;;  %v7017_v4 = vld [vmem:[#allocation11 + $0x8] sm:$0xff] }
0x24a1   : > { %5017 = vmax.xlane.f32.xlu0 %v5016_v14  ;;  %v4130_v58 = vmax.f32 %v13625_v25, %v13632_v26 }
0x24a5   : > { %6789 = vmax.xlane.f32.xlu0 %v6788_v30 }
0x2522   : > { %v6922_v48 = vpop.xlane.xlu0 %6921 }
0x2523   : > { %v6923_v53 = vsub.f32 %v6918_v40, %v6922_v48  ;;  %v13601_v40 = vadd.f32 %v13152_v2, %v2280_v12  ;;  %v5819_v2 = vld [vmem:[%s13929_s10] sm:$0x3]  ;;  %v6942_v12 = vld [vmem:[#allocation8 + $0x60] sm:$0xff] }
0x2524   : > { %v5824_v15 = vrot.slane %v5819_v2, %v13042_v46  ;;  %v5828_v20 = vrot.slane %v5819_v2, %v13050_v28  ;;  %v7034_v2 = vld [vmem:[#allocation11 + $0x90] sm:$0xff] }
0x2525   : > { %v6924_v60 = vmul.f32 1.442695, %v6923_v53  ;;  %v2358_v30 = vmax.f32 %v13601_v40, %v13604_v41 }
0x2526   : > { %v13580_v54 = vpop.xlane.xlu0 %1474  ;;  %v13637_v21 = vadd.f32 %v13448_v31, %v5824_v15  ;;  %v13640_v16 = vadd.f32 %v13450_v29, %v5828_v20  ;;  %v6941_v29 = vld [vmem:[#allocation8 + $0x58] sm:$0xff]  ;;  %v7036_v15 = vld [vmem:[#allocation11 + $0xa0] sm:$0xff]  ;;  %v7037_v20 = vld [vmem:[#allocation11 + $0xa8] sm:$0xff] }
0x2527   : > { %11976 = vpow2.f32 %v6924_v60  ;;  %v1476_v10 = vsub.f32 %v13536_v23, %v13580_v54  ;;  %v1477_v55 = vsub.f32 %v13539_v38, %v13580_v54 }
0x2528   : > { %v5902_v48 = vmax.f32 %v13637_v21, %v13640_v16 }
0x2529   : > { %v1478_v32 = vmul.f32 1.442695, %v1476_v10  ;;  %v1480_v11 = vmul.f32 1.442695, %v1477_v55  ;;  %v11466_v55 = vpack.c.bf16 %v6941_v29, %v6940_v61  ;;  %v7024_v29 = vld [vmem:[#allocation11 + $0x40] sm:$0xff] }
0x252a   : > { %v13591_v6 = vpop.xlane.xlu0 %3245 }
0x252b   : > { %11978 = vpow2.f32 %v1478_v32  ;;  %v3247_v17 = vsub.f32 %v13545_v47, %v13591_v6  ;;  %v3248_v42 = vsub.f32 %v13548_v50, %v13591_v6  ;;  %11467 = vmatpush3.bf16.msra.mxu1 %v11466_v55  ;;  %v7042_v55 = vld [vmem:[#allocation11 + $0xd0] sm:$0xff] }
0x252c   : > { %11980 = vpow2.f32 %v1480_v11  ;;  %11468 = vmatprep.subr.bf16.mxu1 %v12431_v59 }
0x252d   : > { %v3249_v18 = vmul.f32 1.442695, %v3247_v17  ;;  %v3251_v19 = vmul.f32 1.442695, %v3248_v42  ;;  %v11469_v17 = vpack.c.bf16 %v6943_v13, %v6942_v12  ;;  %v6944_v42 = vld [vmem:[#allocation8 + $0x70] sm:$0xff] }
0x252e   : > { %v13606_v44 = vpop.xlane.xlu0 %5017  ;;  %v7026_v13 = vld [vmem:[#allocation11 + $0x50] sm:$0xff] }
0x252f   : > { %11982 = vpow2.f32 %v3249_v18  ;;  %v5019_v36 = vsub.f32 %v13560_v43, %v13606_v44  ;;  %v5020_v45 = vsub.f32 %v13563_v52, %v13606_v44  ;;  %11470 = vmatpush3.bf16.msra.mxu1 %v11469_v17  ;;  %v11472_v18 = vpack.c.bf16 %v6945_v51, %v6944_v42  ;;  %v7027_v17 = vld [vmem:[#allocation11 + $0x58] sm:$0xff]  ;;  %v7044_v42 = vld [vmem:[#allocation11 + $0xe0] sm:$0xff]  ;;  %v7045_v51 = vld [vmem:[#allocation11 + $0xe8] sm:$0xff] }
0x2530   : > { %11984 = vpow2.f32 %v3251_v19  ;;  %11471 = vmatprep.subr.bf16.mxu1 %v12431_v59  ;;  %v7032_v19 = vld [vmem:[#allocation11 + $0x80] sm:$0xff] }
0x2531   : > { %v13614_v8 = vpop.eup %11976  ;;  %v5021_v3 = vmul.f32 1.442695, %v5019_v36  ;;  %v5023_v62 = vmul.f32 1.442695, %v5020_v45  ;;  %v7016_v36 = vld [vmem:[#allocation11] sm:$0xff]  ;;  %v11474_v45 = vpack.c.bf16 %v7033_v35, %v7032_v19  ;;  %v11498_v19 = vpack.c.bf16 %v7045_v51, %v7044_v42  ;;  %v7136_v42 = vld [vmem:[#allocation12 + $0x50] sm:$0xff] }
0x2532   : > { %6926 = vadd.xlane.f32.xlu1 %v13614_v8  ;;  %v13620_v14 = vpop.xlane.xlu0 %6789  ;;  %v7028_v35 = vld [vmem:[#allocation11 + $0x60] sm:$0xff] }
0x2533   : > { %11986 = vpow2.f32 %v5021_v3  ;;  %v6791_v37 = vsub.f32 %v13567_v49, %v13620_v14  ;;  %v6792_v1 = vsub.f32 %v13569_v9, %v13620_v14  ;;  %11473 = vmatpush3.bf16.msra.mxu1 %v11472_v18  ;;  %v7035_v3 = vld [vmem:[#allocation11 + $0x98] sm:$0xff]  ;;  %11475 = vmatprep.subr.bf16.mxu0 %v11474_v45  ;;  %v11496_v18 = vpack.c.bf16 %v7027_v17, %v7026_v13  ;;  %v7046_v45 = vld [vmem:[#allocation11 + $0xf0] sm:$0xff] }
0x2534   : > { %11988 = vpow2.f32 %v5023_v62  ;;  %v11476_v62 = vpack.c.bf16 %v7017_v4, %v7016_v36  ;;  %v7029_v36 = vld [vmem:[#allocation11 + $0x68] sm:$0xff]  ;;  %v7047_v4 = vld [vmem:[#allocation11 + $0xf8] sm:$0xff] }
0x2535   : > { %v11979_v22 = vpop.eup %11978  ;;  %v6793_v39 = vmul.f32 1.442695, %v6791_v37  ;;  %v6795_v63 = vmul.f32 1.442695, %v6792_v1  ;;  %v7018_v37 = vld [vmem:[#allocation11 + $0x10] sm:$0xff]  ;;  %v7019_v1 = vld [vmem:[#allocation11 + $0x18] sm:$0xff] }
0x2536   : > { %v11981_v57 = vpop.eup %11980  ;;  %2359 = vmax.xlane.f32.xlu1 %v2358_v30  ;;  %v11478_v30 = vpack.c.bf16 %v7035_v3, %v7034_v2  ;;  %11477 = vmatpush3.bf16.msra.mxu0 %v11476_v62  ;;  %v11500_v2 = vpack.c.bf16 %v7029_v36, %v7028_v35  ;;  %v11502_v3 = vpack.c.bf16 %v7047_v4, %v7046_v45  ;;  %v7030_v62 = vld [vmem:[#allocation11 + $0x70] sm:$0xff]  ;;  %v7129_v13 = vld [vmem:[#allocation12 + $0x18] sm:$0xff]  ;;  %v7138_v35 = vld [vmem:[#allocation12 + $0x60] sm:$0xff] }
0x2537   : > { %11990 = vpow2.f32 %v6793_v39  ;;  %v1482_v56 = vadd.f32 %v11981_v57, %v11979_v22  ;;  %v11480_v22 = vpack.c.bf16 %v7019_v1, %v7018_v37  ;;  %v11482_v39 = vpack.c.bf16 %v7037_v20, %v7036_v15  ;;  %v7021_v57 = vld [vmem:[#allocation11 + $0x28] sm:$0xff]  ;;  %v7141_v36 = vld [vmem:[#allocation12 + $0x78] sm:$0xff] }
0x2538   : > { %11992 = vpow2.f32 %v6795_v63  ;;  %11479 = vmatprep.subr.bf16.mxu0 %v11478_v30  ;;  %v7020_v63 = vld [vmem:[#allocation11 + $0x20] sm:$0xff]  ;;  %v7031_v30 = vld [vmem:[#allocation11 + $0x78] sm:$0xff]  ;;  %v11516_v45 = vpack.c.bf16 %v7141_v36, %v7138_v35  ;;  %v7168_v36 = vld [vmem:[#allocation12 + $0x150] sm:$0xff] }
0x2539   : > { %v11983_v27 = vpop.eup %11982  ;;  %1483 = vadd.xlane.f32.xlu0 %v1482_v56  ;;  %v7038_v56 = vld [vmem:[#allocation11 + $0xb0] sm:$0xff]  ;;  %v11504_v37 = vpack.c.bf16 %v7031_v30, %v7030_v62  ;;  %v7145_v4 = vld [vmem:[#allocation12 + $0x98] sm:$0xff]  ;;  %v7147_v30 = vld [vmem:[#allocation12 + $0xa8] sm:$0xff] }
0x253a   : > { %v11985_v33 = vpop.eup %11984  ;;  %4131 = vmax.xlane.f32.xlu1 %v4130_v58  ;;  %v7039_v58 = vld [vmem:[#allocation11 + $0xb8] sm:$0xff]  ;;  %11481 = vmatpush3.bf16.msra.mxu0 %v11480_v22  ;;  %v7144_v62 = vld [vmem:[#allocation12 + $0x90] sm:$0xff] }
0x253b   : > { %v3253_v34 = vadd.f32 %v11985_v33, %v11983_v27  ;;  %v11484_v27 = vpack.c.bf16 %v7021_v57, %v7020_v63  ;;  %11483 = vmatprep.subr.bf16.mxu0 %v11482_v39  ;;  %v11486_v33 = vpack.c.bf16 %v7039_v58, %v7038_v56 }
0x253d   : > { %v11987_v53 = vpop.eup %11986  ;;  %3254 = vadd.xlane.f32.xlu0 %v3253_v34  ;;  %v7022_v34 = vld [vmem:[#allocation11 + $0x30] sm:$0xff] }
0x253e   : > { %v11989_v60 = vpop.eup %11988  ;;  %5903 = vmax.xlane.f32.xlu1 %v5902_v48  ;;  %v7023_v48 = vld [vmem:[#allocation11 + $0x38] sm:$0xff]  ;;  %11485 = vmatpush3.bf16.msra.mxu0 %v11484_v27 }
0x253f   : > { %v5025_v31 = vadd.f32 %v11989_v60, %v11987_v53  ;;  %v7040_v53 = vld [vmem:[#allocation11 + $0xc0] sm:$0xff]  ;;  %v7041_v60 = vld [vmem:[#allocation11 + $0xc8] sm:$0xff]  ;;  %11487 = vmatprep.subr.bf16.mxu0 %v11486_v33 }
0x2540   : > { %v11490_v61 = vpack.c.bf16 %v7041_v60, %v7040_v53 }
0x2541   : > { %v11991_v10 = vpop.eup %11990  ;;  %5026 = vadd.xlane.f32.xlu0 %v5025_v31  ;;  %v11488_v31 = vpack.c.bf16 %v7023_v48, %v7022_v34 }
0x2542   : > { %v11993_v32 = vpop.eup %11992 }
0x2543   : > { %v6797_v11 = vadd.f32 %v11993_v32, %v11991_v10  ;;  %v7025_v10 = vld [vmem:[#allocation11 + $0x48] sm:$0xff]  ;;  %v7043_v32 = vld [vmem:[#allocation11 + $0xd8] sm:$0xff]  ;;  %11489 = vmatpush3.bf16.msra.mxu0 %v11488_v31 }
0x2544   : > { %11491 = vmatprep.subr.bf16.mxu0 %v11490_v61  ;;  %v11494_v12 = vpack.c.bf16 %v7043_v32, %v7042_v55 }
0x2545   : > { %6798 = vadd.xlane.f32.xlu0 %v6797_v11  ;;  %v11492_v11 = vpack.c.bf16 %v7025_v10, %v7024_v29 }
0x2547   : > { %11493 = vmatpush3.bf16.msra.mxu0 %v11492_v11  ;;  %v7130_v11 = vld [vmem:[#allocation12 + $0x20] sm:$0xff] }
0x2548   : > { %11495 = vmatprep.subr.bf16.mxu0 %v11494_v12  ;;  %v7126_v12 = vld [vmem:[#allocation12] sm:$0xff] }
0x2549   : > { %v11508_v17 = vpack.c.bf16 %v7129_v13, %v7126_v12  ;;  %v7155_v12 = vld [vmem:[#allocation12 + $0xe8] sm:$0xff]  ;;  %v7158_v13 = vld [vmem:[#allocation12 + $0x100] sm:$0xff] }
0x254b   : > { %11497 = vmatpush3.bf16.msra.mxu0 %v11496_v18  ;;  %v7135_v18 = vld [vmem:[#allocation12 + $0x48] sm:$0xff] }
0x254c   : > { %11499 = vmatprep.subr.bf16.mxu0 %v11498_v19  ;;  %v7142_v19 = vld [vmem:[#allocation12 + $0x80] sm:$0xff] }
0x254f   : > { %11501 = vmatpush3.bf16.msra.mxu0 %v11500_v2  ;;  %v7148_v2 = vld [vmem:[#allocation12 + $0xb0] sm:$0xff] }
0x2550   : > { %11503 = vmatprep.subr.bf16.mxu0 %v11502_v3  ;;  %v11518_v3 = vpack.c.bf16 %v7148_v2, %v7145_v4  ;;  %v7170_v4 = vld [vmem:[#allocation12 + $0x160] sm:$0xff] }
0x2553   : > { %11505 = vmatpush3.bf16.msra.mxu0 %v11504_v37  ;;  %v11520_v37 = vpack.c.bf16 %v7147_v30, %v7144_v62  ;;  %v7333_v30 = vld [vmem:[#allocation14 + $0x8] sm:$0xff] }
0x2554   : > { %11538 = vmatprep.subr.bf16.mxu0 %v12431_v59 }
0x25bf   : > { %v6927_v1 = vpop.xlane.xlu1 %6926 }
0x25c0   : > { %11994 = vrcp.f32 %v6927_v1  ;;  %v7151_v1 = vld [vmem:[#allocation12 + $0xc8] sm:$0xff] }
0x25c6   : > { %v1484_v15 = vpop.xlane.xlu0 %1483 }
0x25c7   : > { %11996 = vlog2.f32 %v1484_v15  ;;  %v7154_v15 = vld [vmem:[#allocation12 + $0xe0] sm:$0xff] }
0x25ca   : > { %v11995_v20 = vpop.eup %11994  ;;  %v3255_v22 = vpop.xlane.xlu0 %3254 }
0x25cb   : > { %11998 = vlog2.f32 %v3255_v22  ;;  %v6929_v39 = vmul.f32 %v11995_v20, %v13614_v8  ;;  %v11522_v20 = vpack.c.bf16 %v7154_v15, %v7151_v1  ;;  %v7150_v22 = vld [vmem:[#allocation12 + $0xc0] sm:$0xff] }
0x25cd   : > { %9722 = vmatmul.mubr.f32.vlgmr.msra.gmra.mrb[42].mxu1 %v6929_v39  ;;  %7976 = vst [vmem:[%s12918_s23 + $0xf8] sm:$0xff] %v6929_v39  ;;  %v7153_v39 = vld [vmem:[#allocation12 + $0xd8] sm:$0xff] }
0x25ce   : > { %v5027_v63 = vpop.xlane.xlu0 %5026  ;;  %7255 = vmatprep.mubr.f32.mxu1 %v12433_v24 }
0x25cf   : > { %12000 = vlog2.f32 %v5027_v63  ;;  %v11524_v63 = vpack.c.bf16 %v7153_v39, %v7150_v22  ;;  %v7332_v39 = vld [vmem:[#allocation14] sm:$0xff] }
0x25d1   : > { %v11997_v57 = vpop.eup %11996 }
0x25d2   : > { %v1486_v56 = vmul.f32 0.6931472, %v11997_v57  ;;  %v6799_v58 = vpop.xlane.xlu0 %6798  ;;  %v7157_v57 = vld [vmem:[#allocation12 + $0xf8] sm:$0xff] }
0x25d3   : > { %12002 = vlog2.f32 %v6799_v58 }
0x25d4   : > { %v1487_v27 = vadd.f32 %v1486_v56, %v13580_v54  ;;  %v7160_v56 = vld [vmem:[#allocation12 + $0x110] sm:$0xff] }
0x25d5   : > { %v11999_v33 = vpop.eup %11998  ;;  %v11526_v58 = vpack.c.bf16 %v7160_v56, %v7157_v57  ;;  %v7335_v57 = vld [vmem:[#allocation14 + $0x18] sm:$0xff]  ;;  %v7334_v56 = vld [vmem:[#allocation14 + $0x10] sm:$0xff] }
0x25d6   : > { %v1488_v34 = vsub.f32 %v13536_v23, %v1487_v27  ;;  %v1489_v8 = vsub.f32 %v13539_v38, %v1487_v27  ;;  %v3257_v48 = vmul.f32 0.6931472, %v11999_v33  ;;  %v7156_v27 = vld [vmem:[#allocation12 + $0xf0] sm:$0xff]  ;;  %v7159_v33 = vld [vmem:[#allocation12 + $0x108] sm:$0xff] }
0x25d8   : > { %1490 = vst [vmem:[%s12918_s23] sm:$0xff] %v1488_v34  ;;  %1491 = vst [vmem:[%s12918_s23 + $0x8] sm:$0xff] %v1489_v8  ;;  %v3258_v53 = vadd.f32 %v3257_v48, %v13591_v6  ;;  %v11528_v34 = vpack.c.bf16 %v7159_v33, %v7156_v27  ;;  %v7163_v8 = vld [vmem:[#allocation12 + $0x128] sm:$0xff]  ;;  %v7166_v48 = vld [vmem:[#allocation12 + $0x140] sm:$0xff] }
0x25d9   : > { %v12001_v60 = vpop.eup %12000  ;;  %v7339_v27 = vld [vmem:[#allocation14 + $0x38] sm:$0xff]  ;;  %v7342_v33 = vld [vmem:[#allocation14 + $0x50] sm:$0xff] }
0x25da   : > { %v3259_v31 = vsub.f32 %v13545_v47, %v3258_v53  ;;  %v3260_v61 = vsub.f32 %v13548_v50, %v3258_v53  ;;  %v5029_v54 = vmul.f32 0.6931472, %v12001_v60  ;;  %v7127_v50 = vld [vmem:[#allocation12 + $0x8] sm:$0xff]  ;;  %v11530_v53 = vpack.c.bf16 %v7166_v48, %v7163_v8  ;;  %v7128_v60 = vld [vmem:[#allocation12 + $0x10] sm:$0xff] }
0x25db   : > { %v11564_v8 = vpack.c.bf16 %v7335_v57, %v7332_v39  ;;  %v7369_v39 = vld [vmem:[#allocation14 + $0x128] sm:$0xff] }
0x25dc   : > { %7928 = vst [vmem:[%s12918_s23 + $0x40] sm:$0xff] %v3259_v31  ;;  %7929 = vst [vmem:[%s12918_s23 + $0x48] sm:$0xff] %v3260_v61  ;;  %v5030_v23 = vadd.f32 %v5029_v54, %v13606_v44  ;;  %v11506_v44 = vpack.c.bf16 %v7130_v11, %v7127_v50  ;;  %v7131_v31 = vld [vmem:[#allocation12 + $0x28] sm:$0xff]  ;;  %v7149_v50 = vld [vmem:[#allocation12 + $0xb8] sm:$0xff] }
0x25dd   : > { %v12003_v38 = vpop.eup %12002  ;;  %v11539_v61 = vpack.c.bf16 %v7131_v31, %v7128_v60  ;;  %v11566_v31 = vpack.c.bf16 %v7342_v33, %v7339_v27  ;;  %v7371_v33 = vld [vmem:[#allocation14 + $0x138] sm:$0xff] }
0x25de   : > { %v5031_v29 = vsub.f32 %v13560_v43, %v5030_v23  ;;  %v5032_v10 = vsub.f32 %v13563_v52, %v5030_v23  ;;  %v6801_v55 = vmul.f32 0.6931472, %v12003_v38  ;;  %v7133_v43 = vld [vmem:[#allocation12 + $0x38] sm:$0xff]  ;;  %v7132_v52 = vld [vmem:[#allocation12 + $0x30] sm:$0xff]  ;;  %11507 = vmatprep.subr.bf16.mxu1 %v11506_v44  ;;  %v7134_v23 = vld [vmem:[#allocation12 + $0x40] sm:$0xff] }
0x25df   : > { %v11510_v51 = vpack.c.bf16 %v7136_v42, %v7133_v43  ;;  %11509 = vmatpush1.bf16.msra.mxu1 %v11508_v17  ;;  %v7137_v38 = vld [vmem:[#allocation12 + $0x58] sm:$0xff]  ;;  %v7162_v42 = vld [vmem:[#allocation12 + $0x120] sm:$0xff] }
0x25e0   : > { %7946 = vst [vmem:[%s12918_s23 + $0x80] sm:$0xff] %v5031_v29  ;;  %7947 = vst [vmem:[%s12918_s23 + $0x88] sm:$0xff] %v5032_v10  ;;  %v6802_v6 = vadd.f32 %v6801_v55, %v13620_v14  ;;  %v11512_v14 = vpack.c.bf16 %v7135_v18, %v7132_v52  ;;  %v11542_v10 = vpack.c.bf16 %v7137_v38, %v7134_v23  ;;  %v7140_v55 = vld [vmem:[#allocation12 + $0x70] sm:$0xff]  ;;  %v7161_v17 = vld [vmem:[#allocation12 + $0x118] sm:$0xff] }
0x25e1   : > { %11511 = vmatprep.subr.bf16.mxu1 %v11510_v51  ;;  %v11554_v43 = vpack.c.bf16 %v7161_v17, %v7158_v13  ;;  %v7165_v52 = vld [vmem:[#allocation12 + $0x138] sm:$0xff]  ;;  %v7164_v51 = vld [vmem:[#allocation12 + $0x130] sm:$0xff]  ;;  %v7345_v38 = vld [vmem:[#allocation14 + $0x68] sm:$0xff] }
0x25e2   : > { %v6803_v47 = vsub.f32 %v13567_v49, %v6802_v6  ;;  %v6804_v32 = vsub.f32 %v13569_v9, %v6802_v6  ;;  %v7139_v49 = vld [vmem:[#allocation12 + $0x68] sm:$0xff]  ;;  %v11532_v18 = vpack.c.bf16 %v7165_v52, %v7162_v42  ;;  %v7343_v23 = vld [vmem:[#allocation14 + $0x58] sm:$0xff]  ;;  %v7350_v17 = vld [vmem:[#allocation14 + $0x90] sm:$0xff] }
0x25e3   : > { %v11514_v9 = vpack.c.bf16 %v7142_v19, %v7139_v49  ;;  %11513 = vmatpush1.bf16.msra.mxu1 %v11512_v14  ;;  %v7143_v6 = vld [vmem:[#allocation12 + $0x88] sm:$0xff]  ;;  %v7169_v19 = vld [vmem:[#allocation12 + $0x158] sm:$0xff]  ;;  %v7352_v52 = vld [vmem:[#allocation14 + $0xa0] sm:$0xff] }
0x25e4   : > { %7964 = vst [vmem:[%s12918_s23 + $0xc0] sm:$0xff] %v6803_v47  ;;  %7965 = vst [vmem:[%s12918_s23 + $0xc8] sm:$0xff] %v6804_v32  ;;  %v11545_v47 = vpack.c.bf16 %v7143_v6, %v7140_v55  ;;  %v7146_v32 = vld [vmem:[#allocation12 + $0xa0] sm:$0xff]  ;;  %v7167_v14 = vld [vmem:[#allocation12 + $0x148] sm:$0xff] }
0x25e5   : > { %11515 = vmatprep.subr.bf16.mxu1 %v11514_v9  ;;  %v11548_v11 = vpack.c.bf16 %v7149_v50, %v7146_v32  ;;  %v11557_v49 = vpack.c.bf16 %v7167_v14, %v7164_v51  ;;  %v7172_v9 = vld [vmem:[#allocation12 + $0x170] sm:$0xff]  ;;  %v7344_v6 = vld [vmem:[#allocation14 + $0x60] sm:$0xff]  ;;  %v7347_v32 = vld [vmem:[#allocation14 + $0x78] sm:$0xff] }
0x25e6   : > { %v11534_v35 = vpack.c.bf16 %v7172_v9, %v7169_v19  ;;  %v7346_v50 = vld [vmem:[#allocation14 + $0x70] sm:$0xff]  ;;  %v7353_v42 = vld [vmem:[#allocation14 + $0xa8] sm:$0xff]  ;;  %v7355_v51 = vld [vmem:[#allocation14 + $0xb8] sm:$0xff] }
0x25e7   : > { %11517 = vmatpush1.bf16.msra.mxu1 %v11516_v45  ;;  %v7171_v45 = vld [vmem:[#allocation12 + $0x168] sm:$0xff]  ;;  %v7360_v14 = vld [vmem:[#allocation14 + $0xe0] sm:$0xff]  ;;  %v11604_v19 = vpack.c.bf16 %v7355_v51, %v7352_v52  ;;  %v7569_v51 = vld [vmem:[#allocation15 + $0x50] sm:$0xff] }
0x25e8   : > { %11519 = vmatprep.subr.bf16.mxu1 %v11518_v3  ;;  %v11536_v2 = vpack.c.bf16 %v7171_v45, %v7168_v36  ;;  %v7173_v3 = vld [vmem:[#allocation12 + $0x178] sm:$0xff]  ;;  %v7356_v9 = vld [vmem:[#allocation14 + $0xc0] sm:$0xff]  ;;  %v7358_v45 = vld [vmem:[#allocation14 + $0xd0] sm:$0xff] }
0x25e9   : > { %v11560_v62 = vpack.c.bf16 %v7173_v3, %v7170_v4  ;;  %v7359_v36 = vld [vmem:[#allocation14 + $0xd8] sm:$0xff]  ;;  %v7361_v4 = vld [vmem:[#allocation14 + $0xe8] sm:$0xff]  ;;  %v7366_v3 = vld [vmem:[#allocation14 + $0x110] sm:$0xff] }
0x25eb   : > { %11521 = vmatpush1.bf16.msra.mxu1 %v11520_v37  ;;  %v7336_v37 = vld [vmem:[#allocation14 + $0x20] sm:$0xff] }
0x25ec   : > { %11523 = vmatprep.subr.bf16.mxu1 %v11522_v20  ;;  %v11562_v1 = vpack.c.bf16 %v7336_v37, %v7333_v30  ;;  %v7970_v20 = vld [vmem:[%s13925_s22] ss:$0 sm:$0xff]  ;;  %v11607_v30 = vpack.c.bf16 %v7361_v4, %v7358_v45  ;;  %v7362_v37 = vld [vmem:[#allocation14 + $0xf0] sm:$0xff]  ;;  %v7578_v4 = vld [vmem:[#allocation15 + $0x98] sm:$0xff] }
0x25ed   : > { %v7576_v45 = vld [vmem:[#allocation15 + $0x88] sm:$0xff] }
0x25ef   : > { %11525 = vmatpush1.bf16.msra.mxu1 %v11524_v63 }
0x25f0   : > { %11527 = vmatprep.subr.bf16.mxu1 %v11526_v58  ;;  %v7337_v58 = vld [vmem:[#allocation14 + $0x28] sm:$0xff] }
0x25f1   : > { %v11595_v48 = vpack.c.bf16 %v7337_v58, %v7334_v56  ;;  %v7368_v58 = vld [vmem:[#allocation14 + $0x120] sm:$0xff] }
0x25f3   : > { %11529 = vmatpush1.bf16.msra.mxu1 %v11528_v34 }
0x25f4   : > { %11531 = vmatprep.subr.bf16.mxu1 %v11530_v53  ;;  %v7338_v53 = vld [vmem:[#allocation14 + $0x30] sm:$0xff] }
0x25f7   : > { %11533 = vmatpush1.bf16.msra.mxu1 %v11532_v18  ;;  %v7357_v18 = vld [vmem:[#allocation14 + $0xc8] sm:$0xff] }
0x25f8   : > { %11535 = vmatprep.subr.bf16.mxu1 %v11534_v35  ;;  %v11578_v35 = vpack.c.bf16 %v7360_v14, %v7357_v18  ;;  %v7572_v14 = vld [vmem:[#allocation15 + $0x68] sm:$0xff] }
0x25fb   : > { %11537 = vmatpush1.bf16.msra.mxu1 %v11536_v2  ;;  %v7363_v2 = vld [vmem:[#allocation14 + $0xf8] sm:$0xff] }
0x25fc   : > { %11563 = vmatprep.subr.bf16.mxu1 %v11562_v1  ;;  %v11582_v1 = vpack.c.bf16 %v7366_v3, %v7363_v2  ;;  %v11634_v2 = vpack.c.bf16 %v7578_v4, %v7576_v45  ;;  %v7575_v3 = vld [vmem:[#allocation15 + $0x80] sm:$0xff] }
0x26a0   : > { %v7012_v54 = vpop.f32.mrb[42].mxu1 }
0x26a1   : > { %v9723_v29 = vpop.f32.mrb[43].mxu1  ;;  %7119 = vmatprep.mubr.f32.mxu0 %v7012_v54  ;;  %v7340_v54 = vld [vmem:[#allocation14 + $0x40] sm:$0xff] }
0x26a2   : > { %7120 = vmatmul.mubr.f32.vlgmr.msra.gmra.mrb[58].mxu0 %v13513_v7  ;;  %v7152_v7 = vld [vmem:[#allocation12 + $0xd0] sm:$0xff]  ;;  %v7348_v29 = vld [vmem:[#allocation14 + $0x80] sm:$0xff]  ;;  %v11598_v55 = vpack.c.bf16 %v7343_v23, %v7340_v54  ;;  %v7377_v23 = vld [vmem:[#allocation14 + $0x168] sm:$0xff] }
0x26a3   : > { %11540 = vmatpush3.bf16.msra.mxu0 %v11539_v61  ;;  %9756 = vmatprep.mubr.msk.f32.mxu0 %vm12432_vm0, %v12433_v24  ;;  %v11551_v44 = vpack.c.bf16 %v7155_v12, %v7152_v7  ;;  %v7341_v61 = vld [vmem:[#allocation14 + $0x48] sm:$0xff]  ;;  %v7351_v7 = vld [vmem:[#allocation14 + $0x98] sm:$0xff]  ;;  %v7354_v12 = vld [vmem:[#allocation14 + $0xb0] sm:$0xff] }
0x26a4   : > { %11541 = vmatprep.subr.bf16.mxu0 %v12431_v59 }
0x26a7   : > { %11543 = vmatpush3.bf16.msra.mxu0 %v11542_v10  ;;  %v11568_v10 = vpack.c.bf16 %v7341_v61, %v7338_v53  ;;  %v7378_v53 = vld [vmem:[#allocation14 + $0x170] sm:$0xff] }
0x26a8   : > { %11544 = vmatprep.subr.bf16.mxu0 %v12431_v59  ;;  %v7374_v61 = vld [vmem:[#allocation14 + $0x150] sm:$0xff] }
0x26ab   : > { %11546 = vmatpush3.bf16.msra.mxu0 %v11545_v47  ;;  %v11570_v47 = vpack.c.bf16 %v7348_v29, %v7345_v38  ;;  %v7376_v38 = vld [vmem:[#allocation14 + $0x160] sm:$0xff]  ;;  %v7379_v29 = vld [vmem:[#allocation14 + $0x178] sm:$0xff] }
0x26ac   : > { %11547 = vmatprep.subr.bf16.mxu0 %v12431_v59 }
0x26af   : > { %11549 = vmatpush3.bf16.msra.mxu0 %v11548_v11  ;;  %v7349_v11 = vld [vmem:[#allocation14 + $0x88] sm:$0xff] }
0x26b0   : > { %11550 = vmatprep.subr.bf16.mxu0 %v12431_v59  ;;  %v11601_v13 = vpack.c.bf16 %v7349_v11, %v7346_v50  ;;  %v7559_v50 = vld [vmem:[#allocation15] sm:$0xff]  ;;  %v7561_v11 = vld [vmem:[#allocation15 + $0x10] sm:$0xff] }
0x26b3   : > { %11552 = vmatpush3.bf16.msra.mxu0 %v11551_v44  ;;  %v11572_v44 = vpack.c.bf16 %v7347_v32, %v7344_v6  ;;  %v7560_v6 = vld [vmem:[#allocation15 + $0x8] sm:$0xff] }
0x26b4   : > { %11553 = vmatprep.subr.bf16.mxu0 %v12431_v59 }
0x26b7   : > { %11555 = vmatpush3.bf16.msra.mxu0 %v11554_v43  ;;  %v11574_v43 = vpack.c.bf16 %v7354_v12, %v7351_v7  ;;  %v11620_v7 = vpack.c.bf16 %v7561_v11, %v7559_v50  ;;  %v7564_v12 = vld [vmem:[#allocation15 + $0x28] sm:$0xff] }
0x26b8   : > { %11556 = vmatprep.subr.bf16.mxu0 %v12431_v59 }
0x26bb   : > { %11558 = vmatpush3.bf16.msra.mxu0 %v11557_v49  ;;  %v11576_v49 = vpack.c.bf16 %v7353_v42, %v7350_v17  ;;  %v7565_v17 = vld [vmem:[#allocation15 + $0x30] sm:$0xff]  ;;  %v7568_v42 = vld [vmem:[#allocation15 + $0x48] sm:$0xff] }
0x26bc   : > { %11559 = vmatprep.subr.bf16.mxu0 %v12431_v59 }
0x26bf   : > { %11561 = vmatpush3.bf16.msra.mxu0 %v11560_v62  ;;  %v11580_v62 = vpack.c.bf16 %v7359_v36, %v7356_v9  ;;  %v7571_v9 = vld [vmem:[#allocation15 + $0x60] sm:$0xff] }
0x26c0   : > { %11594 = vmatprep.subr.bf16.mxu0 %v12431_v59 }
0x2775   : > { %v8917_v15 = vpop.f32.mrb[58].mxu0 }
0x2776   : > { %v8918_v22 = vpop.f32.mrb[59].mxu0 }
0x2777   : > { %v8919_v63 = vadd.f32 %v8918_v22, %v8917_v15  ;;  %v7365_v15 = vld [vmem:[#allocation14 + $0x108] sm:$0xff]  ;;  %v7367_v22 = vld [vmem:[#allocation14 + $0x118] sm:$0xff] }
0x2778   : > { %v11584_v57 = vpack.c.bf16 %v7365_v15, %v7362_v37  ;;  %v7580_v37 = vld [vmem:[#allocation15 + $0xa8] sm:$0xff]  ;;  %v7579_v15 = vld [vmem:[#allocation15 + $0xa0] sm:$0xff] }
0x2779   : > { %v7122_v34 = vadd.f32 %v8919_v63, %v7970_v20  ;;  %v7364_v20 = vld [vmem:[#allocation14 + $0x100] sm:$0xff] }
0x277a   : > { %v7372_v63 = vld [vmem:[#allocation14 + $0x140] sm:$0xff]  ;;  %v11610_v56 = vpack.c.bf16 %v7367_v22, %v7364_v20  ;;  %v7581_v22 = vld [vmem:[#allocation15 + $0xb0] sm:$0xff] }
0x277b   : > { %v7125_v60 = vmax.f32 %v7122_v34, 0.0  ;;  %v11586_v27 = vpack.c.bf16 %v7372_v63, %v7369_v39  ;;  %v7370_v34 = vld [vmem:[#allocation14 + $0x130] sm:$0xff]  ;;  %v7584_v39 = vld [vmem:[#allocation15 + $0xc8] sm:$0xff]  ;;  %v7586_v63 = vld [vmem:[#allocation15 + $0xd8] sm:$0xff] }
0x277d   : > { %7256 = vmatmul.mubr.f32.vlgmr.msra.gmra.mrb[44].mxu1 %v7125_v60  ;;  %9757 = vmatmul.mubr.f32.vlgmr.msra.gmra.mrb[60].mxu0 %v7125_v60  ;;  %v11588_v60 = vpack.c.bf16 %v7371_v33, %v7368_v58  ;;  %v7583_v58 = vld [vmem:[#allocation15 + $0xc0] sm:$0xff]  ;;  %v7588_v33 = vld [vmem:[#allocation15 + $0xe8] sm:$0xff] }
0x277e   : > { %11565 = vmatpush1.bf16.msra.mxu1 %v11564_v8  ;;  %11596 = vmatpush3.bf16.msra.mxu0 %v11595_v48  ;;  %v7373_v8 = vld [vmem:[#allocation14 + $0x148] sm:$0xff]  ;;  %v7375_v48 = vld [vmem:[#allocation14 + $0x158] sm:$0xff] }
0x277f   : > { %11567 = vmatprep.subr.bf16.mxu1 %v11566_v31  ;;  %11597 = vmatprep.subr.bf16.mxu0 %v12431_v59  ;;  %v11613_v31 = vpack.c.bf16 %v7373_v8, %v7370_v34  ;;  %v11590_v54 = vpack.c.bf16 %v7378_v53, %v7375_v48  ;;  %v7590_v34 = vld [vmem:[#allocation15 + $0xf8] sm:$0xff]  ;;  %v7587_v53 = vld [vmem:[#allocation15 + $0xe0] sm:$0xff] }
0x2780   : > { %7461 = vmatprep.mubr.f32.mxu1 %v12433_v24  ;;  %9791 = vmatprep.mubr.msk.f32.mxu0 %vm12432_vm0, %v12433_v24  ;;  %v11646_v48 = vpack.c.bf16 %v7590_v34, %v7588_v33 }
0x2782   : > { %11569 = vmatpush1.bf16.msra.mxu1 %v11568_v10  ;;  %11599 = vmatpush3.bf16.msra.mxu0 %v11598_v55  ;;  %v11592_v10 = vpack.c.bf16 %v7377_v23, %v7374_v61  ;;  %v11616_v55 = vpack.c.bf16 %v7379_v29, %v7376_v38  ;;  %v7380_v23 = vld [vmem:[%s13926_s7] sm:$0x7] }
0x2783   : > { %11571 = vmatprep.subr.bf16.mxu1 %v11570_v47  ;;  %11600 = vmatprep.subr.bf16.mxu0 %v12431_v59  ;;  %v7562_v47 = vld [vmem:[#allocation15 + $0x18] sm:$0xff]  ;;  %v7174_v38 = vld [vmem:[%s13928_s21] sm:$0x7] }
0x2784   : > { %v11618_v32 = vpack.c.bf16 %v7562_v47, %v7560_v6  ;;  %v7179_v29 = vrot.slane %v7174_v38, %v13042_v46  ;;  %v7389_v6 = vrot.slane %v7380_v23, %v13050_v28 }
0x2786   : > { %11573 = vmatpush1.bf16.msra.mxu1 %v11572_v44  ;;  %11602 = vmatpush3.bf16.msra.mxu0 %v11601_v13  ;;  %v7566_v44 = vld [vmem:[#allocation15 + $0x38] sm:$0xff] }
0x2787   : > { %11575 = vmatprep.subr.bf16.mxu1 %v11574_v43  ;;  %11603 = vmatprep.subr.bf16.mxu0 %v12431_v59  ;;  %v11622_v13 = vpack.c.bf16 %v7566_v44, %v7564_v12 }
0x278a   : > { %11577 = vmatpush1.bf16.msra.mxu1 %v11576_v49  ;;  %11605 = vmatpush3.bf16.msra.mxu0 %v11604_v19  ;;  %v7574_v49 = vld [vmem:[#allocation15 + $0x78] sm:$0xff] }
0x278b   : > { %11579 = vmatprep.subr.bf16.mxu1 %v11578_v35  ;;  %11606 = vmatprep.subr.bf16.mxu0 %v12431_v59  ;;  %v11630_v19 = vpack.c.bf16 %v7574_v49, %v7572_v14  ;;  %v7573_v35 = vld [vmem:[#allocation15 + $0x70] sm:$0xff] }
0x278c   : > { %v11632_v36 = vpack.c.bf16 %v7573_v35, %v7571_v9 }
0x278e   : > { %11581 = vmatpush1.bf16.msra.mxu1 %v11580_v62  ;;  %11608 = vmatpush3.bf16.msra.mxu0 %v11607_v30  ;;  %v7577_v62 = vld [vmem:[#allocation15 + $0x90] sm:$0xff] }
0x278f   : > { %11583 = vmatprep.subr.bf16.mxu1 %v11582_v1  ;;  %11609 = vmatprep.subr.bf16.mxu0 %v12431_v59  ;;  %v11636_v30 = vpack.c.bf16 %v7577_v62, %v7575_v3  ;;  %v7582_v1 = vld [vmem:[#allocation15 + $0xb8] sm:$0xff] }
0x2790   : > { %v11638_v20 = vpack.c.bf16 %v7582_v1, %v7580_v37 }
0x2792   : > { %11585 = vmatpush1.bf16.msra.mxu1 %v11584_v57  ;;  %11611 = vmatpush3.bf16.msra.mxu0 %v11610_v56  ;;  %v11640_v57 = vpack.c.bf16 %v7581_v22, %v7579_v15  ;;  %v11642_v56 = vpack.c.bf16 %v7586_v63, %v7584_v39 }
0x2793   : > { %11587 = vmatprep.subr.bf16.mxu1 %v11586_v27  ;;  %11612 = vmatprep.subr.bf16.mxu0 %v12431_v59  ;;  %v7585_v27 = vld [vmem:[#allocation15 + $0xd0] sm:$0xff] }
0x2794   : > { %v11644_v8 = vpack.c.bf16 %v7585_v27, %v7583_v58  ;;  %v7591_v58 = vld [vmem:[%s13929_s10] sm:$0x3] }
0x2795   : > { %v7596_v34 = vrot.slane %v7591_v58, %v13042_v46 }
0x2796   : > { %11589 = vmatpush1.bf16.msra.mxu1 %v11588_v60  ;;  %11614 = vmatpush3.bf16.msra.mxu0 %v11613_v31  ;;  %v7589_v60 = vld [vmem:[#allocation15 + $0xf0] sm:$0xff] }
0x2797   : > { %11591 = vmatprep.subr.bf16.mxu1 %v11590_v54  ;;  %11615 = vmatprep.subr.bf16.mxu0 %v12431_v59  ;;  %v7563_v59 = vld [vmem:[#allocation15 + $0x20] sm:$0xff]  ;;  %v11648_v31 = vpack.c.bf16 %v7589_v60, %v7587_v53 }
0x2798   : > { %v11624_v43 = vpack.c.bf16 %v7565_v17, %v7563_v59 }
0x279a   : > { %11593 = vmatpush1.bf16.msra.mxu1 %v11592_v10  ;;  %11617 = vmatpush3.bf16.msra.mxu0 %v11616_v55  ;;  %v7385_v10 = vrot.slane %v7380_v23, %v13042_v46  ;;  %v7183_v55 = vrot.slane %v7174_v38, %v13050_v28 }
0x279b   : > { %11619 = vmatprep.subr.bf16.mxu1 %v11618_v32 }
0x279c   : > { %v11678_v47 = vadd.f32 %v7385_v10, %v7179_v29  ;;  %v11680_v11 = vadd.f32 %v7389_v6, %v7183_v55 }
0x279d   : > { %7462 = vmatmul.mubr.f32.vlgmr.msra.gmra.mrb[44].mxu1 %v13510_v5  ;;  %9792 = vmatmul.mubr.f32.vlgmr.msra.gmra.mrb[62].mxu0 %v13510_v5  ;;  %v7570_v5 = vld [vmem:[#allocation15 + $0x58] sm:$0xff] }
0x279e   : > { %7667 = vmatprep.mubr.f32.mxu1 %v12433_v24  ;;  %11621 = vmatpush1.bf16.msra.mxu1 %v11620_v7  ;;  %v11626_v52 = vpack.c.bf16 %v7570_v5, %v7568_v42  ;;  %v7567_v24 = vld [vmem:[#allocation15 + $0x40] sm:$0xff] }
0x279f   : > { %11623 = vmatprep.subr.bf16.mxu1 %v11622_v13  ;;  %v11628_v18 = vpack.c.bf16 %v7569_v51, %v7567_v24  ;;  %v7187_v24 = vrot.slane %v7174_v38, %v13056_v0 }
0x27a2   : > { %11625 = vmatpush1.bf16.msra.mxu1 %v11624_v43 }
0x27a3   : > { %11627 = vmatprep.subr.bf16.mxu1 %v11626_v52  ;;  %v7393_v52 = vrot.slane %v7380_v23, %v13056_v0  ;;  %v2360_v0 = vpop.xlane.xlu1 %2359 }
0x27a4   : > { %v2361_v37 = vsub.f32 %v13601_v40, %v2360_v0  ;;  %v2362_v1 = vsub.f32 %v13604_v41, %v2360_v0 }
0x27a6   : > { %11629 = vmatpush1.bf16.msra.mxu1 %v11628_v18  ;;  %v2363_v15 = vmul.f32 1.442695, %v2361_v37  ;;  %v2365_v22 = vmul.f32 1.442695, %v2362_v1 }
0x27a7   : > { %11631 = vmatprep.subr.bf16.mxu1 %v11630_v19 }
0x27aa   : > { %11633 = vmatpush1.bf16.msra.mxu1 %v11632_v36 }
0x27ab   : > { %11635 = vmatprep.subr.bf16.mxu1 %v11634_v2  ;;  %v12044_v2 = vld [vmem:[%s12918_s23 + $0xd0] sm:$0xff] }
0x27ae   : > { %11637 = vmatpush1.bf16.msra.mxu1 %v11636_v30  ;;  %v13713_v30 = vpop.xlane.xlu1 %4131 }
0x27af   : > { %11639 = vmatprep.subr.bf16.mxu1 %v11638_v20  ;;  %v4133_v20 = vsub.f32 %v13625_v25, %v13713_v30  ;;  %v4134_v39 = vsub.f32 %v13632_v26, %v13713_v30 }
0x27b1   : > { %v4137_v27 = vmul.f32 1.442695, %v4134_v39 }
0x27b2   : > { %11641 = vmatpush1.bf16.msra.mxu1 %v11640_v57  ;;  %v13721_v63 = vpop.xlane.xlu1 %5903  ;;  %v4135_v57 = vmul.f32 1.442695, %v4133_v20 }
0x27b3   : > { %11643 = vmatprep.subr.bf16.mxu1 %v11642_v56  ;;  %v5905_v56 = vsub.f32 %v13637_v21, %v13721_v63  ;;  %v5906_v33 = vsub.f32 %v13640_v16, %v13721_v63 }
0x27b5   : > { %v5909_v53 = vmul.f32 1.442695, %v5906_v33 }
0x27b6   : > { %11645 = vmatpush1.bf16.msra.mxu1 %v11644_v8  ;;  %v5907_v8 = vmul.f32 1.442695, %v5905_v56 }
0x27b7   : > { %11647 = vmatprep.subr.bf16.mxu1 %v11646_v48  ;;  %v7600_v48 = vrot.slane %v7591_v58, %v13050_v28 }
0x27ba   : > { %11649 = vmatpush1.bf16.msra.mxu1 %v11648_v31 }
0x2850   : > { %v7328_v61 = vpop.f32.mrb[60].mxu0 }
0x2851   : > { %v9758_v54 = vpop.f32.mrb[61].mxu0  ;;  %v7329_v49 = vadd.f32 %v7328_v61, %v7187_v24 }
0x2870   : > { %v7463_v32 = vpop.f32.mrb[44].mxu1  ;;  %v7534_v50 = vpop.f32.mrb[62].mxu0 }
0x2871   : > { %v11679_v7 = vadd.f32 %v11678_v47, %v7463_v32  ;;  %v7465_v12 = vpop.f32.mrb[45].mxu1  ;;  %v9793_v44 = vpop.f32.mrb[63].mxu0  ;;  %v7535_v18 = vadd.f32 %v7534_v50, %v7393_v52 }
0x2872   : > { %v11681_v59 = vadd.f32 %v11680_v11, %v7465_v12 }
0x2873   : > { %v7971_v13 = vmul.f32 -1.442695, %v11679_v7 }
0x2874   : > { %v7972_v17 = vmul.f32 -1.442695, %v11681_v59 }
0x2875   : > { %12004 = vpow2.f32 %v7971_v13 }
0x2876   : > { %12006 = vpow2.f32 %v7972_v17 }
0x287f   : > { %v12005_v43 = vpop.eup %12004 }
0x2880   : > { %v7542_v42 = vadd.f32 1.0, %v12005_v43  ;;  %v12007_v5 = vpop.eup %12006 }
0x2881   : > { %v7549_v51 = vadd.f32 1.0, %v12007_v5 }
0x2882   : > { %12008 = vrcp.f32 %v7542_v42 }
0x2883   : > { %12010 = vrcp.f32 %v7549_v51 }
0x288c   : > { %v12009_v14 = vpop.eup %12008 }
0x288d   : > { %v7552_v19 = vmul.f32 %v12009_v14, %v7535_v18  ;;  %v12011_v35 = vpop.eup %12010 }
0x288e   : > { %v7555_v36 = vsub.f32 1.0, %v12011_v35  ;;  %v7557_v3 = vmul.f32 %v12044_v2, %v12011_v35 }
0x288f   : > { %v7553_v9 = vadd.f32 %v7552_v19, %v7329_v49 }
0x2891   : > { %12012 = vtanh.f32 %v7553_v9 }
0x2892   : > { %12014 = vpow2.f32 %v2363_v15 }
0x2893   : > { %12016 = vpow2.f32 %v2365_v22 }
0x2894   : > { %12018 = vpow2.f32 %v4135_v57 }
0x2895   : > { %12020 = vpow2.f32 %v4137_v27 }
0x2896   : > { %12022 = vpow2.f32 %v5907_v8 }
0x2897   : > { %12024 = vpow2.f32 %v5909_v53 }
0x289b   : > { %v12013_v45 = vpop.eup %12012 }
0x289c   : > { %v7556_v4 = vmul.f32 %v12013_v45, %v7555_v36  ;;  %v12015_v23 = vpop.eup %12014 }
0x289d   : > { %v12017_v29 = vpop.eup %12016 }
0x289e   : > { %v7558_v62 = vadd.f32 %v7557_v3, %v7556_v4  ;;  %v12019_v46 = vpop.eup %12018  ;;  %v2367_v10 = vadd.f32 %v12017_v29, %v12015_v23 }
0x289f   : > { %v12021_v55 = vpop.eup %12020 }
0x28a0   : > { %7668 = vmatmul.mubr.f32.vlgmr.msra.gmra.mrb[46].mxu1 %v7558_v62  ;;  %7975 = vst [vmem:[%s12918_s23 + $0xf0] sm:$0xff] %v7558_v62  ;;  %7696 = vst [vmem:[#allocation2] sm:$0xff] %v7558_v62  ;;  %v12023_v28 = vpop.eup %12022  ;;  %v4139_v6 = vadd.f32 %v12021_v55, %v12019_v46 }
0x28a1   : > { %v12025_v47 = vpop.eup %12024 }
0x28a2   : > { %v5911_v32 = vadd.f32 %v12025_v47, %v12023_v28 }
0x2973   : > { %v7669_v60 = vpop.f32.mrb[46].mxu1 }
0x2974   : > { %v13732_v31 = vadd.f32 %v7669_v60, %v7596_v34  ;;  %v7671_v61 = vpop.f32.mrb[47].mxu1 }
0x2975   : > { %v13734_v54 = vadd.f32 %v7671_v61, %v7600_v48 }
0x2977   : > { %v7674_v38 = vmax.f32 %v13732_v31, %v13734_v54 }
0x2979   : > { %7675 = vmax.xlane.f32.xlu1 %v7674_v38 }
0x297d   : > { %2368 = vadd.xlane.f32.xlu1 %v2367_v10 }
0x2981   : > { %4140 = vadd.xlane.f32.xlu1 %v4139_v6 }
0x2985   : > { %5912 = vadd.xlane.f32.xlu1 %v5911_v32 }
0x2a06   : > { %v7676_v50 = vpop.xlane.xlu1 %7675 }
0x2a07   : > { %v7677_v11 = vsub.f32 %v13732_v31, %v7676_v50  ;;  %v7678_v7 = vsub.f32 %v13734_v54, %v7676_v50 }
0x2a09   : > { %v7679_v12 = vmul.f32 1.442695, %v7677_v11  ;;  %v7681_v44 = vmul.f32 1.442695, %v7678_v7 }
0x2a0a   : > { %v2369_v13 = vpop.xlane.xlu1 %2368 }
0x2a0b   : > { %12026 = vpow2.f32 %v7679_v12 }
0x2a0c   : > { %12028 = vpow2.f32 %v7681_v44 }
0x2a0d   : > { %12030 = vlog2.f32 %v2369_v13 }
0x2a0e   : > { %v4141_v59 = vpop.xlane.xlu1 %4140 }
0x2a0f   : > { %12032 = vlog2.f32 %v4141_v59 }
0x2a12   : > { %v5913_v17 = vpop.xlane.xlu1 %5912 }
0x2a13   : > { %12034 = vlog2.f32 %v5913_v17 }
0x2a15   : > { %v12027_v43 = vpop.eup %12026 }
0x2a16   : > { %v12029_v42 = vpop.eup %12028 }
0x2a17   : > { %v12031_v5 = vpop.eup %12030  ;;  %v7683_v52 = vadd.f32 %v12029_v42, %v12027_v43 }
0x2a18   : > { %v2371_v24 = vmul.f32 0.6931472, %v12031_v5 }
0x2a19   : > { %v12033_v51 = vpop.eup %12032  ;;  %7684 = vadd.xlane.f32.xlu1 %v7683_v52 }
0x2a1a   : > { %v2372_v18 = vadd.f32 %v2371_v24, %v2360_v0  ;;  %v4143_v14 = vmul.f32 0.6931472, %v12033_v51 }
0x2a1c   : > { %v2373_v49 = vsub.f32 %v13601_v40, %v2372_v18  ;;  %v2374_v19 = vsub.f32 %v13604_v41, %v2372_v18  ;;  %v4144_v9 = vadd.f32 %v4143_v14, %v13713_v30 }
0x2a1d   : > { %v12035_v35 = vpop.eup %12034 }
0x2a1e   : > { %7919 = vst [vmem:[%s12918_s23 + $0x20] sm:$0xff] %v2373_v49  ;;  %7920 = vst [vmem:[%s12918_s23 + $0x28] sm:$0xff] %v2374_v19  ;;  %v4145_v36 = vsub.f32 %v13625_v25, %v4144_v9  ;;  %v4146_v45 = vsub.f32 %v13632_v26, %v4144_v9  ;;  %v5915_v4 = vmul.f32 0.6931472, %v12035_v35 }
0x2a20   : > { %7937 = vst [vmem:[%s12918_s23 + $0x60] sm:$0xff] %v4145_v36  ;;  %7938 = vst [vmem:[%s12918_s23 + $0x68] sm:$0xff] %v4146_v45  ;;  %v5916_v2 = vadd.f32 %v5915_v4, %v13721_v63 }
0x2a22   : > { %v5917_v40 = vsub.f32 %v13637_v21, %v5916_v2  ;;  %v5918_v41 = vsub.f32 %v13640_v16, %v5916_v2 }
0x2a24   : > { %7955 = vst [vmem:[%s12918_s23 + $0xa0] sm:$0xff] %v5917_v40  ;;  %7956 = vst [vmem:[%s12918_s23 + $0xa8] sm:$0xff] %v5918_v41 }
0x2aa6   : > { %v7685_v3 = vpop.xlane.xlu1 %7684 }
0x2aa7   : > { %12036 = vlog2.f32 %v7685_v3 }
0x2ab1   : > { %v12037_v25 = vpop.eup %12036 }
0x2ab2   : > { %v7687_v26 = vmul.f32 0.6931472, %v12037_v25 }
0x2ab4   : > { %v7688_v62 = vadd.f32 %v7687_v26, %v7676_v50 }
0x2ab6   : > { %v7689_v21 = vsub.f32 %v13732_v31, %v7688_v62  ;;  %v7690_v16 = vsub.f32 %v13734_v54, %v7688_v62 }
0x2ab8   : > { %7973 = vst [vmem:[%s12918_s23 + $0xe0] sm:$0xff] %v7689_v21  ;;  %7974 = vst [vmem:[%s12918_s23 + $0xe8] sm:$0xff] %v7690_v16 }
0x2ab9   : > { %12286 = shalt.err (!%p12283_p2)
}
0x2aba   : > { %s12287_s23 = scalar_lea.hbm %s13760_s0, 4096  ;;  %s12291_s13 = scalar_lea.hbm %s13932_s19, 16384 }
0x2abb   : > { %p12288_p10 = scmp.ne.s32.totalorder %s13760_s0, %s12287_s23  ;;  %p12292_p7 = scmp.lt.u32.totalorder %s13760_s0, %s13932_s19 }
0x2abc   : > { %p12293_p5 = scmp.lt.u32.totalorder %s12291_s13, %s12287_s23  ;;  %p12295_p3 = scmp.lt.u32.totalorder %s12287_s23, %s13760_s0 }
0x2abd   : > { %p12289_p11 = pnand %p12288_p10, %p13933_p4 }
0x2abe   : > { %p12294_p0 = por %p12293_p5, %p12292_p7 }
0x2abf   : > { %p12290_p13 = pneg %p12289_p11 }
0x2ac0   : > { %p12296_p8 = por %p12295_p3, %p12294_p0 }
0x2ac2   : > { %p12297_p6 = pnand %p12296_p8, %p12290_p13 }
0x2ac4   : > { %12300 = shalt.err (!%p12297_p6)
}
0x2ac5   : > { %s12435_s5 = smov 512   ;;  %s12436_s2 = smov 1024  }
0x2ac6   : > { %s12437_s9 = smov 32   ;;  %s13934_s1 = scalar_lea.sflag [#allocation5], %s12885_s11 }
0x2ac7   : > { %11726 = dma.vmem_to_hbm [thread:$0]  (%p13933_p4), %s13762_s14, 4096, %s13760_s0, %s13934_s1, %s12435_s5, %s12436_s2, %s12437_s9  }
0x2ac8 PF: > { %p11771_p9 = scmp.ge.s32.totalorder %s12415_s18, 2  ;;  %s7729_s25 = sand.u32 1, %s12387_s28  }
0x2ac9   : > { %p13935_p1 = scmp.ne.s32.totalorder %s13899_s12, 0  ;;  %s7730_s23 = scalar_lea.sflag [#allocation5], %s7729_s25 }
0x2acb   : > { %p11755_p12 = pnand %p11771_p9, %p13935_p1 }
0x2acd   : > { %12370 = dma.done.wait (!%p11755_p12), %s7730_s23, 4096  }
0x2ace   : > { %12372 = vsyncadd (!%p11755_p12), %s7730_s23, 4294963200  ;;  %s35_s18 = sadd.s32 1, %s12415_s18   ;;  %s13936_s25 = sld [smem:[#allocation26_spill]] }
0x2acf   : > { %p32_p2 = scmp.ge.s32.totalorder %s35_s18, 6   ;;  %s13937_s13 = smov %s12831_s26 }
0x2ad0   : > { %s13938_s0 = sld [smem:[#allocation30_spill]]  ;;  %s13939_s26 = smov %s12383_s27 }
0x2ad1   : > { %s13940_s27 = smov %s13937_s13  ;;  %s13941_s28 = smov %s12391_s29 }
0x2ad2   : > { %s13942_s29 = smov %s12395_s30  ;;  %s13943_s30 = smov %s12775_s24 }
0x2ad3   : > { %s13944_s14 = smov %s12407_s16  ;;  %s13945_s15 = smov %s12411_s17 }
0x2ad4   : > { %s13946_s16 = smov %s13949_s3  ;;  %34 = sbr.rel (!%p32_p2) target bundleno = 29 (0x1d), region = 172 }
0x2ad6   : > { %s13947_s17 = smov %s13938_s0 }
0x2adb   :  { %7735 = vsyncpa [#allocation4], 1 }
0x2adc   :  { %7737 = vsyncpa [#allocation4 + $0x1], 1 }
0x2add   :  { %7738 = vsyncpa [#allocation7], 1 }
0x2ade   :  { %7740 = vsyncpa [#allocation7 + $0x1], 1 }
0x2adf   :  { %7741 = vsyncpa [#allocation10], 1 }
0x2ae0   :  { %7742 = vsyncpa [#allocation13], 1 }
0x2ae1   :  { %7743 = vsyncpa [#allocation16], 1 }
0x2ae2   :  { %7744 = vsyncpa [#allocation5], 1 }
0x2ae3   :  { %7746 = vsyncpa [#allocation5 + $0x1], 1 }

</bundles_post_ra>
